<compile_context>
chip_gen: v7x
topology: tpu7x:2x2x1
jax: 0.10.0
libtpu: 0.0.40
codegen_flags: <defaults>
</compile_context>

<pallas_src>
import jax
import jax.numpy as jnp
import numpy as np
from jax.experimental import pallas as pl
from jax.experimental.pallas import tpu as pltpu

EPS = 1e-5  # PyTorch InstanceNorm2d default


def _conv_in_block(x, xcp_ref, w_ref, g_ref, be_ref, relu):
    """One ConvBlock: reflection-pad-1 3x3 conv + InstanceNorm2d(affine) (+ReLU).

    x       : (H, W, C) f32 activation.
    xcp_ref : VMEM scratch (H+2, W, 3C) in the MXU compute dtype (row-padded, column-tap
              stacked patches).
    w_ref   : (3, 3C, C) conv weights in the compute dtype (per-dy contraction, K = 3C).
    g_ref, be_ref : (1, C) f32 InstanceNorm affine params.
    """
    H, W, C = x.shape
    cdt = xcp_ref.dtype

    # Column taps via XLU sublane rotations; each tap is written straight into its lane
    # slice of the scratch in the compute dtype (no iota, no image-sized selects, no f32
    # concat temporary).  Rolls stay in f32 on purpose: portable to v5e (no native bf16
    # VPU/XLU); taps are quantized only at the store.
    xr = pltpu.roll(x, shift=1, axis=1)       # xr[:, w] = x[:, w-1]   (wraps at w = 0)
    xl = pltpu.roll(x, shift=W - 1, axis=1)   # xl[:, w] = x[:, w+1]   (wraps at w = W-1)
    rows = pl.ds(1, H)
    xcp_ref[rows, :, pl.ds(0, C)] = xr.astype(cdt)           # left tap   (column w-1)
    xcp_ref[rows, :, pl.ds(C, C)] = x.astype(cdt)            # center tap (column w)
    xcp_ref[rows, :, pl.ds(2 * C, C)] = xl.astype(cdt)       # right tap  (column w+1)
    # Reflection edge fixups touch only one column (sublane row) each:
    #   column -1 reflects to column 1; column W reflects to column W-2.
    xcp_ref[rows, pl.ds(0, 1), pl.ds(0, C)] = x[:, 1:2, :].astype(cdt)
    xcp_ref[rows, pl.ds(W - 1, 1), pl.ds(2 * C, C)] = x[:, W - 2:W - 1, :].astype(cdt)
    # Reflection pad along H: two cheap leading-dim row copies inside VMEM.
    xcp_ref[0] = xcp_ref[2]
    xcp_ref[H + 1] = xcp_ref[H - 1]

    # 3x3 conv as 3 MXU matmuls with M = H*W and K = 3C (one per dy), f32 accumulation.
    # The (H, W, 3C) -> (H*W, 3C) reshape is layout-free when W % 8 == 0.
    HW = H * W
    acc = jnp.zeros((HW, C), jnp.float32)
    for dy in range(3):
        strip = xcp_ref[pl.ds(dy, H)].reshape(HW, 3 * C)     # (H*W, 3C), compute dtype
        acc = acc + jnp.dot(strip, w_ref[dy], preferred_element_type=jnp.float32)
    # Conv bias omitted intentionally: it cancels in the InstanceNorm mean subtraction.

    # InstanceNorm2d on the 2-D (H*W, C) view: fused single-pass stats, biased variance.
    inv_n = 1.0 / HW
    s = jnp.sum(acc, axis=0, keepdims=True)
    s2 = jnp.sum(acc * acc, axis=0, keepdims=True)
    mean = s * inv_n
    var = jnp.maximum(s2 * inv_n - mean * mean, 0.0)
    y = (acc - mean) * jax.lax.rsqrt(var + EPS)
    y = y * g_ref[...] + be_ref[...]                          # affine
    if relu:
        y = jnp.maximum(y, 0.0)
    return y.reshape(H, W, C)


def residual_block_kernel(x_ref,
                          w1_ref, g1_ref, be1_ref,
                          w2_ref, g2_ref, be2_ref,
                          o_ref, xcp_ref):
    h = _conv_in_block(x_ref[0].astype(jnp.float32), xcp_ref,
                       w1_ref, g1_ref, be1_ref, relu=True)
    h = _conv_in_block(h, xcp_ref, w2_ref, g2_ref, be2_ref, relu=False)
    # Re-read the resident input block for the skip instead of keeping an f32 copy live
    # across both conv blocks.
    o_ref[0] = (h + x_ref[0].astype(jnp.float32)).astype(o_ref.dtype)


def _vmem_budget_bytes():
    """Generation-aware VMEM cap: 75% of physical per-core VMEM (leaves Mosaic headroom)."""
    cap = 128 * 2**20
    try:
        info = pltpu.get_tpu_info()
        cap = int(getattr(info, "vmem_capacity_bytes", cap) or cap)
    except Exception:
        pass
    return (cap * 3) // 4


def residual_block_nhwc(x, params, *, compute_dtype=jnp.bfloat16):
    """x: (N, H, W, C). `params` in PyTorch layout. Returns (N, H, W, C)."""
    w1, b1, g1, be1, w2, b2, g2, be2 = params
    del b1, b2  # per-channel bias before InstanceNorm is a mathematical no-op
    N, H, W, C = x.shape
    assert H >= 2 and W >= 2, "reflection pad of 1 requires H >= 2 and W >= 2"

    # Lane-dense channels: pad C to a multiple of 128 (zero weights / gamma / beta in the
    # pad lanes -> padded channels stay exactly zero end-to-end and are sliced off after).
    Cp = max(128, -(-C // 128) * 128)
    pad_c = Cp - C
    x_in = jnp.pad(x, ((0, 0), (0, 0), (0, 0), (0, pad_c))) if pad_c else x

    def conv_w(w):
        # torch (Cout, Cin, kh, kw) -> (kh, kw*Cin_p, Cout_p): per-dy contraction with
        # K = 3*Cp; row index kw*Cp + cin matches the [left | center | right] lane stacking.
        w = jnp.transpose(w, (2, 3, 1, 0))                    # (3, 3, Cin, Cout)
        if pad_c:
            w = jnp.pad(w, ((0, 0), (0, 0), (0, pad_c), (0, pad_c)))
        return w.reshape(3, 3 * Cp, Cp).astype(compute_dtype)

    def vec(v):
        v = jnp.pad(v, (0, pad_c)) if pad_c else v
        return v.reshape(1, Cp).astype(jnp.float32)

    w1k, w2k = conv_w(w1), conv_w(w2)
    g1v, be1v, g2v, be2v = vec(g1), vec(be1), vec(g2), vec(be2)

    cbytes = np.dtype(compute_dtype).itemsize
    xbytes = x.dtype.itemsize
    img = H * W * Cp
    vmem_est = (
        2 * img * xbytes                      # input block, double buffered
        + 2 * img * xbytes                    # output block, double buffered
        + 2 * 2 * 3 * 3 * Cp * Cp * cbytes    # both conv weight tensors, double buffered
        + (H + 2) * W * 3 * Cp * cbytes       # padded-patch VMEM scratch
        + 6 * img * 4                         # live f32 intermediates (taps/acc/norm)
    )
    vmem_limit = int(min(_vmem_budget_bytes(), max(32 * 2**20, 2 * vmem_est)))

    full = lambda shape: pl.BlockSpec(shape, lambda n: (0,) * len(shape))
    # Constant index_maps: parameter blocks are fetched once and revisited across the grid.
    # TODO(synk): single-buffer the parameter blocks (pipeline_mode=pl.Buffered(1)) once
    # it is load-bearing for VMEM; left default here to keep the lowering path conservative.
    # TODO(synk): for v7x (64 MiB VMEM, 2 TCs) with large H*W, add an H-strip grid axis
    # with a 1-row halo and cross-strip (two-pass) InstanceNorm so blocks stay small and
    # both TensorCores get work even at N == 1.
    out = pl.pallas_call(
        residual_block_kernel,
        out_shape=jax.ShapeDtypeStruct((N, H, W, Cp), x.dtype),
        grid_spec=pltpu.PrefetchScalarGridSpec(
            num_scalar_prefetch=0,
            grid=(N,),
            in_specs=[
                pl.BlockSpec((1, H, W, Cp), lambda n: (n, 0, 0, 0)),   # x
                full((3, 3 * Cp, Cp)), full((1, Cp)), full((1, Cp)),   # block 1 params
                full((3, 3 * Cp, Cp)), full((1, Cp)), full((1, Cp)),   # block 2 params
            ],
            out_specs=pl.BlockSpec((1, H, W, Cp), lambda n: (n, 0, 0, 0)),
            scratch_shapes=[pltpu.VMEM((H + 2, W, 3 * Cp), compute_dtype)],
        ),
        compiler_params=pltpu.CompilerParams(
            dimension_semantics=("parallel",),
            vmem_limit_bytes=vmem_limit),
    )(x_in, w1k, g1v, be1v, w2k, g2v, be2v)
    return out[..., :C] if pad_c else out


def residual_block(x_nchw, params, *, compute_dtype=jnp.bfloat16):
    """NCHW wrapper (PyTorch convention). The boundary transposes are avoidable by keeping
    the surrounding model in NHWC and calling residual_block_nhwc directly."""
    x = jnp.transpose(x_nchw, (0, 2, 3, 1))
    out = residual_block_nhwc(x, params, compute_dtype=compute_dtype)
    return jnp.transpose(out, (0, 3, 1, 2))


# ------------------------- pure-JAX reference (for checking) -------------------------
def _ref_conv_block(x, w, b, g, be, relu):
    # x: (N, C, H, W); w: (Cout, Cin, 3, 3)
    xp = jnp.pad(x, ((0, 0), (0, 0), (1, 1), (1, 1)), mode='reflect')
    y = jax.lax.conv_general_dilated(
        xp, w, window_strides=(1, 1), padding='VALID',
        dimension_numbers=('NCHW', 'OIHW', 'NCHW'))
    y = y + b[None, :, None, None]
    mean = jnp.mean(y, axis=(2, 3), keepdims=True)
    var = jnp.mean((y - mean) ** 2, axis=(2, 3), keepdims=True)
    y = (y - mean) * jax.lax.rsqrt(var + EPS)
    y = y * g[None, :, None, None] + be[None, :, None, None]
    if relu:
        y = jnp.maximum(y, 0.0)
    return y


def residual_block_ref(x, params):
    w1, b1, g1, be1, w2, b2, g2, be2 = params
    h = _ref_conv_block(x, w1, b1, g1, be1, True)
    h = _ref_conv_block(h, w2, b2, g2, be2, False)
    return h + x


if __name__ == "__main__":
    N, C, H, W = 2, 4, 16, 16   # C=4 is padded to 128 lanes inside the wrapper
    key = jax.random.PRNGKey(0)
    ks = jax.random.split(key, 9)
    x = jax.random.normal(ks[0], (N, C, H, W), jnp.float32)

    scale = 0.1
    w1 = scale * jax.random.normal(ks[1], (C, C, 3, 3), jnp.float32)
    b1 = scale * jax.random.normal(ks[2], (C,), jnp.float32)
    g1 = 1.0 + scale * jax.random.normal(ks[3], (C,), jnp.float32)
    be1 = scale * jax.random.normal(ks[4], (C,), jnp.float32)
    w2 = scale * jax.random.normal(ks[5], (C, C, 3, 3), jnp.float32)
    b2 = scale * jax.random.normal(ks[6], (C,), jnp.float32)
    g2 = 1.0 + scale * jax.random.normal(ks[7], (C,), jnp.float32)
    be2 = scale * jax.random.normal(ks[8], (C,), jnp.float32)
    params = (w1, b1, g1, be1, w2, b2, g2, be2)

    ref = residual_block_ref(x, params)

    # f32 MXU path: tight check of kernel structure / padding / norm semantics.
    out_f32 = residual_block(x, params, compute_dtype=jnp.float32)
    jax.block_until_ready(out_f32)
    np.testing.assert_allclose(np.asarray(out_f32), np.asarray(ref), rtol=2e-3, atol=2e-3)

    # Default bf16-operand MXU path (f32 accumulation): looser tolerance.
    out_bf16 = residual_block(x, params)
    jax.block_until_ready(out_bf16)
    np.testing.assert_allclose(np.asarray(out_bf16), np.asarray(ref), rtol=4e-2, atol=4e-2)

    print("KERNEL_OK")
</pallas_src>

<mosaic_0001>
module attributes {stable_mosaic.version = 11 : i64} {
  func.func @residual_block_kernel(%arg0: i32, %arg1: memref<1x16x16x128xf32, #tpu.memory_space<vmem>>, %arg2: memref<3x384x128xf32, #tpu.memory_space<vmem>>, %arg3: memref<1x128xf32, #tpu.memory_space<vmem>>, %arg4: memref<1x128xf32, #tpu.memory_space<vmem>>, %arg5: memref<3x384x128xf32, #tpu.memory_space<vmem>>, %arg6: memref<1x128xf32, #tpu.memory_space<vmem>>, %arg7: memref<1x128xf32, #tpu.memory_space<vmem>>, %arg8: memref<1x16x16x128xf32, #tpu.memory_space<vmem>>, %arg9: memref<18x16x384xf32, #tpu.memory_space<vmem>>) attributes {dimension_semantics = [#tpu.dimension_semantics<parallel>], iteration_bounds = array<i64: 2>, scalar_prefetch = 0 : i64, scratch_operands = 1 : i64, tpu.core_type = #tpu.core_type<tc>, window_params = [{transform_indices = @transform_0, window_bounds = array<i64: 1, 16, 16, 128>}, {pipeline_mode = #tpu.pipeline_mode<synchronous>, transform_indices = @transform_1, window_bounds = array<i64: 3, 384, 128>}, {pipeline_mode = #tpu.pipeline_mode<synchronous>, transform_indices = @transform_2, window_bounds = array<i64: 1, 128>}, {pipeline_mode = #tpu.pipeline_mode<synchronous>, transform_indices = @transform_3, window_bounds = array<i64: 1, 128>}, {pipeline_mode = #tpu.pipeline_mode<synchronous>, transform_indices = @transform_4, window_bounds = array<i64: 3, 384, 128>}, {pipeline_mode = #tpu.pipeline_mode<synchronous>, transform_indices = @transform_5, window_bounds = array<i64: 1, 128>}, {pipeline_mode = #tpu.pipeline_mode<synchronous>, transform_indices = @transform_6, window_bounds = array<i64: 1, 128>}, {transform_indices = @transform_7, window_bounds = array<i64: 1, 16, 16, 128>}]} {
    %c0 = arith.constant 0 : index
    %c0_0 = arith.constant 0 : index
    %c0_1 = arith.constant 0 : index
    %c0_2 = arith.constant 0 : index
    %0 = vector.load %arg1[%c0, %c0_0, %c0_1, %c0_2] : memref<1x16x16x128xf32, #tpu.memory_space<vmem>>, vector<1x16x16x128xf32>
    %1 = vector.shape_cast %0 : vector<1x16x16x128xf32> to vector<16x16x128xf32>
    %c1_i32 = arith.constant 1 : i32
    %2 = tpu.dynamic_rotate %1 by %c1_i32 dim 1 : vector<16x16x128xf32>, i32 -> vector<16x16x128xf32>
    %c15_i32 = arith.constant 15 : i32
    %3 = tpu.dynamic_rotate %1 by %c15_i32 dim 1 : vector<16x16x128xf32>, i32 -> vector<16x16x128xf32>
    %c1 = arith.constant 1 : index
    %c0_3 = arith.constant 0 : index
    %c0_4 = arith.constant 0 : index
    %4 = vector.load %arg9[%c1, %c0_3, %c0_4] : memref<18x16x384xf32, #tpu.memory_space<vmem>>, vector<16x16x128xf32>
    tpu.vector_store %arg9[%c1, %c0_3, %c0_4], %2 {strides = array<i32>} : memref<18x16x384xf32, #tpu.memory_space<vmem>>, vector<16x16x128xf32>,
    %c1_5 = arith.constant 1 : index
    %c0_6 = arith.constant 0 : index
    %c128 = arith.constant 128 : index
    %5 = vector.load %arg9[%c1_5, %c0_6, %c128] : memref<18x16x384xf32, #tpu.memory_space<vmem>>, vector<16x16x128xf32>
    tpu.vector_store %arg9[%c1_5, %c0_6, %c128], %1 {strides = array<i32>} : memref<18x16x384xf32, #tpu.memory_space<vmem>>, vector<16x16x128xf32>,
    %c1_7 = arith.constant 1 : index
    %c0_8 = arith.constant 0 : index
    %c256 = arith.constant 256 : index
    %6 = vector.load %arg9[%c1_7, %c0_8, %c256] : memref<18x16x384xf32, #tpu.memory_space<vmem>>, vector<16x16x128xf32>
    tpu.vector_store %arg9[%c1_7, %c0_8, %c256], %3 {strides = array<i32>} : memref<18x16x384xf32, #tpu.memory_space<vmem>>, vector<16x16x128xf32>,
    %7 = vector.extract_strided_slice %1 {offsets = [0, 1, 0], sizes = [16, 1, 128], strides = [1, 1, 1]} : vector<16x16x128xf32> to vector<16x1x128xf32>
    %c1_9 = arith.constant 1 : index
    %c0_10 = arith.constant 0 : index
    %c0_11 = arith.constant 0 : index
    %8 = vector.load %arg9[%c1_9, %c0_10, %c0_11] : memref<18x16x384xf32, #tpu.memory_space<vmem>>, vector<16x1x128xf32>
    tpu.vector_store %arg9[%c1_9, %c0_10, %c0_11], %7 {strides = array<i32>} : memref<18x16x384xf32, #tpu.memory_space<vmem>>, vector<16x1x128xf32>,
    %9 = vector.extract_strided_slice %1 {offsets = [0, 14, 0], sizes = [16, 1, 128], strides = [1, 1, 1]} : vector<16x16x128xf32> to vector<16x1x128xf32>
    %c1_12 = arith.constant 1 : index
    %c15 = arith.constant 15 : index
    %c256_13 = arith.constant 256 : index
    %10 = vector.load %arg9[%c1_12, %c15, %c256_13] : memref<18x16x384xf32, #tpu.memory_space<vmem>>, vector<16x1x128xf32>
    tpu.vector_store %arg9[%c1_12, %c15, %c256_13], %9 {strides = array<i32>} : memref<18x16x384xf32, #tpu.memory_space<vmem>>, vector<16x1x128xf32>,
    %c2 = arith.constant 2 : index
    %c0_14 = arith.constant 0 : index
    %c0_15 = arith.constant 0 : index
    %11 = vector.load %arg9[%c2, %c0_14, %c0_15] : memref<18x16x384xf32, #tpu.memory_space<vmem>>, vector<1x16x384xf32>
    %12 = vector.shape_cast %11 : vector<1x16x384xf32> to vector<16x384xf32>
    %c0_16 = arith.constant 0 : index
    %c0_17 = arith.constant 0 : index
    %c0_18 = arith.constant 0 : index
    %13 = vector.load %arg9[%c0_16, %c0_17, %c0_18] : memref<18x16x384xf32, #tpu.memory_space<vmem>>, vector<1x16x384xf32>
    %14 = vector.shape_cast %13 : vector<1x16x384xf32> to vector<16x384xf32>
    %15 = vector.shape_cast %12 : vector<16x384xf32> to vector<1x16x384xf32>
    tpu.vector_store %arg9[%c0_16, %c0_17, %c0_18], %15 {strides = array<i32>} : memref<18x16x384xf32, #tpu.memory_space<vmem>>, vector<1x16x384xf32>,
    %c15_19 = arith.constant 15 : index
    %c0_20 = arith.constant 0 : index
    %c0_21 = arith.constant 0 : index
    %16 = vector.load %arg9[%c15_19, %c0_20, %c0_21] : memref<18x16x384xf32, #tpu.memory_space<vmem>>, vector<1x16x384xf32>
    %17 = vector.shape_cast %16 : vector<1x16x384xf32> to vector<16x384xf32>
    %c17 = arith.constant 17 : index
    %c0_22 = arith.constant 0 : index
    %c0_23 = arith.constant 0 : index
    %18 = vector.load %arg9[%c17, %c0_22, %c0_23] : memref<18x16x384xf32, #tpu.memory_space<vmem>>, vector<1x16x384xf32>
    %19 = vector.shape_cast %18 : vector<1x16x384xf32> to vector<16x384xf32>
    %20 = vector.shape_cast %17 : vector<16x384xf32> to vector<1x16x384xf32>
    tpu.vector_store %arg9[%c17, %c0_22, %c0_23], %20 {strides = array<i32>} : memref<18x16x384xf32, #tpu.memory_space<vmem>>, vector<1x16x384xf32>,
    %cst = arith.constant 0.000000e+00 : f32
    %21 = vector.broadcast %cst : f32 to vector<256x128xf32>
    %c0_24 = arith.constant 0 : index
    %c0_25 = arith.constant 0 : index
    %c0_26 = arith.constant 0 : index
    %22 = vector.load %arg9[%c0_24, %c0_25, %c0_26] : memref<18x16x384xf32, #tpu.memory_space<vmem>>, vector<16x16x384xf32>
    %23 = vector.shape_cast %22 : vector<16x16x384xf32> to vector<256x384xf32>
    %c0_27 = arith.constant 0 : index
    %c0_28 = arith.constant 0 : index
    %c0_29 = arith.constant 0 : index
    %24 = vector.load %arg2[%c0_27, %c0_28, %c0_29] : memref<3x384x128xf32, #tpu.memory_space<vmem>>, vector<1x384x128xf32>
    %25 = vector.shape_cast %24 : vector<1x384x128xf32> to vector<384x128xf32>
    %cst_30 = arith.constant dense<0.000000e+00> : vector<256x128xf32>
    %26 = tpu.matmul %23, %25, %cst_30 {dimension_numbers = #tpu.dot_dimension_numbers<[1], [0], [0], [1], [0, 0, 1, 1], [], []>} : vector<256x384xf32>, vector<384x128xf32>, vector<256x128xf32> -> vector<256x128xf32>
    %27 = arith.addf %21, %26 : vector<256x128xf32>
    %c1_31 = arith.constant 1 : index
    %c0_32 = arith.constant 0 : index
    %c0_33 = arith.constant 0 : index
    %28 = vector.load %arg9[%c1_31, %c0_32, %c0_33] : memref<18x16x384xf32, #tpu.memory_space<vmem>>, vector<16x16x384xf32>
    %29 = vector.shape_cast %28 : vector<16x16x384xf32> to vector<256x384xf32>
    %c1_34 = arith.constant 1 : index
    %c0_35 = arith.constant 0 : index
    %c0_36 = arith.constant 0 : index
    %30 = vector.load %arg2[%c1_34, %c0_35, %c0_36] : memref<3x384x128xf32, #tpu.memory_space<vmem>>, vector<1x384x128xf32>
    %31 = vector.shape_cast %30 : vector<1x384x128xf32> to vector<384x128xf32>
    %cst_37 = arith.constant dense<0.000000e+00> : vector<256x128xf32>
    %32 = tpu.matmul %29, %31, %cst_37 {dimension_numbers = #tpu.dot_dimension_numbers<[1], [0], [0], [1], [0, 0, 1, 1], [], []>} : vector<256x384xf32>, vector<384x128xf32>, vector<256x128xf32> -> vector<256x128xf32>
    %33 = arith.addf %27, %32 : vector<256x128xf32>
    %c2_38 = arith.constant 2 : index
    %c0_39 = arith.constant 0 : index
    %c0_40 = arith.constant 0 : index
    %34 = vector.load %arg9[%c2_38, %c0_39, %c0_40] : memref<18x16x384xf32, #tpu.memory_space<vmem>>, vector<16x16x384xf32>
    %35 = vector.shape_cast %34 : vector<16x16x384xf32> to vector<256x384xf32>
    %c2_41 = arith.constant 2 : index
    %c0_42 = arith.constant 0 : index
    %c0_43 = arith.constant 0 : index
    %36 = vector.load %arg2[%c2_41, %c0_42, %c0_43] : memref<3x384x128xf32, #tpu.memory_space<vmem>>, vector<1x384x128xf32>
    %37 = vector.shape_cast %36 : vector<1x384x128xf32> to vector<384x128xf32>
    %cst_44 = arith.constant dense<0.000000e+00> : vector<256x128xf32>
    %38 = tpu.matmul %35, %37, %cst_44 {dimension_numbers = #tpu.dot_dimension_numbers<[1], [0], [0], [1], [0, 0, 1, 1], [], []>} : vector<256x384xf32>, vector<384x128xf32>, vector<256x128xf32> -> vector<256x128xf32>
    %39 = arith.addf %33, %38 : vector<256x128xf32>
    %cst_45 = arith.constant dense<0.000000e+00> : vector<128xf32>
    %40 = vector.multi_reduction <add>, %39, %cst_45 [0] : vector<256x128xf32> to vector<128xf32>
    %41 = vector.shape_cast %40 : vector<128xf32> to vector<1x128xf32>
    %42 = arith.mulf %39, %39 : vector<256x128xf32>
    %cst_46 = arith.constant dense<0.000000e+00> : vector<128xf32>
    %43 = vector.multi_reduction <add>, %42, %cst_46 [0] : vector<256x128xf32> to vector<128xf32>
    %44 = vector.shape_cast %43 : vector<128xf32> to vector<1x128xf32>
    %cst_47 = arith.constant 3.906250e-03 : f32
    %45 = vector.broadcast %cst_47 : f32 to vector<1x128xf32>
    %46 = arith.mulf %41, %45 : vector<1x128xf32>
    %cst_48 = arith.constant 3.906250e-03 : f32
    %47 = vector.broadcast %cst_48 : f32 to vector<1x128xf32>
    %48 = arith.mulf %44, %47 : vector<1x128xf32>
    %49 = arith.mulf %46, %46 : vector<1x128xf32>
    %50 = arith.subf %48, %49 : vector<1x128xf32>
    %cst_49 = arith.constant 0.000000e+00 : f32
    %51 = vector.broadcast %cst_49 : f32 to vector<1x128xf32>
    %52 = arith.maximumf %50, %51 : vector<1x128xf32>
    %53 = vector.broadcast %46 : vector<1x128xf32> to vector<256x128xf32>
    %54 = arith.subf %39, %53 : vector<256x128xf32>
    %cst_50 = arith.constant 9.99999974E-6 : f32
    %55 = vector.broadcast %cst_50 : f32 to vector<1x128xf32>
    %56 = arith.addf %52, %55 : vector<1x128xf32>
    %57 = math.rsqrt %56 : vector<1x128xf32>
    %58 = vector.broadcast %57 : vector<1x128xf32> to vector<256x128xf32>
    %59 = arith.mulf %54, %58 : vector<256x128xf32>
    %c0_51 = arith.constant 0 : index
    %c0_52 = arith.constant 0 : index
    %60 = vector.load %arg3[%c0_51, %c0_52] : memref<1x128xf32, #tpu.memory_space<vmem>>, vector<1x128xf32>
    %61 = vector.broadcast %60 : vector<1x128xf32> to vector<256x128xf32>
    %62 = arith.mulf %59, %61 : vector<256x128xf32>
    %c0_53 = arith.constant 0 : index
    %c0_54 = arith.constant 0 : index
    %63 = vector.load %arg4[%c0_53, %c0_54] : memref<1x128xf32, #tpu.memory_space<vmem>>, vector<1x128xf32>
    %64 = vector.broadcast %63 : vector<1x128xf32> to vector<256x128xf32>
    %65 = arith.addf %62, %64 : vector<256x128xf32>
    %cst_55 = arith.constant 0.000000e+00 : f32
    %66 = vector.broadcast %cst_55 : f32 to vector<256x128xf32>
    %67 = arith.maximumf %65, %66 : vector<256x128xf32>
    %68 = vector.shape_cast %67 : vector<256x128xf32> to vector<16x16x128xf32>
    %c1_i32_56 = arith.constant 1 : i32
    %69 = tpu.dynamic_rotate %68 by %c1_i32_56 dim 1 : vector<16x16x128xf32>, i32 -> vector<16x16x128xf32>
    %c15_i32_57 = arith.constant 15 : i32
    %70 = tpu.dynamic_rotate %68 by %c15_i32_57 dim 1 : vector<16x16x128xf32>, i32 -> vector<16x16x128xf32>
    %c1_58 = arith.constant 1 : index
    %c0_59 = arith.constant 0 : index
    %c0_60 = arith.constant 0 : index
    %71 = vector.load %arg9[%c1_58, %c0_59, %c0_60] : memref<18x16x384xf32, #tpu.memory_space<vmem>>, vector<16x16x128xf32>
    tpu.vector_store %arg9[%c1_58, %c0_59, %c0_60], %69 {strides = array<i32>} : memref<18x16x384xf32, #tpu.memory_space<vmem>>, vector<16x16x128xf32>,
    %c1_61 = arith.constant 1 : index
    %c0_62 = arith.constant 0 : index
    %c128_63 = arith.constant 128 : index
    %72 = vector.load %arg9[%c1_61, %c0_62, %c128_63] : memref<18x16x384xf32, #tpu.memory_space<vmem>>, vector<16x16x128xf32>
    tpu.vector_store %arg9[%c1_61, %c0_62, %c128_63], %68 {strides = array<i32>} : memref<18x16x384xf32, #tpu.memory_space<vmem>>, vector<16x16x128xf32>,
    %c1_64 = arith.constant 1 : index
    %c0_65 = arith.constant 0 : index
    %c256_66 = arith.constant 256 : index
    %73 = vector.load %arg9[%c1_64, %c0_65, %c256_66] : memref<18x16x384xf32, #tpu.memory_space<vmem>>, vector<16x16x128xf32>
    tpu.vector_store %arg9[%c1_64, %c0_65, %c256_66], %70 {strides = array<i32>} : memref<18x16x384xf32, #tpu.memory_space<vmem>>, vector<16x16x128xf32>,
    %74 = vector.extract_strided_slice %68 {offsets = [0, 1, 0], sizes = [16, 1, 128], strides = [1, 1, 1]} : vector<16x16x128xf32> to vector<16x1x128xf32>
    %c1_67 = arith.constant 1 : index
    %c0_68 = arith.constant 0 : index
    %c0_69 = arith.constant 0 : index
    %75 = vector.load %arg9[%c1_67, %c0_68, %c0_69] : memref<18x16x384xf32, #tpu.memory_space<vmem>>, vector<16x1x128xf32>
    tpu.vector_store %arg9[%c1_67, %c0_68, %c0_69], %74 {strides = array<i32>} : memref<18x16x384xf32, #tpu.memory_space<vmem>>, vector<16x1x128xf32>,
    %76 = vector.extract_strided_slice %68 {offsets = [0, 14, 0], sizes = [16, 1, 128], strides = [1, 1, 1]} : vector<16x16x128xf32> to vector<16x1x128xf32>
    %c1_70 = arith.constant 1 : index
    %c15_71 = arith.constant 15 : index
    %c256_72 = arith.constant 256 : index
    %77 = vector.load %arg9[%c1_70, %c15_71, %c256_72] : memref<18x16x384xf32, #tpu.memory_space<vmem>>, vector<16x1x128xf32>
    tpu.vector_store %arg9[%c1_70, %c15_71, %c256_72], %76 {strides = array<i32>} : memref<18x16x384xf32, #tpu.memory_space<vmem>>, vector<16x1x128xf32>,
    %c2_73 = arith.constant 2 : index
    %c0_74 = arith.constant 0 : index
    %c0_75 = arith.constant 0 : index
    %78 = vector.load %arg9[%c2_73, %c0_74, %c0_75] : memref<18x16x384xf32, #tpu.memory_space<vmem>>, vector<1x16x384xf32>
    %79 = vector.shape_cast %78 : vector<1x16x384xf32> to vector<16x384xf32>
    %c0_76 = arith.constant 0 : index
    %c0_77 = arith.constant 0 : index
    %c0_78 = arith.constant 0 : index
    %80 = vector.load %arg9[%c0_76, %c0_77, %c0_78] : memref<18x16x384xf32, #tpu.memory_space<vmem>>, vector<1x16x384xf32>
    %81 = vector.shape_cast %80 : vector<1x16x384xf32> to vector<16x384xf32>
    %82 = vector.shape_cast %79 : vector<16x384xf32> to vector<1x16x384xf32>
    tpu.vector_store %arg9[%c0_76, %c0_77, %c0_78], %82 {strides = array<i32>} : memref<18x16x384xf32, #tpu.memory_space<vmem>>, vector<1x16x384xf32>,
    %c15_79 = arith.constant 15 : index
    %c0_80 = arith.constant 0 : index
    %c0_81 = arith.constant 0 : index
    %83 = vector.load %arg9[%c15_79, %c0_80, %c0_81] : memref<18x16x384xf32, #tpu.memory_space<vmem>>, vector<1x16x384xf32>
    %84 = vector.shape_cast %83 : vector<1x16x384xf32> to vector<16x384xf32>
    %c17_82 = arith.constant 17 : index
    %c0_83 = arith.constant 0 : index
    %c0_84 = arith.constant 0 : index
    %85 = vector.load %arg9[%c17_82, %c0_83, %c0_84] : memref<18x16x384xf32, #tpu.memory_space<vmem>>, vector<1x16x384xf32>
    %86 = vector.shape_cast %85 : vector<1x16x384xf32> to vector<16x384xf32>
    %87 = vector.shape_cast %84 : vector<16x384xf32> to vector<1x16x384xf32>
    tpu.vector_store %arg9[%c17_82, %c0_83, %c0_84], %87 {strides = array<i32>} : memref<18x16x384xf32, #tpu.memory_space<vmem>>, vector<1x16x384xf32>,
    %cst_85 = arith.constant 0.000000e+00 : f32
    %88 = vector.broadcast %cst_85 : f32 to vector<256x128xf32>
    %c0_86 = arith.constant 0 : index
    %c0_87 = arith.constant 0 : index
    %c0_88 = arith.constant 0 : index
    %89 = vector.load %arg9[%c0_86, %c0_87, %c0_88] : memref<18x16x384xf32, #tpu.memory_space<vmem>>, vector<16x16x384xf32>
    %90 = vector.shape_cast %89 : vector<16x16x384xf32> to vector<256x384xf32>
    %c0_89 = arith.constant 0 : index
    %c0_90 = arith.constant 0 : index
    %c0_91 = arith.constant 0 : index
    %91 = vector.load %arg5[%c0_89, %c0_90, %c0_91] : memref<3x384x128xf32, #tpu.memory_space<vmem>>, vector<1x384x128xf32>
    %92 = vector.shape_cast %91 : vector<1x384x128xf32> to vector<384x128xf32>
    %cst_92 = arith.constant dense<0.000000e+00> : vector<256x128xf32>
    %93 = tpu.matmul %90, %92, %cst_92 {dimension_numbers = #tpu.dot_dimension_numbers<[1], [0], [0], [1], [0, 0, 1, 1], [], []>} : vector<256x384xf32>, vector<384x128xf32>, vector<256x128xf32> -> vector<256x128xf32>
    %94 = arith.addf %88, %93 : vector<256x128xf32>
    %c1_93 = arith.constant 1 : index
    %c0_94 = arith.constant 0 : index
    %c0_95 = arith.constant 0 : index
    %95 = vector.load %arg9[%c1_93, %c0_94, %c0_95] : memref<18x16x384xf32, #tpu.memory_space<vmem>>, vector<16x16x384xf32>
    %96 = vector.shape_cast %95 : vector<16x16x384xf32> to vector<256x384xf32>
    %c1_96 = arith.constant 1 : index
    %c0_97 = arith.constant 0 : index
    %c0_98 = arith.constant 0 : index
    %97 = vector.load %arg5[%c1_96, %c0_97, %c0_98] : memref<3x384x128xf32, #tpu.memory_space<vmem>>, vector<1x384x128xf32>
    %98 = vector.shape_cast %97 : vector<1x384x128xf32> to vector<384x128xf32>
    %cst_99 = arith.constant dense<0.000000e+00> : vector<256x128xf32>
    %99 = tpu.matmul %96, %98, %cst_99 {dimension_numbers = #tpu.dot_dimension_numbers<[1], [0], [0], [1], [0, 0, 1, 1], [], []>} : vector<256x384xf32>, vector<384x128xf32>, vector<256x128xf32> -> vector<256x128xf32>
    %100 = arith.addf %94, %99 : vector<256x128xf32>
    %c2_100 = arith.constant 2 : index
    %c0_101 = arith.constant 0 : index
    %c0_102 = arith.constant 0 : index
    %101 = vector.load %arg9[%c2_100, %c0_101, %c0_102] : memref<18x16x384xf32, #tpu.memory_space<vmem>>, vector<16x16x384xf32>
    %102 = vector.shape_cast %101 : vector<16x16x384xf32> to vector<256x384xf32>
    %c2_103 = arith.constant 2 : index
    %c0_104 = arith.constant 0 : index
    %c0_105 = arith.constant 0 : index
    %103 = vector.load %arg5[%c2_103, %c0_104, %c0_105] : memref<3x384x128xf32, #tpu.memory_space<vmem>>, vector<1x384x128xf32>
    %104 = vector.shape_cast %103 : vector<1x384x128xf32> to vector<384x128xf32>
    %cst_106 = arith.constant dense<0.000000e+00> : vector<256x128xf32>
    %105 = tpu.matmul %102, %104, %cst_106 {dimension_numbers = #tpu.dot_dimension_numbers<[1], [0], [0], [1], [0, 0, 1, 1], [], []>} : vector<256x384xf32>, vector<384x128xf32>, vector<256x128xf32> -> vector<256x128xf32>
    %106 = arith.addf %100, %105 : vector<256x128xf32>
    %cst_107 = arith.constant dense<0.000000e+00> : vector<128xf32>
    %107 = vector.multi_reduction <add>, %106, %cst_107 [0] : vector<256x128xf32> to vector<128xf32>
    %108 = vector.shape_cast %107 : vector<128xf32> to vector<1x128xf32>
    %109 = arith.mulf %106, %106 : vector<256x128xf32>
    %cst_108 = arith.constant dense<0.000000e+00> : vector<128xf32>
    %110 = vector.multi_reduction <add>, %109, %cst_108 [0] : vector<256x128xf32> to vector<128xf32>
    %111 = vector.shape_cast %110 : vector<128xf32> to vector<1x128xf32>
    %cst_109 = arith.constant 3.906250e-03 : f32
    %112 = vector.broadcast %cst_109 : f32 to vector<1x128xf32>
    %113 = arith.mulf %108, %112 : vector<1x128xf32>
    %cst_110 = arith.constant 3.906250e-03 : f32
    %114 = vector.broadcast %cst_110 : f32 to vector<1x128xf32>
    %115 = arith.mulf %111, %114 : vector<1x128xf32>
    %116 = arith.mulf %113, %113 : vector<1x128xf32>
    %117 = arith.subf %115, %116 : vector<1x128xf32>
    %cst_111 = arith.constant 0.000000e+00 : f32
    %118 = vector.broadcast %cst_111 : f32 to vector<1x128xf32>
    %119 = arith.maximumf %117, %118 : vector<1x128xf32>
    %120 = vector.broadcast %113 : vector<1x128xf32> to vector<256x128xf32>
    %121 = arith.subf %106, %120 : vector<256x128xf32>
    %cst_112 = arith.constant 9.99999974E-6 : f32
    %122 = vector.broadcast %cst_112 : f32 to vector<1x128xf32>
    %123 = arith.addf %119, %122 : vector<1x128xf32>
    %124 = math.rsqrt %123 : vector<1x128xf32>
    %125 = vector.broadcast %124 : vector<1x128xf32> to vector<256x128xf32>
    %126 = arith.mulf %121, %125 : vector<256x128xf32>
    %c0_113 = arith.constant 0 : index
    %c0_114 = arith.constant 0 : index
    %127 = vector.load %arg6[%c0_113, %c0_114] : memref<1x128xf32, #tpu.memory_space<vmem>>, vector<1x128xf32>
    %128 = vector.broadcast %127 : vector<1x128xf32> to vector<256x128xf32>
    %129 = arith.mulf %126, %128 : vector<256x128xf32>
    %c0_115 = arith.constant 0 : index
    %c0_116 = arith.constant 0 : index
    %130 = vector.load %arg7[%c0_115, %c0_116] : memref<1x128xf32, #tpu.memory_space<vmem>>, vector<1x128xf32>
    %131 = vector.broadcast %130 : vector<1x128xf32> to vector<256x128xf32>
    %132 = arith.addf %129, %131 : vector<256x128xf32>
    %133 = vector.shape_cast %132 : vector<256x128xf32> to vector<16x16x128xf32>
    %c0_117 = arith.constant 0 : index
    %c0_118 = arith.constant 0 : index
    %c0_119 = arith.constant 0 : index
    %c0_120 = arith.constant 0 : index
    %134 = vector.load %arg1[%c0_117, %c0_118, %c0_119, %c0_120] : memref<1x16x16x128xf32, #tpu.memory_space<vmem>>, vector<1x16x16x128xf32>
    %135 = vector.shape_cast %134 : vector<1x16x16x128xf32> to vector<16x16x128xf32>
    %136 = arith.addf %133, %135 : vector<16x16x128xf32>
    %c0_121 = arith.constant 0 : index
    %c0_122 = arith.constant 0 : index
    %c0_123 = arith.constant 0 : index
    %c0_124 = arith.constant 0 : index
    %137 = vector.load %arg8[%c0_121, %c0_122, %c0_123, %c0_124] : memref<1x16x16x128xf32, #tpu.memory_space<vmem>>, vector<1x16x16x128xf32>
    %138 = vector.shape_cast %137 : vector<1x16x16x128xf32> to vector<16x16x128xf32>
    %139 = vector.shape_cast %136 : vector<16x16x128xf32> to vector<1x16x16x128xf32>
    tpu.vector_store %arg8[%c0_121, %c0_122, %c0_123, %c0_124], %139 {strides = array<i32>} : memref<1x16x16x128xf32, #tpu.memory_space<vmem>>, vector<1x16x16x128xf32>,
    return
  }
  func.func @transform_0(%arg0: i32) -> (i32, i32, i32, i32) {
    %c0_i32 = arith.constant 0 : i32
    %c0_i32_0 = arith.constant 0 : i32
    %c0_i32_1 = arith.constant 0 : i32
    %c0_i32_2 = arith.constant 0 : i32
    return %arg0, %c0_i32, %c0_i32_0, %c0_i32_1 : i32, i32, i32, i32
  }
  func.func @transform_1(%arg0: i32) -> (i32, i32, i32) {
    %c0_i32 = arith.constant 0 : i32
    %c0_i32_0 = arith.constant 0 : i32
    %c0_i32_1 = arith.constant 0 : i32
    %c0_i32_2 = arith.constant 0 : i32
    return %c0_i32, %c0_i32_0, %c0_i32_1 : i32, i32, i32
  }
  func.func @transform_2(%arg0: i32) -> (i32, i32) {
    %c0_i32 = arith.constant 0 : i32
    %c0_i32_0 = arith.constant 0 : i32
    %c0_i32_1 = arith.constant 0 : i32
    return %c0_i32, %c0_i32_0 : i32, i32
  }
  func.func @transform_3(%arg0: i32) -> (i32, i32) {
    %c0_i32 = arith.constant 0 : i32
    %c0_i32_0 = arith.constant 0 : i32
    %c0_i32_1 = arith.constant 0 : i32
    return %c0_i32, %c0_i32_0 : i32, i32
  }
  func.func @transform_4(%arg0: i32) -> (i32, i32, i32) {
    %c0_i32 = arith.constant 0 : i32
    %c0_i32_0 = arith.constant 0 : i32
    %c0_i32_1 = arith.constant 0 : i32
    %c0_i32_2 = arith.constant 0 : i32
    return %c0_i32, %c0_i32_0, %c0_i32_1 : i32, i32, i32
  }
  func.func @transform_5(%arg0: i32) -> (i32, i32) {
    %c0_i32 = arith.constant 0 : i32
    %c0_i32_0 = arith.constant 0 : i32
    %c0_i32_1 = arith.constant 0 : i32
    return %c0_i32, %c0_i32_0 : i32, i32
  }
  func.func @transform_6(%arg0: i32) -> (i32, i32) {
    %c0_i32 = arith.constant 0 : i32
    %c0_i32_0 = arith.constant 0 : i32
    %c0_i32_1 = arith.constant 0 : i32
    return %c0_i32, %c0_i32_0 : i32, i32
  }
  func.func @transform_7(%arg0: i32) -> (i32, i32, i32, i32) {
    %c0_i32 = arith.constant 0 : i32
    %c0_i32_0 = arith.constant 0 : i32
    %c0_i32_1 = arith.constant 0 : i32
    %c0_i32_2 = arith.constant 0 : i32
    return %arg0, %c0_i32, %c0_i32_0, %c0_i32_1 : i32, i32, i32, i32
  }
}

</mosaic_0001>

<bundles_post_ra>
// kernel: tpu_custom_call.1
= control target key start
LH: loop header
LB: loop body
LE: loop exit
PB: predicated region body
PF: predicated region fallthrough
CT: control target
= control target key end

     0   :  { %12 = vsyncpa [#allocation4], 0  ;;  %s10627_s0 = inlined_call_operand.hbm [shape: f32[2,16,16,128], index: 0, kind: input, shape index: {}]   ;;  %s10628_s1 = inlined_call_operand.hbm [shape: f32[3,384,128], index: 1, kind: input, shape index: {}]   ;;  %s10629_s2 = inlined_call_operand.vmem [shape: f32[1,128], index: 2, kind: input, shape index: {}]   ;;  %s10630_s3 = inlined_call_operand.vmem [shape: f32[1,128], index: 3, kind: input, shape index: {}]   ;;  %s10631_s4 = inlined_call_operand.hbm [shape: f32[3,384,128], index: 4, kind: input, shape index: {}]   ;;  %s10632_s5 = inlined_call_operand.vmem [shape: f32[1,128], index: 5, kind: input, shape index: {}]   ;;  %s10633_s6 = inlined_call_operand.vmem [shape: f32[1,128], index: 6, kind: input, shape index: {}]   ;;  %s10634_s7 = inlined_call_operand.hbm [shape: f32[2,16,16,128], index: 7, kind: output, shape index: {}]  }
   0x1   :  { %14 = vsyncpa [#allocation4 + $0x1], 0 }
   0x2   :  { %15 = vsyncpa [#allocation7], 0 }
   0x3   :  { %16 = vsyncpa [#allocation5], 0 }
   0x4   :  { %18 = vsyncpa [#allocation5 + $0x1], 0  ;;  %s7083_s24 = smov 0   ;;  %s7085_s25 = smov 0  }
   0x5   :  { %s7087_s26 = smov 0   ;;  %s7089_s27 = smov 0  }
   0x6 LB: > { %s7104_s28 = sadd.s32 4294967295, %s7032_s27   ;;  %s5494_s29 = sadd.s32 4294967294, %s7032_s27   ;;  %s7032_s27 = sphi %s7089_s27, %s10858_s27   ;;  %s7028_s26 = sphi %s7087_s26, %s10857_s26   ;;  %s7024_s25 = sphi %s7085_s25, %s10856_s25   ;;  %s7020_s24 = sphi %s7083_s24, %s10855_s24  }
   0x7   : > { %p44_p0 = scmp.ne.s32.totalorder %s7024_s25, %s7020_s24  ;;  %p10635_p1 = scmp.eq.s32.totalorder %s7104_s28, 0 }
   0x8   : > { %p200_p3 = scmp.eq.s32.totalorder %s5494_s29, 1  ;;  %p5495_p5 = scmp.ge.s32.totalorder %s7032_s27, 1 }
   0x9   : > { %p7113_p4 = por %p10635_p1, %p44_p0  ;;  %p207_p7 = scmp.lt.s32.totalorder %s7032_s27, 3 }
   0xa   : > { %p7118_p6 = por %p200_p3, %p44_p0  ;;  %s7034_s10 = smov [#allocation6]  }
   0xb   : > { %s10709_s30 = scalar_select %p7113_p4, 1, 0 }
   0xc   : > { %s10710_s8 = scalar_select %p7118_p6, 1, 0 }
   0xd   : > { %p7123_p8 = pnand %p5495_p5, %p207_p7  ;;  %s219_s11 = sshll.u32 %s7034_s10, 4  ;;  %s7127_s11 = int_to_ptr.vmem [resolvable:$true] %s219_s11 }
   0xe   : > { %s7035_s13 = smov [#allocation8]   ;;  %s6876_s17 = scalar_lea.hbm %s10628_s1, 18432 }
   0xf   : > { %p6778_p9 = pneg %p7123_p8  ;;  %s238_s14 = sshll.u32 %s7035_s13, 4  ;;  %s7138_s14 = int_to_ptr.vmem [resolvable:$true] %s238_s14 }
  0x10   : > { %p6877_p12 = scmp.ne.s32.totalorder %s10628_s1, %s6876_s17  ;;  %p6883_p5 = scmp.lt.u32.totalorder %s6876_s17, %s10628_s1 }
  0x11   : > { %p7134_p11 = pnand %p6778_p9, %p10635_p1 }
  0x13   : > { %p6878_p13 = pneg %p7134_p11 }
  0x15   : > { %p6879_p0 = pnand %p6878_p13, %p6877_p12 }
  0x17   : > { %p6880_p3 = pneg %p6879_p0 }
  0x19   : > { %p6885_p7 = pnand %p6883_p5, %p6880_p3 }
  0x1b   : > { %6888 = shalt.err (!%p6885_p7)
}
  0x1c   : > { %s6889_s22 = scalar_lea.vmem %s7127_s11, 18432  ;;  %p6897_p2 = scmp.lt.s32.totalorder %s7127_s11, %s7127_s11 }
  0x1d   : > { %p6890_p9 = scmp.ne.s32.totalorder %s7127_s11, %s6889_s22  ;;  %p6898_p12 = scmp.lt.s32.totalorder %s6889_s22, %s6889_s22 }
  0x1f   : > { %p6892_p10 = pnand %p6890_p9, %p6878_p13  ;;  %p6899_p0 = por %p6898_p12, %p6897_p2 }
  0x21   : > { %p6893_p1 = pneg %p6892_p10 }
  0x23   : > { %p6900_p6 = pnand %p6899_p0, %p6893_p1 }
  0x25   : > { %6903 = shalt.err (!%p6900_p6)
}
  0x26   : > { %s10636_s23 = smov 128   ;;  %s7037_s29 = smov 8  }
  0x27   : > { %6781 = dma.hbm_to_vmem [thread:$0]  (!%p7134_p11), %s10628_s1, 18432, %s7127_s11, [#allocation7], %s10636_s23, %s10636_s23, %s7037_s29  }
  0x28   : > { %s6904_s17 = scalar_lea.hbm %s10631_s4, 18432 }
  0x29   : > { %p6905_p1 = scmp.ne.s32.totalorder %s10631_s4, %s6904_s17  ;;  %p6911_p10 = scmp.lt.u32.totalorder %s6904_s17, %s10631_s4 }
  0x2b   : > { %p6907_p2 = pnand %p6905_p1, %p6878_p13 }
  0x2d   : > { %p6908_p6 = pneg %p6907_p2 }
  0x2f   : > { %p6913_p3 = pnand %p6911_p10, %p6908_p6 }
  0x31   : > { %6916 = shalt.err (!%p6913_p3)
}
  0x32   : > { %s6917_s11 = scalar_lea.vmem %s7138_s14, 18432  ;;  %p6925_p12 = scmp.lt.s32.totalorder %s7138_s14, %s7138_s14 }
  0x33   : > { %p6918_p5 = scmp.ne.s32.totalorder %s7138_s14, %s6917_s11  ;;  %p6926_p0 = scmp.lt.s32.totalorder %s6917_s11, %s6917_s11 }
  0x35   : > { %p6920_p7 = pnand %p6918_p5, %p6878_p13  ;;  %p6927_p1 = por %p6926_p0, %p6925_p12 }
  0x37   : > { %p6921_p9 = pneg %p6920_p7 }
  0x39   : > { %p6928_p2 = pnand %p6927_p1, %p6921_p9 }
  0x3b   : > { %6931 = shalt.err (!%p6928_p2)
}
  0x3c   : > { %6784 = dma.hbm_to_vmem [thread:$0]  (!%p7134_p11), %s10631_s4, 18432, %s7138_s14, [#allocation7], %s10636_s23, %s10636_s23, %s7037_s29  }
  0x3d   : > { %s7199_s12 = sadd.s32 1, %s7032_s27   ;;  %s31_s13 = sadd.s32 1, %s7028_s26 }
  0x3e   : > { %s28_s15 = ssub.s32 %s7032_s27, %s7199_s12  ;;  %p38_p13 = scmp.ne.s32.totalorder %s7028_s26, %s7024_s25 }
  0x3f   : > { %p29_p6 = scmp.eq.s32.totalorder %s28_s15, 0  ;;  %p39_p10 = scmp.eq.s32.totalorder %s7032_s27, 0 }
  0x40   : > { %p10713_p3 = scmp.eq.s32.totalorder %s7104_s28, 1  ;;  %p6795_p7 = scmp.lt.s32.totalorder %s7032_s27, 2 }
  0x41   : > { %s7215_s17 = scalar_select %p29_p6, %s7028_s26, %s31_s13  }
  0x42   : > { %p7209_p5 = por %p10713_p3, %p38_p13  ;;  %p40_p9 = por %p39_p10, %p38_p13 }
  0x43   : > { %s258_s18 = sand.u32 1, %s7028_s26   ;;  %s5516_s14 = sshll.u32 %s7032_s27, 12 }
  0x44   : > { %s10714_s16 = scalar_select %p7209_p5, 1, 0 }
  0x45   : > { %s5499_s19 = sshll.u32 %s258_s18, 8  ;;  %s7222_s11 = scalar_lea.hbm %s10627_s0, %s5516_s14 }
  0x46   : > { %s262_s22 = scalar_lea.vmem [#allocation3], %s5499_s19  ;;  %p7226_p11 = pnand %p6795_p7, %p40_p9 }
  0x47   : > { %s269_s10 = sshll.u32 %s262_s22, 4  ;;  %s7230_s15 = scalar_lea.sflag [#allocation4], %s258_s18  ;;  %s7224_s10 = int_to_ptr.vmem [resolvable:$true] %s269_s10 }
  0x48   : > { %s6932_s23 = scalar_lea.hbm %s7222_s11, 4096  ;;  %p6934_p0 = pneg %p7226_p11 }
  0x49   : > { %p6933_p12 = scmp.ne.s32.totalorder %s7222_s11, %s6932_s23  ;;  %s6937_s20 = scalar_lea.hbm %s10627_s0, 8192 }
  0x4a   : > { %p6938_p13 = scmp.lt.u32.totalorder %s7222_s11, %s10627_s0  ;;  %p6939_p6 = scmp.lt.u32.totalorder %s6937_s20, %s6932_s23 }
  0x4b   : > { %p6935_p1 = pnand %p6934_p0, %p6933_p12  ;;  %p6941_p3 = scmp.lt.u32.totalorder %s6932_s23, %s7222_s11 }
  0x4c   : > { %p6940_p10 = por %p6939_p6, %p6938_p13 }
  0x4d   : > { %p6936_p2 = pneg %p6935_p1 }
  0x4e   : > { %p6942_p7 = por %p6941_p3, %p6940_p10 }
  0x50   : > { %p6943_p9 = pnand %p6942_p7, %p6936_p2 }
  0x52   : > { %6946 = shalt.err (!%p6943_p9)
}
  0x53   : > { %s6947_s18 = scalar_lea.vmem %s7224_s10, 4096  ;;  %s7038_s19 = smov [#allocation3]  }
  0x54   : > { %p6948_p12 = scmp.ne.s32.totalorder %s7224_s10, %s6947_s18  ;;  %s6952_s14 = sshll.u32 %s7038_s19, 4  ;;  %s6953_s14 = int_to_ptr.vmem [resolvable:$false] %s6952_s14 }
  0x55   : > { %s6954_s21 = scalar_lea.vmem %s6953_s14, 8192  ;;  %p6955_p4 = scmp.lt.s32.totalorder %s7224_s10, %s6953_s14 }
  0x56   : > { %p6950_p1 = pnand %p6948_p12, %p6934_p0  ;;  %p6956_p13 = scmp.lt.s32.totalorder %s6954_s21, %s6947_s18 }
  0x58   : > { %p6951_p5 = pneg %p6950_p1  ;;  %p6957_p6 = por %p6956_p13, %p6955_p4 }
  0x5a   : > { %p6958_p10 = pnand %p6957_p6, %p6951_p5 }
  0x5c   : > { %6961 = shalt.err (!%p6958_p10)
}
  0x5d   : > { %s10716_s23 = smov 128   ;;  %281 = sbr.rel (%p7123_p8) target bundleno = 1434 (0x59a), region = 48 }
  0x5e   : > { %6788 = dma.hbm_to_vmem [thread:$0]  (!%p7226_p11), %s7222_s11, 4096, %s7224_s10, %s7230_s15, %s10716_s23, %s10716_s23, %s7037_s29  }
  0x64   : > { %s7264_s20 = sand.u32 1, %s7024_s25   ;;  %p10717_p4 = scmp.ne.s32.totalorder %s10709_s30, 0 }
  0x65   : > { %s5503_s22 = sshll.u32 %s7264_s20, 8  ;;  %s284_s18 = scalar_lea.sflag [#allocation4], %s7264_s20 }
  0x66   : > { %s7270_s13 = scalar_lea.vmem [#allocation3], %s5503_s22 }
  0x67   : > { %7007 = dma.done.wait (%p10717_p4), %s284_s18, 4096  }
  0x68   : > { %7009 = vsyncadd (%p10717_p4), %s284_s18, 4294963200  ;;  %p10718_p5 = scmp.eq.s32.totalorder %s7104_s28, 0 }
  0x6a   : > { %7011 = dma.done.wait (%p10718_p5), [#allocation7], 36864   ;;  %p10719_p8 = pmov %p10718_p5 }
  0x6b   : > { %v10641_v0 = vmov 0.0|0.0   ;;  %v983_v1 = vld [vmem:[#allocation6 + $0x180] sm:$0xff]  ;;  %v984_v2 = vld [vmem:[#allocation6 + $0x188] sm:$0xff]  ;;  %v985_v6 = vld [vmem:[#allocation6 + $0x190] sm:$0xff]  ;;  %v390_v11 = vlaneseq  ;;  %s10403_s21 = scalar_lea.vmem [#allocation9], %s5503_s22  ;;  %s5517_s23 = sshll.u32 %s7104_s28, 12 }
  0x6c   : > { %7013 = vsyncadd (%p10719_p8), [#allocation7], 4294930432  ;;  %6286 = vmatprep.subr.bf16.mxu0 %v10641_v0  ;;  %v1015_v3 = vld [vmem:[#allocation6 + $0x280] sm:$0xff]  ;;  %v6287_v4 = vpack.c.bf16 %v984_v2, %v983_v1  ;;  %v1016_v5 = vld [vmem:[#allocation6 + $0x288] sm:$0xff]  ;;  %s5402_s22 = sshll.u32 %s10403_s21, 4  ;;  %s10563_s30 = scalar_lea.hbm %s10634_s7, %s5517_s23  ;;  %s10567_s22 = int_to_ptr.vmem [resolvable:$true] %s5402_s22 }
  0x6d   : > { %v986_v7 = vld [vmem:[#allocation6 + $0x198] sm:$0xff]  ;;  %v6334_v8 = vpack.c.bf16 %v1016_v5, %v1015_v3  ;;  %v1017_v9 = vld [vmem:[#allocation6 + $0x290] sm:$0xff]  ;;  %v1019_v14 = vld [vmem:[#allocation6 + $0x2a0] sm:$0xff]  ;;  %v7282_v19 = vshrl.u32 %v390_v11, 7  ;;  %s5389_s28 = scalar_lea.sflag [#allocation5], %s7264_s20  ;;  %s6962_s9 = scalar_lea.vmem %s10567_s22, 4096 }
  0x6e   : > { %v1018_v10 = vld [vmem:[#allocation6 + $0x298] sm:$0xff]  ;;  %6288 = vmatpush1.bf16.msra.mxu0 %v6287_v4  ;;  %v6290_v12 = vpack.c.bf16 %v986_v7, %v985_v6  ;;  %v1020_v15 = vld [vmem:[#allocation6 + $0x2a8] sm:$0xff]  ;;  %v987_v16 = vld [vmem:[#allocation6 + $0x1a0] sm:$0xff]  ;;  %p6963_p11 = scmp.ne.s32.totalorder %s10567_s22, %s6962_s9  ;;  %p10852_p0 = scmp.ne.s32.totalorder %s10714_s16, 0 }
  0x6f   : > { %v6338_v13 = vpack.c.bf16 %v1018_v10, %v1017_v9  ;;  %6335 = vmatprep.subr.bf16.mxu1 %v6334_v8  ;;  %6289 = vmatprep.subr.bf16.mxu0 %v10641_v0  ;;  %v988_v17 = vld [vmem:[#allocation6 + $0x1a8] sm:$0xff]  ;;  %v6342_v18 = vpack.c.bf16 %v1020_v15, %v1019_v14  ;;  %10720 = vst [vmem:[#allocation13_spill] sm:$0xff] %v7282_v19  ;;  %v1021_v21 = vld [vmem:[#allocation6 + $0x2b0] sm:$0xff]  ;;  %v1022_v22 = vld [vmem:[#allocation6 + $0x2b8] sm:$0xff]  ;;  %vm457_vm0 = vcmp.lt.s32.totalorder %v7282_v19, 7  ;;  %vm392_vm1 = vcmp.lt.s32.totalorder %v7282_v19, 1 }
  0x70   : > { %6337 = vmatpush3.bf16.msra.mxu1 %v6334_v8  ;;  %v6293_v20 = vpack.c.bf16 %v988_v17, %v987_v16  ;;  %v989_v23 = vld [vmem:[#allocation6 + $0x1b0] sm:$0xff]  ;;  %v990_v24 = vld [vmem:[#allocation6 + $0x1b8] sm:$0xff]  ;;  %v6346_v25 = vpack.c.bf16 %v1022_v22, %v1021_v21  ;;  %v7286_v26 = vld [vmem:[%s7270_s13] sm:$0xff]  ;;  %p6964_p2 = pnand %p6963_p11, %p10852_p0  ;;  %s7040_s29 = smov [#allocation9]  }
  0x71   : > { %6339 = vmatprep.subr.bf16.mxu1 %v6338_v13  ;;  %v6296_v27 = vpack.c.bf16 %v990_v24, %v989_v23  ;;  %v1023_v28 = vld [vmem:[#allocation6 + $0x2c0] sm:$0xff]  ;;  %v1024_v29 = vld [vmem:[#allocation6 + $0x2c8] sm:$0xff]  ;;  %v425_v31 = vrot.slane %v7286_v26, 1  ;;  %1095 = vmatprep.mubr.f32.mxu0 %v7286_v26  ;;  %v10639_v32 = vrot.slane %v7286_v26, 7  ;;  %v7300_v37 = vld [vmem:[%s7270_s13 + $0x10] sm:$0xff]  ;;  %s6966_s11 = sshll.u32 %s7040_s29, 4  ;;  %s6967_s11 = int_to_ptr.vmem [resolvable:$false] %s6966_s11 }
  0x72   : > { %6291 = vmatpush1.bf16.msra.mxu0 %v6290_v12  ;;  %v7290_v30 = vld [vmem:[%s7270_s13 + $0x8] sm:$0xff]  ;;  %v991_v33 = vld [vmem:[#allocation6 + $0x1c0] sm:$0xff]  ;;  %10721 = vst [vmem:[#allocation14_spill] sm:$0xff] %v7300_v37  ;;  %v7304_v39 = vld [vmem:[%s7270_s13 + $0x18] sm:$0xff]  ;;  %v7307_v40 = vrot.slane %v7300_v37, 1  ;;  %v7310_v41 = vpack.c.bf16 %v1024_v29, %v1023_v28  ;;  %v359_v62 = vrot.slane %v7300_v37, 7  ;;  %p6965_p3 = pneg %p6964_p2  ;;  %p6969_p7 = scmp.lt.s32.totalorder %s10567_s22, %s6967_s11 }
  0x73   : > { %6292 = vmatprep.subr.bf16.mxu0 %v10641_v0  ;;  %v992_v34 = vld [vmem:[#allocation6 + $0x1c8] sm:$0xff]  ;;  %v441_v35 = vrot.slane %v7290_v30, 1  ;;  %v667_v36 = vrot.slane %v7290_v30, 6  ;;  %v10640_v38 = vrot.slane %v7290_v30, 7  ;;  %10722 = vst [vmem:[#allocation15_spill] sm:$0xff] %v7304_v39  ;;  %525 = vst [vmem:[#allocation2 + $0x68] sm:$0xff] %v7300_v37 }
  0x74   : > { %6341 = vmatpush3.bf16.msra.mxu1 %v6338_v13  ;;  %v442_v44 = vrot.slane %v7304_v39, 1  ;;  %526 = vst [vmem:[#allocation2 + $0x80] sm:$0xff] %v7304_v39  ;;  %v7319_v45 = vld [vmem:[%s7270_s13 + $0x20] sm:$0xff]  ;;  %v6299_v46 = vpack.c.bf16 %v992_v34, %v991_v33  ;;  %v1025_v47 = vld [vmem:[#allocation6 + $0x2d0] sm:$0xff]  ;;  %v1026_v48 = vld [vmem:[#allocation6 + $0x2d8] sm:$0xff]  ;;  %v668_v49 = vrot.slane %v7304_v39, 6 }
  0x75   : > { %6343 = vmatprep.subr.bf16.mxu1 %v6342_v18  ;;  %v458_v42 = vsel %vm457_vm0, %v425_v31, %v441_v35  ;;  %v474_v43 = vsel %vm457_vm0, %v441_v35, %v425_v31  ;;  %10723 = vst [vmem:[#allocation16_spill] sm:$0xff] %v7319_v45  ;;  %v7323_v50 = vld [vmem:[%s7270_s13 + $0x28] sm:$0xff]  ;;  %v7326_v51 = vrot.slane %v7319_v45, 1  ;;  %527 = vst [vmem:[#allocation2 + $0x98] sm:$0xff] %v7319_v45  ;;  %v7336_v53 = vld [vmem:[#allocation6 + $0x1d0] sm:$0xff]  ;;  %v375_v11 = vrot.slane %v7304_v39, 7 }
  0x76   : > { %6294 = vmatpush1.bf16.msra.mxu0 %v6293_v20  ;;  %555 = vst [vmem:[#allocation2 + $0x40] sm:$0xff] %v458_v42  ;;  %5838 = vmatprep.mubr.f32.mxu1 %v458_v42  ;;  %556 = vst [vmem:[#allocation2 + $0x58] sm:$0xff] %v474_v43  ;;  %v409_v52 = vsel %vm392_vm1, %v10640_v38, %v10639_v32  ;;  %v7338_v54 = vld [vmem:[#allocation6 + $0x1d8] sm:$0xff]  ;;  %v7343_v55 = vsel %vm457_vm0, %v7307_v40, %v442_v44  ;;  %v443_v57 = vrot.slane %v7323_v50, 1  ;;  %v7351_v58 = vld [vmem:[%s7270_s13 + $0x30] sm:$0xff]  ;;  %s6968_s10 = scalar_lea.vmem %s6967_s11, 8192 }
  0x77   : > { %6295 = vmatprep.subr.bf16.mxu0 %v10641_v0  ;;  %10724 = vst [vmem:[#allocation17_spill] sm:$0xff] %v7323_v50  ;;  %699 = vst [vmem:[#allocation2 + $0x5f] sm:$0x1] %v667_v36  ;;  %v475_v56 = vsel %vm457_vm0, %v442_v44, %v7307_v40  ;;  %v669_v59 = vrot.slane %v7323_v50, 6  ;;  %v7356_v60 = vld [vmem:[%s7270_s13 + $0x38] sm:$0xff]  ;;  %v7359_v61 = vrot.slane %v7351_v58, 1  ;;  %v7364_v63 = vpack.c.bf16 %v1026_v48, %v1025_v47  ;;  %p6970_p9 = scmp.lt.s32.totalorder %s6968_s10, %s6962_s9 }
  0x78   : > { %6345 = vmatpush3.bf16.msra.mxu1 %v6342_v18  ;;  %528 = vst [vmem:[#allocation2 + $0xb0] sm:$0xff] %v7323_v50  ;;  %10725 = vst [vmem:[#allocation18_spill] sm:$0xff] %v7351_v58  ;;  %v7369_v1 = vsel %vm457_vm0, %v7326_v51, %v443_v57  ;;  %v476_v2 = vsel %vm457_vm0, %v443_v57, %v7326_v51  ;;  %v444_v3 = vrot.slane %v7356_v60, 1  ;;  %v7377_v4 = vld [vmem:[%s7270_s13 + $0x40] sm:$0xff]  ;;  %v1028_v7 = vld [vmem:[#allocation6 + $0x2e8] sm:$0xff]  ;;  %v670_v8 = vrot.slane %v7356_v60, 6 }
  0x79   : > { %6347 = vmatprep.subr.bf16.mxu1 %v6346_v25  ;;  %491 = vst [vmem:[#allocation2 + $0x30] sm:$0xff] %v409_v52  ;;  %557 = vst [vmem:[#allocation2 + $0x70] sm:$0xff] %v7343_v55  ;;  %v6302_v5 = vpack.c.bf16 %v7338_v54, %v7336_v53  ;;  %v1027_v6 = vld [vmem:[#allocation6 + $0x2e0] sm:$0xff]  ;;  %v7384_v9 = vld [vmem:[%s7270_s13 + $0x48] sm:$0xff]  ;;  %v7387_v10 = vrot.slane %v7377_v4, 1  ;;  %v410_v22 = vsel %vm392_vm1, %v375_v11, %v359_v62  ;;  %v360_v53 = vrot.slane %v7319_v45, 7  ;;  %p6971_p12 = por %p6970_p9, %p6969_p7 }
  0x7a   : > { %6297 = vmatpush1.bf16.msra.mxu0 %v6296_v27  ;;  %558 = vst [vmem:[#allocation2 + $0x88] sm:$0xff] %v475_v56  ;;  %10726 = vst [vmem:[#allocation19_spill] sm:$0xff] %v7356_v60  ;;  %v7392_v12 = vld [vmem:[#allocation6 + $0x1e0] sm:$0xff]  ;;  %v996_v13 = vld [vmem:[#allocation6 + $0x1e8] sm:$0xff]  ;;  %v7397_v14 = vsel %vm457_vm0, %v7359_v61, %v444_v3  ;;  %v477_v15 = vsel %vm457_vm0, %v444_v3, %v7359_v61  ;;  %v445_v16 = vrot.slane %v7384_v9, 1  ;;  %v671_v18 = vrot.slane %v7384_v9, 6 }
  0x7b   : > { %6298 = vmatprep.subr.bf16.mxu0 %v10641_v0  ;;  %529 = vst [vmem:[#allocation2 + $0xc8] sm:$0xff] %v7351_v58  ;;  %635 = vst [vmem:[#allocation2 + $0x30] sm:$0x1] %v425_v31  ;;  %v7405_v17 = vld [vmem:[%s7270_s13 + $0x50] sm:$0xff]  ;;  %v7411_v20 = vld [vmem:[%s7270_s13 + $0x58] sm:$0xff]  ;;  %v7420_v23 = vpack.c.bf16 %v1028_v7, %v1027_v6  ;;  %v6305_v33 = vpack.c.bf16 %v996_v13, %v7392_v12  ;;  %v376_v54 = vrot.slane %v7323_v50, 7  ;;  %p6972_p1 = pnand %p6971_p12, %p6965_p3 }
  0x7c   : > { %6349 = vmatpush3.bf16.msra.mxu1 %v6346_v25  ;;  %700 = vst [vmem:[#allocation2 + $0x8f] sm:$0x1] %v668_v49  ;;  %530 = vst [vmem:[#allocation2 + $0xe0] sm:$0xff] %v7356_v60  ;;  %v7414_v21 = vrot.slane %v7405_v17, 1  ;;  %v1029_v24 = vld [vmem:[#allocation6 + $0x2f0] sm:$0xff]  ;;  %v1030_v25 = vld [vmem:[#allocation6 + $0x2f8] sm:$0xff]  ;;  %v7425_v27 = vsel %vm457_vm0, %v7387_v10, %v445_v16  ;;  %v478_v28 = vsel %vm457_vm0, %v445_v16, %v7387_v10 }
  0x7d   : > { %6351 = vmatprep.subr.bf16.mxu1 %v7310_v41  ;;  %10727 = vst [vmem:[#allocation20_spill] sm:$0xff] %v7377_v4  ;;  %559 = vst [vmem:[#allocation2 + $0xa0] sm:$0xff] %v7369_v1  ;;  %v446_v29 = vrot.slane %v7411_v20, 1  ;;  %v7433_v31 = vld [vmem:[%s7270_s13 + $0x60] sm:$0xff]  ;;  %v672_v34 = vrot.slane %v7411_v20, 6  ;;  %v7439_v35 = vld [vmem:[%s7270_s13 + $0x68] sm:$0xff]  ;;  %v7464_v48 = vpack.c.bf16 %v1030_v25, %v1029_v24  ;;  %v411_v6 = vsel %vm392_vm1, %v376_v54, %v360_v53 }
  0x7e   : > { %6300 = vmatpush1.bf16.msra.mxu0 %v6299_v46  ;;  %560 = vst [vmem:[#allocation2 + $0xb8] sm:$0xff] %v476_v2  ;;  %10728 = vst [vmem:[#allocation21_spill] sm:$0xff] %v7384_v9  ;;  %v7442_v36 = vrot.slane %v7433_v31, 1  ;;  %v997_v42 = vld [vmem:[#allocation6 + $0x1f0] sm:$0xff]  ;;  %v998_v43 = vld [vmem:[#allocation6 + $0x1f8] sm:$0xff]  ;;  %v447_v46 = vrot.slane %v7439_v35, 1  ;;  %v7500_v7 = vsel %vm392_vm1, %v360_v53, %v376_v54 }
  0x7f   : > { %531 = vst [vmem:[#allocation2 + $0xf8] sm:$0xff] %v7377_v4  ;;  %6301 = vmatprep.subr.bf16.mxu0 %v10641_v0  ;;  %701 = vst [vmem:[#allocation2 + $0xbf] sm:$0x1] %v669_v59  ;;  %v7454_v44 = vsel %vm457_vm0, %v7414_v21, %v446_v29  ;;  %v673_v47 = vrot.slane %v7439_v35, 6  ;;  %v7468_v49 = vld [vmem:[%s7270_s13 + $0x70] sm:$0xff]  ;;  %v7471_v52 = vld [vmem:[%s7270_s13 + $0x78] sm:$0xff] }
  0x80   : > { %532 = vst [vmem:[#allocation2 + $0x110] sm:$0xff] %v7384_v9  ;;  %10729 = vst [vmem:[#allocation22_spill] sm:$0xff] %v7405_v17  ;;  %6353 = vmatpush3.bf16.msra.mxu1 %v7310_v41  ;;  %v7448_v41 = vsel %vm392_vm1, %v359_v62, %v375_v11  ;;  %v7479_v56 = vsel %vm457_vm0, %v7442_v36, %v447_v46  ;;  %v480_v57 = vsel %vm457_vm0, %v447_v46, %v7442_v36  ;;  %v7490_v2 = vld [vmem:[#allocation6 + $0x200] sm:$0xff]  ;;  %v7492_v3 = vld [vmem:[#allocation6 + $0x208] sm:$0xff] }
  0x81   : > { %561 = vst [vmem:[#allocation2 + $0xd0] sm:$0xff] %v7397_v14  ;;  %562 = vst [vmem:[#allocation2 + $0xe8] sm:$0xff] %v477_v15  ;;  %6355 = vmatprep.subr.bf16.mxu1 %v7364_v63  ;;  %v7485_v59 = vrot.slane %v7468_v49, 1  ;;  %v448_v62 = vrot.slane %v7471_v52, 1  ;;  %v7512_v12 = vld [vmem:[%s7270_s13 + $0x80] sm:$0xff]  ;;  %v7515_v13 = vld [vmem:[%s7270_s13 + $0x88] sm:$0xff] }
  0x82   : > { %533 = vst [vmem:[#allocation2 + $0x128] sm:$0xff] %v7405_v17  ;;  %702 = vst [vmem:[#allocation2 + $0xef] sm:$0x1] %v670_v8  ;;  %6303 = vmatpush1.bf16.msra.mxu0 %v6302_v5  ;;  %v674_v5 = vrot.slane %v7471_v52, 6  ;;  %v361_v15 = vrot.slane %v7351_v58, 7  ;;  %v7520_v16 = vld [vmem:[#allocation6] sm:$0xff] }
  0x83   : > { %534 = vst [vmem:[#allocation2 + $0x140] sm:$0xff] %v7411_v20  ;;  %493 = vst [vmem:[#allocation2 + $0x60] sm:$0xff] %v410_v22  ;;  %6304 = vmatprep.subr.bf16.mxu0 %v10641_v0  ;;  %v7506_v8 = vsel %vm457_vm0, %v7485_v59, %v448_v62  ;;  %v481_v11 = vsel %vm457_vm0, %v448_v62, %v7485_v59  ;;  %v7526_v22 = vrot.slane %v7512_v12, 1  ;;  %v449_v24 = vrot.slane %v7515_v13, 1  ;;  %v7563_v53 = vld [vmem:[%s7270_s13 + $0xa0] sm:$0xff]  ;;  %v7570_v62 = vld [vmem:[#allocation6 + $0x18] sm:$0xff] }
  0x84   : > { %563 = vst [vmem:[#allocation2 + $0x100] sm:$0xff] %v7425_v27  ;;  %564 = vst [vmem:[#allocation2 + $0x118] sm:$0xff] %v478_v28  ;;  %6357 = vmatpush3.bf16.msra.mxu1 %v7364_v63  ;;  %v6308_v63 = vpack.c.bf16 %v998_v43, %v997_v42  ;;  %v675_v25 = vrot.slane %v7515_v13, 6  ;;  %v7533_v28 = vld [vmem:[%s7270_s13 + $0x90] sm:$0xff] }
  0x85   : > { %535 = vst [vmem:[#allocation2 + $0x158] sm:$0xff] %v7433_v31  ;;  %636 = vst [vmem:[#allocation2 + $0x60] sm:$0x1] %v7307_v40  ;;  %v479_v40 = vsel %vm457_vm0, %v446_v29, %v7414_v21  ;;  %6359 = vmatprep.subr.bf16.mxu1 %v7420_v23  ;;  %v7540_v29 = vld [vmem:[%s7270_s13 + $0x98] sm:$0xff]  ;;  %v7547_v42 = vld [vmem:[#allocation6 + $0x210] sm:$0xff]  ;;  %v7554_v43 = vsel %vm457_vm0, %v7526_v22, %v449_v24 }
  0x86   : > { %10730 = vst [vmem:[#allocation23_spill] sm:$0xff] %v7448_v41  ;;  %703 = vst [vmem:[#allocation2 + $0x11f] sm:$0x1] %v671_v18  ;;  %6306 = vmatpush1.bf16.msra.mxu0 %v6305_v33  ;;  %v7522_v18 = vld [vmem:[#allocation6 + $0x8] sm:$0xff]  ;;  %v7543_v33 = vrot.slane %v7533_v28, 1  ;;  %v450_v46 = vrot.slane %v7540_v29, 1 }
  0x87   : > { %536 = vst [vmem:[#allocation2 + $0x170] sm:$0xff] %v7439_v35  ;;  %494 = vst [vmem:[#allocation2 + $0x78] sm:$0xff] %v7448_v41  ;;  %6307 = vmatprep.subr.bf16.mxu0 %v10641_v0  ;;  %v6367_v54 = vpack.c.bf16 %v7522_v18, %v7520_v16  ;;  %v7703_v41 = vld [vmem:[%s7270_s13 + $0xf0] sm:$0xff] }
  0x88   : > { %565 = vst [vmem:[#allocation2 + $0x130] sm:$0xff] %v7454_v44  ;;  %566 = vst [vmem:[#allocation2 + $0x148] sm:$0xff] %v479_v40  ;;  %6361 = vmatpush3.bf16.msra.mxu1 %v7420_v23  ;;  %v6311_v23 = vpack.c.bf16 %v7492_v3, %v7490_v2  ;;  %v482_v40 = vsel %vm457_vm0, %v449_v24, %v7526_v22  ;;  %v7577_v2 = vrot.slane %v7563_v53, 1  ;;  %v7599_v24 = vld [vmem:[%s7270_s13 + $0xb0] sm:$0xff] }
  0x89   : > { %704 = vst [vmem:[#allocation2 + $0x14f] sm:$0x1] %v672_v34  ;;  %537 = vst [vmem:[#allocation2 + $0x188] sm:$0xff] %v7468_v49  ;;  %6363 = vmatprep.subr.bf16.mxu1 %v7464_v48  ;;  %v377_v34 = vrot.slane %v7356_v60, 7  ;;  %v483_v16 = vsel %vm457_vm0, %v450_v46, %v7543_v33  ;;  %v7659_v60 = vld [vmem:[%s7270_s13 + $0xd0] sm:$0xff] }
  0x8a   : > { %538 = vst [vmem:[#allocation2 + $0x1a0] sm:$0xff] %v7471_v52  ;;  %567 = vst [vmem:[#allocation2 + $0x160] sm:$0xff] %v7479_v56  ;;  %6309 = vmatpush1.bf16.msra.mxu0 %v6308_v63  ;;  %v7574_v63 = vld [vmem:[%s7270_s13 + $0xa8] sm:$0xff] }
  0x8b   : > { %568 = vst [vmem:[#allocation2 + $0x178] sm:$0xff] %v480_v57  ;;  %10731 = vst [vmem:[#allocation24_spill] sm:$0xff] %v7500_v7  ;;  %6310 = vmatprep.subr.bf16.mxu0 %v10641_v0  ;;  %v7568_v57 = vld [vmem:[#allocation6 + $0x10] sm:$0xff]  ;;  %v412_v3 = vsel %vm392_vm1, %v377_v34, %v361_v15  ;;  %v451_v18 = vrot.slane %v7574_v63, 1 }
  0x8c   : > { %705 = vst [vmem:[#allocation2 + $0x17f] sm:$0x1] %v673_v47  ;;  %495 = vst [vmem:[#allocation2 + $0x90] sm:$0xff] %v411_v6  ;;  %v676_v47 = vrot.slane %v7540_v29, 6  ;;  %6365 = vmatpush3.bf16.msra.mxu1 %v7464_v48  ;;  %v891_v6 = vld [vmem:[#allocation2 + $0x58] sm:$0xff] }
  0x8d   : > { %496 = vst [vmem:[#allocation2 + $0xa8] sm:$0xff] %v7500_v7  ;;  %569 = vst [vmem:[#allocation2 + $0x190] sm:$0xff] %v7506_v8  ;;  %v7602_v48 = vld [vmem:[%s7270_s13 + $0xb8] sm:$0xff]  ;;  %6366 = vmatprep.subr.bf16.mxu1 %v10641_v0  ;;  %v484_v38 = vsel %vm457_vm0, %v451_v18, %v7577_v2  ;;  %v7635_v0 = vld [vmem:[%s7270_s13 + $0xc8] sm:$0xff]  ;;  %v7669_v7 = vrot.slane %v7659_v60, 1 }
  0x8e   : > { %570 = vst [vmem:[#allocation2 + $0x1a8] sm:$0xff] %v481_v11  ;;  %539 = vst [vmem:[#allocation2 + $0x1b8] sm:$0xff] %v7512_v12  ;;  %v7590_v11 = vsel %vm457_vm0, %v7543_v33, %v450_v46  ;;  %v7614_v46 = vrot.slane %v7599_v24, 1  ;;  %v678_v32 = vrot.slane %v7602_v48, 6  ;;  %6312 = vmatpush1.bf16.msra.mxu0 %v6311_v23  ;;  %v7642_v23 = vld [vmem:[#allocation6 + $0x20] sm:$0xff] }
  0x8f   : > { %540 = vst [vmem:[#allocation2 + $0x1d0] sm:$0xff] %v7515_v13  ;;  %637 = vst [vmem:[#allocation2 + $0x90] sm:$0x1] %v7326_v51  ;;  %v7549_v51 = vld [vmem:[#allocation6 + $0x218] sm:$0xff]  ;;  %5839 = vmatmul.mubr.f32.vlgmr.msra.gmra.mrb[0].mxu1 %v891_v6  ;;  %v453_v6 = vrot.slane %v7635_v0, 1 }
  0x90   : > { %706 = vst [vmem:[#allocation2 + $0x1af] sm:$0x1] %v674_v5  ;;  %541 = vst [vmem:[#allocation2 + $0x1e8] sm:$0xff] %v7533_v28  ;;  %v7584_v5 = vsel %vm392_vm1, %v361_v15, %v377_v34  ;;  %v677_v15 = vrot.slane %v7574_v63, 6  ;;  %v7608_v34 = vld [vmem:[#allocation6 + $0x220] sm:$0xff]  ;;  %6368 = vmatpush1.bf16.msra.mxu1 %v6367_v54  ;;  %5841 = vmatprep.mubr.f32.mxu1 %v7343_v55  ;;  %v362_v54 = vrot.slane %v7377_v4, 7 }
  0x91   : > { %542 = vst [vmem:[#allocation2 + $0x200] sm:$0xff] %v7540_v29  ;;  %571 = vst [vmem:[#allocation2 + $0x1c0] sm:$0xff] %v7554_v43  ;;  %v378_v55 = vrot.slane %v7384_v9, 7  ;;  %v7687_v9 = vld [vmem:[%s7270_s13 + $0xe0] sm:$0xff]  ;;  %v7690_v4 = vld [vmem:[%s7270_s13 + $0xe8] sm:$0xff] }
  0x92   : > { %572 = vst [vmem:[#allocation2 + $0x1d8] sm:$0xff] %v482_v40  ;;  %543 = vst [vmem:[#allocation2 + $0x218] sm:$0xff] %v7563_v53  ;;  %v7610_v40 = vld [vmem:[#allocation6 + $0x228] sm:$0xff]  ;;  %v455_v50 = vrot.slane %v7690_v4, 1  ;;  %v681_v45 = vrot.slane %v7690_v4, 6 }
  0x93   : > { %10732 = vst [vmem:[#allocation25_spill] sm:$0xff] %v7584_v5  ;;  %707 = vst [vmem:[#allocation2 + $0x1df] sm:$0x1] %v675_v25  ;;  %v6314_v25 = vpack.c.bf16 %v7549_v51, %v7547_v42  ;;  %v7621_v42 = vld [vmem:[%s7270_s13 + $0xc0] sm:$0xff]  ;;  %v6370_v51 = vpack.c.bf16 %v7570_v62, %v7568_v57  ;;  %v6317_v58 = vpack.c.bf16 %v7610_v40, %v7608_v34 }
  0x94   : > { %10733 = vst [vmem:[#allocation26_spill] sm:$0xff] %v7590_v11  ;;  %544 = vst [vmem:[#allocation2 + $0x230] sm:$0xff] %v7574_v63 }
  0x95   : > { %497 = vst [vmem:[#allocation2 + $0xc0] sm:$0xff] %v412_v3  ;;  %498 = vst [vmem:[#allocation2 + $0xd8] sm:$0xff] %v7584_v5  ;;  %v452_v3 = vrot.slane %v7602_v48, 1  ;;  %v7638_v5 = vrot.slane %v7621_v42, 1 }
  0x96   : > { %573 = vst [vmem:[#allocation2 + $0x1f0] sm:$0xff] %v7590_v11  ;;  %574 = vst [vmem:[#allocation2 + $0x208] sm:$0xff] %v483_v16  ;;  %v7629_v16 = vsel %vm457_vm0, %v7577_v2, %v451_v18  ;;  %v679_v18 = vrot.slane %v7635_v0, 6 }
  0x97   : > { %545 = vst [vmem:[#allocation2 + $0x248] sm:$0xff] %v7599_v24  ;;  %546 = vst [vmem:[#allocation2 + $0x260] sm:$0xff] %v7602_v48  ;;  %v7650_v57 = vsel %vm457_vm0, %v7614_v46, %v452_v3  ;;  %v485_v62 = vsel %vm457_vm0, %v452_v3, %v7614_v46  ;;  %v7666_v3 = vld [vmem:[%s7270_s13 + $0xd8] sm:$0xff]  ;;  %v486_v34 = vsel %vm457_vm0, %v453_v6, %v7638_v5 }
  0x98   : > { %638 = vst [vmem:[#allocation2 + $0xc0] sm:$0x1] %v7359_v61  ;;  %708 = vst [vmem:[#allocation2 + $0x20f] sm:$0x1] %v676_v47  ;;  %v10735_v61 = vmov 0.0|0.0   ;;  %v7644_v47 = vld [vmem:[#allocation6 + $0x28] sm:$0xff] }
  0x99   : > { %10734 = vst [vmem:[#allocation27_spill] sm:$0xff] %v7629_v16  ;;  %547 = vst [vmem:[#allocation2 + $0x278] sm:$0xff] %v7621_v42  ;;  %6313 = vmatprep.subr.bf16.mxu0 %v10735_v61  ;;  %6369 = vmatprep.subr.bf16.mxu1 %v10735_v61  ;;  %v454_v40 = vrot.slane %v7666_v3, 1 }
  0x9a   : > { %575 = vst [vmem:[#allocation2 + $0x220] sm:$0xff] %v7629_v16  ;;  %576 = vst [vmem:[#allocation2 + $0x238] sm:$0xff] %v484_v38  ;;  %v897_v38 = vld [vmem:[#allocation2 + $0x88] sm:$0xff]  ;;  %6315 = vmatpush1.bf16.msra.mxu0 %v6314_v25  ;;  %v1005_v25 = vld [vmem:[#allocation6 + $0x230] sm:$0xff]  ;;  %6371 = vmatpush1.bf16.msra.mxu1 %v6370_v51 }
  0x9b   : > { %10736 = vst [vmem:[#allocation28_spill] sm:$0xff] %v7650_v57  ;;  %548 = vst [vmem:[#allocation2 + $0x290] sm:$0xff] %v7635_v0  ;;  %5842 = vmatmul.mubr.f32.gmra.mrb[2].mxu1 %v897_v38  ;;  %6316 = vmatprep.subr.bf16.mxu0 %v10735_v61  ;;  %v363_v38 = vrot.slane %v7405_v17, 7  ;;  %v845_v17 = vld [vmem:[#allocation6 + $0x38] sm:$0xff] }
  0x9c   : > { %709 = vst [vmem:[#allocation2 + $0x23f] sm:$0x1] %v677_v15  ;;  %577 = vst [vmem:[#allocation2 + $0x250] sm:$0xff] %v7650_v57  ;;  %v7678_v15 = vsel %vm457_vm0, %v7638_v5, %v453_v6  ;;  %v7696_v6 = vrot.slane %v7687_v9, 1  ;;  %v7718_v57 = vrot.slane %v7703_v41, 1  ;;  %5844 = vmatprep.mubr.f32.mxu1 %v7369_v1  ;;  %6372 = vmatprep.subr.bf16.mxu1 %v10735_v61  ;;  %v844_v1 = vld [vmem:[#allocation6 + $0x30] sm:$0xff] }
  0x9d   : > { %578 = vst [vmem:[#allocation2 + $0x268] sm:$0xff] %v485_v62  ;;  %549 = vst [vmem:[#allocation2 + $0x2a8] sm:$0xff] %v7659_v60  ;;  %v680_v62 = vrot.slane %v7666_v3, 6 }
  0x9e   : > { %710 = vst [vmem:[#allocation2 + $0x26f] sm:$0x1] %v678_v32  ;;  %10737 = vst [vmem:[#allocation29_spill] sm:$0xff] %v7678_v15  ;;  %v6373_v32 = vpack.c.bf16 %v7644_v47, %v7642_v23  ;;  %v1006_v23 = vld [vmem:[#allocation6 + $0x238] sm:$0xff]  ;;  %v7709_v47 = vsel %vm457_vm0, %v7669_v7, %v454_v40  ;;  %v488_v39 = vsel %vm457_vm0, %v455_v50, %v7696_v6  ;;  %6318 = vmatpush1.bf16.msra.mxu0 %v6317_v58  ;;  %v1007_v58 = vld [vmem:[#allocation6 + $0x240] sm:$0xff] }
  0x9f   : > { %550 = vst [vmem:[#allocation2 + $0x2c0] sm:$0xff] %v7666_v3  ;;  %579 = vst [vmem:[#allocation2 + $0x280] sm:$0xff] %v7678_v15  ;;  %v7715_v15 = vld [vmem:[%s7270_s13 + $0xf8] sm:$0xff]  ;;  %v6320_v37 = vpack.c.bf16 %v1006_v23, %v1005_v25  ;;  %6319 = vmatprep.subr.bf16.mxu0 %v10735_v61  ;;  %v6376_v25 = vpack.c.bf16 %v845_v17, %v844_v1  ;;  %v1009_v1 = vld [vmem:[#allocation6 + $0x250] sm:$0xff] }
  0xa0   : > { %580 = vst [vmem:[#allocation2 + $0x298] sm:$0xff] %v486_v34  ;;  %551 = vst [vmem:[#allocation2 + $0x2d8] sm:$0xff] %v7687_v9  ;;  %v487_v34 = vsel %vm457_vm0, %v454_v40, %v7669_v7  ;;  %v7727_v40 = vsel %vm457_vm0, %v7696_v6, %v455_v50  ;;  %v456_v16 = vrot.slane %v7715_v15, 1  ;;  %v682_v51 = vrot.slane %v7715_v15, 6  ;;  %6374 = vmatpush1.bf16.msra.mxu1 %v6373_v32 }
  0xa1   : > { %552 = vst [vmem:[#allocation2 + $0x2f0] sm:$0xff] %v7690_v4  ;;  %711 = vst [vmem:[#allocation2 + $0x29f] sm:$0x1] %v679_v18  ;;  %v903_v18 = vld [vmem:[#allocation2 + $0xb8] sm:$0xff]  ;;  %v7741_v50 = vsel %vm392_vm1, %v362_v54, %v378_v55  ;;  %6375 = vmatprep.subr.bf16.mxu1 %v10735_v61  ;;  %v366_v32 = vrot.slane %v7512_v12, 7 }
  0xa2   : > { %10738 = vst [vmem:[#allocation30_spill] sm:$0xff] %v7709_v47  ;;  %553 = vst [vmem:[#allocation2 + $0x308] sm:$0xff] %v7703_v41  ;;  %v7747_v11 = vsel %vm457_vm0, %v7718_v57, %v456_v16  ;;  %5845 = vmatmul.mubr.f32.gmra.mrb[4].mxu1 %v903_v18  ;;  %v365_v18 = vrot.slane %v7468_v49, 7  ;;  %6321 = vmatpush1.bf16.msra.mxu0 %v6320_v37  ;;  %v367_v37 = vrot.slane %v7533_v28, 7 }
  0xa3   : > { %581 = vst [vmem:[#allocation2 + $0x2b0] sm:$0xff] %v7709_v47  ;;  %582 = vst [vmem:[#allocation2 + $0x2c8] sm:$0xff] %v487_v34  ;;  %v413_v34 = vsel %vm392_vm1, %v378_v55, %v362_v54  ;;  %v379_v47 = vrot.slane %v7411_v20, 7  ;;  %v364_v54 = vrot.slane %v7433_v31, 7  ;;  %v1008_v55 = vld [vmem:[#allocation6 + $0x248] sm:$0xff]  ;;  %5847 = vmatprep.mubr.f32.mxu1 %v7397_v14  ;;  %6322 = vmatprep.subr.bf16.mxu0 %v10735_v61 }
  0xa4   : > { %554 = vst [vmem:[#allocation2 + $0x320] sm:$0xff] %v7715_v15  ;;  %712 = vst [vmem:[#allocation2 + $0x2cf] sm:$0x1] %v680_v62  ;;  %v909_v62 = vld [vmem:[#allocation2 + $0xe8] sm:$0xff]  ;;  %6377 = vmatpush1.bf16.msra.mxu1 %v6376_v25 }
  0xa5   : > { %583 = vst [vmem:[#allocation2 + $0x2e0] sm:$0xff] %v7727_v40  ;;  %584 = vst [vmem:[#allocation2 + $0x2f8] sm:$0xff] %v488_v39  ;;  %v489_v39 = vsel %vm457_vm0, %v456_v16, %v7718_v57  ;;  %v380_v16 = vrot.slane %v7439_v35, 7  ;;  %v7763_v23 = vsel %vm392_vm1, %v363_v38, %v379_v47  ;;  %6378 = vmatprep.subr.bf16.mxu1 %v10735_v61 }
  0xa6   : > { %713 = vst [vmem:[#allocation2 + $0x2ff] sm:$0x1] %v681_v45  ;;  %499 = vst [vmem:[#allocation2 + $0xf0] sm:$0xff] %v413_v34  ;;  %v414_v45 = vsel %vm392_vm1, %v379_v47, %v363_v38  ;;  %v846_v34 = vld [vmem:[#allocation6 + $0x40] sm:$0xff]  ;;  %v6323_v47 = vpack.c.bf16 %v1008_v55, %v1007_v58  ;;  %5848 = vmatmul.mubr.f32.gmra.mrb[6].mxu1 %v909_v62  ;;  %v383_v58 = vrot.slane %v7540_v29, 7  ;;  %v368_v55 = vrot.slane %v7563_v53, 7 }
  0xa7   : > { %500 = vst [vmem:[#allocation2 + $0x108] sm:$0xff] %v7741_v50  ;;  %585 = vst [vmem:[#allocation2 + $0x310] sm:$0xff] %v7747_v11  ;;  %v415_v14 = vsel %vm392_vm1, %v380_v16, %v364_v54  ;;  %v7774_v17 = vsel %vm392_vm1, %v364_v54, %v380_v16  ;;  %v1010_v54 = vld [vmem:[#allocation6 + $0x258] sm:$0xff]  ;;  %5850 = vmatprep.mubr.f32.mxu1 %v7425_v27 }
  0xa8   : > { %586 = vst [vmem:[#allocation2 + $0x328] sm:$0xff] %v489_v39  ;;  %639 = vst [vmem:[#allocation2 + $0xf0] sm:$0x1] %v7387_v10  ;;  %v381_v10 = vrot.slane %v7471_v52, 7  ;;  %v847_v39 = vld [vmem:[#allocation6 + $0x48] sm:$0xff]  ;;  %v418_v27 = vsel %vm392_vm1, %v383_v58, %v367_v37  ;;  %6324 = vmatpush1.bf16.msra.mxu0 %v6323_v47  ;;  %v6326_v25 = vpack.c.bf16 %v1010_v54, %v1009_v1  ;;  %v370_v47 = vrot.slane %v7621_v42, 7 }
  0xa9   : > { %714 = vst [vmem:[#allocation2 + $0x32f] sm:$0x1] %v682_v51  ;;  %501 = vst [vmem:[#allocation2 + $0x120] sm:$0xff] %v414_v45  ;;  %v382_v51 = vrot.slane %v7515_v13, 7  ;;  %v915_v45 = vld [vmem:[#allocation2 + $0x118] sm:$0xff]  ;;  %v6379_v16 = vpack.c.bf16 %v847_v39, %v846_v34  ;;  %6325 = vmatprep.subr.bf16.mxu0 %v10735_v61  ;;  %v386_v1 = vrot.slane %v7635_v0, 7 }
  0xaa   : > { %640 = vst [vmem:[#allocation2 + $0x120] sm:$0x1] %v7414_v21  ;;  %502 = vst [vmem:[#allocation2 + $0x138] sm:$0xff] %v7763_v23  ;;  %v416_v38 = vsel %vm392_vm1, %v381_v10, %v365_v18  ;;  %v7782_v21 = vsel %vm392_vm1, %v365_v18, %v381_v10  ;;  %v384_v18 = vrot.slane %v7574_v63, 7  ;;  %v848_v10 = vld [vmem:[#allocation6 + $0x50] sm:$0xff]  ;;  %5851 = vmatmul.mubr.f32.gmra.mrb[8].mxu1 %v915_v45  ;;  %v921_v54 = vld [vmem:[#allocation2 + $0x148] sm:$0xff] }
  0xab   : > { %503 = vst [vmem:[#allocation2 + $0x150] sm:$0xff] %v415_v14  ;;  %504 = vst [vmem:[#allocation2 + $0x168] sm:$0xff] %v7774_v17  ;;  %v417_v62 = vsel %vm392_vm1, %v382_v51, %v366_v32  ;;  %v849_v14 = vld [vmem:[#allocation6 + $0x58] sm:$0xff]  ;;  %6380 = vmatpush1.bf16.msra.mxu1 %v6379_v16  ;;  %5853 = vmatprep.mubr.f32.mxu1 %v7454_v44  ;;  %v851_v45 = vld [vmem:[#allocation6 + $0x68] sm:$0xff]  ;;  %v421_v44 = vsel %vm392_vm1, %v386_v1, %v370_v47 }
  0xac   : > { %641 = vst [vmem:[#allocation2 + $0x150] sm:$0x1] %v7442_v36  ;;  %505 = vst [vmem:[#allocation2 + $0x180] sm:$0xff] %v416_v38  ;;  %v7797_v36 = vsel %vm392_vm1, %v366_v32, %v382_v51  ;;  %v419_v34 = vsel %vm392_vm1, %v384_v18, %v368_v55  ;;  %v7812_v39 = vsel %vm392_vm1, %v368_v55, %v384_v18  ;;  %v369_v32 = vrot.slane %v7599_v24, 7  ;;  %v1011_v38 = vld [vmem:[#allocation6 + $0x260] sm:$0xff]  ;;  %v1012_v51 = vld [vmem:[#allocation6 + $0x268] sm:$0xff] }
  0xad   : > { %506 = vst [vmem:[#allocation2 + $0x198] sm:$0xff] %v7782_v21  ;;  %642 = vst [vmem:[#allocation2 + $0x180] sm:$0x1] %v7485_v59  ;;  %v7805_v59 = vsel %vm392_vm1, %v367_v37, %v383_v58  ;;  %v6382_v37 = vpack.c.bf16 %v849_v14, %v848_v10  ;;  %v371_v58 = vrot.slane %v7659_v60, 7  ;;  %v387_v55 = vrot.slane %v7666_v3, 7  ;;  %6381 = vmatprep.subr.bf16.mxu1 %v10735_v61 }
  0xae   : > { %507 = vst [vmem:[#allocation2 + $0x1b0] sm:$0xff] %v417_v62  ;;  %509 = vst [vmem:[#allocation2 + $0x1e0] sm:$0xff] %v418_v27  ;;  %6327 = vmatpush1.bf16.msra.mxu0 %v6326_v25  ;;  %v6329_v18 = vpack.c.bf16 %v1012_v51, %v1011_v38  ;;  %v7836_v10 = vsel %vm392_vm1, %v370_v47, %v386_v1  ;;  %5854 = vmatmul.mubr.f32.gmra.mrb[10].mxu1 %v921_v54  ;;  %v388_v25 = vrot.slane %v7690_v4, 7  ;;  %v870_v1 = vld [vmem:[#allocation6 + $0x100] sm:$0xff]  ;;  %v871_v54 = vld [vmem:[#allocation6 + $0x108] sm:$0xff] }
  0xaf   : > { %643 = vst [vmem:[#allocation2 + $0x1b0] sm:$0x1] %v7526_v22  ;;  %644 = vst [vmem:[#allocation2 + $0x1e0] sm:$0x1] %v7543_v33  ;;  %v385_v22 = vrot.slane %v7602_v48, 7  ;;  %v850_v33 = vld [vmem:[#allocation6 + $0x60] sm:$0xff]  ;;  %v422_v14 = vsel %vm392_vm1, %v387_v55, %v371_v58  ;;  %v7842_v27 = vsel %vm392_vm1, %v371_v58, %v387_v55  ;;  %6328 = vmatprep.subr.bf16.mxu0 %v10735_v61  ;;  %6383 = vmatpush1.bf16.msra.mxu1 %v6382_v37 }
  0xb0   : > { %511 = vst [vmem:[#allocation2 + $0x210] sm:$0xff] %v419_v34  ;;  %515 = vst [vmem:[#allocation2 + $0x270] sm:$0xff] %v421_v44  ;;  %v1013_v34 = vld [vmem:[#allocation6 + $0x270] sm:$0xff]  ;;  %v373_v38 = vrot.slane %v7703_v41, 7  ;;  %v389_v51 = vrot.slane %v7715_v15, 7  ;;  %5856 = vmatprep.mubr.f32.mxu1 %v7479_v56  ;;  %v6385_v47 = vpack.c.bf16 %v851_v45, %v850_v33  ;;  %6384 = vmatprep.subr.bf16.mxu1 %v10735_v61  ;;  %v933_v45 = vld [vmem:[#allocation2 + $0x1a8] sm:$0xff] }
  0xb1   : > { %645 = vst [vmem:[#allocation2 + $0x210] sm:$0x1] %v7577_v2  ;;  %v420_v62 = vsel %vm392_vm1, %v385_v22, %v369_v32  ;;  %v7829_v16 = vsel %vm392_vm1, %v369_v32, %v385_v22  ;;  %v372_v2 = vrot.slane %v7687_v9, 7  ;;  %v1014_v32 = vld [vmem:[#allocation6 + $0x278] sm:$0xff]  ;;  %647 = vst [vmem:[#allocation2 + $0x270] sm:$0x1] %v7638_v5 }
  0xb2   : > { %513 = vst [vmem:[#allocation2 + $0x240] sm:$0xff] %v420_v62  ;;  %517 = vst [vmem:[#allocation2 + $0x2a0] sm:$0xff] %v422_v14  ;;  %v927_v22 = vld [vmem:[#allocation2 + $0x178] sm:$0xff]  ;;  %6330 = vmatpush1.bf16.msra.mxu0 %v6329_v18  ;;  %v6332_v37 = vpack.c.bf16 %v1014_v32, %v1013_v34  ;;  %v424_v56 = vsel %vm392_vm1, %v389_v51, %v373_v38  ;;  %v7866_v33 = vsel %vm392_vm1, %v373_v38, %v389_v51  ;;  %v872_v44 = vld [vmem:[#allocation6 + $0x110] sm:$0xff] }
  0xb3   : > { %646 = vst [vmem:[#allocation2 + $0x240] sm:$0x1] %v7614_v46  ;;  %648 = vst [vmem:[#allocation2 + $0x2a0] sm:$0x1] %v7669_v7  ;;  %v852_v46 = vld [vmem:[#allocation6 + $0x70] sm:$0xff]  ;;  %v853_v5 = vld [vmem:[#allocation6 + $0x78] sm:$0xff]  ;;  %v423_v58 = vsel %vm392_vm1, %v388_v25, %v372_v2  ;;  %v7857_v55 = vsel %vm392_vm1, %v372_v2, %v388_v25  ;;  %5857 = vmatmul.mubr.f32.gmra.mrb[12].mxu1 %v927_v22  ;;  %6331 = vmatprep.subr.bf16.mxu0 %v10735_v61 }
  0xb4   : > { %519 = vst [vmem:[#allocation2 + $0x2d0] sm:$0xff] %v423_v58  ;;  %520 = vst [vmem:[#allocation2 + $0x2e8] sm:$0xff] %v7857_v55  ;;  %v6414_v7 = vpack.c.bf16 %v871_v54, %v870_v1  ;;  %6386 = vmatpush1.bf16.msra.mxu1 %v6385_v47  ;;  %5859 = vmatprep.mubr.f32.mxu1 %v7506_v8  ;;  %v6388_v62 = vpack.c.bf16 %v853_v5, %v852_v46  ;;  %v873_v2 = vld [vmem:[#allocation6 + $0x118] sm:$0xff]  ;;  %v854_v18 = vld [vmem:[#allocation6 + $0x80] sm:$0xff]  ;;  %v10740_v22 = vrot.slane %v7290_v30, 7 }
  0xb5   : > { %649 = vst [vmem:[#allocation2 + $0x2d0] sm:$0x1] %v7696_v6  ;;  %521 = vst [vmem:[#allocation2 + $0x300] sm:$0xff] %v424_v56  ;;  %6387 = vmatprep.subr.bf16.mxu1 %v10735_v61  ;;  %v855_v14 = vld [vmem:[#allocation6 + $0x88] sm:$0xff]  ;;  %v7871_v6 = vld [vmem:[#allocation2 + $0x30] sm:$0xff]  ;;  %v6418_v34 = vpack.c.bf16 %v873_v2, %v872_v44  ;;  %v10741_v47 = vrot.slane %v7286_v26, 7 }
  0xb6   : > { %10739 = vst [vmem:[#allocation31_spill] sm:$0xff] %v7866_v33  ;;  %650 = vst [vmem:[#allocation2 + $0x300] sm:$0x1] %v7718_v57  ;;  %6333 = vmatpush1.bf16.msra.mxu0 %v6332_v37  ;;  %v939_v8 = vld [vmem:[#allocation2 + $0x1d8] sm:$0xff]  ;;  %v6391_v32 = vpack.c.bf16 %v855_v14, %v854_v18  ;;  %v874_v25 = vld [vmem:[#allocation6 + $0x120] sm:$0xff] }
  0xb7   : > { %5860 = vmatmul.mubr.f32.gmra.mrb[14].mxu1 %v933_v45  ;;  %6415 = vmatprep.subr.bf16.mxu0 %v6414_v7  ;;  %v875_v38 = vld [vmem:[#allocation6 + $0x128] sm:$0xff]  ;;  %v856_v57 = vld [vmem:[#allocation6 + $0x90] sm:$0xff]  ;;  %v857_v51 = vld [vmem:[#allocation6 + $0x98] sm:$0xff]  ;;  %v7883_v1 = vsel %vm392_vm1, %v10741_v47, %v10740_v22 }
  0xb8   : > { %6389 = vmatpush1.bf16.msra.mxu1 %v6388_v62  ;;  %5862 = vmatprep.mubr.f32.mxu1 %v7554_v43  ;;  %v6422_v43 = vpack.c.bf16 %v875_v38, %v874_v25  ;;  %v10742_v54 = vld [vmem:[#allocation26_spill] sm:$0xff]  ;;  %v6394_v5 = vpack.c.bf16 %v857_v51, %v856_v57  ;;  %v876_v58 = vld [vmem:[#allocation6 + $0x130] sm:$0xff]  ;;  %v877_v37 = vld [vmem:[#allocation6 + $0x138] sm:$0xff] }
  0xb9   : > { %1096 = vmatmul.mubr.f32.vlgmr.msra.gmra.mrb[0].mxu0 %v7871_v6  ;;  %6390 = vmatprep.subr.bf16.mxu1 %v10735_v61  ;;  %v945_v46 = vld [vmem:[#allocation2 + $0x208] sm:$0xff]  ;;  %v858_v26 = vld [vmem:[#allocation6 + $0xa0] sm:$0xff]  ;;  %v10744_v62 = vld [vmem:[#allocation27_spill] sm:$0xff] }
  0xba   : > { %1100 = vmatprep.mubr.f32.mxu0 %v7290_v30  ;;  %6417 = vmatpush3.bf16.msra.mxu0 %v6414_v7  ;;  %v859_v30 = vld [vmem:[#allocation6 + $0xa8] sm:$0xff]  ;;  %v7889_v45 = vld [vmem:[#allocation2 + $0x60] sm:$0xff]  ;;  %v6426_v7 = vpack.c.bf16 %v877_v37, %v876_v58  ;;  %v951_v44 = vld [vmem:[#allocation2 + $0x238] sm:$0xff] }
  0xbb   : > { %5863 = vmatmul.mubr.f32.gmra.mrb[16].mxu1 %v939_v8  ;;  %6419 = vmatprep.subr.bf16.mxu0 %v6418_v34  ;;  %v10743_v56 = vld [vmem:[#allocation14_spill] sm:$0xff]  ;;  %v6397_v2 = vpack.c.bf16 %v859_v30, %v858_v26  ;;  %v878_v18 = vld [vmem:[#allocation6 + $0x140] sm:$0xff]  ;;  %v860_v8 = vld [vmem:[#allocation6 + $0xb0] sm:$0xff] }
  0xbc   : > { %6392 = vmatpush1.bf16.msra.mxu1 %v6391_v32  ;;  %5865 = vmatprep.mubr.f32.mxu1 %v10742_v54  ;;  %v879_v14 = vld [vmem:[#allocation6 + $0x148] sm:$0xff]  ;;  %v861_v32 = vld [vmem:[#allocation6 + $0xb8] sm:$0xff]  ;;  %v10745_v25 = vld [vmem:[#allocation15_spill] sm:$0xff] }
  0xbd   : > { %1101 = vmatmul.mubr.f32.gmra.mrb[2].mxu0 %v7883_v1  ;;  %6393 = vmatprep.subr.bf16.mxu1 %v10735_v61  ;;  %v10746_v38 = vld [vmem:[#allocation28_spill] sm:$0xff]  ;;  %v957_v57 = vld [vmem:[#allocation2 + $0x268] sm:$0xff]  ;;  %v6400_v51 = vpack.c.bf16 %v861_v32, %v860_v8  ;;  %v880_v22 = vld [vmem:[#allocation6 + $0x150] sm:$0xff] }
  0xbe   : > { %1105 = vmatprep.mubr.f32.mxu0 %v10743_v56  ;;  %6421 = vmatpush3.bf16.msra.mxu0 %v6418_v34  ;;  %v6430_v34 = vpack.c.bf16 %v879_v14, %v878_v18  ;;  %v881_v47 = vld [vmem:[#allocation6 + $0x158] sm:$0xff]  ;;  %v10747_v54 = vld [vmem:[#allocation23_spill] sm:$0xff]  ;;  %v10749_v26 = vld [vmem:[#allocation29_spill] sm:$0xff] }
  0xbf   : > { %5866 = vmatmul.mubr.f32.gmra.mrb[18].mxu1 %v945_v46  ;;  %6423 = vmatprep.subr.bf16.mxu0 %v6422_v43  ;;  %v862_v46 = vld [vmem:[#allocation6 + $0xc0] sm:$0xff]  ;;  %v10748_v58 = vld [vmem:[#allocation16_spill] sm:$0xff]  ;;  %v7899_v37 = vld [vmem:[#allocation2 + $0x90] sm:$0xff] }
  0xc0   : > { %6395 = vmatpush1.bf16.msra.mxu1 %v6394_v5  ;;  %5868 = vmatprep.mubr.f32.mxu1 %v10744_v62  ;;  %v863_v5 = vld [vmem:[#allocation6 + $0xc8] sm:$0xff]  ;;  %v963_v30 = vld [vmem:[#allocation2 + $0x298] sm:$0xff]  ;;  %v882_v62 = vld [vmem:[#allocation6 + $0x160] sm:$0xff] }
  0xc1   : > { %1106 = vmatmul.mubr.f32.gmra.mrb[4].mxu0 %v7889_v45  ;;  %6396 = vmatprep.subr.bf16.mxu1 %v10735_v61  ;;  %v6403_v56 = vpack.c.bf16 %v863_v5, %v862_v46  ;;  %v865_v18 = vld [vmem:[#allocation6 + $0xd8] sm:$0xff]  ;;  %v10750_v14 = vld [vmem:[#allocation17_spill] sm:$0xff]  ;;  %v10751_v8 = vld [vmem:[#allocation30_spill] sm:$0xff] }
  0xc2   : > { %1110 = vmatprep.mubr.f32.mxu0 %v10745_v25  ;;  %6425 = vmatpush3.bf16.msra.mxu0 %v6422_v43  ;;  %v6434_v43 = vpack.c.bf16 %v881_v47, %v880_v22  ;;  %v969_v32 = vld [vmem:[#allocation2 + $0x2c8] sm:$0xff]  ;;  %v866_v22 = vld [vmem:[#allocation6 + $0xe0] sm:$0xff] }
  0xc3   : > { %5869 = vmatmul.mubr.f32.gmra.mrb[20].mxu1 %v951_v44  ;;  %6427 = vmatprep.subr.bf16.mxu0 %v6426_v7  ;;  %v883_v44 = vld [vmem:[#allocation6 + $0x168] sm:$0xff]  ;;  %v7909_v5 = vld [vmem:[#allocation2 + $0xc0] sm:$0xff] }
  0xc4   : > { %6398 = vmatpush1.bf16.msra.mxu1 %v6397_v2  ;;  %5871 = vmatprep.mubr.f32.mxu1 %v10746_v38  ;;  %v864_v2 = vld [vmem:[#allocation6 + $0xd0] sm:$0xff]  ;;  %v867_v47 = vld [vmem:[#allocation6 + $0xe8] sm:$0xff] }
  0xc5   : > { %1111 = vmatmul.mubr.f32.gmra.mrb[6].mxu0 %v10747_v54  ;;  %6399 = vmatprep.subr.bf16.mxu1 %v10735_v61  ;;  %v6406_v25 = vpack.c.bf16 %v865_v18, %v864_v2  ;;  %v884_v38 = vld [vmem:[#allocation6 + $0x170] sm:$0xff]  ;;  %v10753_v46 = vld [vmem:[#allocation18_spill] sm:$0xff]  ;;  %v10755_v2 = vld [vmem:[#allocation25_spill] sm:$0xff] }
  0xc6   : > { %1115 = vmatprep.mubr.f32.mxu0 %v10748_v58  ;;  %6429 = vmatpush3.bf16.msra.mxu0 %v6426_v7  ;;  %v6438_v7 = vpack.c.bf16 %v883_v44, %v882_v62  ;;  %v975_v58 = vld [vmem:[#allocation2 + $0x2f8] sm:$0xff]  ;;  %v10754_v62 = vld [vmem:[#allocation19_spill] sm:$0xff]  ;;  %v2029_v18 = vld [vmem:[#allocation6 + $0x308] sm:$0xff] }
  0xc7   : > { %5872 = vmatmul.mubr.f32.gmra.mrb[22].mxu1 %v957_v57  ;;  %6431 = vmatprep.subr.bf16.mxu0 %v6430_v34  ;;  %v885_v57 = vld [vmem:[#allocation6 + $0x178] sm:$0xff] }
  0xc8   : > { %6401 = vmatpush1.bf16.msra.mxu1 %v6400_v51  ;;  %5874 = vmatprep.mubr.f32.mxu1 %v10749_v26  ;;  %v10752_v51 = vld [vmem:[#allocation24_spill] sm:$0xff]  ;;  %v6409_v26 = vpack.c.bf16 %v867_v47, %v866_v22  ;;  %v10757_v47 = vld [vmem:[#allocation21_spill] sm:$0xff] }
  0xc9   : > { %1116 = vmatmul.mubr.f32.gmra.mrb[8].mxu0 %v7899_v37  ;;  %6402 = vmatprep.subr.bf16.mxu1 %v10735_v61  ;;  %v2031_v22 = vld [vmem:[#allocation6 + $0x318] sm:$0xff] }
  0xca   : > { %1120 = vmatprep.mubr.f32.mxu0 %v10750_v14  ;;  %6433 = vmatpush3.bf16.msra.mxu0 %v6430_v34  ;;  %v6442_v34 = vpack.c.bf16 %v885_v57, %v884_v38  ;;  %v10756_v14 = vld [vmem:[#allocation20_spill] sm:$0xff]  ;;  %v2030_v57 = vld [vmem:[#allocation6 + $0x310] sm:$0xff] }
  0xcb   : > { %5875 = vmatmul.mubr.f32.gmra.mrb[24].mxu1 %v963_v30  ;;  %6435 = vmatprep.subr.bf16.mxu0 %v6434_v43  ;;  %v868_v30 = vld [vmem:[#allocation6 + $0xf0] sm:$0xff] }
  0xcc   : > { %6404 = vmatpush1.bf16.msra.mxu1 %v6403_v56  ;;  %5877 = vmatprep.mubr.f32.mxu1 %v10751_v8  ;;  %v869_v56 = vld [vmem:[#allocation6 + $0xf8] sm:$0xff]  ;;  %v7919_v8 = vld [vmem:[#allocation2 + $0xf0] sm:$0xff] }
  0xcd   : > { %1121 = vmatmul.mubr.f32.gmra.mrb[10].mxu0 %v10752_v51  ;;  %6405 = vmatprep.subr.bf16.mxu1 %v10735_v61  ;;  %v6412_v44 = vpack.c.bf16 %v869_v56, %v868_v30  ;;  %v10758_v30 = vld [vmem:[#allocation22_spill] sm:$0xff]  ;;  %v7931_v56 = vld [vmem:[#allocation2 + $0x120] sm:$0xff] }
  0xce   : > { %1125 = vmatprep.mubr.f32.mxu0 %v10753_v46  ;;  %6437 = vmatpush3.bf16.msra.mxu0 %v6434_v43  ;;  %v981_v43 = vld [vmem:[#allocation2 + $0x328] sm:$0xff]  ;;  %v6843_v46 = vld [vmem:[#allocation2 + $0x80] sm:$0xff] }
  0xcf   : > { %5878 = vmatmul.mubr.f32.gmra.mrb[26].mxu1 %v969_v32  ;;  %6439 = vmatprep.subr.bf16.mxu0 %v6438_v7  ;;  %v2061_v32 = vld [vmem:[#allocation6 + $0x408] sm:$0xff] }
  0xd0   : > { %6407 = vmatpush1.bf16.msra.mxu1 %v6406_v25  ;;  %5880 = vmatprep.mubr.f32.mxu1 %v7727_v40  ;;  %v2028_v40 = vld [vmem:[#allocation6 + $0x300] sm:$0xff]  ;;  %v6842_v25 = vld [vmem:[#allocation2 + $0x68] sm:$0xff] }
  0xd1   : > { %1126 = vmatmul.mubr.f32.gmra.mrb[12].mxu0 %v7909_v5  ;;  %6408 = vmatprep.subr.bf16.mxu1 %v10735_v61 }
  0xd2   : > { %1130 = vmatprep.mubr.f32.mxu0 %v10754_v62  ;;  %6441 = vmatpush3.bf16.msra.mxu0 %v6438_v7  ;;  %v2060_v7 = vld [vmem:[#allocation6 + $0x400] sm:$0xff] }
  0xd3   : > { %5881 = vmatmul.mubr.f32.gmra.mrb[28].mxu1 %v975_v58  ;;  %6443 = vmatprep.subr.bf16.mxu0 %v6442_v34  ;;  %v7921_v38 = vpack.c.bf16 %v2061_v32, %v2060_v7  ;;  %v2032_v58 = vld [vmem:[#allocation6 + $0x320] sm:$0xff]  ;;  %v2037_v32 = vld [vmem:[#allocation6 + $0x348] sm:$0xff] }
  0xd4   : > { %6410 = vmatpush1.bf16.msra.mxu1 %v6409_v26  ;;  %5883 = vmatprep.mubr.f32.mxu1 %v7747_v11  ;;  %v6447_v11 = vpack.c.bf16 %v2029_v18, %v2028_v40  ;;  %v2033_v26 = vld [vmem:[#allocation6 + $0x328] sm:$0xff]  ;;  %v6844_v62 = vld [vmem:[%s7270_s13] sm:$0xff]  ;;  %v2035_v40 = vld [vmem:[#allocation6 + $0x338] sm:$0xff] }
  0xd5   : > { %1131 = vmatmul.mubr.f32.gmra.mrb[14].mxu0 %v10755_v2  ;;  %6411 = vmatprep.subr.bf16.mxu1 %v10735_v61  ;;  %v6845_v18 = vld [vmem:[%s7270_s13 + $0x8] sm:$0xff]  ;;  %v2036_v7 = vld [vmem:[#allocation6 + $0x340] sm:$0xff] }
  0xd6   : > { %1135 = vmatprep.mubr.f32.mxu0 %v10756_v14  ;;  %6445 = vmatpush3.bf16.msra.mxu0 %v6442_v34  ;;  %v6450_v34 = vpack.c.bf16 %v2031_v22, %v2030_v57  ;;  %v2039_v57 = vld [vmem:[#allocation6 + $0x358] sm:$0xff]  ;;  %v7953_v22 = vld [vmem:[#allocation2 + $0x180] sm:$0xff] }
  0xd7   : > { %5884 = vmatmul.mubr.f32.gmra.mrb[30].mxu1 %v981_v43  ;;  %6495 = vmatprep.subr.bf16.mxu0 %v7921_v38  ;;  %v6453_v43 = vpack.c.bf16 %v2033_v26, %v2032_v58  ;;  %v2045_v58 = vld [vmem:[#allocation6 + $0x388] sm:$0xff]  ;;  %v7963_v26 = vld [vmem:[#allocation2 + $0x1b0] sm:$0xff] }
  0xd8   : > { %6413 = vmatpush1.bf16.msra.mxu1 %v6412_v44  ;;  %1545 = vmatprep.mubr.f32.mxu1 %v6842_v25  ;;  %v2034_v44 = vld [vmem:[#allocation6 + $0x330] sm:$0xff] }
  0xd9   : > { %1136 = vmatmul.mubr.f32.gmra.mrb[16].mxu0 %v7919_v8  ;;  %6446 = vmatprep.subr.bf16.mxu1 %v10735_v61  ;;  %v6456_v14 = vpack.c.bf16 %v2035_v40, %v2034_v44  ;;  %v2049_v44 = vld [vmem:[#allocation6 + $0x3a8] sm:$0xff]  ;;  %v7973_v40 = vld [vmem:[#allocation2 + $0x1e0] sm:$0xff] }
  0xda   : > { %1140 = vmatprep.mubr.f32.mxu0 %v10757_v47  ;;  %v6846_v47 = vld [vmem:[#allocation2 + $0x98] sm:$0xff] }
  0xdb   : > { %1546 = vmatmul.mubr.f32.vlgmr.msra.gmra.mrb[32].mxu1 %v7889_v45 }
  0xdc   : > { %6448 = vmatpush1.bf16.msra.mxu1 %v6447_v11  ;;  %1550 = vmatprep.mubr.f32.mxu1 %v6843_v46  ;;  %v7943_v11 = vld [vmem:[#allocation2 + $0x150] sm:$0xff] }
  0xdd   : > { %1141 = vmatmul.mubr.f32.gmra.mrb[18].mxu0 %v7741_v50  ;;  %6449 = vmatprep.subr.bf16.mxu1 %v10735_v61 }
  0xde   : > { %1145 = vmatprep.mubr.f32.mxu0 %v10758_v30  ;;  %v6848_v30 = vld [vmem:[#allocation2 + $0xc8] sm:$0xff] }
  0xdf   : > { %1551 = vmatmul.mubr.f32.gmra.mrb[34].mxu1 %v10747_v54 }
  0xe0   : > { %1555 = vmatprep.mubr.f32.mxu1 %v6844_v62  ;;  %6451 = vmatpush1.bf16.msra.mxu1 %v6450_v34  ;;  %v6847_v34 = vld [vmem:[#allocation2 + $0xb0] sm:$0xff]  ;;  %v2047_v62 = vld [vmem:[#allocation6 + $0x398] sm:$0xff] }
  0xe1   : > { %1146 = vmatmul.mubr.f32.gmra.mrb[20].mxu0 %v7931_v56  ;;  %6452 = vmatprep.subr.bf16.mxu1 %v10735_v61 }
  0xe2   : > { %1150 = vmatprep.mubr.f32.mxu0 %v7411_v20  ;;  %v6459_v20 = vpack.c.bf16 %v2037_v32, %v2036_v7  ;;  %v6851_v7 = vld [vmem:[#allocation2 + $0x110] sm:$0xff]  ;;  %v2053_v32 = vld [vmem:[#allocation6 + $0x3c8] sm:$0xff] }
  0xe3   : > { %1556 = vmatmul.mubr.f32.gmra.mrb[36].mxu1 %v7871_v6  ;;  %v2038_v6 = vld [vmem:[#allocation6 + $0x350] sm:$0xff] }
  0xe4   : > { %1560 = vmatprep.mubr.f32.mxu1 %v6845_v18  ;;  %6454 = vmatpush1.bf16.msra.mxu1 %v6453_v43  ;;  %v6849_v43 = vld [vmem:[#allocation2 + $0xe0] sm:$0xff]  ;;  %v6850_v18 = vld [vmem:[#allocation2 + $0xf8] sm:$0xff] }
  0xe5   : > { %1151 = vmatmul.mubr.f32.gmra.mrb[22].mxu0 %v7763_v23  ;;  %6455 = vmatprep.subr.bf16.mxu1 %v10735_v61 }
  0xe6   : > { %1155 = vmatprep.mubr.f32.mxu0 %v7433_v31  ;;  %v6462_v31 = vpack.c.bf16 %v2039_v57, %v2038_v6  ;;  %v6852_v6 = vld [vmem:[#allocation2 + $0x128] sm:$0xff]  ;;  %v2054_v57 = vld [vmem:[#allocation6 + $0x3d0] sm:$0xff] }
  0xe7   : > { %1561 = vmatmul.mubr.f32.gmra.mrb[38].mxu1 %v7883_v1  ;;  %v2040_v1 = vld [vmem:[#allocation6 + $0x360] sm:$0xff] }
  0xe8   : > { %1565 = vmatprep.mubr.f32.mxu1 %v6842_v25  ;;  %6457 = vmatpush1.bf16.msra.mxu1 %v6456_v14  ;;  %v2041_v25 = vld [vmem:[#allocation6 + $0x368] sm:$0xff]  ;;  %v2051_v14 = vld [vmem:[#allocation6 + $0x3b8] sm:$0xff] }
  0xe9   : > { %1156 = vmatmul.mubr.f32.gmra.mrb[24].mxu0 %v7943_v11  ;;  %6458 = vmatprep.subr.bf16.mxu1 %v10735_v61 }
  0xea   : > { %1160 = vmatprep.mubr.f32.mxu0 %v7439_v35  ;;  %v6465_v35 = vpack.c.bf16 %v2041_v25, %v2040_v1  ;;  %v2057_v1 = vld [vmem:[#allocation6 + $0x3e8] sm:$0xff]  ;;  %v7996_v25 = vld [vmem:[#allocation2 + $0x240] sm:$0xff] }
  0xeb   : > { %1566 = vmatmul.mubr.f32.gmra.mrb[40].mxu1 %v7889_v45  ;;  %v2042_v45 = vld [vmem:[#allocation6 + $0x370] sm:$0xff] }
  0xec   : > { %1570 = vmatprep.mubr.f32.mxu1 %v6843_v46  ;;  %6460 = vmatpush1.bf16.msra.mxu1 %v6459_v20  ;;  %v2043_v46 = vld [vmem:[#allocation6 + $0x378] sm:$0xff]  ;;  %v7983_v20 = vld [vmem:[#allocation2 + $0x210] sm:$0xff] }
  0xed   : > { %1161 = vmatmul.mubr.f32.gmra.mrb[26].mxu0 %v7774_v17  ;;  %6461 = vmatprep.subr.bf16.mxu1 %v10735_v61 }
  0xee   : > { %1165 = vmatprep.mubr.f32.mxu0 %v7468_v49  ;;  %v6468_v49 = vpack.c.bf16 %v2043_v46, %v2042_v45  ;;  %v2059_v45 = vld [vmem:[#allocation6 + $0x3f8] sm:$0xff]  ;;  %v6854_v46 = vld [vmem:[#allocation2 + $0x188] sm:$0xff] }
  0xef   : > { %1571 = vmatmul.mubr.f32.gmra.mrb[42].mxu1 %v10747_v54  ;;  %v2044_v54 = vld [vmem:[#allocation6 + $0x380] sm:$0xff] }
  0xf0   : > { %1575 = vmatprep.mubr.f32.mxu1 %v6846_v47  ;;  %6463 = vmatpush1.bf16.msra.mxu1 %v6462_v31  ;;  %v2055_v31 = vld [vmem:[#allocation6 + $0x3d8] sm:$0xff] }
  0xf1   : > { %1166 = vmatmul.mubr.f32.gmra.mrb[28].mxu0 %v7953_v22  ;;  %6464 = vmatprep.subr.bf16.mxu1 %v10735_v61  ;;  %v6853_v47 = vld [vmem:[#allocation2 + $0x158] sm:$0xff] }
  0xf2   : > { %1170 = vmatprep.mubr.f32.mxu0 %v7471_v52  ;;  %v6471_v52 = vpack.c.bf16 %v2045_v58, %v2044_v54  ;;  %v8057_v54 = vld [vmem:[#allocation2 + $0x88] sm:$0xff]  ;;  %v750_v58 = vld [vmem:[#allocation2 + $0x40] sm:$0xff] }
  0xf3   : > { %1576 = vmatmul.mubr.f32.gmra.mrb[44].mxu1 %v7899_v37  ;;  %v2046_v37 = vld [vmem:[#allocation6 + $0x390] sm:$0xff] }
  0xf4   : > { %1580 = vmatprep.mubr.f32.mxu1 %v6847_v34  ;;  %6466 = vmatpush1.bf16.msra.mxu1 %v6465_v35  ;;  %v2058_v35 = vld [vmem:[#allocation6 + $0x3f0] sm:$0xff] }
  0xf5   : > { %1171 = vmatmul.mubr.f32.gmra.mrb[30].mxu0 %v7782_v21  ;;  %6467 = vmatprep.subr.bf16.mxu1 %v10735_v61  ;;  %v2062_v34 = vld [vmem:[#allocation6 + $0x410] sm:$0xff] }
  0xf6   : > { %1175 = vmatprep.mubr.f32.mxu0 %v7512_v12  ;;  %v6474_v12 = vpack.c.bf16 %v2047_v62, %v2046_v37  ;;  %v8062_v37 = vld [vmem:[#allocation2 + $0x260] sm:$0xff]  ;;  %v753_v62 = vld [vmem:[#allocation2 + $0x58] sm:$0xff] }
  0xf7   : > { %1581 = vmatmul.mubr.f32.gmra.mrb[46].mxu1 %v10752_v51  ;;  %v2048_v51 = vld [vmem:[#allocation6 + $0x3a0] sm:$0xff] }
  0xf8   : > { %1585 = vmatprep.mubr.f32.mxu1 %v6848_v30  ;;  %6469 = vmatpush1.bf16.msra.mxu1 %v6468_v49  ;;  %v8054_v49 = vld [vmem:[#allocation2 + $0x248] sm:$0xff]  ;;  %v2064_v30 = vld [vmem:[#allocation6 + $0x420] sm:$0xff] }
  0xf9   : > { %1176 = vmatmul.mubr.f32.gmra.mrb[32].mxu0 %v7963_v26  ;;  %6470 = vmatprep.subr.bf16.mxu1 %v10735_v61 }
  0xfa   : > { %1180 = vmatprep.mubr.f32.mxu0 %v7515_v13  ;;  %v6477_v13 = vpack.c.bf16 %v2049_v44, %v2048_v51  ;;  %v2067_v51 = vld [vmem:[#allocation6 + $0x438] sm:$0xff]  ;;  %v8069_v44 = vld [vmem:[#allocation2 + $0xa0] sm:$0xff] }
  0xfb   : > { %1586 = vmatmul.mubr.f32.gmra.mrb[48].mxu1 %v7909_v5  ;;  %v2050_v5 = vld [vmem:[#allocation6 + $0x3b0] sm:$0xff] }
  0xfc   : > { %1590 = vmatprep.mubr.f32.mxu1 %v6849_v43  ;;  %6472 = vmatpush1.bf16.msra.mxu1 %v6471_v52  ;;  %v2065_v52 = vld [vmem:[#allocation6 + $0x428] sm:$0xff] }
  0xfd   : > { %1181 = vmatmul.mubr.f32.gmra.mrb[34].mxu0 %v7797_v36  ;;  %6473 = vmatprep.subr.bf16.mxu1 %v10735_v61  ;;  %v6502_v43 = vpack.c.bf16 %v2065_v52, %v2064_v30  ;;  %v1932_v30 = vld [vmem:[#allocation2 + $0x68] sm:$0xff] }
  0xfe   : > { %1185 = vmatprep.mubr.f32.mxu0 %v7533_v28  ;;  %v6480_v28 = vpack.c.bf16 %v2051_v14, %v2050_v5  ;;  %v2069_v5 = vld [vmem:[#allocation6 + $0x448] sm:$0xff]  ;;  %v8072_v14 = vld [vmem:[#allocation2 + $0x290] sm:$0xff] }
  0xff   : > { %1591 = vmatmul.mubr.f32.gmra.mrb[50].mxu1 %v10755_v2  ;;  %v2052_v2 = vld [vmem:[#allocation6 + $0x3c0] sm:$0xff]  ;;  %v8114_v52 = vld [vmem:[#allocation2 + $0x1a8] sm:$0xff] }
 0x100   : > { %1595 = vmatprep.mubr.f32.mxu1 %v6850_v18  ;;  %6475 = vmatpush1.bf16.msra.mxu1 %v6474_v12  ;;  %v2066_v12 = vld [vmem:[#allocation6 + $0x430] sm:$0xff] }
 0x101   : > { %1186 = vmatmul.mubr.f32.gmra.mrb[36].mxu0 %v7973_v40  ;;  %6476 = vmatprep.subr.bf16.mxu1 %v10735_v61  ;;  %v6506_v18 = vpack.c.bf16 %v2067_v51, %v2066_v12  ;;  %v1935_v12 = vld [vmem:[#allocation2 + $0x80] sm:$0xff]  ;;  %v8122_v51 = vld [vmem:[#allocation2 + $0x1d8] sm:$0xff] }
 0x102   : > { %1190 = vmatprep.mubr.f32.mxu0 %v7540_v29  ;;  %v6483_v29 = vpack.c.bf16 %v2053_v32, %v2052_v2  ;;  %v2070_v32 = vld [vmem:[#allocation6 + $0x450] sm:$0xff] }
 0x103   : > { %1596 = vmatmul.mubr.f32.gmra.mrb[52].mxu1 %v7919_v8  ;;  %v7987_v8 = vld [vmem:[#allocation2 + $0x140] sm:$0xff] }
 0x104   : > { %1600 = vmatprep.mubr.f32.mxu1 %v6851_v7  ;;  %6478 = vmatpush1.bf16.msra.mxu1 %v6477_v13  ;;  %v6858_v13 = vld [vmem:[#allocation2 + $0x278] sm:$0xff] }
 0x105   : > { %1191 = vmatmul.mubr.f32.gmra.mrb[38].mxu0 %v7805_v59  ;;  %6479 = vmatprep.subr.bf16.mxu1 %v10735_v61  ;;  %v8075_v7 = vld [vmem:[#allocation2 + $0xb8] sm:$0xff] }
 0x106   : > { %1195 = vmatprep.mubr.f32.mxu0 %v7563_v53  ;;  %v6486_v53 = vpack.c.bf16 %v2055_v31, %v2054_v57  ;;  %v8086_v57 = vld [vmem:[#allocation2 + $0x100] sm:$0xff] }
 0x107   : > { %1601 = vmatmul.mubr.f32.gmra.mrb[54].mxu1 %v7741_v50  ;;  %v2056_v50 = vld [vmem:[#allocation6 + $0x3e0] sm:$0xff] }
 0x108   : > { %1605 = vmatprep.mubr.f32.mxu1 %v6852_v6  ;;  %6481 = vmatpush1.bf16.msra.mxu1 %v6480_v28  ;;  %v8078_v28 = vld [vmem:[#allocation2 + $0xd0] sm:$0xff]  ;;  %v2071_v6 = vld [vmem:[#allocation6 + $0x458] sm:$0xff] }
 0x109   : > { %1196 = vmatmul.mubr.f32.gmra.mrb[40].mxu0 %v7983_v20  ;;  %6482 = vmatprep.subr.bf16.mxu1 %v10735_v61  ;;  %v6514_v31 = vpack.c.bf16 %v2071_v6, %v2070_v32  ;;  %v1941_v32 = vld [vmem:[#allocation2 + $0xb0] sm:$0xff]  ;;  %v8134_v6 = vld [vmem:[#allocation2 + $0x238] sm:$0xff] }
 0x10a   : > { %1200 = vmatprep.mubr.f32.mxu0 %v7574_v63  ;;  %v6489_v63 = vpack.c.bf16 %v2057_v1, %v2056_v50  ;;  %v2072_v50 = vld [vmem:[#allocation6 + $0x460] sm:$0xff]  ;;  %v2073_v1 = vld [vmem:[#allocation6 + $0x468] sm:$0xff] }
 0x10b   : > { %1606 = vmatmul.mubr.f32.gmra.mrb[56].mxu1 %v7931_v56  ;;  %v8000_v56 = vld [vmem:[#allocation2 + $0x170] sm:$0xff] }
 0x10c   : > { %1610 = vmatprep.mubr.f32.mxu1 %v7987_v8  ;;  %6484 = vmatpush1.bf16.msra.mxu1 %v6483_v29  ;;  %v8083_v29 = vld [vmem:[#allocation2 + $0xe8] sm:$0xff] }
 0x10d   : > { %1201 = vmatmul.mubr.f32.gmra.mrb[42].mxu0 %v7812_v39  ;;  %6485 = vmatprep.subr.bf16.mxu1 %v10735_v61 }
 0x10e   : > { %1205 = vmatprep.mubr.f32.mxu0 %v7599_v24  ;;  %v6492_v24 = vpack.c.bf16 %v2059_v45, %v2058_v35  ;;  %v8095_v35 = vld [vmem:[#allocation2 + $0x130] sm:$0xff]  ;;  %v6518_v45 = vpack.c.bf16 %v2073_v1, %v2072_v50  ;;  %v1944_v50 = vld [vmem:[#allocation2 + $0xc8] sm:$0xff] }
 0x10f   : > { %1611 = vmatmul.mubr.f32.gmra.mrb[58].mxu1 %v7763_v23  ;;  %v8009_v23 = vld [vmem:[#allocation2 + $0x270] sm:$0xff]  ;;  %v8140_v1 = vld [vmem:[#allocation2 + $0x268] sm:$0xff] }
 0x110   : > { %1615 = vmatprep.mubr.f32.mxu1 %v6853_v47  ;;  %6487 = vmatpush1.bf16.msra.mxu1 %v6486_v53  ;;  %v6859_v53 = vld [vmem:[#allocation2 + $0x2a8] sm:$0xff]  ;;  %v8089_v47 = vld [vmem:[#allocation2 + $0x2c0] sm:$0xff] }
 0x111   : > { %1206 = vmatmul.mubr.f32.gmra.mrb[44].mxu0 %v7996_v25  ;;  %6488 = vmatprep.subr.bf16.mxu1 %v10735_v61 }
 0x112   : > { %1210 = vmatprep.mubr.f32.mxu0 %v7602_v48  ;;  %v8013_v48 = vld [vmem:[#allocation2 + $0x1a0] sm:$0xff] }
 0x113   : > { %1616 = vmatmul.mubr.f32.gmra.mrb[60].mxu1 %v7943_v11  ;;  %v8024_v11 = vld [vmem:[#allocation2 + $0x1d0] sm:$0xff] }
 0x114   : > { %1620 = vmatprep.mubr.f32.mxu1 %v8000_v56  ;;  %6490 = vmatpush1.bf16.msra.mxu1 %v6489_v63  ;;  %v8092_v63 = vld [vmem:[#allocation2 + $0x118] sm:$0xff] }
 0x115   : > { %1211 = vmatmul.mubr.f32.gmra.mrb[46].mxu0 %v7829_v16  ;;  %6491 = vmatprep.subr.bf16.mxu1 %v10735_v61 }
 0x116   : > { %1215 = vmatprep.mubr.f32.mxu0 %v7621_v42  ;;  %v8020_v42 = vld [vmem:[#allocation2 + $0x2a0] sm:$0xff] }
 0x117   : > { %1621 = vmatmul.mubr.f32.gmra.mrb[62].mxu1 %v7774_v17  ;;  %v6855_v17 = vld [vmem:[#allocation2 + $0x1b8] sm:$0xff] }
 0x118   : > { %1625 = vmatprep.mubr.f32.mxu1 %v6854_v46  ;;  %6493 = vmatpush1.bf16.msra.mxu1 %v6492_v24  ;;  %v2074_v24 = vld [vmem:[#allocation6 + $0x470] sm:$0xff]  ;;  %v2075_v46 = vld [vmem:[#allocation6 + $0x478] sm:$0xff] }
 0x119   : > { %1216 = vmatmul.mubr.f32.gmra.mrb[48].mxu0 %v8009_v23 }
 0x11a   : > { %1220 = vmatprep.mubr.f32.mxu0 %v7635_v0  ;;  %v8031_v0 = vld [vmem:[#allocation2 + $0x2d0] sm:$0xff] }
 0x11b   : > { %1626 = vmatmul.mubr.f32.gmra.mrb[64].mxu1 %v7953_v22  ;;  %v8046_v22 = vld [vmem:[#allocation2 + $0x230] sm:$0xff] }
 0x11c   : > { %1630 = vmatprep.mubr.f32.mxu1 %v8013_v48 }
 0x11d   : > { %1221 = vmatmul.mubr.f32.gmra.mrb[50].mxu0 %v7836_v10 }
 0x11e   : > { %1225 = vmatprep.mubr.f32.mxu0 %v7659_v60  ;;  %v6856_v60 = vld [vmem:[#allocation2 + $0x1e8] sm:$0xff] }
 0x11f   : > { %1631 = vmatmul.mubr.f32.gmra.mrb[66].mxu1 %v7782_v21  ;;  %v8035_v21 = vld [vmem:[#allocation2 + $0x200] sm:$0xff] }
 0x120   : > { %1635 = vmatprep.mubr.f32.mxu1 %v6855_v17  ;;  %v8100_v17 = vld [vmem:[#allocation2 + $0x148] sm:$0xff] }
 0x121   : > { %1226 = vmatmul.mubr.f32.gmra.mrb[52].mxu0 %v8020_v42 }
 0x122   : > { %1230 = vmatprep.mubr.f32.mxu0 %v7666_v3  ;;  %v6857_v3 = vld [vmem:[#allocation2 + $0x218] sm:$0xff] }
 0x123   : > { %1636 = vmatmul.mubr.f32.gmra.mrb[68].mxu1 %v7963_v26 }
 0x124   : > { %1640 = vmatprep.mubr.f32.mxu1 %v8024_v11 }
 0x125   : > { %1231 = vmatmul.mubr.f32.gmra.mrb[54].mxu0 %v7842_v27 }
 0x126   : > { %1235 = vmatprep.mubr.f32.mxu0 %v7687_v9  ;;  %v8042_v9 = vld [vmem:[#allocation2 + $0x300] sm:$0xff] }
 0x127   : > { %1641 = vmatmul.mubr.f32.gmra.mrb[70].mxu1 %v7797_v36  ;;  %10759 = vst [vmem:[#allocation26_spill] sm:$0xff] %v8042_v9 }
 0x128   : > { %1645 = vmatprep.mubr.f32.mxu1 %v6856_v60  ;;  %v8103_v60 = vld [vmem:[#allocation2 + $0x160] sm:$0xff] }
 0x129   : > { %1236 = vmatmul.mubr.f32.gmra.mrb[56].mxu0 %v8031_v0 }
 0x12a   : > { %1240 = vmatprep.mubr.f32.mxu0 %v7690_v4  ;;  %v8050_v4 = vld [vmem:[#allocation2 + $0x70] sm:$0xff] }
 0x12b   : > { %1646 = vmatmul.mubr.f32.gmra.mrb[72].mxu1 %v7973_v40 }
 0x12c   : > { %1650 = vmatprep.mubr.f32.mxu1 %v8035_v21 }
 0x12d   : > { %1241 = vmatmul.mubr.f32.gmra.mrb[58].mxu0 %v7857_v55 }
 0x12e   : > { %1245 = vmatprep.mubr.f32.mxu0 %v7703_v41  ;;  %v2063_v41 = vld [vmem:[#allocation6 + $0x418] sm:$0xff] }
 0x12f   : > { %1651 = vmatmul.mubr.f32.gmra.mrb[74].mxu1 %v7805_v59 }
 0x130   : > { %1655 = vmatprep.mubr.f32.mxu1 %v6857_v3  ;;  %v6522_v3 = vpack.c.bf16 %v2075_v46, %v2074_v24  ;;  %v1943_v24 = vld [vmem:[#allocation2 + $0xc0] sm:$0xff] }
 0x131   : > { %1246 = vmatmul.mubr.f32.gmra.mrb[60].mxu0 %v8042_v9  ;;  %v1947_v46 = vld [vmem:[#allocation2 + $0xe0] sm:$0xff] }
 0x132   : > { %1250 = vmatprep.mubr.f32.mxu0 %v7715_v15  ;;  %v6498_v15 = vpack.c.bf16 %v2063_v41, %v2062_v34  ;;  %v6860_v34 = vld [vmem:[#allocation2 + $0x2d8] sm:$0xff] }
 0x133   : > { %1656 = vmatmul.mubr.f32.gmra.mrb[76].mxu1 %v7983_v20  ;;  %v8107_v41 = vld [vmem:[#allocation2 + $0x178] sm:$0xff] }
 0x134   : > { %1660 = vmatprep.mubr.f32.mxu1 %v8046_v22 }
 0x135   : > { %1251 = vmatmul.mubr.f32.gmra.mrb[62].mxu0 %v7866_v33 }
 0x136   : > { %5918 = vmatprep.mubr.f32.mxu0 %v8050_v4 }
 0x137   : > { %1661 = vmatmul.mubr.f32.gmra.mrb[78].mxu1 %v7812_v39 }
 0x138   : > { %1665 = vmatprep.mubr.f32.mxu1 %v8054_v49 }
 0x139   : > { %5919 = vmatmul.mubr.f32.vlgmr.msra.gmra.mrb[64].mxu0 %v8057_v54 }
 0x13a   : > { %5921 = vmatprep.mubr.f32.mxu0 %v750_v58  ;;  %6497 = vmatpush3.bf16.msra.mxu0 %v7921_v38  ;;  %v2068_v38 = vld [vmem:[#allocation6 + $0x440] sm:$0xff]  ;;  %v8110_v58 = vld [vmem:[#allocation2 + $0x190] sm:$0xff] }
 0x13b   : > { %1666 = vmatmul.mubr.f32.gmra.mrb[80].mxu1 %v7996_v25  ;;  %6499 = vmatprep.subr.bf16.mxu0 %v6498_v15  ;;  %v6510_v2 = vpack.c.bf16 %v2069_v5, %v2068_v38  ;;  %v8128_v38 = vld [vmem:[#allocation2 + $0x208] sm:$0xff]  ;;  %v8130_v5 = vld [vmem:[#allocation2 + $0x220] sm:$0xff] }
 0x13c   : > { %1670 = vmatprep.mubr.f32.mxu1 %v8062_v37 }
 0x13d   : > { %5922 = vmatmul.mubr.f32.gmra.mrb[66].mxu0 %v753_v62  ;;  %v8117_v62 = vld [vmem:[#allocation2 + $0x1c0] sm:$0xff] }
 0x13e   : > { %5924 = vmatprep.mubr.f32.mxu0 %v8050_v4  ;;  %6501 = vmatpush3.bf16.msra.mxu0 %v6498_v15  ;;  %v6861_v15 = vld [vmem:[#allocation2 + $0x2f0] sm:$0xff] }
 0x13f   : > { %1671 = vmatmul.mubr.f32.gmra.mrb[82].mxu1 %v7829_v16  ;;  %6503 = vmatprep.subr.bf16.mxu0 %v6502_v43 }
 0x140   : > { %1675 = vmatprep.mubr.f32.mxu1 %v6858_v13  ;;  %v1934_v13 = vld [vmem:[#allocation2 + $0x78] sm:$0xff] }
 0x141   : > { %5925 = vmatmul.mubr.f32.gmra.mrb[68].mxu0 %v8057_v54 }
 0x142   : > { %5927 = vmatprep.mubr.f32.mxu0 %v8069_v44  ;;  %6505 = vmatpush3.bf16.msra.mxu0 %v6502_v43  ;;  %v1931_v43 = vld [vmem:[#allocation2 + $0x60] sm:$0xff] }
 0x143   : > { %1676 = vmatmul.mubr.f32.gmra.mrb[84].mxu1 %v8009_v23  ;;  %6507 = vmatprep.subr.bf16.mxu0 %v6506_v18 }
 0x144   : > { %1680 = vmatprep.mubr.f32.mxu1 %v8072_v14 }
 0x145   : > { %5928 = vmatmul.mubr.f32.gmra.mrb[70].mxu0 %v8075_v7 }
 0x146   : > { %5930 = vmatprep.mubr.f32.mxu0 %v8078_v28  ;;  %6509 = vmatpush3.bf16.msra.mxu0 %v6506_v18  ;;  %v8124_v18 = vld [vmem:[#allocation2 + $0x1f0] sm:$0xff] }
 0x147   : > { %1681 = vmatmul.mubr.f32.gmra.mrb[86].mxu1 %v7836_v10  ;;  %6511 = vmatprep.subr.bf16.mxu0 %v6510_v2 }
 0x148   : > { %1685 = vmatprep.mubr.f32.mxu1 %v6859_v53  ;;  %v1940_v53 = vld [vmem:[#allocation2 + $0xa8] sm:$0xff] }
 0x149   : > { %5931 = vmatmul.mubr.f32.gmra.mrb[72].mxu0 %v8083_v29 }
 0x14a   : > { %5933 = vmatprep.mubr.f32.mxu0 %v8086_v57  ;;  %6513 = vmatpush3.bf16.msra.mxu0 %v6510_v2  ;;  %v1937_v2 = vld [vmem:[#allocation2 + $0x90] sm:$0xff] }
 0x14b   : > { %1686 = vmatmul.mubr.f32.gmra.mrb[88].mxu1 %v8020_v42  ;;  %6515 = vmatprep.subr.bf16.mxu0 %v6514_v31 }
 0x14c   : > { %1690 = vmatprep.mubr.f32.mxu1 %v8089_v47 }
 0x14d   : > { %5934 = vmatmul.mubr.f32.gmra.mrb[74].mxu0 %v8092_v63 }
 0x14e   : > { %5936 = vmatprep.mubr.f32.mxu0 %v8095_v35  ;;  %6517 = vmatpush3.bf16.msra.mxu0 %v6514_v31  ;;  %v8136_v31 = vld [vmem:[#allocation2 + $0x250] sm:$0xff] }
 0x14f   : > { %1691 = vmatmul.mubr.f32.gmra.mrb[90].mxu1 %v7842_v27  ;;  %6519 = vmatprep.subr.bf16.mxu0 %v6518_v45 }
 0x150   : > { %1695 = vmatprep.mubr.f32.mxu1 %v6860_v34  ;;  %v8148_v34 = vld [vmem:[#allocation2 + $0x2b0] sm:$0xff] }
 0x151   : > { %5937 = vmatmul.mubr.f32.gmra.mrb[76].mxu0 %v8100_v17 }
 0x152   : > { %5939 = vmatprep.mubr.f32.mxu0 %v8103_v60  ;;  %6521 = vmatpush3.bf16.msra.mxu0 %v6518_v45  ;;  %v8142_v45 = vld [vmem:[#allocation2 + $0x280] sm:$0xff] }
 0x153   : > { %1696 = vmatmul.mubr.f32.gmra.mrb[92].mxu1 %v8031_v0  ;;  %6523 = vmatprep.subr.bf16.mxu0 %v6522_v3 }
 0x154   : > { %1700 = vmatprep.mubr.f32.mxu1 %v6861_v15  ;;  %v1946_v15 = vld [vmem:[#allocation2 + $0xd8] sm:$0xff] }
 0x155   : > { %5940 = vmatmul.mubr.f32.gmra.mrb[78].mxu0 %v8107_v41 }
 0x156   : > { %5942 = vmatprep.mubr.f32.mxu0 %v8110_v58  ;;  %6525 = vmatpush3.bf16.msra.mxu0 %v6522_v3  ;;  %v8146_v3 = vld [vmem:[#allocation2 + $0x298] sm:$0xff] }
 0x157   : > { %1701 = vmatmul.mubr.f32.gmra.mrb[94].mxu1 %v7857_v55  ;;  %6526 = vmatprep.subr.bf16.mxu0 %v10735_v61  ;;  %v1938_v55 = vld [vmem:[#allocation2 + $0x98] sm:$0xff]  ;;  %v1955_v61 = vld [vmem:[#allocation2 + $0x120] sm:$0xff] }
 0x158   : > { %2140 = vmatprep.mubr.f32.mxu1 %v1932_v30  ;;  %v1950_v30 = vld [vmem:[#allocation2 + $0xf8] sm:$0xff] }
 0x159   : > { %5943 = vmatmul.mubr.f32.gmra.mrb[80].mxu0 %v8114_v52 }
 0x15a   : > { %5945 = vmatprep.mubr.f32.mxu0 %v8117_v62 }
 0x15b   : > { %2141 = vmatmul.mubr.f32.vlgmr.msra.gmra.mrb[96].mxu1 %v1931_v43 }
 0x15c   : > { %2145 = vmatprep.mubr.f32.mxu1 %v1935_v12  ;;  %v8154_v12 = vld [vmem:[#allocation2 + $0x2c8] sm:$0xff] }
 0x15d   : > { %5946 = vmatmul.mubr.f32.gmra.mrb[82].mxu0 %v8122_v51 }
 0x15e   : > { %5948 = vmatprep.mubr.f32.mxu0 %v8124_v18 }
 0x15f   : > { %2146 = vmatmul.mubr.f32.gmra.mrb[98].mxu1 %v1934_v13 }
 0x160   : > { %2150 = vmatprep.mubr.f32.mxu1 %v1938_v55  ;;  %v8158_v55 = vld [vmem:[#allocation2 + $0x2e0] sm:$0xff] }
 0x161   : > { %5949 = vmatmul.mubr.f32.gmra.mrb[84].mxu0 %v8128_v38 }
 0x162   : > { %5951 = vmatprep.mubr.f32.mxu0 %v8130_v5  ;;  %v8151_v43 = vpop.f32.mrb[0].mxu1 }
 0x163   : > { %2151 = vmatmul.mubr.f32.gmra.mrb[100].mxu1 %v1937_v2  ;;  %v8156_v13 = vpop.f32.mrb[1].mxu1  ;;  %v1949_v2 = vld [vmem:[#allocation2 + $0xf0] sm:$0xff] }
 0x164   : > { %2155 = vmatprep.mubr.f32.mxu1 %v1941_v32  ;;  %v1953_v32 = vld [vmem:[#allocation2 + $0x110] sm:$0xff] }
 0x165   : > { %5952 = vmatmul.mubr.f32.gmra.mrb[86].mxu0 %v8134_v6 }
 0x166   : > { %5954 = vmatprep.mubr.f32.mxu0 %v8136_v31 }
 0x167   : > { %2156 = vmatmul.mubr.f32.gmra.mrb[102].mxu1 %v1940_v53 }
 0x168   : > { %2160 = vmatprep.mubr.f32.mxu1 %v1944_v50  ;;  %v8164_v50 = vld [vmem:[#allocation2 + $0x2f8] sm:$0xff] }
 0x169   : > { %5955 = vmatmul.mubr.f32.gmra.mrb[88].mxu0 %v8140_v1 }
 0x16a   : > { %5957 = vmatprep.mubr.f32.mxu0 %v8142_v45 }
 0x16b   : > { %2161 = vmatmul.mubr.f32.gmra.mrb[104].mxu1 %v1943_v24 }
 0x16c   : > { %2165 = vmatprep.mubr.f32.mxu1 %v1947_v46  ;;  %v1952_v46 = vld [vmem:[#allocation2 + $0x108] sm:$0xff] }
 0x16d   : > { %5958 = vmatmul.mubr.f32.gmra.mrb[90].mxu0 %v8146_v3 }
 0x16e   : > { %5960 = vmatprep.mubr.f32.mxu0 %v8148_v34  ;;  %v8161_v53 = vpop.f32.mrb[2].mxu1 }
 0x16f   : > { %2166 = vmatmul.mubr.f32.gmra.mrb[106].mxu1 %v1946_v15  ;;  %v8166_v24 = vpop.f32.mrb[3].mxu1  ;;  %v1956_v15 = vld [vmem:[#allocation2 + $0x128] sm:$0xff] }
 0x170   : > { %2170 = vmatprep.mubr.f32.mxu1 %v1950_v30 }
 0x171   : > { %5961 = vmatmul.mubr.f32.gmra.mrb[92].mxu0 %v8154_v12 }
 0x172   : > { %5963 = vmatprep.mubr.f32.mxu0 %v8158_v55 }
 0x173   : > { %2171 = vmatmul.mubr.f32.gmra.mrb[108].mxu1 %v1949_v2 }
 0x174   : > { %2175 = vmatprep.mubr.f32.mxu1 %v1953_v32  ;;  %v1958_v32 = vld [vmem:[#allocation2 + $0x138] sm:$0xff] }
 0x175   : > { %5964 = vmatmul.mubr.f32.gmra.mrb[94].mxu0 %v8164_v50  ;;  %v8169_v19 = vpop.f32.mrb[4].mxu1 }
 0x176   : > { %5998 = vmatprep.mubr.f32.mxu0 %v8050_v4  ;;  %v8172_v30 = vpop.f32.mrb[5].mxu1  ;;  %v1962_v4 = vld [vmem:[#allocation2 + $0x158] sm:$0xff] }
 0x177   : > { %2176 = vmatmul.mubr.f32.gmra.mrb[110].mxu1 %v1952_v46 }
 0x178   : > { %2180 = vmatprep.mubr.f32.mxu1 %v1956_v15 }
 0x179   : > { %5999 = vmatmul.mubr.f32.vlgmr.msra.gmra.mrb[96].mxu0 %v8057_v54  ;;  %v8175_v33 = vpop.f32.mrb[6].mxu1  ;;  %v1961_v54 = vld [vmem:[#allocation2 + $0x150] sm:$0xff] }
 0x17a   : > { %6001 = vmatprep.mubr.f32.mxu0 %v8069_v44  ;;  %v8178_v2 = vpop.f32.mrb[7].mxu1 }
 0x17b   : > { %2181 = vmatmul.mubr.f32.gmra.mrb[112].mxu1 %v1955_v61 }
 0x17c   : > { %2185 = vmatprep.mubr.f32.mxu1 %v7987_v8  ;;  %v1964_v8 = vld [vmem:[#allocation2 + $0x168] sm:$0xff] }
 0x17d   : > { %6002 = vmatmul.mubr.f32.gmra.mrb[98].mxu0 %v8075_v7  ;;  %v8182_v9 = vpop.f32.mrb[8].mxu1  ;;  %v1968_v7 = vld [vmem:[#allocation2 + $0x188] sm:$0xff] }
 0x17e   : > { %6004 = vmatprep.mubr.f32.mxu0 %v8078_v28  ;;  %v8185_v46 = vpop.f32.mrb[9].mxu1 }
 0x17f   : > { %2186 = vmatmul.mubr.f32.gmra.mrb[114].mxu1 %v1958_v32  ;;  %v1970_v32 = vld [vmem:[#allocation2 + $0x198] sm:$0xff] }
 0x180   : > { %2190 = vmatprep.mubr.f32.mxu1 %v1962_v4  ;;  %v1974_v4 = vld [vmem:[#allocation2 + $0x1b8] sm:$0xff] }
 0x181   : > { %6005 = vmatmul.mubr.f32.gmra.mrb[100].mxu0 %v8083_v29  ;;  %v8188_v44 = vpop.f32.mrb[10].mxu1  ;;  %v1967_v29 = vld [vmem:[#allocation2 + $0x180] sm:$0xff] }
 0x182   : > { %6007 = vmatprep.mubr.f32.mxu0 %v8086_v57  ;;  %v8191_v61 = vpop.f32.mrb[11].mxu1 }
 0x183   : > { %2191 = vmatmul.mubr.f32.gmra.mrb[116].mxu1 %v1961_v54 }
 0x184   : > { %2195 = vmatprep.mubr.f32.mxu1 %v8000_v56 }
 0x185   : > { %6008 = vmatmul.mubr.f32.gmra.mrb[102].mxu0 %v8092_v63 }
 0x186   : > { %v8195_v28 = vpop.f32.mrb[12].mxu1  ;;  %6010 = vmatprep.mubr.f32.mxu0 %v8095_v35 }
 0x187   : > { %v8198_v15 = vpop.f32.mrb[13].mxu1  ;;  %2196 = vmatmul.mubr.f32.gmra.mrb[118].mxu1 %v1964_v8 }
 0x188   : > { %2200 = vmatprep.mubr.f32.mxu1 %v1968_v7 }
 0x189   : > { %6011 = vmatmul.mubr.f32.gmra.mrb[104].mxu0 %v8100_v17 }
 0x18a   : > { %v8201_v57 = vpop.f32.mrb[14].mxu1  ;;  %6013 = vmatprep.mubr.f32.mxu0 %v8103_v60 }
 0x18b   : > { %v8204_v56 = vpop.f32.mrb[15].mxu1  ;;  %2201 = vmatmul.mubr.f32.gmra.mrb[120].mxu1 %v1967_v29 }
 0x18c   : > { %v1097_v63 = vpop.f32.mrb[0].mxu0  ;;  %2205 = vmatprep.mubr.f32.mxu1 %v8013_v48 }
 0x18d   : > { %6014 = vmatmul.mubr.f32.gmra.mrb[106].mxu0 %v8107_v41  ;;  %v1099_v35 = vpop.f32.mrb[1].mxu0  ;;  %v8209_v54 = vadd.f32 %v8156_v13, %v1097_v63  ;;  %v1980_v63 = vld [vmem:[#allocation2 + $0x1e8] sm:$0xff] }
 0x18e   : > { %v8211_v8 = vpop.f32.mrb[16].mxu1  ;;  %6016 = vmatprep.mubr.f32.mxu0 %v8110_v58  ;;  %v1986_v35 = vld [vmem:[#allocation2 + $0x218] sm:$0xff] }
 0x18f   : > { %v8214_v17 = vpop.f32.mrb[17].mxu1  ;;  %2206 = vmatmul.mubr.f32.gmra.mrb[122].mxu1 %v1970_v32 }
 0x190   : > { %v1102_v60 = vpop.f32.mrb[2].mxu0  ;;  %2210 = vmatprep.mubr.f32.mxu1 %v1974_v4 }
 0x191   : > { %6017 = vmatmul.mubr.f32.gmra.mrb[108].mxu0 %v8114_v52  ;;  %v1104_v48 = vpop.f32.mrb[3].mxu0  ;;  %v8218_v7 = vadd.f32 %v8151_v43, %v1102_v60 }
 0x192   : > { %v8220_v41 = vpop.f32.mrb[18].mxu1  ;;  %6019 = vmatprep.mubr.f32.mxu0 %v8117_v62 }
 0x193   : > { %v8223_v13 = vpop.f32.mrb[19].mxu1  ;;  %2211 = vmatmul.mubr.f32.gmra.mrb[124].mxu1 %v7963_v26 }
 0x194   : > { %v1107_v58 = vpop.f32.mrb[4].mxu0  ;;  %2215 = vmatprep.mubr.f32.mxu1 %v8024_v11 }
 0x195   : > { %6020 = vmatmul.mubr.f32.gmra.mrb[110].mxu0 %v8122_v51  ;;  %v1109_v29 = vpop.f32.mrb[5].mxu0  ;;  %v8229_v52 = vadd.f32 %v8166_v24, %v1107_v58  ;;  %v2020_v58 = vld [vmem:[#allocation2 + $0x328] sm:$0xff] }
 0x196   : > { %v8231_v43 = vpop.f32.mrb[20].mxu1  ;;  %6022 = vmatprep.mubr.f32.mxu0 %v8124_v18 }
 0x197   : > { %v8234_v32 = vpop.f32.mrb[21].mxu1  ;;  %2216 = vmatmul.mubr.f32.gmra.mrb[126].mxu1 %v7797_v36 }
 0x198   : > { %v1112_v62 = vpop.f32.mrb[6].mxu0  ;;  %2220 = vmatprep.mubr.f32.mxu1 %v1980_v63 }
 0x199   : > { %6023 = vmatmul.mubr.f32.gmra.mrb[112].mxu0 %v8128_v38  ;;  %v1114_v26 = vpop.f32.mrb[7].mxu0  ;;  %v8239_v11 = vadd.f32 %v8161_v53, %v1112_v62 }
 0x19a   : > { %v8241_v51 = vpop.f32.mrb[22].mxu1  ;;  %6025 = vmatprep.mubr.f32.mxu0 %v8130_v5 }
 0x19b   : > { %v8244_v24 = vpop.f32.mrb[23].mxu1  ;;  %2221 = vmatmul.mubr.f32.gmra.mrb[128].mxu1 %v7973_v40 }
 0x19c   : > { %v1117_v18 = vpop.f32.mrb[8].mxu0  ;;  %2225 = vmatprep.mubr.f32.mxu1 %v8035_v21 }
 0x19d   : > { %v1119_v36 = vpop.f32.mrb[9].mxu0  ;;  %6026 = vmatmul.mubr.f32.gmra.mrb[114].mxu0 %v8134_v6  ;;  %v8250_v38 = vadd.f32 %v8172_v30, %v1117_v18 }
 0x19e   : > { %v8252_v53 = vpop.f32.mrb[24].mxu1  ;;  %6028 = vmatprep.mubr.f32.mxu0 %v8136_v31  ;;  %v2004_v36 = vld [vmem:[#allocation2 + $0x2a8] sm:$0xff] }
 0x19f   : > { %v8255_v4 = vpop.f32.mrb[25].mxu1  ;;  %2226 = vmatmul.mubr.f32.gmra.mrb[130].mxu1 %v7805_v59 }
 0x1a0   : > { %v1122_v5 = vpop.f32.mrb[10].mxu0  ;;  %2230 = vmatprep.mubr.f32.mxu1 %v1986_v35 }
 0x1a1   : > { %v1124_v40 = vpop.f32.mrb[11].mxu0  ;;  %6029 = vmatmul.mubr.f32.gmra.mrb[116].mxu0 %v8140_v1  ;;  %v8260_v21 = vadd.f32 %v8169_v19, %v1122_v5 }
 0x1a2   : > { %v8262_v6 = vpop.f32.mrb[26].mxu1  ;;  %6031 = vmatprep.mubr.f32.mxu0 %v8142_v45 }
 0x1a3   : > { %v8265_v30 = vpop.f32.mrb[27].mxu1  ;;  %2231 = vmatmul.mubr.f32.gmra.mrb[132].mxu1 %v7983_v20 }
 0x1a4   : > { %v1127_v31 = vpop.f32.mrb[12].mxu0  ;;  %2235 = vmatprep.mubr.f32.mxu1 %v8046_v22 }
 0x1a5   : > { %v1129_v59 = vpop.f32.mrb[13].mxu0  ;;  %6032 = vmatmul.mubr.f32.gmra.mrb[118].mxu0 %v8146_v3  ;;  %v8271_v60 = vadd.f32 %v8178_v2, %v1127_v31 }
 0x1a6   : > { %v8273_v1 = vpop.f32.mrb[28].mxu1  ;;  %6034 = vmatprep.mubr.f32.mxu0 %v8148_v34  ;;  %v2017_v34 = vld [vmem:[#allocation2 + $0x310] sm:$0xff]  ;;  %v2010_v59 = vld [vmem:[#allocation2 + $0x2d8] sm:$0xff] }
 0x1a7   : > { %v8276_v19 = vpop.f32.mrb[29].mxu1  ;;  %2236 = vmatmul.mubr.f32.gmra.mrb[134].mxu1 %v7812_v39 }
 0x1a8   : > { %v1132_v45 = vpop.f32.mrb[14].mxu0  ;;  %2240 = vmatprep.mubr.f32.mxu1 %v8054_v49  ;;  %v1998_v49 = vld [vmem:[#allocation2 + $0x278] sm:$0xff] }
 0x1a9   : > { %v1134_v20 = vpop.f32.mrb[15].mxu0  ;;  %6035 = vmatmul.mubr.f32.gmra.mrb[120].mxu0 %v8154_v12  ;;  %v8282_v22 = vadd.f32 %v8175_v33, %v1132_v45 }
 0x1aa   : > { %v8284_v3 = vpop.f32.mrb[30].mxu1  ;;  %6037 = vmatprep.mubr.f32.mxu0 %v8158_v55 }
 0x1ab   : > { %v8287_v2 = vpop.f32.mrb[31].mxu1  ;;  %2241 = vmatmul.mubr.f32.gmra.mrb[136].mxu1 %v7996_v25 }
 0x1ac   : > { %v1137_v48 = vpop.f32.mrb[16].mxu0  ;;  %2245 = vmatprep.mubr.f32.mxu1 %v8062_v37 }
 0x1ad   : > { %v1139_v39 = vpop.f32.mrb[17].mxu0  ;;  %6038 = vmatmul.mubr.f32.gmra.mrb[122].mxu0 %v8164_v50  ;;  %v8293_v12 = vadd.f32 %v8185_v46, %v1137_v48  ;;  %v2013_v48 = vld [vmem:[#allocation2 + $0x2f0] sm:$0xff] }
 0x1ae   : > { %v1547_v33 = vpop.f32.mrb[32].mxu1  ;;  %6040 = vmatprep.mubr.f32.mxu0 %v2017_v34 }
 0x1af   : > { %v8296_v29 = vadd.f32 %v1547_v33, %v8209_v54  ;;  %v1549_v63 = vpop.f32.mrb[33].mxu1  ;;  %2246 = vmatmul.mubr.f32.gmra.mrb[138].mxu1 %v7829_v16  ;;  %v2016_v33 = vld [vmem:[#allocation2 + $0x308] sm:$0xff] }
 0x1b0   : > { %v1142_v25 = vpop.f32.mrb[18].mxu0  ;;  %2250 = vmatprep.mubr.f32.mxu1 %v1998_v49 }
 0x1b1   : > { %v1144_v62 = vpop.f32.mrb[19].mxu0  ;;  %6041 = vmatmul.mubr.f32.gmra.mrb[124].mxu0 %v2020_v58  ;;  %v8300_v37 = vadd.f32 %v8182_v9, %v1142_v25  ;;  %v6862_v25 = vld [vmem:[#allocation2 + $0x2e8] sm:$0xff] }
 0x1b2   : > { %v1552_v26 = vpop.f32.mrb[34].mxu1  ;;  %6043 = vmatprep.mubr.f32.mxu0 %v8158_v55 }
 0x1b3   : > { %v8304_v46 = vadd.f32 %v1552_v26, %v8218_v7  ;;  %v1554_v18 = vpop.f32.mrb[35].mxu1  ;;  %2251 = vmatmul.mubr.f32.gmra.mrb[140].mxu1 %v8009_v23  ;;  %v2019_v26 = vld [vmem:[#allocation2 + $0x320] sm:$0xff] }
 0x1b4   : > { %v1147_v54 = vpop.f32.mrb[20].mxu0  ;;  %2255 = vmatprep.mubr.f32.mxu1 %v8072_v14 }
 0x1b5   : > { %v1149_v16 = vpop.f32.mrb[21].mxu0  ;;  %6044 = vmatmul.mubr.f32.gmra.mrb[126].mxu0 %v8164_v50  ;;  %v8310_v35 = vadd.f32 %v8191_v61, %v1147_v54 }
 0x1b6   : > { %v1557_v9 = vpop.f32.mrb[36].mxu1 }
 0x1b7   : > { %v8313_v5 = vadd.f32 %v1557_v9, %v8229_v52  ;;  %v1559_v55 = vpop.f32.mrb[37].mxu1  ;;  %2256 = vmatmul.mubr.f32.gmra.mrb[142].mxu1 %v7836_v10 }
 0x1b8   : > { %v1152_v7 = vpop.f32.mrb[22].mxu0  ;;  %2260 = vmatprep.mubr.f32.mxu1 %v2004_v36 }
 0x1b9   : > { %v1154_v23 = vpop.f32.mrb[23].mxu0  ;;  %v8317_v40 = vadd.f32 %v8188_v44, %v1152_v7 }
 0x1ba   : > { %v1562_v14 = vpop.f32.mrb[38].mxu1 }
 0x1bb   : > { %v8320_v31 = vadd.f32 %v1562_v14, %v8239_v11  ;;  %v1564_v50 = vpop.f32.mrb[39].mxu1  ;;  %2261 = vmatmul.mubr.f32.gmra.mrb[144].mxu1 %v8020_v42  ;;  %v10761_v14 = vld [vmem:[#allocation31_spill] sm:$0xff] }
 0x1bc   : > { %v1157_v61 = vpop.f32.mrb[24].mxu0  ;;  %2265 = vmatprep.mubr.f32.mxu1 %v8089_v47  ;;  %v729_v50 = vld [vmem:[#allocation2 + $0x2d0] sm:$0xff] }
 0x1bd   : > { %v1159_v52 = vpop.f32.mrb[25].mxu0  ;;  %v8325_v10 = vadd.f32 %v8198_v15, %v1157_v61 }
 0x1be   : > { %v1567_v45 = vpop.f32.mrb[40].mxu1 }
 0x1bf   : > { %v8328_v20 = vadd.f32 %v1567_v45, %v8250_v38  ;;  %v1569_v44 = vpop.f32.mrb[41].mxu1  ;;  %2266 = vmatmul.mubr.f32.gmra.mrb[146].mxu1 %v7842_v27 }
 0x1c0   : > { %v1162_v11 = vpop.f32.mrb[26].mxu0  ;;  %2270 = vmatprep.mubr.f32.mxu1 %v2010_v59 }
 0x1c1   : > { %v1164_v34 = vpop.f32.mrb[27].mxu0  ;;  %v8332_v42 = vadd.f32 %v8195_v28, %v1162_v11  ;;  %v732_v11 = vld [vmem:[#allocation2 + $0x2e8] sm:$0xff] }
 0x1c2   : > { %v1572_v47 = vpop.f32.mrb[42].mxu1 }
 0x1c3   : > { %v8335_v39 = vadd.f32 %v1572_v47, %v8260_v21  ;;  %v1574_v15 = vpop.f32.mrb[43].mxu1  ;;  %2271 = vmatmul.mubr.f32.gmra.mrb[148].mxu1 %v8031_v0 }
 0x1c4   : > { %v1167_v49 = vpop.f32.mrb[28].mxu0  ;;  %2275 = vmatprep.mubr.f32.mxu1 %v2013_v48 }
 0x1c5   : > { %v1169_v38 = vpop.f32.mrb[29].mxu0  ;;  %v8339_v27 = vadd.f32 %v8204_v56, %v1167_v49  ;;  %v10760_v56 = vld [vmem:[#allocation26_spill] sm:$0xff] }
 0x1c6   : > { %v1577_v58 = vpop.f32.mrb[44].mxu1 }
 0x1c7   : > { %v8342_v63 = vadd.f32 %v1577_v58, %v8271_v60  ;;  %v1579_v28 = vpop.f32.mrb[45].mxu1  ;;  %2276 = vmatmul.mubr.f32.gmra.mrb[150].mxu1 %v6862_v25 }
 0x1c8   : > { %v1172_v62 = vpop.f32.mrb[30].mxu0  ;;  %2280 = vmatprep.mubr.f32.mxu1 %v2016_v33 }
 0x1c9   : > { %v1174_v21 = vpop.f32.mrb[31].mxu0  ;;  %v1398_v0 = vadd.f32 %v8201_v57, %v1172_v62 }
 0x1ca   : > { %v1582_v18 = vpop.f32.mrb[46].mxu1 }
 0x1cb   : > { %v8346_v54 = vadd.f32 %v1582_v18, %v8282_v22  ;;  %v1584_v16 = vpop.f32.mrb[47].mxu1  ;;  %2281 = vmatmul.mubr.f32.gmra.mrb[152].mxu1 %v10760_v56 }
 0x1cc   : > { %v1177_v36 = vpop.f32.mrb[32].mxu0  ;;  %2285 = vmatprep.mubr.f32.mxu1 %v2019_v26 }
 0x1cd   : > { %v1403_v60 = vadd.f32 %v8214_v17, %v1177_v36  ;;  %v1179_v9 = vpop.f32.mrb[33].mxu0 }
 0x1ce   : > { %v1587_v55 = vpop.f32.mrb[48].mxu1 }
 0x1cf   : > { %v8351_v7 = vadd.f32 %v1587_v55, %v8293_v12  ;;  %v1589_v23 = vpop.f32.mrb[49].mxu1  ;;  %2286 = vmatmul.mubr.f32.gmra.mrb[154].mxu1 %v10761_v14 }
 0x1d0   : > { %v1182_v57 = vpop.f32.mrb[34].mxu0  ;;  %2290 = vmatprep.mubr.f32.mxu1 %v2010_v59 }
 0x1d1   : > { %v1408_v22 = vadd.f32 %v8211_v8, %v1182_v57  ;;  %v1184_v61 = vpop.f32.mrb[35].mxu0 }
 0x1d2   : > { %v1592_v52 = vpop.f32.mrb[50].mxu1 }
 0x1d3   : > { %v8356_v45 = vadd.f32 %v1592_v52, %v8300_v37  ;;  %v1594_v44 = vpop.f32.mrb[51].mxu1  ;;  %2291 = vmatmul.mubr.f32.gmra.mrb[156].mxu1 %v729_v50 }
 0x1d4   : > { %v1187_v17 = vpop.f32.mrb[36].mxu0  ;;  %2295 = vmatprep.mubr.f32.mxu1 %v2013_v48 }
 0x1d5   : > { %v1413_v12 = vadd.f32 %v8223_v13, %v1187_v17  ;;  %v1189_v34 = vpop.f32.mrb[37].mxu0 }
 0x1d6   : > { %v1597_v47 = vpop.f32.mrb[52].mxu1 }
 0x1d7   : > { %v8360_v15 = vadd.f32 %v1597_v47, %v8310_v35  ;;  %v1599_v59 = vpop.f32.mrb[53].mxu1  ;;  %2296 = vmatmul.mubr.f32.gmra.mrb[158].mxu1 %v732_v11 }
 0x1d8   : > { %v1192_v8 = vpop.f32.mrb[38].mxu0 }
 0x1d9   : > { %v1418_v49 = vadd.f32 %v8220_v41, %v1192_v8  ;;  %v1194_v38 = vpop.f32.mrb[39].mxu0 }
 0x1da   : > { %v1602_v37 = vpop.f32.mrb[54].mxu1 }
 0x1db   : > { %v8364_v33 = vadd.f32 %v1602_v37, %v8317_v40  ;;  %v1604_v58 = vpop.f32.mrb[55].mxu1 }
 0x1dc   : > { %v1197_v48 = vpop.f32.mrb[40].mxu0 }
 0x1dd   : > { %v1423_v28 = vadd.f32 %v8234_v32, %v1197_v48  ;;  %v1199_v13 = vpop.f32.mrb[41].mxu0 }
 0x1de   : > { %v1607_v25 = vpop.f32.mrb[56].mxu1 }
 0x1df   : > { %v8368_v62 = vadd.f32 %v1607_v25, %v8325_v10  ;;  %v1609_v35 = vpop.f32.mrb[57].mxu1 }
 0x1e0   : > { %v1202_v21 = vpop.f32.mrb[42].mxu0 }
 0x1e1   : > { %v1428_v26 = vadd.f32 %v8231_v43, %v1202_v21  ;;  %v1204_v18 = vpop.f32.mrb[43].mxu0 }
 0x1e2   : > { %v1612_v41 = vpop.f32.mrb[58].mxu1 }
 0x1e3   : > { %v8372_v16 = vadd.f32 %v1612_v41, %v8332_v42  ;;  %v1614_v40 = vpop.f32.mrb[59].mxu1 }
 0x1e4   : > { %v1207_v56 = vpop.f32.mrb[44].mxu0 }
 0x1e5   : > { %v1433_v36 = vadd.f32 %v8244_v24, %v1207_v56  ;;  %v1209_v9 = vpop.f32.mrb[45].mxu0 }
 0x1e6   : > { %v1617_v32 = vpop.f32.mrb[60].mxu1 }
 0x1e7   : > { %v8376_v55 = vadd.f32 %v1617_v32, %v8339_v27  ;;  %v1619_v10 = vpop.f32.mrb[61].mxu1 }
 0x1e8   : > { %v1212_v23 = vpop.f32.mrb[46].mxu0 }
 0x1e9   : > { %v1438_v14 = vadd.f32 %v8241_v51, %v1212_v23  ;;  %v1214_v57 = vpop.f32.mrb[47].mxu0 }
 0x1ea   : > { %v1622_v43 = vpop.f32.mrb[62].mxu1 }
 0x1eb   : > { %v8379_v50 = vadd.f32 %v1622_v43, %v1398_v0  ;;  %v1624_v61 = vpop.f32.mrb[63].mxu1 }
 0x1ec   : > { %v1217_v42 = vpop.f32.mrb[48].mxu0 }
 0x1ed   : > { %v1443_v52 = vadd.f32 %v8255_v4, %v1217_v42  ;;  %v1219_v44 = vpop.f32.mrb[49].mxu0 }
 0x1ee   : > { %v1627_v17 = vpop.f32.mrb[64].mxu1 }
 0x1ef   : > { %v8382_v24 = vadd.f32 %v1627_v17, %v1403_v60  ;;  %v1629_v11 = vpop.f32.mrb[65].mxu1 }
 0x1f0   : > { %v1222_v34 = vpop.f32.mrb[50].mxu0 }
 0x1f1   : > { %v1448_v27 = vadd.f32 %v8252_v53, %v1222_v34  ;;  %v1224_v47 = vpop.f32.mrb[51].mxu0 }
 0x1f2   : > { %v1632_v59 = vpop.f32.mrb[66].mxu1 }
 0x1f3   : > { %v8385_v8 = vadd.f32 %v1632_v59, %v1408_v22  ;;  %v1634_v51 = vpop.f32.mrb[67].mxu1 }
 0x1f4   : > { %v1227_v38 = vpop.f32.mrb[52].mxu0 }
 0x1f5   : > { %v1453_v0 = vadd.f32 %v8265_v30, %v1227_v38  ;;  %v1229_v37 = vpop.f32.mrb[53].mxu0 }
 0x1f6   : > { %v1637_v58 = vpop.f32.mrb[68].mxu1 }
 0x1f7   : > { %v8388_v48 = vadd.f32 %v1637_v58, %v1413_v12  ;;  %v1639_v4 = vpop.f32.mrb[69].mxu1 }
 0x1f8   : > { %v1232_v13 = vpop.f32.mrb[54].mxu0 }
 0x1f9   : > { %v1458_v60 = vadd.f32 %v8262_v6, %v1232_v13  ;;  %v1234_v25 = vpop.f32.mrb[55].mxu0 }
 0x1fa   : > { %v1642_v35 = vpop.f32.mrb[70].mxu1 }
 0x1fb   : > { %v8391_v21 = vadd.f32 %v1642_v35, %v1418_v49  ;;  %v1644_v53 = vpop.f32.mrb[71].mxu1 }
 0x1fc   : > { %v1237_v18 = vpop.f32.mrb[56].mxu0 }
 0x1fd   : > { %v1463_v22 = vadd.f32 %v8276_v19, %v1237_v18  ;;  %v1239_v41 = vpop.f32.mrb[57].mxu0 }
 0x1fe   : > { %v1647_v40 = vpop.f32.mrb[72].mxu1 }
 0x1ff   : > { %v8394_v56 = vadd.f32 %v1647_v40, %v1423_v28  ;;  %v1649_v30 = vpop.f32.mrb[73].mxu1 }
 0x200   : > { %v1242_v9 = vpop.f32.mrb[58].mxu0 }
 0x201   : > { %v1468_v12 = vadd.f32 %v8273_v1, %v1242_v9  ;;  %v1244_v32 = vpop.f32.mrb[59].mxu0 }
 0x202   : > { %v1652_v10 = vpop.f32.mrb[74].mxu1 }
 0x203   : > { %v8397_v23 = vadd.f32 %v1652_v10, %v1428_v26  ;;  %v1654_v6 = vpop.f32.mrb[75].mxu1 }
 0x204   : > { %v1247_v57 = vpop.f32.mrb[60].mxu0 }
 0x205   : > { %v1473_v49 = vadd.f32 %v8287_v2, %v1247_v57  ;;  %v1249_v43 = vpop.f32.mrb[61].mxu0 }
 0x206   : > { %v1657_v61 = vpop.f32.mrb[76].mxu1 }
 0x207   : > { %v8400_v42 = vadd.f32 %v1657_v61, %v1433_v36  ;;  %v1659_v19 = vpop.f32.mrb[77].mxu1 }
 0x208   : > { %v1252_v44 = vpop.f32.mrb[62].mxu0 }
 0x209   : > { %v8403_v28 = vadd.f32 %v8284_v3, %v1252_v44  ;;  %v1254_v17 = vpop.f32.mrb[63].mxu0 }
 0x20a   : > { %v1662_v11 = vpop.f32.mrb[78].mxu1 }
 0x20b   : > { %v8405_v1 = vadd.f32 %v1662_v11, %v1438_v14  ;;  %v1664_v34 = vpop.f32.mrb[79].mxu1  ;;  %v3462_v11 = vld [vmem:[#allocation8 + $0x180] sm:$0xff] }
 0x20c   : > { %v5920_v26 = vpop.f32.mrb[64].mxu0  ;;  %v3463_v34 = vld [vmem:[#allocation8 + $0x188] sm:$0xff] }
 0x20d   : > { %v8408_v47 = vadd.f32 %v5920_v26, %v8304_v46  ;;  %v1772_v59 = vpop.f32.mrb[65].mxu0  ;;  %v6527_v26 = vpack.c.bf16 %v3463_v34, %v3462_v11 }
 0x20e   : > { %v1667_v2 = vpop.f32.mrb[80].mxu1  ;;  %v8411_v51 = vadd.f32 %v1772_v59, %v8296_v29 }
 0x20f   : > { %v8413_v36 = vadd.f32 %v1667_v2, %v1443_v52  ;;  %v1669_v38 = vpop.f32.mrb[81].mxu1  ;;  %6528 = vmatpush1.bf16.msra.mxu0 %v6527_v26 }
 0x210   : > { %v5923_v37 = vpop.f32.mrb[66].mxu0 }
 0x211   : > { %v8416_v3 = vadd.f32 %v5923_v37, %v8320_v31  ;;  %v1782_v58 = vpop.f32.mrb[67].mxu0  ;;  %v10762_v37 = vmov 0.0|0.0  }
 0x212   : > { %v1672_v14 = vpop.f32.mrb[82].mxu1  ;;  %v8419_v4 = vadd.f32 %v1782_v58, %v8313_v5  ;;  %6529 = vmatprep.subr.bf16.mxu0 %v10762_v37 }
 0x213   : > { %v8421_v13 = vadd.f32 %v1672_v14, %v1448_v27  ;;  %v1674_v46 = vpop.f32.mrb[83].mxu1  ;;  %v3494_v14 = vld [vmem:[#allocation8 + $0x280] sm:$0xff] }
 0x214   : > { %v5926_v25 = vpop.f32.mrb[68].mxu0  ;;  %v3495_v46 = vld [vmem:[#allocation8 + $0x288] sm:$0xff] }
 0x215   : > { %v8424_v35 = vadd.f32 %v5926_v25, %v8335_v39  ;;  %v1792_v29 = vpop.f32.mrb[69].mxu0 }
 0x216   : > { %v1677_v52 = vpop.f32.mrb[84].mxu1  ;;  %v8427_v53 = vadd.f32 %v1792_v29, %v8328_v20  ;;  %v6574_v29 = vpack.c.bf16 %v3495_v46, %v3494_v14 }
 0x217   : > { %v8429_v18 = vadd.f32 %v1677_v52, %v1453_v0  ;;  %v1679_v31 = vpop.f32.mrb[85].mxu1 }
 0x218   : > { %v5929_v41 = vpop.f32.mrb[70].mxu0  ;;  %6575 = vmatprep.subr.bf16.mxu1 %v6574_v29 }
 0x219   : > { %v8432_v40 = vadd.f32 %v5929_v41, %v8346_v54  ;;  %v1802_v5 = vpop.f32.mrb[71].mxu0  ;;  %6577 = vmatpush3.bf16.msra.mxu1 %v6574_v29 }
 0x21a   : > { %v1682_v27 = vpop.f32.mrb[86].mxu1  ;;  %v8435_v30 = vadd.f32 %v1802_v5, %v8342_v63 }
 0x21b   : > { %v8437_v9 = vadd.f32 %v1682_v27, %v1458_v60  ;;  %v1684_v39 = vpop.f32.mrb[87].mxu1 }
 0x21c   : > { %v5932_v32 = vpop.f32.mrb[72].mxu0 }
 0x21d   : > { %v8440_v10 = vadd.f32 %v5932_v32, %v8356_v45  ;;  %v1812_v20 = vpop.f32.mrb[73].mxu0 }
 0x21e   : > { %v1687_v0 = vpop.f32.mrb[88].mxu1  ;;  %v8443_v6 = vadd.f32 %v1812_v20, %v8351_v7 }
 0x21f   : > { %v8445_v57 = vadd.f32 %v1687_v0, %v1463_v22  ;;  %v1689_v54 = vpop.f32.mrb[89].mxu1 }
 0x220   : > { %v5935_v43 = vpop.f32.mrb[74].mxu0 }
 0x221   : > { %v8448_v61 = vadd.f32 %v5935_v43, %v8364_v33  ;;  %v1822_v63 = vpop.f32.mrb[75].mxu0 }
 0x222   : > { %v1692_v60 = vpop.f32.mrb[90].mxu1  ;;  %v8451_v19 = vadd.f32 %v1822_v63, %v8360_v15 }
 0x223   : > { %v8453_v44 = vadd.f32 %v1692_v60, %v1468_v12  ;;  %v1694_v45 = vpop.f32.mrb[91].mxu1 }
 0x224   : > { %v5938_v17 = vpop.f32.mrb[76].mxu0 }
 0x225   : > { %v8456_v7 = vadd.f32 %v5938_v17, %v8372_v16  ;;  %v1832_v22 = vpop.f32.mrb[77].mxu0 }
 0x226   : > { %v1697_v59 = vpop.f32.mrb[92].mxu1  ;;  %v8459_v33 = vadd.f32 %v1832_v22, %v8368_v62 }
 0x227   : > { %v1698_v2 = vadd.f32 %v1697_v59, %v1473_v49  ;;  %v1699_v38 = vpop.f32.mrb[93].mxu1 }
 0x228   : > { %v5941_v15 = vpop.f32.mrb[78].mxu0 }
 0x229   : > { %v8463_v12 = vadd.f32 %v5941_v15, %v8379_v50  ;;  %v1842_v58 = vpop.f32.mrb[79].mxu0 }
 0x22a   : > { %v1702_v16 = vpop.f32.mrb[94].mxu1  ;;  %v8466_v25 = vadd.f32 %v1842_v58, %v8376_v55 }
 0x22b   : > { %v1703_v62 = vadd.f32 %v1702_v16, %v8403_v28  ;;  %v1704_v52 = vpop.f32.mrb[95].mxu1 }
 0x22c   : > { %v5944_v49 = vpop.f32.mrb[80].mxu0 }
 0x22d   : > { %v8470_v31 = vadd.f32 %v5944_v49, %v8385_v8  ;;  %v1852_v41 = vpop.f32.mrb[81].mxu0 }
 0x22e   : > { %v8473_v50 = vadd.f32 %v1852_v41, %v8382_v24  ;;  %v2142_v5 = vpop.f32.mrb[96].mxu1 }
 0x22f   : > { %v2144_v27 = vpop.f32.mrb[97].mxu1 }
 0x230   : > { %v5947_v39 = vpop.f32.mrb[82].mxu0 }
 0x231   : > { %v8476_v55 = vadd.f32 %v5947_v39, %v8391_v21  ;;  %v1862_v32 = vpop.f32.mrb[83].mxu0 }
 0x232   : > { %v8479_v28 = vadd.f32 %v1862_v32, %v8388_v48  ;;  %v2147_v20 = vpop.f32.mrb[98].mxu1 }
 0x233   : > { %v2149_v0 = vpop.f32.mrb[99].mxu1 }
 0x234   : > { %v5950_v54 = vpop.f32.mrb[84].mxu0 }
 0x235   : > { %v8482_v8 = vadd.f32 %v5950_v54, %v8397_v23  ;;  %v1872_v43 = vpop.f32.mrb[85].mxu0 }
 0x236   : > { %v8485_v24 = vadd.f32 %v1872_v43, %v8394_v56  ;;  %v2152_v63 = vpop.f32.mrb[100].mxu1 }
 0x237   : > { %v2154_v60 = vpop.f32.mrb[101].mxu1 }
 0x238   : > { %v5953_v45 = vpop.f32.mrb[86].mxu0 }
 0x239   : > { %v8488_v21 = vadd.f32 %v5953_v45, %v8405_v1  ;;  %v1882_v17 = vpop.f32.mrb[87].mxu0 }
 0x23a   : > { %v8491_v48 = vadd.f32 %v1882_v17, %v8400_v42  ;;  %v2157_v11 = vpop.f32.mrb[102].mxu1 }
 0x23b   : > { %v2159_v34 = vpop.f32.mrb[103].mxu1 }
 0x23c   : > { %v5956_v22 = vpop.f32.mrb[88].mxu0 }
 0x23d   : > { %v8494_v23 = vadd.f32 %v5956_v22, %v8421_v13  ;;  %v1892_v26 = vpop.f32.mrb[89].mxu0 }
 0x23e   : > { %v8497_v56 = vadd.f32 %v1892_v26, %v8413_v36  ;;  %v2162_v59 = vpop.f32.mrb[104].mxu1 }
 0x23f   : > { %v2164_v38 = vpop.f32.mrb[105].mxu1 }
 0x240   : > { %v5959_v15 = vpop.f32.mrb[90].mxu0 }
 0x241   : > { %v8500_v1 = vadd.f32 %v5959_v15, %v8437_v9  ;;  %v1902_v58 = vpop.f32.mrb[91].mxu0 }
 0x242   : > { %v8503_v42 = vadd.f32 %v1902_v58, %v8429_v18  ;;  %v2167_v14 = vpop.f32.mrb[106].mxu1 }
 0x243   : > { %v2169_v46 = vpop.f32.mrb[107].mxu1 }
 0x244   : > { %v5962_v16 = vpop.f32.mrb[92].mxu0 }
 0x245   : > { %v8506_v13 = vadd.f32 %v5962_v16, %v8453_v44  ;;  %v1912_v29 = vpop.f32.mrb[93].mxu0 }
 0x246   : > { %v8509_v36 = vadd.f32 %v1912_v29, %v8445_v57  ;;  %v2172_v52 = vpop.f32.mrb[108].mxu1 }
 0x247   : > { %v2174_v49 = vpop.f32.mrb[109].mxu1 }
 0x248   : > { %v5965_v41 = vpop.f32.mrb[94].mxu0 }
 0x249   : > { %v8511_v27 = vadd.f32 %v5965_v41, %v1703_v62  ;;  %v1922_v9 = vpop.f32.mrb[95].mxu0 }
 0x24a   : > { %v8513_v39 = vadd.f32 %v1922_v9, %v1698_v2  ;;  %v2177_v18 = vpop.f32.mrb[110].mxu1 }
 0x24b   : > { %v2179_v32 = vpop.f32.mrb[111].mxu1 }
 0x24c   : > { %v6000_v0 = vpop.f32.mrb[96].mxu0 }
 0x24d   : > { %v2373_v54 = vadd.f32 %v6000_v0, %v2147_v20  ;;  %v2367_v43 = vpop.f32.mrb[97].mxu0 }
 0x24e   : > { %v2182_v60 = vpop.f32.mrb[112].mxu1  ;;  %v2368_v44 = vadd.f32 %v2367_v43, %v2142_v5 }
 0x24f   : > { %v8516_v45 = vadd.f32 %v2373_v54, %v8408_v47  ;;  %v2184_v57 = vpop.f32.mrb[113].mxu1 }
 0x250   : > { %v8519_v17 = vadd.f32 %v2368_v44, %v8411_v51  ;;  %v6003_v34 = vpop.f32.mrb[98].mxu0 }
 0x251   : > { %v2383_v62 = vadd.f32 %v6003_v34, %v2157_v11  ;;  %v2377_v22 = vpop.f32.mrb[99].mxu0  ;;  %v2596_v2 = vmul.f32 %v8516_v45, %v8516_v45 }
 0x252   : > { %v2595_v26 = vmul.f32 %v8519_v17, %v8519_v17  ;;  %v2187_v20 = vpop.f32.mrb[114].mxu1  ;;  %v2378_v38 = vadd.f32 %v2377_v22, %v2152_v63  ;;  %v2558_v15 = vadd.f32 %v8516_v45, %v8519_v17 }
 0x253   : > { %v8526_v5 = vadd.f32 %v2383_v62, %v8416_v3  ;;  %v2189_v47 = vpop.f32.mrb[115].mxu1 }
 0x254   : > { %v8531_v51 = vadd.f32 %v2378_v38, %v8419_v4  ;;  %v6006_v11 = vpop.f32.mrb[100].mxu0  ;;  %v2627_v16 = vadd.f32 %v2596_v2, %v2595_v26 }
 0x255   : > { %v2393_v58 = vadd.f32 %v6006_v11, %v2167_v14  ;;  %v2387_v46 = vpop.f32.mrb[101].mxu0  ;;  %v2598_v32 = vmul.f32 %v8526_v5, %v8526_v5 }
 0x256   : > { %v2559_v29 = vadd.f32 %v2558_v15, %v8531_v51  ;;  %v2597_v49 = vmul.f32 %v8531_v51, %v8531_v51  ;;  %v2192_v63 = vpop.f32.mrb[116].mxu1  ;;  %v2388_v41 = vadd.f32 %v2387_v46, %v2162_v59 }
 0x257   : > { %v8537_v3 = vadd.f32 %v2393_v58, %v8424_v35  ;;  %v2194_v9 = vpop.f32.mrb[117].mxu1 }
 0x258   : > { %v2628_v4 = vadd.f32 %v2627_v16, %v2597_v49  ;;  %v8542_v0 = vadd.f32 %v2388_v41, %v8427_v53  ;;  %v2560_v14 = vadd.f32 %v2559_v29, %v8526_v5  ;;  %v6009_v54 = vpop.f32.mrb[102].mxu0 }
 0x259   : > { %v2403_v43 = vadd.f32 %v6009_v54, %v2177_v18  ;;  %v2397_v44 = vpop.f32.mrb[103].mxu0  ;;  %v2600_v53 = vmul.f32 %v8537_v3, %v8537_v3 }
 0x25a   : > { %v2561_v57 = vadd.f32 %v2560_v14, %v8542_v0  ;;  %v2599_v59 = vmul.f32 %v8542_v0, %v8542_v0  ;;  %v2629_v35 = vadd.f32 %v2628_v4, %v2598_v32  ;;  %v2197_v34 = vpop.f32.mrb[118].mxu1  ;;  %v2398_v62 = vadd.f32 %v2397_v44, %v2172_v52 }
 0x25b   : > { %v8549_v22 = vadd.f32 %v2403_v43, %v8432_v40  ;;  %v2199_v2 = vpop.f32.mrb[119].mxu1 }
 0x25c   : > { %v2630_v26 = vadd.f32 %v2629_v35, %v2599_v59  ;;  %v8554_v38 = vadd.f32 %v2398_v62, %v8435_v30  ;;  %v2562_v18 = vadd.f32 %v2561_v57, %v8537_v3  ;;  %v6012_v47 = vpop.f32.mrb[104].mxu0  ;;  %v3464_v35 = vld [vmem:[#allocation8 + $0x190] sm:$0xff]  ;;  %v3465_v62 = vld [vmem:[#allocation8 + $0x198] sm:$0xff] }
 0x25d   : > { %v2413_v15 = vadd.f32 %v6012_v47, %v2187_v20  ;;  %v2407_v11 = vpop.f32.mrb[105].mxu0  ;;  %v2602_v30 = vmul.f32 %v8549_v22, %v8549_v22 }
 0x25e   : > { %v2563_v58 = vadd.f32 %v2562_v18, %v8554_v38  ;;  %v2601_v52 = vmul.f32 %v8554_v38, %v8554_v38  ;;  %v2631_v40 = vadd.f32 %v2630_v26, %v2600_v53  ;;  %v2202_v46 = vpop.f32.mrb[120].mxu1  ;;  %v2408_v16 = vadd.f32 %v2407_v11, %v2182_v60 }
 0x25f   : > { %v8561_v29 = vadd.f32 %v2413_v15, %v8440_v10  ;;  %v2204_v49 = vpop.f32.mrb[121].mxu1  ;;  %v6530_v18 = vpack.c.bf16 %v3465_v62, %v3464_v35 }
 0x260   : > { %v2632_v41 = vadd.f32 %v2631_v40, %v2601_v52  ;;  %v8566_v9 = vadd.f32 %v2408_v16, %v8443_v6  ;;  %v2564_v20 = vadd.f32 %v2563_v58, %v8549_v22  ;;  %v6015_v32 = vpop.f32.mrb[106].mxu0  ;;  %v3466_v16 = vld [vmem:[#allocation8 + $0x1a0] sm:$0xff]  ;;  %v3467_v49 = vld [vmem:[#allocation8 + $0x1a8] sm:$0xff] }
 0x261   : > { %v2423_v4 = vadd.f32 %v6015_v32, %v2197_v34  ;;  %v2417_v14 = vpop.f32.mrb[107].mxu0  ;;  %v2604_v57 = vmul.f32 %v8561_v29, %v8561_v29  ;;  %6531 = vmatpush1.bf16.msra.mxu0 %v6530_v18  ;;  %v6533_v32 = vpack.c.bf16 %v3467_v49, %v3466_v16 }
 0x262   : > { %v2565_v54 = vadd.f32 %v2564_v20, %v8566_v9  ;;  %v2603_v60 = vmul.f32 %v8566_v9, %v8566_v9  ;;  %v2633_v10 = vadd.f32 %v2632_v41, %v2602_v30  ;;  %v2207_v43 = vpop.f32.mrb[122].mxu1  ;;  %v2418_v44 = vadd.f32 %v2417_v14, %v2192_v63  ;;  %6532 = vmatprep.subr.bf16.mxu0 %v10762_v37 }
 0x263   : > { %v8575_v59 = vadd.f32 %v2423_v4, %v8448_v61  ;;  %v2209_v6 = vpop.f32.mrb[123].mxu1 }
 0x264   : > { %v2634_v2 = vadd.f32 %v2633_v10, %v2603_v60  ;;  %v8578_v34 = vadd.f32 %v2418_v44, %v8451_v19  ;;  %v2566_v53 = vadd.f32 %v2565_v54, %v8561_v29  ;;  %v6018_v26 = vpop.f32.mrb[108].mxu0  ;;  %v3469_v44 = vld [vmem:[#allocation8 + $0x1b8] sm:$0xff] }
 0x265   : > { %v2433_v47 = vadd.f32 %v6018_v26, %v2207_v43  ;;  %v2427_v15 = vpop.f32.mrb[109].mxu0  ;;  %6534 = vmatpush1.bf16.msra.mxu0 %v6533_v32  ;;  %v3468_v43 = vld [vmem:[#allocation8 + $0x1b0] sm:$0xff] }
 0x266   : > { %v2605_v63 = vmul.f32 %v8578_v34, %v8578_v34  ;;  %v2635_v11 = vadd.f32 %v2634_v2, %v2604_v57  ;;  %v2212_v58 = vpop.f32.mrb[124].mxu1  ;;  %v2428_v61 = vadd.f32 %v2427_v15, %v2202_v46  ;;  %v2567_v52 = vadd.f32 %v2566_v53, %v8578_v34  ;;  %6535 = vmatprep.subr.bf16.mxu0 %v10762_v37  ;;  %v3472_v32 = vld [vmem:[#allocation8 + $0x1d0] sm:$0xff] }
 0x267   : > { %v8585_v40 = vadd.f32 %v2433_v47, %v8456_v7  ;;  %v2214_v19 = vpop.f32.mrb[125].mxu1  ;;  %v2606_v46 = vmul.f32 %v8575_v59, %v8575_v59  ;;  %v6536_v62 = vpack.c.bf16 %v3469_v44, %v3468_v43 }
 0x268   : > { %v2636_v30 = vadd.f32 %v2635_v11, %v2605_v63  ;;  %v8589_v41 = vadd.f32 %v2428_v61, %v8459_v33  ;;  %v6021_v20 = vpop.f32.mrb[110].mxu0  ;;  %v2568_v7 = vadd.f32 %v2567_v52, %v8575_v59  ;;  %v3470_v63 = vld [vmem:[#allocation8 + $0x1c0] sm:$0xff]  ;;  %v3471_v11 = vld [vmem:[#allocation8 + $0x1c8] sm:$0xff] }
 0x269   : > { %v2437_v4 = vpop.f32.mrb[111].mxu0  ;;  %6537 = vmatpush1.bf16.msra.mxu0 %v6536_v62 }
 0x26a   : > { %v2217_v14 = vpop.f32.mrb[126].mxu1  ;;  %v2438_v54 = vadd.f32 %v2437_v4, %v2212_v58  ;;  %v2607_v33 = vmul.f32 %v8589_v41, %v8589_v41  ;;  %v2637_v57 = vadd.f32 %v2636_v30, %v2606_v46  ;;  %v2569_v18 = vadd.f32 %v2568_v7, %v8589_v41  ;;  %6538 = vmatprep.subr.bf16.mxu0 %v10762_v37  ;;  %v3473_v4 = vld [vmem:[#allocation8 + $0x1d8] sm:$0xff] }
 0x26b   : > { %v2443_v60 = vadd.f32 %v6021_v20, %v2217_v14  ;;  %v2219_v10 = vpop.f32.mrb[127].mxu1 }
 0x26c   : > { %v8598_v6 = vadd.f32 %v2438_v54, %v8466_v25  ;;  %v6024_v35 = vpop.f32.mrb[112].mxu0  ;;  %v2638_v58 = vadd.f32 %v2637_v57, %v2607_v33  ;;  %v6539_v25 = vpack.c.bf16 %v3471_v11, %v3470_v63  ;;  %v2570_v49 = vadd.f32 %v2569_v18, %v8585_v40  ;;  %v3474_v57 = vld [vmem:[#allocation8 + $0x1e0] sm:$0xff] }
 0x26d   : > { %v8601_v2 = vadd.f32 %v2443_v60, %v8463_v12  ;;  %v2447_v53 = vpop.f32.mrb[113].mxu0  ;;  %v2608_v12 = vmul.f32 %v8585_v40, %v8585_v40  ;;  %v6542_v54 = vpack.c.bf16 %v3473_v4, %v3472_v32 }
 0x26e   : > { %v2222_v26 = vpop.f32.mrb[128].mxu1  ;;  %6540 = vmatpush1.bf16.msra.mxu0 %v6539_v25  ;;  %v2609_v46 = vmul.f32 %v8598_v6, %v8598_v6  ;;  %v2571_v43 = vadd.f32 %v2570_v49, %v8598_v6  ;;  %v3476_v25 = vld [vmem:[#allocation8 + $0x1f0] sm:$0xff] }
 0x26f   : > { %v2448_v47 = vadd.f32 %v2447_v53, %v2222_v26  ;;  %v2224_v15 = vpop.f32.mrb[129].mxu1  ;;  %6541 = vmatprep.subr.bf16.mxu0 %v10762_v37  ;;  %v2639_v14 = vadd.f32 %v2638_v58, %v2608_v12 }
 0x270   : > { %v6027_v61 = vpop.f32.mrb[114].mxu0  ;;  %v2572_v63 = vadd.f32 %v2571_v43, %v8601_v2 }
 0x271   : > { %v8606_v52 = vadd.f32 %v2448_v47, %v8473_v50  ;;  %v2457_v19 = vpop.f32.mrb[115].mxu0  ;;  %v2640_v62 = vadd.f32 %v2639_v14, %v2609_v46  ;;  %v2610_v47 = vmul.f32 %v8601_v2, %v8601_v2 }
 0x272   : > { %v2227_v16 = vpop.f32.mrb[130].mxu1  ;;  %6543 = vmatpush1.bf16.msra.mxu0 %v6542_v54  ;;  %v3478_v54 = vld [vmem:[#allocation8 + $0x200] sm:$0xff] }
 0x273   : > { %v2453_v30 = vadd.f32 %v6024_v35, %v2227_v16  ;;  %v2229_v20 = vpop.f32.mrb[131].mxu1  ;;  %6544 = vmatprep.subr.bf16.mxu0 %v10762_v37  ;;  %v3475_v35 = vld [vmem:[#allocation8 + $0x1e8] sm:$0xff]  ;;  %v2611_v12 = vmul.f32 %v8606_v52, %v8606_v52  ;;  %v2641_v16 = vadd.f32 %v2640_v62, %v2610_v47  ;;  %v2573_v4 = vadd.f32 %v2572_v63, %v8606_v52  ;;  %v3497_v63 = vld [vmem:[#allocation8 + $0x298] sm:$0xff] }
 0x274   : > { %v6030_v50 = vpop.f32.mrb[116].mxu0  ;;  %v6545_v26 = vpack.c.bf16 %v3475_v35, %v3474_v57 }
 0x275   : > { %v8615_v7 = vadd.f32 %v2453_v30, %v8470_v31  ;;  %v2467_v60 = vpop.f32.mrb[117].mxu0  ;;  %v2642_v43 = vadd.f32 %v2641_v16, %v2611_v12  ;;  %v3480_v12 = vld [vmem:[#allocation8 + $0x210] sm:$0xff] }
 0x276   : > { %v2232_v10 = vpop.f32.mrb[132].mxu1  ;;  %6546 = vmatpush1.bf16.msra.mxu0 %v6545_v26 }
 0x277   : > { %v2458_v44 = vadd.f32 %v2457_v19, %v2232_v10  ;;  %v2234_v33 = vpop.f32.mrb[133].mxu1  ;;  %6547 = vmatprep.subr.bf16.mxu0 %v10762_v37  ;;  %v3477_v19 = vld [vmem:[#allocation8 + $0x1f8] sm:$0xff]  ;;  %v3479_v10 = vld [vmem:[#allocation8 + $0x208] sm:$0xff]  ;;  %v2574_v57 = vadd.f32 %v2573_v4, %v8615_v7 }
 0x278   : > { %v8619_v53 = vpop.f32.mrb[118].mxu0  ;;  %v6548_v49 = vpack.c.bf16 %v3477_v19, %v3476_v25  ;;  %v6551_v33 = vpack.c.bf16 %v3479_v10, %v3478_v54  ;;  %v3498_v10 = vld [vmem:[#allocation8 + $0x2a0] sm:$0xff] }
 0x279   : > { %v8622_v18 = vadd.f32 %v2458_v44, %v8479_v28  ;;  %v2477_v31 = vpop.f32.mrb[119].mxu0 }
 0x27a   : > { %v2237_v15 = vpop.f32.mrb[134].mxu1  ;;  %6549 = vmatpush1.bf16.msra.mxu0 %v6548_v49 }
 0x27b   : > { %v2463_v11 = vadd.f32 %v6027_v61, %v2237_v15  ;;  %v2239_v58 = vpop.f32.mrb[135].mxu1  ;;  %v2612_v61 = vmul.f32 %v8615_v7, %v8615_v7  ;;  %6550 = vmatprep.subr.bf16.mxu0 %v10762_v37  ;;  %v3496_v15 = vld [vmem:[#allocation8 + $0x290] sm:$0xff] }
 0x27c   : > { %v8630_v28 = vpop.f32.mrb[120].mxu0  ;;  %v6578_v19 = vpack.c.bf16 %v3497_v63, %v3496_v15  ;;  %v3483_v15 = vld [vmem:[#allocation8 + $0x228] sm:$0xff] }
 0x27d   : > { %v8633_v30 = vadd.f32 %v2463_v11, %v8476_v55  ;;  %v8635_v20 = vpop.f32.mrb[121].mxu0  ;;  %v2613_v55 = vmul.f32 %v8622_v18, %v8622_v18  ;;  %v2575_v11 = vadd.f32 %v2574_v57, %v8622_v18 }
 0x27e   : > { %v2242_v32 = vpop.f32.mrb[136].mxu1  ;;  %6552 = vmatpush1.bf16.msra.mxu0 %v6551_v33  ;;  %6579 = vmatprep.subr.bf16.mxu1 %v6578_v19 }
 0x27f   : > { %v2468_v46 = vadd.f32 %v2467_v60, %v2242_v32  ;;  %v2244_v14 = vpop.f32.mrb[137].mxu1  ;;  %v2643_v60 = vadd.f32 %v2642_v43, %v2612_v61  ;;  %v2614_v26 = vmul.f32 %v8633_v30, %v8633_v30  ;;  %6553 = vmatprep.subr.bf16.mxu0 %v10762_v37  ;;  %v2576_v4 = vadd.f32 %v2575_v11, %v8633_v30  ;;  %v3499_v43 = vld [vmem:[#allocation8 + $0x2a8] sm:$0xff] }
 0x280   : > { %v8643_v44 = vpop.f32.mrb[122].mxu0  ;;  %6581 = vmatpush3.bf16.msra.mxu1 %v6578_v19 }
 0x281   : > { %v8647_v35 = vadd.f32 %v2468_v46, %v8485_v24  ;;  %v8649_v62 = vpop.f32.mrb[123].mxu0  ;;  %v3481_v24 = vld [vmem:[#allocation8 + $0x218] sm:$0xff]  ;;  %v2644_v16 = vadd.f32 %v2643_v60, %v2613_v55 }
 0x282   : > { %v2247_v47 = vpop.f32.mrb[138].mxu1  ;;  %v6554_v32 = vpack.c.bf16 %v3481_v24, %v3480_v12  ;;  %v3500_v24 = vld [vmem:[#allocation8 + $0x2b0] sm:$0xff] }
 0x283   : > { %v2473_v58 = vadd.f32 %v6030_v50, %v2247_v47  ;;  %v2249_v25 = vpop.f32.mrb[139].mxu1  ;;  %v2615_v49 = vmul.f32 %v8647_v35, %v8647_v35  ;;  %v2645_v50 = vadd.f32 %v2644_v16, %v2614_v26  ;;  %v2577_v55 = vadd.f32 %v2576_v4, %v8647_v35  ;;  %v3501_v16 = vld [vmem:[#allocation8 + $0x2b8] sm:$0xff] }
 0x284   : > { %v8657_v61 = vpop.f32.mrb[124].mxu0  ;;  %6555 = vmatpush1.bf16.msra.mxu0 %v6554_v32  ;;  %v6582_v47 = vpack.c.bf16 %v3499_v43, %v3498_v10  ;;  %v3485_v10 = vld [vmem:[#allocation8 + $0x238] sm:$0xff] }
 0x285   : > { %v8661_v46 = vadd.f32 %v2473_v58, %v8482_v8  ;;  %v8663_v14 = vpop.f32.mrb[125].mxu0  ;;  %6556 = vmatprep.subr.bf16.mxu0 %v10762_v37  ;;  %v3482_v8 = vld [vmem:[#allocation8 + $0x220] sm:$0xff]  ;;  %v2646_v63 = vadd.f32 %v2645_v50, %v2615_v49 }
 0x286   : > { %v2252_v54 = vpop.f32.mrb[140].mxu1  ;;  %v6557_v26 = vpack.c.bf16 %v3483_v15, %v3482_v8  ;;  %6583 = vmatprep.subr.bf16.mxu1 %v6582_v47 }
 0x287   : > { %v2616_v33 = vmul.f32 %v8661_v46, %v8661_v46  ;;  %v2478_v57 = vadd.f32 %v2477_v31, %v2252_v54  ;;  %v2254_v60 = vpop.f32.mrb[141].mxu1  ;;  %v2578_v58 = vadd.f32 %v2577_v55, %v8661_v46  ;;  %6585 = vmatpush3.bf16.msra.mxu1 %v6582_v47  ;;  %v3484_v54 = vld [vmem:[#allocation8 + $0x230] sm:$0xff]  ;;  %v3503_v47 = vld [vmem:[#allocation8 + $0x2c8] sm:$0xff] }
 0x288   : > { %v8669_v11 = vpop.f32.mrb[126].mxu0  ;;  %6558 = vmatpush1.bf16.msra.mxu0 %v6557_v26  ;;  %v6560_v43 = vpack.c.bf16 %v3485_v10, %v3484_v54  ;;  %v3502_v60 = vld [vmem:[#allocation8 + $0x2c0] sm:$0xff]  ;;  %v3488_v10 = vld [vmem:[#allocation8 + $0x250] sm:$0xff] }
 0x289   : > { %v8673_v25 = vadd.f32 %v2478_v57, %v8491_v48  ;;  %v8675_v19 = vpop.f32.mrb[127].mxu0  ;;  %v2647_v12 = vadd.f32 %v2646_v63, %v2616_v33  ;;  %6559 = vmatprep.subr.bf16.mxu0 %v10762_v37  ;;  %v6586_v48 = vpack.c.bf16 %v3501_v16, %v3500_v24  ;;  %v6590_v26 = vpack.c.bf16 %v3503_v47, %v3502_v60  ;;  %v3506_v47 = vld [vmem:[#allocation8 + $0x2e0] sm:$0xff] }
 0x28a   : > { %v2257_v31 = vpop.f32.mrb[142].mxu1 }
 0x28b   : > { %v2579_v32 = vadd.f32 %v2578_v58, %v8673_v25  ;;  %v2617_v49 = vmul.f32 %v8673_v25, %v8673_v25  ;;  %v2483_v4 = vadd.f32 %v8619_v53, %v2257_v31  ;;  %v2259_v50 = vpop.f32.mrb[143].mxu1  ;;  %6587 = vmatprep.subr.bf16.mxu1 %v6586_v48  ;;  %v3486_v58 = vld [vmem:[#allocation8 + $0x240] sm:$0xff] }
 0x28c   : > { %6561 = vmatpush1.bf16.msra.mxu0 %v6560_v43  ;;  %6589 = vmatpush3.bf16.msra.mxu1 %v6586_v48 }
 0x28d   : > { %v2648_v55 = vadd.f32 %v2647_v12, %v2617_v49  ;;  %v8683_v33 = vadd.f32 %v2483_v4, %v8488_v21  ;;  %6562 = vmatprep.subr.bf16.mxu0 %v10762_v37  ;;  %v3487_v21 = vld [vmem:[#allocation8 + $0x248] sm:$0xff]  ;;  %6591 = vmatprep.subr.bf16.mxu1 %v6590_v26  ;;  %v3505_v49 = vld [vmem:[#allocation8 + $0x2d8] sm:$0xff] }
 0x28e   : > { %v2262_v57 = vpop.f32.mrb[144].mxu1  ;;  %v6563_v12 = vpack.c.bf16 %v3487_v21, %v3486_v58  ;;  %v3490_v58 = vld [vmem:[#allocation8 + $0x260] sm:$0xff]  ;;  %v3508_v21 = vld [vmem:[#allocation8 + $0x2f0] sm:$0xff] }
 0x28f   : > { %v2580_v8 = vadd.f32 %v2579_v32, %v8683_v33  ;;  %v2618_v53 = vmul.f32 %v8683_v33, %v8683_v33  ;;  %v2488_v15 = vadd.f32 %v8635_v20, %v2262_v57  ;;  %v2264_v63 = vpop.f32.mrb[145].mxu1  ;;  %v3504_v32 = vld [vmem:[#allocation8 + $0x2d0] sm:$0xff] }
 0x290   : > { %6564 = vmatpush1.bf16.msra.mxu0 %v6563_v12  ;;  %6593 = vmatpush3.bf16.msra.mxu1 %v6590_v26  ;;  %v6594_v54 = vpack.c.bf16 %v3505_v49, %v3504_v32  ;;  %v3493_v32 = vld [vmem:[#allocation8 + $0x278] sm:$0xff] }
 0x291   : > { %v2649_v31 = vadd.f32 %v2648_v55, %v2618_v53  ;;  %v8691_v24 = vadd.f32 %v2488_v15, %v8497_v56  ;;  %6565 = vmatprep.subr.bf16.mxu0 %v10762_v37  ;;  %v3489_v56 = vld [vmem:[#allocation8 + $0x258] sm:$0xff] }
 0x292   : > { %v2267_v16 = vpop.f32.mrb[146].mxu1  ;;  %v6566_v43 = vpack.c.bf16 %v3489_v56, %v3488_v10  ;;  %6595 = vmatprep.subr.bf16.mxu1 %v6594_v54 }
 0x293   : > { %v2581_v4 = vadd.f32 %v2580_v8, %v8691_v24  ;;  %v2619_v20 = vmul.f32 %v8691_v24, %v8691_v24  ;;  %v2493_v50 = vadd.f32 %v8630_v28, %v2267_v16  ;;  %v2269_v48 = vpop.f32.mrb[147].mxu1  ;;  %v3507_v8 = vld [vmem:[#allocation8 + $0x2e8] sm:$0xff]  ;;  %v3492_v16 = vld [vmem:[#allocation8 + $0x270] sm:$0xff] }
 0x294   : > { %6567 = vmatpush1.bf16.msra.mxu0 %v6566_v43  ;;  %6597 = vmatpush3.bf16.msra.mxu1 %v6594_v54  ;;  %v6598_v26 = vpack.c.bf16 %v3507_v8, %v3506_v47  ;;  %v3349_v43 = vld [vmem:[#allocation8 + $0x100] sm:$0xff] }
 0x295   : > { %v2650_v55 = vadd.f32 %v2649_v31, %v2619_v20  ;;  %v8699_v57 = vadd.f32 %v2493_v50, %v8494_v23  ;;  %6568 = vmatprep.subr.bf16.mxu0 %v10762_v37  ;;  %v3491_v23 = vld [vmem:[#allocation8 + $0x268] sm:$0xff]  ;;  %v3509_v31 = vld [vmem:[#allocation8 + $0x2f8] sm:$0xff] }
 0x296   : > { %v2272_v60 = vpop.f32.mrb[148].mxu1  ;;  %v6569_v12 = vpack.c.bf16 %v3491_v23, %v3490_v58  ;;  %6599 = vmatprep.subr.bf16.mxu1 %v6598_v26 }
 0x297   : > { %v2582_v53 = vadd.f32 %v2581_v4, %v8699_v57  ;;  %v2620_v28 = vmul.f32 %v8699_v57, %v8699_v57  ;;  %v2498_v15 = vadd.f32 %v8649_v62, %v2272_v60  ;;  %v2274_v63 = vpop.f32.mrb[149].mxu1  ;;  %v6602_v4 = vpack.c.bf16 %v3509_v31, %v3508_v21 }
 0x298   : > { %6570 = vmatpush1.bf16.msra.mxu0 %v6569_v12  ;;  %6601 = vmatpush3.bf16.msra.mxu1 %v6598_v26  ;;  %v6572_v62 = vpack.c.bf16 %v3493_v32, %v3492_v16 }
 0x299   : > { %v2651_v49 = vadd.f32 %v2650_v55, %v2620_v28  ;;  %v8707_v20 = vadd.f32 %v2498_v15, %v8503_v42  ;;  %6571 = vmatprep.subr.bf16.mxu0 %v10762_v37  ;;  %6603 = vmatprep.subr.bf16.mxu1 %v6602_v4  ;;  %v3350_v42 = vld [vmem:[#allocation8 + $0x108] sm:$0xff] }
 0x29a   : > { %v2277_v50 = vpop.f32.mrb[150].mxu1  ;;  %v8717_v47 = vpack.c.bf16 %v3350_v42, %v3349_v43 }
 0x29b   : > { %v2583_v48 = vadd.f32 %v2582_v53, %v8707_v20  ;;  %v2621_v54 = vmul.f32 %v8707_v20, %v8707_v20  ;;  %v2503_v10 = vadd.f32 %v8643_v44, %v2277_v50  ;;  %v2279_v56 = vpop.f32.mrb[151].mxu1 }
 0x29c   : > { %6573 = vmatpush1.bf16.msra.mxu0 %v6572_v62  ;;  %6605 = vmatpush3.bf16.msra.mxu1 %v6602_v4 }
 0x29d   : > { %v2652_v55 = vadd.f32 %v2651_v49, %v2621_v54  ;;  %v8715_v60 = vadd.f32 %v2503_v10, %v8500_v1  ;;  %6606 = vmatprep.subr.bf16.mxu1 %v10762_v37  ;;  %6655 = vmatprep.subr.bf16.mxu0 %v8717_v47 }
 0x29e   : > { %v2282_v8 = vpop.f32.mrb[152].mxu1 }
 0x29f   : > { %v2584_v53 = vadd.f32 %v2583_v48, %v8715_v60  ;;  %v2622_v44 = vmul.f32 %v8715_v60, %v8715_v60  ;;  %v2508_v28 = vadd.f32 %v8663_v14, %v2282_v8  ;;  %v2284_v15 = vpop.f32.mrb[153].mxu1 }
 0x2a1   : > { %v2653_v63 = vadd.f32 %v2652_v55, %v2622_v44  ;;  %v8726_v1 = vadd.f32 %v2508_v28, %v8509_v36 }
 0x2a2   : > { %v2287_v26 = vpop.f32.mrb[154].mxu1 }
 0x2a3   : > { %v2585_v58 = vadd.f32 %v2584_v53, %v8726_v1  ;;  %v2623_v23 = vmul.f32 %v8726_v1, %v8726_v1  ;;  %v2513_v21 = vadd.f32 %v8657_v61, %v2287_v26  ;;  %v2289_v12 = vpop.f32.mrb[155].mxu1 }
 0x2a5   : > { %v2654_v31 = vadd.f32 %v2653_v63, %v2623_v23  ;;  %v8733_v14 = vadd.f32 %v2513_v21, %v8506_v13 }
 0x2a6   : > { %v2292_v16 = vpop.f32.mrb[156].mxu1 }
 0x2a7   : > { %v2586_v32 = vadd.f32 %v2585_v58, %v8733_v14  ;;  %v2624_v36 = vmul.f32 %v8733_v14, %v8733_v14  ;;  %v2518_v49 = vadd.f32 %v8675_v19, %v2292_v16  ;;  %v2294_v4 = vpop.f32.mrb[157].mxu1 }
 0x2a9   : > { %v2655_v50 = vadd.f32 %v2654_v31, %v2624_v36  ;;  %v8740_v62 = vadd.f32 %v2518_v49, %v8513_v39 }
 0x2aa   : > { %v2297_v48 = vpop.f32.mrb[158].mxu1 }
 0x2ab   : > { %v2587_v61 = vadd.f32 %v2586_v32, %v8740_v62  ;;  %v2625_v13 = vmul.f32 %v8740_v62, %v8740_v62  ;;  %v2523_v54 = vadd.f32 %v8669_v11, %v2297_v48  ;;  %v2299_v10 = vpop.f32.mrb[159].mxu1 }
 0x2ad   : > { %v2656_v56 = vadd.f32 %v2655_v50, %v2625_v13  ;;  %v8747_v43 = vadd.f32 %v2523_v54, %v8511_v27 }
 0x2af   : > { %v2588_v19 = vadd.f32 %v2587_v61, %v8747_v43  ;;  %v2626_v42 = vmul.f32 %v8747_v43, %v8747_v43 }
 0x2b1   : > { %v2589_v39 = vrot.slane %v2588_v19, 4  ;;  %v2657_v55 = vadd.f32 %v2656_v56, %v2626_v42  ;;  %v3352_v42 = vld [vmem:[#allocation8 + $0x118] sm:$0xff] }
 0x2b3   : > { %v2590_v8 = vadd.f32 %v2589_v39, %v2588_v19  ;;  %v2658_v53 = vrot.slane %v2657_v55, 4  ;;  %v3351_v19 = vld [vmem:[#allocation8 + $0x110] sm:$0xff]  ;;  %v3353_v39 = vld [vmem:[#allocation8 + $0x120] sm:$0xff] }
 0x2b5   : > { %v2591_v44 = vrot.slane %v2590_v8, 2  ;;  %v2659_v28 = vadd.f32 %v2658_v53, %v2657_v55  ;;  %v3354_v55 = vld [vmem:[#allocation8 + $0x128] sm:$0xff] }
 0x2b7   : > { %v2592_v15 = vadd.f32 %v2591_v44, %v2590_v8  ;;  %v2660_v63 = vrot.slane %v2659_v28, 2  ;;  %v8782_v44 = vpack.c.bf16 %v3352_v42, %v3351_v19 }
 0x2b9   : > { %v2593_v26 = vrot.slane %v2592_v15, 1  ;;  %v2661_v11 = vadd.f32 %v2660_v63, %v2659_v28  ;;  %v8784_v28 = vpack.c.bf16 %v3354_v55, %v3353_v39 }
 0x2bb   : > { %v2594_v58 = vadd.f32 %v2593_v26, %v2592_v15  ;;  %v2662_v23 = vrot.slane %v2661_v11, 1 }
 0x2bd   : > { %v2663_v21 = vadd.f32 %v2662_v23, %v2661_v11  ;;  %v8752_v27 = vmul.f32 0.00390625, %v2594_v58  ;;  %v3355_v23 = vld [vmem:[#allocation8 + $0x130] sm:$0xff] }
 0x2bf   : > { %v2665_v12 = vmul.f32 0.00390625, %v2663_v21  ;;  %v2666_v31 = vmul.f32 %v8752_v27, %v8752_v27  ;;  %v2699_v16 = vsub.f32 %v8740_v62, %v8752_v27  ;;  %v2700_v32 = vsub.f32 %v8747_v43, %v8752_v27 }
 0x2c0   : > { %v2690_v50 = vsub.f32 %v8661_v46, %v8752_v27  ;;  %v2691_v48 = vsub.f32 %v8673_v25, %v8752_v27  ;;  %v2692_v61 = vsub.f32 %v8683_v33, %v8752_v27  ;;  %v2693_v13 = vsub.f32 %v8691_v24, %v8752_v27 }
 0x2c1   : > { %v2667_v36 = vsub.f32 %v2665_v12, %v2666_v31  ;;  %v2694_v62 = vsub.f32 %v8699_v57, %v8752_v27  ;;  %v2669_v8 = vsub.f32 %v8519_v17, %v8752_v27  ;;  %v2670_v53 = vsub.f32 %v8516_v45, %v8752_v27 }
 0x2c2   : > { %v2671_v15 = vsub.f32 %v8531_v51, %v8752_v27  ;;  %v2672_v63 = vsub.f32 %v8526_v5, %v8752_v27  ;;  %v2673_v26 = vsub.f32 %v8542_v0, %v8752_v27  ;;  %v2674_v11 = vsub.f32 %v8537_v3, %v8752_v27  ;;  %v3356_v5 = vld [vmem:[#allocation8 + $0x138] sm:$0xff] }
 0x2c3   : > { %v2668_v49 = vmax.f32 %v2667_v36, 0.0  ;;  %v2675_v17 = vsub.f32 %v8554_v38, %v8752_v27  ;;  %v2676_v45 = vsub.f32 %v8549_v22, %v8752_v27  ;;  %v2677_v58 = vsub.f32 %v8566_v9, %v8752_v27 }
 0x2c4   : > { %v2678_v51 = vsub.f32 %v8561_v29, %v8752_v27  ;;  %v2679_v0 = vsub.f32 %v8578_v34, %v8752_v27  ;;  %v2680_v3 = vsub.f32 %v8575_v59, %v8752_v27  ;;  %v2681_v38 = vsub.f32 %v8589_v41, %v8752_v27  ;;  %v8821_v59 = vld [vmem:[%s10629_s2] ss:$0 sm:$0xff] }
 0x2c5   : > { %v2701_v4 = vadd.f32 1e-05, %v2668_v49  ;;  %v2682_v22 = vsub.f32 %v8585_v40, %v8752_v27  ;;  %v2683_v9 = vsub.f32 %v8598_v6, %v8752_v27  ;;  %v2684_v29 = vsub.f32 %v8601_v2, %v8752_v27  ;;  %v8834_v49 = vld [vmem:[%s10630_s3] ss:$0 sm:$0xff] }
 0x2c6   : > { %v2685_v21 = vsub.f32 %v8606_v52, %v8752_v27  ;;  %v2686_v34 = vsub.f32 %v8615_v7, %v8752_v27  ;;  %v2687_v40 = vsub.f32 %v8622_v18, %v8752_v27  ;;  %v2688_v41 = vsub.f32 %v8633_v30, %v8752_v27 }
 0x2c7   : > { %6838 = vrsqrt.f32 %v2701_v4  ;;  %v2689_v6 = vsub.f32 %v8647_v35, %v8752_v27  ;;  %v8829_v2 = vpack.c.bf16 %v3356_v5, %v3355_v23  ;;  %v10765_v57 = vsub.f32 %v8715_v60, %v8752_v27 }
 0x2d1   : > { %v6839_v12 = vpop.eup %6838 }
 0x2d2   : > { %v2733_v52 = vmul.f32 %v6839_v12, %v2699_v16  ;;  %v2734_v31 = vmul.f32 %v6839_v12, %v2700_v32  ;;  %v2703_v7 = vmul.f32 %v6839_v12, %v2669_v8  ;;  %v2704_v36 = vmul.f32 %v6839_v12, %v2670_v53 }
 0x2d3   : > { %v2705_v4 = vmul.f32 %v6839_v12, %v2671_v15  ;;  %v2706_v19 = vmul.f32 %v6839_v12, %v2672_v63  ;;  %v2707_v18 = vmul.f32 %v6839_v12, %v2673_v26  ;;  %v2708_v42 = vmul.f32 %v6839_v12, %v2674_v11 }
 0x2d4   : > { %v2772_v30 = vmul.f32 %v8821_v59, %v2733_v52  ;;  %v2773_v39 = vmul.f32 %v8821_v59, %v2734_v31  ;;  %v2709_v35 = vmul.f32 %v6839_v12, %v2675_v17  ;;  %v2710_v55 = vmul.f32 %v6839_v12, %v2676_v45 }
 0x2d5   : > { %v2711_v23 = vmul.f32 %v6839_v12, %v2677_v58  ;;  %v2712_v16 = vmul.f32 %v6839_v12, %v2678_v51  ;;  %v2713_v32 = vmul.f32 %v6839_v12, %v2679_v0  ;;  %v2714_v8 = vmul.f32 %v6839_v12, %v2680_v3 }
 0x2d6   : > { %v2811_v53 = vadd.f32 %v8834_v49, %v2772_v30  ;;  %v2812_v5 = vadd.f32 %v8834_v49, %v2773_v39  ;;  %v2715_v43 = vmul.f32 %v6839_v12, %v2681_v38  ;;  %v2716_v56 = vmul.f32 %v6839_v12, %v2682_v22 }
 0x2d7   : > { %v2717_v15 = vmul.f32 %v6839_v12, %v2683_v9  ;;  %v2718_v63 = vmul.f32 %v6839_v12, %v2684_v29  ;;  %v2719_v26 = vmul.f32 %v6839_v12, %v2685_v21  ;;  %v2720_v11 = vmul.f32 %v6839_v12, %v2686_v34 }
 0x2d8   : > { %v2843_v10 = vmax.f32 %v2811_v53, 0.0  ;;  %v2844_v52 = vmax.f32 %v2812_v5, 0.0  ;;  %v2721_v54 = vmul.f32 %v6839_v12, %v2687_v40  ;;  %v2722_v31 = vmul.f32 %v6839_v12, %v2688_v41 }
 0x2d9   : > { %v2723_v17 = vmul.f32 %v6839_v12, %v2689_v6  ;;  %v2724_v45 = vmul.f32 %v6839_v12, %v2690_v50  ;;  %v2725_v58 = vmul.f32 %v6839_v12, %v2691_v48  ;;  %v2726_v51 = vmul.f32 %v6839_v12, %v2692_v61 }
 0x2da   : > { %v2860_v0 = vrot.slane %v2843_v10, 7  ;;  %v2876_v3 = vrot.slane %v2844_v52, 7  ;;  %v2924_v38 = vrot.slane %v2843_v10, 1  ;;  %v2940_v22 = vrot.slane %v2844_v52, 1  ;;  %3036 = vst [vmem:[#allocation2 + $0x320] sm:$0xff] %v2844_v52  ;;  %3035 = vst [vmem:[#allocation2 + $0x308] sm:$0xff] %v2843_v10 }
 0x2db   : > { %v3164_v9 = vrot.slane %v2844_v52, 6  ;;  %v2727_v46 = vmul.f32 %v6839_v12, %v2693_v13  ;;  %v2728_v25 = vmul.f32 %v6839_v12, %v2694_v62  ;;  %v10763_v50 = vsub.f32 %v8707_v20, %v8752_v27 }
 0x2dc   : > { %v2892_v61 = vsel %vm392_vm1, %v2860_v0, %v2876_v3  ;;  %v2908_v29 = vsel %vm392_vm1, %v2876_v3, %v2860_v0  ;;  %v2956_v10 = vsel %vm457_vm0, %v2924_v38, %v2940_v22  ;;  %v2972_v24 = vsel %vm457_vm0, %v2940_v22, %v2924_v38 }
 0x2dd   : > { %v2729_v33 = vmul.f32 %v6839_v12, %v10763_v50  ;;  %3004 = vst [vmem:[#allocation2 + $0x318] sm:$0xff] %v2892_v61  ;;  %3067 = vst [vmem:[#allocation2 + $0x310] sm:$0xff] %v2956_v10  ;;  %v2730_v20 = vmul.f32 %v6839_v12, %v10765_v57  ;;  %v10766_v13 = vsub.f32 %v8726_v1, %v8752_v27 }
 0x2de   : > { %3068 = vst [vmem:[#allocation2 + $0x328] sm:$0xff] %v2972_v24  ;;  %3003 = vst [vmem:[#allocation2 + $0x300] sm:$0xff] %v2908_v29  ;;  %v10767_v21 = vsub.f32 %v8733_v14, %v8752_v27  ;;  %v2742_v40 = vmul.f32 %v8821_v59, %v2703_v7  ;;  %v2743_v41 = vmul.f32 %v8821_v59, %v2704_v36 }
 0x2df   : > { %v2731_v62 = vmul.f32 %v6839_v12, %v10766_v13  ;;  %3196 = vst [vmem:[#allocation2 + $0x32f] sm:$0x1] %v3164_v9  ;;  %v2744_v6 = vmul.f32 %v8821_v59, %v2705_v4  ;;  %v2745_v30 = vmul.f32 %v8821_v59, %v2706_v19  ;;  %v2746_v60 = vmul.f32 %v8821_v59, %v2707_v18 }
 0x2e0   : > { %v2732_v34 = vmul.f32 %v6839_v12, %v10767_v21  ;;  %3132 = vst [vmem:[#allocation2 + $0x300] sm:$0x1] %v2924_v38  ;;  %v2747_v39 = vmul.f32 %v8821_v59, %v2708_v42  ;;  %v2748_v1 = vmul.f32 %v8821_v59, %v2709_v35  ;;  %v2749_v53 = vmul.f32 %v8821_v59, %v2710_v55 }
 0x2e1   : > { %v2750_v14 = vmul.f32 %v8821_v59, %v2711_v23  ;;  %v2751_v27 = vmul.f32 %v8821_v59, %v2712_v16  ;;  %v2752_v12 = vmul.f32 %v8821_v59, %v2713_v32  ;;  %v2753_v7 = vmul.f32 %v8821_v59, %v2714_v8 }
 0x2e2   : > { %v2754_v36 = vmul.f32 %v8821_v59, %v2715_v43  ;;  %v2755_v4 = vmul.f32 %v8821_v59, %v2716_v56  ;;  %v2756_v19 = vmul.f32 %v8821_v59, %v2717_v15  ;;  %v2757_v18 = vmul.f32 %v8821_v59, %v2718_v63 }
 0x2e3   : > { %v2758_v42 = vmul.f32 %v8821_v59, %v2719_v26  ;;  %v2759_v35 = vmul.f32 %v8821_v59, %v2720_v11  ;;  %v2760_v55 = vmul.f32 %v8821_v59, %v2721_v54  ;;  %v2761_v23 = vmul.f32 %v8821_v59, %v2722_v31 }
 0x2e4   : > { %v2762_v16 = vmul.f32 %v8821_v59, %v2723_v17  ;;  %v2763_v32 = vmul.f32 %v8821_v59, %v2724_v45  ;;  %v2764_v43 = vmul.f32 %v8821_v59, %v2725_v58  ;;  %v2765_v56 = vmul.f32 %v8821_v59, %v2726_v51 }
 0x2e5   : > { %v2766_v8 = vmul.f32 %v8821_v59, %v2727_v46  ;;  %v2767_v5 = vmul.f32 %v8821_v59, %v2728_v25  ;;  %v2768_v15 = vmul.f32 %v8821_v59, %v2729_v33  ;;  %v2769_v63 = vmul.f32 %v8821_v59, %v2730_v20 }
 0x2e6   : > { %v2770_v54 = vmul.f32 %v8821_v59, %v2731_v62  ;;  %v2771_v26 = vmul.f32 %v8821_v59, %v2732_v34  ;;  %v2781_v11 = vadd.f32 %v8834_v49, %v2742_v40  ;;  %v2782_v52 = vadd.f32 %v8834_v49, %v2743_v41 }
 0x2e7   : > { %v2783_v31 = vadd.f32 %v8834_v49, %v2744_v6  ;;  %v2784_v17 = vadd.f32 %v8834_v49, %v2745_v30  ;;  %v2785_v45 = vadd.f32 %v8834_v49, %v2746_v60  ;;  %v2786_v58 = vadd.f32 %v8834_v49, %v2747_v39 }
 0x2e8   : > { %v2787_v51 = vadd.f32 %v8834_v49, %v2748_v1  ;;  %v2788_v0 = vadd.f32 %v8834_v49, %v2749_v53  ;;  %v2789_v3 = vadd.f32 %v8834_v49, %v2750_v14  ;;  %v2790_v59 = vadd.f32 %v8834_v49, %v2751_v27 }
 0x2e9   : > { %v2791_v38 = vadd.f32 %v8834_v49, %v2752_v12  ;;  %v2792_v22 = vadd.f32 %v8834_v49, %v2753_v7  ;;  %v2793_v9 = vadd.f32 %v8834_v49, %v2754_v36  ;;  %v2794_v46 = vadd.f32 %v8834_v49, %v2755_v4 }
 0x2ea   : > { %v2795_v25 = vadd.f32 %v8834_v49, %v2756_v19  ;;  %v2796_v50 = vadd.f32 %v8834_v49, %v2757_v18  ;;  %v2797_v33 = vadd.f32 %v8834_v49, %v2758_v42  ;;  %v2798_v61 = vadd.f32 %v8834_v49, %v2759_v35 }
 0x2eb   : > { %v2799_v29 = vadd.f32 %v8834_v49, %v2760_v55  ;;  %v2800_v10 = vadd.f32 %v8834_v49, %v2761_v23  ;;  %v2801_v24 = vadd.f32 %v8834_v49, %v2762_v16  ;;  %v2802_v57 = vadd.f32 %v8834_v49, %v2763_v32 }
 0x2ec   : > { %v2803_v20 = vadd.f32 %v8834_v49, %v2764_v43  ;;  %v2804_v13 = vadd.f32 %v8834_v49, %v2765_v56  ;;  %v2805_v62 = vadd.f32 %v8834_v49, %v2766_v8  ;;  %v2806_v21 = vadd.f32 %v8834_v49, %v2767_v5 }
 0x2ed   : > { %v2807_v34 = vadd.f32 %v8834_v49, %v2768_v15  ;;  %v2808_v40 = vadd.f32 %v8834_v49, %v2769_v63  ;;  %v2809_v41 = vadd.f32 %v8834_v49, %v2770_v54  ;;  %v2810_v6 = vadd.f32 %v8834_v49, %v2771_v26 }
 0x2ee   : > { %v8935_v30 = vmax.f32 %v2781_v11, 0.0  ;;  %v8937_v60 = vmax.f32 %v2782_v52, 0.0  ;;  %v8939_v39 = vmax.f32 %v2783_v31, 0.0  ;;  %v8941_v1 = vmax.f32 %v2784_v17, 0.0 }
 0x2ef   : > { %v8943_v53 = vmax.f32 %v2785_v45, 0.0  ;;  %v8945_v14 = vmax.f32 %v2786_v58, 0.0  ;;  %v8947_v27 = vmax.f32 %v2787_v51, 0.0  ;;  %v8949_v12 = vmax.f32 %v2788_v0, 0.0 }
 0x2f0   : > { %v8951_v7 = vmax.f32 %v2789_v3, 0.0  ;;  %3005 = vst [vmem:[#allocation2 + $0x38] sm:$0xff] %v8935_v30  ;;  %3574 = vmatprep.mubr.f32.mxu0 %v8935_v30  ;;  %v8955_v49 = vmax.f32 %v2790_v59, 0.0  ;;  %v8957_v36 = vmax.f32 %v2791_v38, 0.0  ;;  %v8959_v4 = vmax.f32 %v2792_v22, 0.0  ;;  %3006 = vst [vmem:[#allocation2 + $0x50] sm:$0xff] %v8937_v60 }
 0x2f1   : > { %10768 = vst [vmem:[#allocation14_spill] sm:$0xff] %v8943_v53  ;;  %10769 = vst [vmem:[#allocation27_spill] sm:$0xff] %v8947_v27  ;;  %v8961_v19 = vmax.f32 %v2793_v9, 0.0  ;;  %v8967_v18 = vmax.f32 %v2794_v46, 0.0  ;;  %v8969_v42 = vmax.f32 %v2795_v25, 0.0  ;;  %v8971_v35 = vmax.f32 %v2796_v50, 0.0 }
 0x2f2   : > { %10770 = vst [vmem:[#allocation15_spill] sm:$0xff] %v8951_v7  ;;  %10771 = vst [vmem:[#allocation28_spill] sm:$0xff] %v8957_v36  ;;  %v8973_v55 = vmax.f32 %v2797_v33, 0.0  ;;  %v8979_v23 = vmax.f32 %v2798_v61, 0.0  ;;  %v8981_v16 = vmax.f32 %v2799_v29, 0.0  ;;  %v8983_v32 = vmax.f32 %v2800_v10, 0.0 }
 0x2f3   : > { %10772 = vst [vmem:[#allocation23_spill] sm:$0xff] %v8961_v19  ;;  %3009 = vst [vmem:[#allocation2 + $0x98] sm:$0xff] %v8943_v53  ;;  %v8985_v43 = vmax.f32 %v2801_v24, 0.0  ;;  %v8991_v56 = vmax.f32 %v2802_v57, 0.0  ;;  %v8993_v8 = vmax.f32 %v2803_v20, 0.0  ;;  %v8995_v5 = vmax.f32 %v2804_v13, 0.0 }
 0x2f4   : > { %3007 = vst [vmem:[#allocation2 + $0x68] sm:$0xff] %v8939_v39  ;;  %3008 = vst [vmem:[#allocation2 + $0x80] sm:$0xff] %v8941_v1  ;;  %v8997_v15 = vmax.f32 %v2805_v62, 0.0  ;;  %v9003_v63 = vmax.f32 %v2806_v21, 0.0  ;;  %v9005_v54 = vmax.f32 %v2807_v34, 0.0  ;;  %v9007_v26 = vmax.f32 %v2808_v40, 0.0 }
 0x2f5   : > { %10773 = vst [vmem:[#allocation16_spill] sm:$0xff] %v8969_v42  ;;  %10774 = vst [vmem:[#allocation29_spill] sm:$0xff] %v8973_v55  ;;  %v9009_v11 = vmax.f32 %v2809_v41, 0.0  ;;  %v9015_v52 = vmax.f32 %v2810_v6, 0.0  ;;  %v10668_v31 = vrot.slane %v8935_v30, 7  ;;  %v10672_v17 = vrot.slane %v8939_v39, 7 }
 0x2f6   : > { %3010 = vst [vmem:[#allocation2 + $0xb0] sm:$0xff] %v8945_v14  ;;  %3011 = vst [vmem:[#allocation2 + $0xc8] sm:$0xff] %v8947_v27  ;;  %v10669_v45 = vrot.slane %v8943_v53, 7  ;;  %v10670_v58 = vrot.slane %v8947_v27, 7  ;;  %v10671_v51 = vrot.slane %v8951_v7, 7  ;;  %v10675_v0 = vrot.slane %v8957_v36, 7 }
 0x2f7   : > { %3012 = vst [vmem:[#allocation2 + $0xe0] sm:$0xff] %v8949_v12  ;;  %3013 = vst [vmem:[#allocation2 + $0xf8] sm:$0xff] %v8951_v7  ;;  %v10673_v3 = vrot.slane %v8961_v19, 7  ;;  %v10674_v59 = vrot.slane %v8969_v42, 7  ;;  %v10676_v38 = vrot.slane %v8973_v55, 7  ;;  %v2861_v61 = vrot.slane %v8937_v60, 7 }
 0x2f8   : > { %10775 = vst [vmem:[#allocation17_spill] sm:$0xff] %v8981_v16  ;;  %10776 = vst [vmem:[#allocation30_spill] sm:$0xff] %v8985_v43  ;;  %v2862_v29 = vrot.slane %v8941_v1, 7  ;;  %v2863_v10 = vrot.slane %v8945_v14, 7  ;;  %v2864_v24 = vrot.slane %v8949_v12, 7  ;;  %v2865_v57 = vrot.slane %v8955_v49, 7 }
 0x2f9   : > { %3014 = vst [vmem:[#allocation2 + $0x110] sm:$0xff] %v8955_v49  ;;  %3015 = vst [vmem:[#allocation2 + $0x128] sm:$0xff] %v8957_v36  ;;  %v2866_v20 = vrot.slane %v8959_v4, 7  ;;  %v2867_v13 = vrot.slane %v8967_v18, 7  ;;  %v2868_v62 = vrot.slane %v8971_v35, 7  ;;  %v2869_v21 = vrot.slane %v8979_v23, 7 }
 0x2fa   : > { %3016 = vst [vmem:[#allocation2 + $0x140] sm:$0xff] %v8959_v4  ;;  %3017 = vst [vmem:[#allocation2 + $0x158] sm:$0xff] %v8961_v19  ;;  %v2870_v34 = vrot.slane %v8983_v32, 7  ;;  %v2871_v40 = vrot.slane %v8991_v56, 7  ;;  %v2872_v41 = vrot.slane %v8995_v5, 7  ;;  %v2873_v6 = vrot.slane %v9003_v63, 7 }
 0x2fb   : > { %10777 = vst [vmem:[#allocation24_spill] sm:$0xff] %v8993_v8  ;;  %3018 = vst [vmem:[#allocation2 + $0x170] sm:$0xff] %v8967_v18  ;;  %v2874_v33 = vrot.slane %v9007_v26, 7  ;;  %v2875_v50 = vrot.slane %v9015_v52, 7  ;;  %v9060_v25 = vsel %vm392_vm1, %v10668_v31, %v2861_v61  ;;  %v9066_v46 = vsel %vm392_vm1, %v10672_v17, %v2862_v29 }
 0x2fc   : > { %3019 = vst [vmem:[#allocation2 + $0x188] sm:$0xff] %v8969_v42  ;;  %3020 = vst [vmem:[#allocation2 + $0x1a0] sm:$0xff] %v8971_v35  ;;  %v9072_v9 = vsel %vm392_vm1, %v10669_v45, %v2863_v10  ;;  %v9078_v22 = vsel %vm392_vm1, %v10670_v58, %v2864_v24  ;;  %v9084_v31 = vsel %vm392_vm1, %v10671_v51, %v2865_v57  ;;  %v3154_v48 = vrot.slane %v8959_v4, 6 }
 0x2fd   : > { %3021 = vst [vmem:[#allocation2 + $0x1b8] sm:$0xff] %v8973_v55  ;;  %3022 = vst [vmem:[#allocation2 + $0x1d0] sm:$0xff] %v8979_v23  ;;  %v9091_v45 = vsel %vm392_vm1, %v10675_v0, %v2866_v20  ;;  %v9097_v58 = vsel %vm392_vm1, %v10673_v3, %v2867_v13  ;;  %v9103_v51 = vsel %vm392_vm1, %v10674_v59, %v2868_v62  ;;  %v10786_v3 = vrot.slane %v8981_v16, 7 }
 0x2fe   : > { %3023 = vst [vmem:[#allocation2 + $0x1e8] sm:$0xff] %v8981_v16  ;;  %3024 = vst [vmem:[#allocation2 + $0x200] sm:$0xff] %v8983_v32  ;;  %v9109_v17 = vsel %vm392_vm1, %v10676_v38, %v2869_v21  ;;  %v10788_v0 = vrot.slane %v8985_v43, 7 }
 0x2ff   : > { %3025 = vst [vmem:[#allocation2 + $0x218] sm:$0xff] %v8985_v43  ;;  %3026 = vst [vmem:[#allocation2 + $0x230] sm:$0xff] %v8991_v56  ;;  %v9119_v59 = vsel %vm392_vm1, %v10786_v3, %v2870_v34 }
 0x300   : > { %3027 = vst [vmem:[#allocation2 + $0x248] sm:$0xff] %v8993_v8  ;;  %3028 = vst [vmem:[#allocation2 + $0x260] sm:$0xff] %v8995_v5  ;;  %v9125_v38 = vsel %vm392_vm1, %v10788_v0, %v2871_v40  ;;  %v10794_v0 = vrot.slane %v9005_v54, 7 }
 0x301   : > { %3029 = vst [vmem:[#allocation2 + $0x278] sm:$0xff] %v8997_v15  ;;  %3030 = vst [vmem:[#allocation2 + $0x290] sm:$0xff] %v9003_v63 }
 0x302   : > { %3031 = vst [vmem:[#allocation2 + $0x2a8] sm:$0xff] %v9005_v54  ;;  %3032 = vst [vmem:[#allocation2 + $0x2c0] sm:$0xff] %v9007_v26  ;;  %v9147_v3 = vsel %vm392_vm1, %v10794_v0, %v2874_v33  ;;  %v10800_v0 = vrot.slane %v8943_v53, 7 }
 0x303   : > { %3033 = vst [vmem:[#allocation2 + $0x2d8] sm:$0xff] %v9009_v11  ;;  %3034 = vst [vmem:[#allocation2 + $0x2f0] sm:$0xff] %v9015_v52 }
 0x304   : > { %10778 = vst [vmem:[#allocation18_spill] sm:$0xff] %v9066_v46  ;;  %10779 = vst [vmem:[#allocation19_spill] sm:$0xff] %v9072_v9 }
 0x305   : > { %10780 = vst [vmem:[#allocation25_spill] sm:$0xff] %v9078_v22  ;;  %10781 = vst [vmem:[#allocation20_spill] sm:$0xff] %v9084_v31 }
 0x306   : > { %2974 = vst [vmem:[#allocation2 + $0x48] sm:$0xff] %v9060_v25  ;;  %10782 = vst [vmem:[#allocation21_spill] sm:$0xff] %v9091_v45 }
 0x307   : > { %10783 = vst [vmem:[#allocation22_spill] sm:$0xff] %v9097_v58  ;;  %10784 = vst [vmem:[#allocation26_spill] sm:$0xff] %v9103_v51 }
 0x308   : > { %10785 = vst [vmem:[#allocation31_spill] sm:$0xff] %v9109_v17  ;;  %2978 = vst [vmem:[#allocation2 + $0xa8] sm:$0xff] %v9072_v9  ;;  %v10790_v9 = vrot.slane %v8993_v8, 7 }
 0x309   : > { %2980 = vst [vmem:[#allocation2 + $0xd8] sm:$0xff] %v9078_v22  ;;  %2982 = vst [vmem:[#allocation2 + $0x108] sm:$0xff] %v9084_v31  ;;  %v10792_v31 = vrot.slane %v8997_v15, 7 }
 0x30a   : > { %2976 = vst [vmem:[#allocation2 + $0x78] sm:$0xff] %v9066_v46  ;;  %10787 = vst [vmem:[#allocation13_spill] sm:$0xff] %v9119_v59  ;;  %v9131_v22 = vsel %vm392_vm1, %v10790_v9, %v2872_v41  ;;  %v10796_v9 = vrot.slane %v9009_v11, 7 }
 0x30b   : > { %10789 = vst [vmem:[#allocation32_spill] sm:$0xff] %v9125_v38  ;;  %10791 = vst [vmem:[#allocation33_spill] sm:$0xff] %v9131_v22  ;;  %v9137_v37 = vsel %vm392_vm1, %v10792_v31, %v2873_v6 }
 0x30c   : > { %10793 = vst [vmem:[#allocation34_spill] sm:$0xff] %v9137_v37  ;;  %2984 = vst [vmem:[#allocation2 + $0x138] sm:$0xff] %v9091_v45  ;;  %v9153_v31 = vsel %vm392_vm1, %v10796_v9, %v2875_v50  ;;  %v10798_v45 = vrot.slane %v8935_v30, 7  ;;  %v2895_v9 = vsel %vm392_vm1, %v2863_v10, %v10800_v0  ;;  %v3312_v10 = vld [vmem:[#allocation2 + $0x2d8] sm:$0xff]  ;;  %v10804_v0 = vrot.slane %v8961_v19, 7 }
 0x30d   : > { %2986 = vst [vmem:[#allocation2 + $0x168] sm:$0xff] %v9097_v58  ;;  %2988 = vst [vmem:[#allocation2 + $0x198] sm:$0xff] %v9103_v51  ;;  %v10799_v51 = vrot.slane %v8939_v39, 7 }
 0x30e   : > { %2990 = vst [vmem:[#allocation2 + $0x1c8] sm:$0xff] %v9109_v17  ;;  %10795 = vst [vmem:[#allocation35_spill] sm:$0xff] %v9147_v3  ;;  %v2893_v58 = vsel %vm392_vm1, %v2861_v61, %v10798_v45  ;;  %v10801_v45 = vrot.slane %v8947_v27, 7 }
 0x30f   : > { %10797 = vst [vmem:[#allocation36_spill] sm:$0xff] %v9153_v31  ;;  %v2894_v17 = vsel %vm392_vm1, %v2862_v29, %v10799_v51  ;;  %2992 = vst [vmem:[#allocation2 + $0x1f8] sm:$0xff] %v9119_v59  ;;  %v10802_v51 = vrot.slane %v8951_v7, 7 }
 0x310   : > { %2994 = vst [vmem:[#allocation2 + $0x228] sm:$0xff] %v9125_v38  ;;  %2996 = vst [vmem:[#allocation2 + $0x258] sm:$0xff] %v9131_v22  ;;  %v2896_v61 = vsel %vm392_vm1, %v2864_v24, %v10801_v45  ;;  %v10803_v38 = vrot.slane %v8957_v36, 7  ;;  %v2899_v24 = vsel %vm392_vm1, %v2867_v13, %v10804_v0  ;;  %v10805_v45 = vrot.slane %v8969_v42, 7 }
 0x311   : > { %2998 = vst [vmem:[#allocation2 + $0x288] sm:$0xff] %v9137_v37  ;;  %v2897_v29 = vsel %vm392_vm1, %v2865_v57, %v10802_v51  ;;  %2973 = vst [vmem:[#allocation2 + $0x30] sm:$0xff] %v2893_v58  ;;  %v10806_v51 = vrot.slane %v8973_v55, 7  ;;  %v10807_v58 = vrot.slane %v8981_v16, 7  ;;  %v10808_v13 = vrot.slane %v8985_v43, 7 }
 0x312   : > { %v2898_v37 = vsel %vm392_vm1, %v2866_v20, %v10803_v38  ;;  %2975 = vst [vmem:[#allocation2 + $0x60] sm:$0xff] %v2894_v17  ;;  %3000 = vst [vmem:[#allocation2 + $0x2b8] sm:$0xff] %v9147_v3  ;;  %v2900_v57 = vsel %vm392_vm1, %v2868_v62, %v10805_v45  ;;  %v3315_v20 = vld [vmem:[#allocation2 + $0x2f0] sm:$0xff]  ;;  %v10809_v0 = vrot.slane %v8993_v8, 7  ;;  %v10810_v45 = vrot.slane %v8997_v15, 7 }
 0x313   : > { %3002 = vst [vmem:[#allocation2 + $0x2e8] sm:$0xff] %v9153_v31  ;;  %v2901_v17 = vsel %vm392_vm1, %v2869_v21, %v10806_v51  ;;  %v2902_v38 = vsel %vm392_vm1, %v2870_v34, %v10807_v58  ;;  %2977 = vst [vmem:[#allocation2 + $0x90] sm:$0xff] %v2895_v9  ;;  %v2903_v62 = vsel %vm392_vm1, %v2871_v40, %v10808_v13  ;;  %v10811_v9 = vrot.slane %v9005_v54, 7 }
 0x314   : > { %2979 = vst [vmem:[#allocation2 + $0xc0] sm:$0xff] %v2896_v61  ;;  %2981 = vst [vmem:[#allocation2 + $0xf0] sm:$0xff] %v2897_v29  ;;  %v2904_v21 = vsel %vm392_vm1, %v2872_v41, %v10809_v0  ;;  %v2905_v34 = vsel %vm392_vm1, %v2873_v6, %v10810_v45  ;;  %v10812_v40 = vrot.slane %v9009_v11, 7  ;;  %v9222_v61 = vrot.slane %v8935_v30, 1 }
 0x315   : > { %2983 = vst [vmem:[#allocation2 + $0x120] sm:$0xff] %v2898_v37  ;;  %3216 = vst [vmem:[#allocation2 + $0x338] sm:$0xff] %v3312_v10  ;;  %v2906_v37 = vsel %vm392_vm1, %v2874_v33, %v10811_v9  ;;  %v9225_v6 = vrot.slane %v8939_v39, 1  ;;  %v9228_v29 = vrot.slane %v8943_v53, 1  ;;  %v9231_v33 = vrot.slane %v8947_v27, 1 }
 0x316   : > { %2985 = vst [vmem:[#allocation2 + $0x150] sm:$0xff] %v2899_v24  ;;  %2987 = vst [vmem:[#allocation2 + $0x180] sm:$0xff] %v2900_v57  ;;  %v2907_v41 = vsel %vm392_vm1, %v2875_v50, %v10812_v40  ;;  %v9234_v10 = vrot.slane %v8951_v7, 1  ;;  %v9237_v50 = vrot.slane %v8957_v36, 1  ;;  %v9240_v30 = vrot.slane %v8961_v19, 1 }
 0x317   : > { %2989 = vst [vmem:[#allocation2 + $0x1b0] sm:$0xff] %v2901_v17  ;;  %2991 = vst [vmem:[#allocation2 + $0x1e0] sm:$0xff] %v2902_v38  ;;  %v9243_v24 = vrot.slane %v8969_v42, 1  ;;  %v9246_v57 = vrot.slane %v8973_v55, 1  ;;  %v9249_v51 = vrot.slane %v8981_v16, 1  ;;  %v9252_v17 = vrot.slane %v8985_v43, 1 }
 0x318   : > { %3219 = vst [vmem:[#allocation2 + $0x350] sm:$0xff] %v3315_v20  ;;  %2993 = vst [vmem:[#allocation2 + $0x210] sm:$0xff] %v2903_v62  ;;  %v9258_v58 = vrot.slane %v8993_v8, 1  ;;  %v9261_v38 = vrot.slane %v8997_v15, 1  ;;  %v9264_v20 = vrot.slane %v9005_v54, 1  ;;  %v9267_v13 = vrot.slane %v9009_v11, 1 }
 0x319   : > { %2995 = vst [vmem:[#allocation2 + $0x240] sm:$0xff] %v2904_v21  ;;  %2997 = vst [vmem:[#allocation2 + $0x270] sm:$0xff] %v2905_v34  ;;  %v2925_v62 = vrot.slane %v8937_v60, 1  ;;  %v2926_v0 = vrot.slane %v8941_v1, 1  ;;  %v2927_v15 = vrot.slane %v8945_v14, 1  ;;  %v2928_v54 = vrot.slane %v8949_v12, 1 }
 0x31a   : > { %2999 = vst [vmem:[#allocation2 + $0x2a0] sm:$0xff] %v2906_v37  ;;  %3001 = vst [vmem:[#allocation2 + $0x2d0] sm:$0xff] %v2907_v41  ;;  %v2929_v11 = vrot.slane %v8955_v49, 1  ;;  %v2930_v21 = vrot.slane %v8959_v4, 1  ;;  %v2931_v45 = vrot.slane %v8967_v18, 1  ;;  %v2932_v34 = vrot.slane %v8971_v35, 1 }
 0x31b   : > { %3117 = vst [vmem:[#allocation2 + $0x30] sm:$0x1] %v9222_v61  ;;  %3118 = vst [vmem:[#allocation2 + $0x60] sm:$0x1] %v9225_v6  ;;  %v2933_v9 = vrot.slane %v8979_v23, 1  ;;  %v2934_v37 = vrot.slane %v8983_v32, 1  ;;  %v2941_v8 = vsel %vm457_vm0, %v9222_v61, %v2925_v62  ;;  %v9302_v59 = vsel %vm457_vm0, %v9225_v6, %v2926_v0 }
 0x31c   : > { %3119 = vst [vmem:[#allocation2 + $0x90] sm:$0x1] %v9228_v29  ;;  %3120 = vst [vmem:[#allocation2 + $0xc0] sm:$0x1] %v9231_v33  ;;  %v2935_v40 = vrot.slane %v8991_v56, 1  ;;  %v2936_v41 = vrot.slane %v8995_v5, 1  ;;  %v9307_v16 = vsel %vm457_vm0, %v9228_v29, %v2927_v15  ;;  %v9312_v55 = vsel %vm457_vm0, %v9231_v33, %v2928_v54  ;;  %6078 = vmatprep.mubr.f32.mxu1 %v2941_v8 }
 0x31d   : > { %3121 = vst [vmem:[#allocation2 + $0xf0] sm:$0x1] %v9234_v10  ;;  %3122 = vst [vmem:[#allocation2 + $0x120] sm:$0x1] %v9237_v50  ;;  %v2937_v31 = vrot.slane %v9003_v63, 1  ;;  %v2938_v3 = vrot.slane %v9007_v26, 1  ;;  %v9317_v22 = vsel %vm457_vm0, %v9234_v10, %v2929_v11  ;;  %v9322_v42 = vsel %vm457_vm0, %v9237_v50, %v2930_v21 }
 0x31e   : > { %3123 = vst [vmem:[#allocation2 + $0x150] sm:$0x1] %v9240_v30  ;;  %3124 = vst [vmem:[#allocation2 + $0x180] sm:$0x1] %v9243_v24  ;;  %v3314_v43 = vld [vmem:[#allocation2 + $0x2e8] sm:$0xff]  ;;  %v9327_v19 = vsel %vm457_vm0, %v9240_v30, %v2931_v45  ;;  %v9332_v36 = vsel %vm457_vm0, %v9243_v24, %v2932_v34  ;;  %v9350_v27 = vsel %vm457_vm0, %v9249_v51, %v2934_v37 }
 0x31f   : > { %3125 = vst [vmem:[#allocation2 + $0x1b0] sm:$0x1] %v9246_v57  ;;  %3126 = vst [vmem:[#allocation2 + $0x1e0] sm:$0x1] %v9249_v51  ;;  %v9355_v53 = vsel %vm457_vm0, %v9252_v17, %v2935_v40 }
 0x320   : > { %3127 = vst [vmem:[#allocation2 + $0x210] sm:$0x1] %v9252_v17  ;;  %3128 = vst [vmem:[#allocation2 + $0x240] sm:$0x1] %v9258_v58 }
 0x321   : > { %3129 = vst [vmem:[#allocation2 + $0x270] sm:$0x1] %v9261_v38  ;;  %3130 = vst [vmem:[#allocation2 + $0x2a0] sm:$0x1] %v9264_v20 }
 0x322   : > { %3131 = vst [vmem:[#allocation2 + $0x2d0] sm:$0x1] %v9267_v13  ;;  %10813 = vst [vmem:[#allocation37_spill] sm:$0xff] %v9302_v59  ;;  %v9345_v7 = vld [vmem:[#allocation2 + $0x60] sm:$0xff] }
 0x323   : > { %10814 = vst [vmem:[#allocation38_spill] sm:$0xff] %v9307_v16  ;;  %10815 = vst [vmem:[#allocation39_spill] sm:$0xff] %v9312_v55 }
 0x324   : > { %10816 = vst [vmem:[#allocation40_spill] sm:$0xff] %v9317_v22  ;;  %3037 = vst [vmem:[#allocation2 + $0x40] sm:$0xff] %v2941_v8  ;;  %v9337_v8 = vsel %vm457_vm0, %v9246_v57, %v2933_v9 }
 0x325   : > { %3218 = vst [vmem:[#allocation2 + $0x348] sm:$0xff] %v3314_v43  ;;  %10817 = vst [vmem:[#allocation41_spill] sm:$0xff] %v9332_v36  ;;  %v9343_v43 = vld [vmem:[#allocation2 + $0x30] sm:$0xff] }
 0x326   : > { %3041 = vst [vmem:[#allocation2 + $0xa0] sm:$0xff] %v9307_v16  ;;  %3043 = vst [vmem:[#allocation2 + $0xd0] sm:$0xff] %v9312_v55  ;;  %v9365_v55 = vsel %vm457_vm0, %v9261_v38, %v2937_v31  ;;  %3575 = vmatmul.mubr.f32.vlgmr.msra.gmra.mrb[128].mxu0 %v9343_v43  ;;  %v9375_v16 = vsel %vm457_vm0, %v9264_v20, %v2938_v3 }
 0x327   : > { %3045 = vst [vmem:[#allocation2 + $0x100] sm:$0xff] %v9317_v22  ;;  %3039 = vst [vmem:[#allocation2 + $0x70] sm:$0xff] %v9302_v59  ;;  %v9360_v22 = vsel %vm457_vm0, %v9258_v58, %v2936_v41  ;;  %v10819_v59 = vrot.slane %v9015_v52, 1  ;;  %3579 = vmatprep.mubr.f32.mxu0 %v8937_v60  ;;  %6657 = vmatpush3.bf16.msra.mxu0 %v8717_v47  ;;  %v2967_v47 = vsel %vm457_vm0, %v2935_v40, %v9252_v17  ;;  %v3359_v40 = vld [vmem:[#allocation8 + $0x150] sm:$0xff] }
 0x328   : > { %10818 = vst [vmem:[#allocation42_spill] sm:$0xff] %v9343_v43  ;;  %3047 = vst [vmem:[#allocation2 + $0x130] sm:$0xff] %v9322_v42  ;;  %v2958_v43 = vsel %vm457_vm0, %v2926_v0, %v9225_v6  ;;  %v2961_v6 = vsel %vm457_vm0, %v2929_v11, %v9234_v10  ;;  %v2965_v10 = vsel %vm457_vm0, %v2933_v9, %v9246_v57  ;;  %6659 = vmatprep.subr.bf16.mxu0 %v8782_v44  ;;  %v3317_v9 = vld [vmem:[#allocation8] sm:$0xff] }
 0x329   : > { %3049 = vst [vmem:[#allocation2 + $0x160] sm:$0xff] %v9327_v19  ;;  %3051 = vst [vmem:[#allocation2 + $0x190] sm:$0xff] %v9332_v36  ;;  %v9382_v46 = vsel %vm457_vm0, %v9267_v13, %v10819_v59  ;;  %v2957_v36 = vsel %vm457_vm0, %v2925_v62, %v9222_v61  ;;  %v2959_v59 = vsel %vm457_vm0, %v2927_v15, %v9228_v29  ;;  %v10820_v57 = vrot.slane %v9015_v52, 1 }
 0x32a   : > { %3053 = vst [vmem:[#allocation2 + $0x1c0] sm:$0xff] %v9337_v8  ;;  %3055 = vst [vmem:[#allocation2 + $0x1f0] sm:$0xff] %v9350_v27  ;;  %v2960_v61 = vsel %vm457_vm0, %v2928_v54, %v9231_v33  ;;  %v2962_v62 = vsel %vm457_vm0, %v2930_v21, %v9237_v50  ;;  %v2963_v29 = vsel %vm457_vm0, %v2931_v45, %v9240_v30  ;;  %3580 = vmatmul.mubr.f32.gmra.mrb[130].mxu0 %v9060_v25  ;;  %v3357_v45 = vld [vmem:[#allocation8 + $0x140] sm:$0xff] }
 0x32b   : > { %3057 = vst [vmem:[#allocation2 + $0x220] sm:$0xff] %v9355_v53  ;;  %3059 = vst [vmem:[#allocation2 + $0x250] sm:$0xff] %v9360_v22  ;;  %v2964_v33 = vsel %vm457_vm0, %v2932_v34, %v9243_v24  ;;  %v2968_v50 = vsel %vm457_vm0, %v2936_v41, %v9258_v58  ;;  %v2969_v30 = vsel %vm457_vm0, %v2937_v31, %v9261_v38  ;;  %v3149_v31 = vrot.slane %v8937_v60, 6  ;;  %v3358_v34 = vld [vmem:[#allocation8 + $0x148] sm:$0xff]  ;;  %v3360_v41 = vld [vmem:[#allocation8 + $0x158] sm:$0xff] }
 0x32c   : > { %3061 = vst [vmem:[#allocation2 + $0x280] sm:$0xff] %v9365_v55  ;;  %3038 = vst [vmem:[#allocation2 + $0x58] sm:$0xff] %v2957_v36  ;;  %v2966_v36 = vsel %vm457_vm0, %v2934_v37, %v9249_v51  ;;  %v2970_v24 = vsel %vm457_vm0, %v2938_v3, %v9264_v20  ;;  %v2971_v51 = vsel %vm457_vm0, %v10820_v57, %v9267_v13  ;;  %v3150_v3 = vrot.slane %v8941_v1, 6  ;;  %v10821_v37 = vld [vmem:[#allocation18_spill] sm:$0xff] }
 0x32d   : > { %3040 = vst [vmem:[#allocation2 + $0x88] sm:$0xff] %v2958_v43  ;;  %3063 = vst [vmem:[#allocation2 + $0x2b0] sm:$0xff] %v9375_v16  ;;  %v3151_v17 = vrot.slane %v8945_v14, 6  ;;  %3584 = vmatprep.mubr.f32.mxu0 %v8939_v39  ;;  %v3152_v25 = vrot.slane %v8949_v12, 6  ;;  %v3153_v58 = vrot.slane %v8955_v49, 6  ;;  %v3155_v38 = vrot.slane %v8967_v18, 6  ;;  %6661 = vmatpush3.bf16.msra.mxu0 %v8782_v44 }
 0x32e   : > { %3065 = vst [vmem:[#allocation2 + $0x2e0] sm:$0xff] %v9382_v46  ;;  %3042 = vst [vmem:[#allocation2 + $0xb8] sm:$0xff] %v2959_v59  ;;  %v9450_v20 = vld [vmem:[#allocation2 + $0x70] sm:$0xff]  ;;  %v3156_v60 = vrot.slane %v8971_v35, 6  ;;  %v3157_v13 = vrot.slane %v8979_v23, 6  ;;  %v3158_v0 = vrot.slane %v8983_v32, 6  ;;  %6663 = vmatprep.subr.bf16.mxu0 %v8784_v28  ;;  %3585 = vmatmul.mubr.f32.gmra.mrb[132].mxu0 %v9345_v7 }
 0x32f   : > { %3044 = vst [vmem:[#allocation2 + $0xe8] sm:$0xff] %v2960_v61  ;;  %3046 = vst [vmem:[#allocation2 + $0x118] sm:$0xff] %v2961_v6  ;;  %v3159_v15 = vrot.slane %v8991_v56, 6  ;;  %v3160_v54 = vrot.slane %v8995_v5, 6  ;;  %v3161_v44 = vrot.slane %v9003_v63, 6  ;;  %v3162_v11 = vrot.slane %v9007_v26, 6  ;;  %3589 = vmatprep.mubr.f32.mxu0 %v8941_v1 }
 0x330   : > { %3048 = vst [vmem:[#allocation2 + $0x148] sm:$0xff] %v2962_v62  ;;  %3054 = vst [vmem:[#allocation2 + $0x1d8] sm:$0xff] %v2965_v10  ;;  %v3163_v21 = vrot.slane %v9015_v52, 6  ;;  %v3318_v5 = vld [vmem:[#allocation8 + $0x8] sm:$0xff]  ;;  %v6670_v63 = vpack.c.bf16 %v3358_v34, %v3357_v45  ;;  %v3319_v43 = vld [vmem:[#allocation8 + $0x10] sm:$0xff] }
 0x331   : > { %3056 = vst [vmem:[#allocation2 + $0x208] sm:$0xff] %v2966_v36  ;;  %3050 = vst [vmem:[#allocation2 + $0x178] sm:$0xff] %v2963_v29  ;;  %6665 = vmatpush3.bf16.msra.mxu0 %v8784_v28  ;;  %v6607_v52 = vpack.c.bf16 %v3318_v5, %v3317_v9  ;;  %v3320_v59 = vld [vmem:[#allocation8 + $0x18] sm:$0xff]  ;;  %v10822_v61 = vld [vmem:[#allocation14_spill] sm:$0xff]  ;;  %v6674_v28 = vpack.c.bf16 %v3360_v41, %v3359_v40 }
 0x332   : > { %3052 = vst [vmem:[#allocation2 + $0x1a8] sm:$0xff] %v2964_v33  ;;  %3058 = vst [vmem:[#allocation2 + $0x238] sm:$0xff] %v2967_v47  ;;  %6667 = vmatprep.subr.bf16.mxu0 %v8829_v2  ;;  %3590 = vmatmul.mubr.f32.gmra.mrb[134].mxu0 %v10821_v37  ;;  %v10823_v29 = vld [vmem:[#allocation37_spill] sm:$0xff]  ;;  %v6610_v33 = vpack.c.bf16 %v3320_v59, %v3319_v43  ;;  %v9478_v10 = vld [vmem:[#allocation2 + $0x90] sm:$0xff] }
 0x333   : > { %3060 = vst [vmem:[#allocation2 + $0x268] sm:$0xff] %v2968_v50  ;;  %3062 = vst [vmem:[#allocation2 + $0x298] sm:$0xff] %v2969_v30  ;;  %3594 = vmatprep.mubr.f32.mxu0 %v10822_v61  ;;  %v3361_v36 = vld [vmem:[#allocation8 + $0x160] sm:$0xff]  ;;  %v3362_v47 = vld [vmem:[#allocation8 + $0x168] sm:$0xff]  ;;  %v10824_v50 = vmov 0.0|0.0  }
 0x334   : > { %3064 = vst [vmem:[#allocation2 + $0x2c8] sm:$0xff] %v2970_v24  ;;  %3066 = vst [vmem:[#allocation2 + $0x2f8] sm:$0xff] %v2971_v51  ;;  %v3321_v30 = vld [vmem:[#allocation8 + $0x20] sm:$0xff]  ;;  %v3322_v24 = vld [vmem:[#allocation8 + $0x28] sm:$0xff] }
 0x335   : > { %3181 = vst [vmem:[#allocation2 + $0x5f] sm:$0x1] %v3149_v31  ;;  %3182 = vst [vmem:[#allocation2 + $0x8f] sm:$0x1] %v3150_v3  ;;  %v9466_v26 = vld [vmem:[#allocation2 + $0x2e0] sm:$0xff]  ;;  %6669 = vmatpush3.bf16.msra.mxu0 %v8829_v2  ;;  %v6678_v2 = vpack.c.bf16 %v3362_v47, %v3361_v36  ;;  %v10825_v57 = vld [vmem:[#allocation38_spill] sm:$0xff]  ;;  %v6613_v51 = vpack.c.bf16 %v3322_v24, %v3321_v30 }
 0x336   : > { %3183 = vst [vmem:[#allocation2 + $0xbf] sm:$0x1] %v3151_v17  ;;  %3205 = vst [vmem:[#allocation2 + $0x10] sm:$0xff] %v9450_v20  ;;  %6671 = vmatprep.subr.bf16.mxu0 %v6670_v63  ;;  %3595 = vmatmul.mubr.f32.gmra.mrb[136].mxu0 %v9478_v10  ;;  %v3363_v31 = vld [vmem:[#allocation8 + $0x170] sm:$0xff]  ;;  %v3364_v3 = vld [vmem:[#allocation8 + $0x178] sm:$0xff] }
 0x337   : > { %3184 = vst [vmem:[#allocation2 + $0xef] sm:$0x1] %v3152_v25  ;;  %3185 = vst [vmem:[#allocation2 + $0x11f] sm:$0x1] %v3153_v58  ;;  %3599 = vmatprep.mubr.f32.mxu0 %v8945_v14  ;;  %v3323_v17 = vld [vmem:[#allocation8 + $0x30] sm:$0xff]  ;;  %v3324_v25 = vld [vmem:[#allocation8 + $0x38] sm:$0xff] }
 0x338   : > { %3186 = vst [vmem:[#allocation2 + $0x14f] sm:$0x1] %v3154_v48  ;;  %3187 = vst [vmem:[#allocation2 + $0x17f] sm:$0x1] %v3155_v38  ;;  %v10826_v58 = vld [vmem:[#allocation19_spill] sm:$0xff]  ;;  %v6682_v38 = vpack.c.bf16 %v3364_v3, %v3363_v31  ;;  %v10829_v45 = vld [vmem:[#allocation40_spill] sm:$0xff] }
 0x339   : > { %3189 = vst [vmem:[#allocation2 + $0x1df] sm:$0x1] %v3157_v13  ;;  %3190 = vst [vmem:[#allocation2 + $0x20f] sm:$0x1] %v3158_v0  ;;  %6673 = vmatpush3.bf16.msra.mxu0 %v6670_v63  ;;  %v10827_v14 = vld [vmem:[#allocation27_spill] sm:$0xff]  ;;  %v6616_v13 = vpack.c.bf16 %v3324_v25, %v3323_v17  ;;  %v9492_v0 = vld [vmem:[#allocation2 + $0xc0] sm:$0xff] }
 0x33a   : > { %3191 = vst [vmem:[#allocation2 + $0x23f] sm:$0x1] %v3159_v15  ;;  %3188 = vst [vmem:[#allocation2 + $0x1af] sm:$0x1] %v3156_v60  ;;  %6675 = vmatprep.subr.bf16.mxu0 %v6674_v28  ;;  %3600 = vmatmul.mubr.f32.gmra.mrb[138].mxu0 %v10826_v58  ;;  %v10828_v60 = vld [vmem:[#allocation39_spill] sm:$0xff]  ;;  %v3325_v15 = vld [vmem:[#allocation8 + $0x40] sm:$0xff] }
 0x33b   : > { %3192 = vst [vmem:[#allocation2 + $0x26f] sm:$0x1] %v3160_v54  ;;  %3193 = vst [vmem:[#allocation2 + $0x29f] sm:$0x1] %v3161_v44  ;;  %3604 = vmatprep.mubr.f32.mxu0 %v10827_v14  ;;  %v3326_v54 = vld [vmem:[#allocation8 + $0x48] sm:$0xff]  ;;  %v3327_v9 = vld [vmem:[#allocation8 + $0x50] sm:$0xff] }
 0x33c   : > { %3194 = vst [vmem:[#allocation2 + $0x2cf] sm:$0x1] %v3162_v11  ;;  %3195 = vst [vmem:[#allocation2 + $0x2ff] sm:$0x1] %v3163_v21  ;;  %v9471_v6 = vld [vmem:[#allocation2 + $0x58] sm:$0xff]  ;;  %v9473_v62 = vld [vmem:[#allocation2 + $0x88] sm:$0xff]  ;;  %v6619_v34 = vpack.c.bf16 %v3326_v54, %v3325_v15 }
 0x33d   : > { %3217 = vst [vmem:[#allocation2 + $0x340] sm:$0xff] %v9466_v26  ;;  %6079 = vmatmul.mubr.f32.vlgmr.msra.gmra.mrb[160].mxu1 %v9471_v6  ;;  %v9487_v48 = vld [vmem:[#allocation2 + $0xb8] sm:$0xff]  ;;  %6677 = vmatpush3.bf16.msra.mxu0 %v6674_v28  ;;  %v4488_v21 = vld [vmem:[#allocation2 + $0x2d0] sm:$0xff]  ;;  %v10830_v63 = vld [vmem:[#allocation25_spill] sm:$0xff] }
 0x33e   : > { %6081 = vmatprep.mubr.f32.mxu1 %v10823_v29  ;;  %6608 = vmatpush1.bf16.msra.mxu1 %v6607_v52  ;;  %v9496_v11 = vld [vmem:[#allocation2 + $0xe8] sm:$0xff]  ;;  %3215 = vst [vmem:[#allocation2 + $0x330] sm:$0xff] %v4488_v21  ;;  %v3328_v5 = vld [vmem:[#allocation8 + $0x58] sm:$0xff]  ;;  %v9509_v41 = vld [vmem:[#allocation2 + $0xf0] sm:$0xff] }
 0x33f   : > { %6609 = vmatprep.subr.bf16.mxu1 %v10824_v50  ;;  %6679 = vmatprep.subr.bf16.mxu0 %v6678_v2  ;;  %v9503_v52 = vld [vmem:[#allocation2 + $0x118] sm:$0xff]  ;;  %v6622_v40 = vpack.c.bf16 %v3328_v5, %v3327_v9  ;;  %v3329_v43 = vld [vmem:[#allocation8 + $0x60] sm:$0xff]  ;;  %v3330_v59 = vld [vmem:[#allocation8 + $0x68] sm:$0xff] }
 0x340   : > { %3605 = vmatmul.mubr.f32.gmra.mrb[140].mxu0 %v9492_v0  ;;  %v9513_v61 = vld [vmem:[#allocation2 + $0x148] sm:$0xff]  ;;  %v3331_v28 = vld [vmem:[#allocation8 + $0x70] sm:$0xff]  ;;  %v3332_v29 = vld [vmem:[#allocation8 + $0x78] sm:$0xff] }
 0x341   : > { %6082 = vmatmul.mubr.f32.gmra.mrb[162].mxu1 %v9473_v62  ;;  %3609 = vmatprep.mubr.f32.mxu0 %v8949_v12  ;;  %v10831_v12 = vld [vmem:[#allocation15_spill] sm:$0xff]  ;;  %v9520_v36 = vld [vmem:[#allocation2 + $0x178] sm:$0xff]  ;;  %v10834_v30 = vld [vmem:[#allocation41_spill] sm:$0xff] }
 0x342   : > { %6084 = vmatprep.mubr.f32.mxu1 %v10825_v57  ;;  %6611 = vmatpush1.bf16.msra.mxu1 %v6610_v33  ;;  %v10832_v33 = vld [vmem:[#allocation20_spill] sm:$0xff]  ;;  %v9525_v24 = vld [vmem:[#allocation2 + $0x120] sm:$0xff]  ;;  %v9529_v57 = vld [vmem:[#allocation2 + $0x1a8] sm:$0xff] }
 0x343   : > { %6612 = vmatprep.subr.bf16.mxu1 %v10824_v50  ;;  %v4493_v44 = vld [vmem:[#allocation2 + $0x2f8] sm:$0xff]  ;;  %6681 = vmatpush3.bf16.msra.mxu0 %v6678_v2  ;;  %v3334_v2 = vld [vmem:[#allocation8 + $0x88] sm:$0xff]  ;;  %v3335_v31 = vld [vmem:[#allocation8 + $0x90] sm:$0xff] }
 0x344   : > { %3220 = vst [vmem:[#allocation2 + $0x358] sm:$0xff] %v4493_v44  ;;  %6683 = vmatprep.subr.bf16.mxu0 %v6682_v38  ;;  %3610 = vmatmul.mubr.f32.gmra.mrb[142].mxu0 %v10830_v63  ;;  %v10833_v47 = vld [vmem:[#allocation28_spill] sm:$0xff]  ;;  %v10835_v17 = vld [vmem:[#allocation21_spill] sm:$0xff]  ;;  %v10836_v58 = vld [vmem:[#allocation23_spill] sm:$0xff] }
 0x345   : > { %6085 = vmatmul.mubr.f32.gmra.mrb[164].mxu1 %v9487_v48  ;;  %3614 = vmatprep.mubr.f32.mxu0 %v10831_v12  ;;  %v3336_v3 = vld [vmem:[#allocation8 + $0x98] sm:$0xff]  ;;  %v9541_v14 = vld [vmem:[#allocation2 + $0x150] sm:$0xff]  ;;  %v10837_v54 = vld [vmem:[#allocation22_spill] sm:$0xff] }
 0x346   : > { %6087 = vmatprep.mubr.f32.mxu1 %v10828_v60  ;;  %6614 = vmatpush1.bf16.msra.mxu1 %v6613_v51  ;;  %v9536_v25 = vld [vmem:[#allocation2 + $0x1d8] sm:$0xff]  ;;  %v9545_v60 = vld [vmem:[#allocation2 + $0x208] sm:$0xff]  ;;  %v3343_v5 = vld [vmem:[#allocation8 + $0xd0] sm:$0xff] }
 0x347   : > { %6615 = vmatprep.subr.bf16.mxu1 %v10824_v50  ;;  %6685 = vmatpush3.bf16.msra.mxu0 %v6682_v38  ;;  %v3338_v38 = vld [vmem:[#allocation8 + $0xa8] sm:$0xff]  ;;  %v3340_v15 = vld [vmem:[#allocation8 + $0xb8] sm:$0xff] }
 0x348   : > { %6686 = vmatprep.subr.bf16.mxu0 %v10824_v50  ;;  %3615 = vmatmul.mubr.f32.gmra.mrb[144].mxu0 %v9509_v41  ;;  %v9552_v44 = vld [vmem:[#allocation2 + $0x238] sm:$0xff]  ;;  %v9561_v9 = vld [vmem:[#allocation2 + $0x268] sm:$0xff] }
 0x349   : > { %6088 = vmatmul.mubr.f32.gmra.mrb[166].mxu1 %v9496_v11  ;;  %3619 = vmatprep.mubr.f32.mxu0 %v8955_v49  ;;  %v6628_v49 = vpack.c.bf16 %v3332_v29, %v3331_v28  ;;  %v10838_v21 = vld [vmem:[#allocation16_spill] sm:$0xff]  ;;  %v10839_v12 = vld [vmem:[#allocation26_spill] sm:$0xff]  ;;  %v3347_v29 = vld [vmem:[#allocation8 + $0xf0] sm:$0xff] }
 0x34a   : > { %6090 = vmatprep.mubr.f32.mxu1 %v10829_v45  ;;  %6617 = vmatpush1.bf16.msra.mxu1 %v6616_v13  ;;  %v3339_v13 = vld [vmem:[#allocation8 + $0xb0] sm:$0xff]  ;;  %v9557_v45 = vld [vmem:[#allocation2 + $0x180] sm:$0xff]  ;;  %v3344_v63 = vld [vmem:[#allocation8 + $0xd8] sm:$0xff] }
 0x34b   : > { %6618 = vmatprep.subr.bf16.mxu1 %v10824_v50  ;;  %v9577_v28 = vld [vmem:[#allocation2 + $0x2c8] sm:$0xff] }
 0x34c   : > { %3620 = vmatmul.mubr.f32.gmra.mrb[146].mxu0 %v10832_v33  ;;  %v3348_v33 = vld [vmem:[#allocation8 + $0xf8] sm:$0xff] }
 0x34d   : > { %6091 = vmatmul.mubr.f32.gmra.mrb[168].mxu1 %v9503_v52  ;;  %3624 = vmatprep.mubr.f32.mxu0 %v10833_v47  ;;  %v10841_v47 = vld [vmem:[#allocation31_spill] sm:$0xff] }
 0x34e   : > { %6093 = vmatprep.mubr.f32.mxu1 %v9322_v42  ;;  %6620 = vmatpush1.bf16.msra.mxu1 %v6619_v34  ;;  %v6625_v42 = vpack.c.bf16 %v3330_v59, %v3329_v43  ;;  %v3342_v34 = vld [vmem:[#allocation8 + $0xc8] sm:$0xff]  ;;  %v10840_v43 = vld [vmem:[#allocation29_spill] sm:$0xff]  ;;  %v9573_v59 = vld [vmem:[#allocation2 + $0x1b0] sm:$0xff] }
 0x34f   : > { %6621 = vmatprep.subr.bf16.mxu1 %v10824_v50 }
 0x350   : > { %3625 = vmatmul.mubr.f32.gmra.mrb[148].mxu0 %v9525_v24 }
 0x351   : > { %6094 = vmatmul.mubr.f32.gmra.mrb[170].mxu1 %v9513_v61  ;;  %3629 = vmatprep.mubr.f32.mxu0 %v8959_v4  ;;  %v6634_v4 = vpack.c.bf16 %v3336_v3, %v3335_v31  ;;  %v3460_v3 = vld [vmem:[#allocation2 + $0x328] sm:$0xff] }
 0x352   : > { %6096 = vmatprep.mubr.f32.mxu1 %v9327_v19  ;;  %6623 = vmatpush1.bf16.msra.mxu1 %v6622_v40  ;;  %v3333_v19 = vld [vmem:[#allocation8 + $0x80] sm:$0xff]  ;;  %v9568_v40 = vld [vmem:[#allocation2 + $0x298] sm:$0xff] }
 0x353   : > { %6624 = vmatprep.subr.bf16.mxu1 %v10824_v50  ;;  %v6631_v51 = vpack.c.bf16 %v3334_v2, %v3333_v19  ;;  %v4539_v19 = vld [vmem:[#allocation8 + $0x400] sm:$0xff]  ;;  %v4540_v2 = vld [vmem:[#allocation8 + $0x408] sm:$0xff] }
 0x354   : > { %3630 = vmatmul.mubr.f32.gmra.mrb[150].mxu0 %v10835_v17  ;;  %v6734_v31 = vpack.c.bf16 %v4540_v2, %v4539_v19  ;;  %v4541_v17 = vld [vmem:[#allocation8 + $0x410] sm:$0xff]  ;;  %v4552_v19 = vld [vmem:[#allocation8 + $0x468] sm:$0xff]  ;;  %v6866_v2 = vld [vmem:[#allocation2 + $0x80] sm:$0xff] }
 0x355   : > { %6097 = vmatmul.mubr.f32.gmra.mrb[172].mxu1 %v9520_v36  ;;  %3634 = vmatprep.mubr.f32.mxu0 %v10836_v58  ;;  %v4542_v58 = vld [vmem:[#allocation8 + $0x418] sm:$0xff] }
 0x356   : > { %6099 = vmatprep.mubr.f32.mxu1 %v10834_v30  ;;  %6626 = vmatpush1.bf16.msra.mxu1 %v6625_v42  ;;  %v3346_v42 = vld [vmem:[#allocation8 + $0xe8] sm:$0xff]  ;;  %v9584_v30 = vld [vmem:[#allocation2 + $0x2f8] sm:$0xff] }
 0x357   : > { %6627 = vmatprep.subr.bf16.mxu1 %v10824_v50 }
 0x358   : > { %3635 = vmatmul.mubr.f32.gmra.mrb[152].mxu0 %v9541_v14 }
 0x359   : > { %6100 = vmatmul.mubr.f32.gmra.mrb[174].mxu1 %v9529_v57  ;;  %3639 = vmatprep.mubr.f32.mxu0 %v8967_v18  ;;  %v6640_v18 = vpack.c.bf16 %v3340_v15, %v3339_v13  ;;  %v4544_v13 = vld [vmem:[#allocation8 + $0x428] sm:$0xff]  ;;  %v9598_v15 = vld [vmem:[#allocation2 + $0x210] sm:$0xff] }
 0x35a   : > { %6102 = vmatprep.mubr.f32.mxu1 %v9337_v8  ;;  %6629 = vmatpush1.bf16.msra.mxu1 %v6628_v49  ;;  %v3337_v8 = vld [vmem:[#allocation8 + $0xa0] sm:$0xff] }
 0x35b   : > { %6630 = vmatprep.subr.bf16.mxu1 %v10824_v50  ;;  %v10842_v49 = vld [vmem:[#allocation17_spill] sm:$0xff] }
 0x35c   : > { %3640 = vmatmul.mubr.f32.gmra.mrb[154].mxu0 %v10837_v54  ;;  %v4546_v54 = vld [vmem:[#allocation8 + $0x438] sm:$0xff] }
 0x35d   : > { %6103 = vmatmul.mubr.f32.gmra.mrb[176].mxu1 %v9536_v25  ;;  %3644 = vmatprep.mubr.f32.mxu0 %v10838_v21  ;;  %v6863_v21 = vld [vmem:[#allocation2 + $0x38] sm:$0xff] }
 0x35e   : > { %6105 = vmatprep.mubr.f32.mxu1 %v9350_v27  ;;  %6632 = vmatpush1.bf16.msra.mxu1 %v6631_v51  ;;  %v6637_v27 = vpack.c.bf16 %v3338_v38, %v3337_v8  ;;  %v9588_v51 = vld [vmem:[#allocation2 + $0x1e0] sm:$0xff]  ;;  %v6738_v8 = vpack.c.bf16 %v4542_v58, %v4541_v17  ;;  %v10844_v38 = vld [vmem:[#allocation30_spill] sm:$0xff]  ;;  %v4554_v17 = vld [vmem:[#allocation8 + $0x478] sm:$0xff] }
 0x35f   : > { %6633 = vmatprep.subr.bf16.mxu1 %v10824_v50  ;;  %v9624_v58 = vld [vmem:[#allocation2 + $0x98] sm:$0xff] }
 0x360   : > { %3645 = vmatmul.mubr.f32.gmra.mrb[156].mxu0 %v9557_v45 }
 0x361   : > { %6106 = vmatmul.mubr.f32.gmra.mrb[178].mxu1 %v9545_v60  ;;  %3649 = vmatprep.mubr.f32.mxu0 %v8971_v35  ;;  %v6646_v35 = vpack.c.bf16 %v3344_v63, %v3343_v5  ;;  %v10847_v5 = vld [vmem:[#allocation42_spill] sm:$0xff]  ;;  %v6864_v63 = vld [vmem:[#allocation2 + $0x50] sm:$0xff] }
 0x362   : > { %6108 = vmatprep.mubr.f32.mxu1 %v9355_v53  ;;  %6635 = vmatpush1.bf16.msra.mxu1 %v6634_v4  ;;  %v3341_v53 = vld [vmem:[#allocation8 + $0xc0] sm:$0xff] }
 0x363   : > { %6636 = vmatprep.subr.bf16.mxu1 %v10824_v50  ;;  %v10843_v4 = vld [vmem:[#allocation13_spill] sm:$0xff] }
 0x364   : > { %3650 = vmatmul.mubr.f32.gmra.mrb[158].mxu0 %v10839_v12  ;;  %v9609_v12 = vld [vmem:[#allocation2 + $0x260] sm:$0xff] }
 0x365   : > { %6109 = vmatmul.mubr.f32.gmra.mrb[180].mxu1 %v9552_v44  ;;  %3654 = vmatprep.mubr.f32.mxu0 %v10840_v43 }
 0x366   : > { %6111 = vmatprep.mubr.f32.mxu1 %v9360_v22  ;;  %6638 = vmatpush1.bf16.msra.mxu1 %v6637_v27  ;;  %v6643_v22 = vpack.c.bf16 %v3342_v34, %v3341_v53  ;;  %v4543_v27 = vld [vmem:[#allocation8 + $0x420] sm:$0xff]  ;;  %v10846_v53 = vld [vmem:[#allocation24_spill] sm:$0xff] }
 0x367   : > { %6639 = vmatprep.subr.bf16.mxu1 %v10824_v50  ;;  %v4547_v34 = vld [vmem:[#allocation8 + $0x440] sm:$0xff] }
 0x368   : > { %3655 = vmatmul.mubr.f32.gmra.mrb[160].mxu0 %v9573_v59 }
 0x369   : > { %6112 = vmatmul.mubr.f32.gmra.mrb[182].mxu1 %v9561_v9  ;;  %3659 = vmatprep.mubr.f32.mxu0 %v8979_v23  ;;  %v3457_v23 = vld [vmem:[#allocation2 + $0x310] sm:$0xff] }
 0x36a   : > { %6114 = vmatprep.mubr.f32.mxu1 %v9365_v55  ;;  %6641 = vmatpush1.bf16.msra.mxu1 %v6640_v18  ;;  %v3345_v55 = vld [vmem:[#allocation8 + $0xe0] sm:$0xff]  ;;  %v10845_v18 = vld [vmem:[#allocation32_spill] sm:$0xff] }
 0x36b   : > { %6642 = vmatprep.subr.bf16.mxu1 %v10824_v50 }
 0x36c   : > { %3660 = vmatmul.mubr.f32.gmra.mrb[162].mxu0 %v10841_v47 }
 0x36d   : > { %6115 = vmatmul.mubr.f32.gmra.mrb[184].mxu1 %v9568_v40  ;;  %3664 = vmatprep.mubr.f32.mxu0 %v10842_v49  ;;  %v4551_v49 = vld [vmem:[#allocation8 + $0x460] sm:$0xff] }
 0x36e   : > { %6117 = vmatprep.mubr.f32.mxu1 %v9375_v16  ;;  %6644 = vmatpush1.bf16.msra.mxu1 %v6643_v22  ;;  %v6649_v16 = vpack.c.bf16 %v3346_v42, %v3345_v55  ;;  %v4548_v22 = vld [vmem:[#allocation8 + $0x448] sm:$0xff]  ;;  %v4549_v55 = vld [vmem:[#allocation8 + $0x450] sm:$0xff]  ;;  %v4550_v42 = vld [vmem:[#allocation8 + $0x458] sm:$0xff] }
 0x36f   : > { %6645 = vmatprep.subr.bf16.mxu1 %v10824_v50  ;;  %v6750_v43 = vpack.c.bf16 %v4548_v22, %v4547_v34  ;;  %v6754_v47 = vpack.c.bf16 %v4550_v42, %v4549_v55  ;;  %v10851_v34 = vld [vmem:[#allocation36_spill] sm:$0xff]  ;;  %v9663_v22 = vld [vmem:[#allocation2 + $0x110] sm:$0xff]  ;;  %v4507_v55 = vld [vmem:[#allocation8 + $0x300] sm:$0xff] }
 0x370   : > { %3665 = vmatmul.mubr.f32.gmra.mrb[164].mxu0 %v9588_v51  ;;  %v4508_v42 = vld [vmem:[#allocation8 + $0x308] sm:$0xff] }
 0x371   : > { %6118 = vmatmul.mubr.f32.gmra.mrb[186].mxu1 %v9577_v28  ;;  %3669 = vmatprep.mubr.f32.mxu0 %v8983_v32  ;;  %v6742_v32 = vpack.c.bf16 %v4544_v13, %v4543_v27  ;;  %v9638_v27 = vld [vmem:[#allocation2 + $0x2c0] sm:$0xff]  ;;  %v9640_v13 = vld [vmem:[#allocation2 + $0xa8] sm:$0xff] }
 0x372   : > { %6120 = vmatprep.mubr.f32.mxu1 %v9382_v46  ;;  %6647 = vmatpush1.bf16.msra.mxu1 %v6646_v35  ;;  %v6652_v46 = vpack.c.bf16 %v3348_v33, %v3347_v29  ;;  %v3230_v35 = vld [vmem:[#allocation2 + $0x48] sm:$0xff]  ;;  %v10848_v29 = vld [vmem:[#allocation33_spill] sm:$0xff]  ;;  %v9613_v33 = vld [vmem:[#allocation2 + $0x278] sm:$0xff] }
 0x373   : > { %6648 = vmatprep.subr.bf16.mxu1 %v10824_v50 }
 0x374   : > { %3670 = vmatmul.mubr.f32.gmra.mrb[166].mxu0 %v10843_v4  ;;  %v9628_v4 = vld [vmem:[#allocation2 + $0x2a8] sm:$0xff] }
 0x375   : > { %6121 = vmatmul.mubr.f32.gmra.mrb[188].mxu1 %v9584_v30  ;;  %3674 = vmatprep.mubr.f32.mxu0 %v10844_v38  ;;  %v9632_v38 = vld [vmem:[#allocation2 + $0xb0] sm:$0xff] }
 0x376   : > { %6123 = vmatprep.mubr.f32.mxu1 %v3457_v23  ;;  %6650 = vmatpush1.bf16.msra.mxu1 %v6649_v16  ;;  %v6865_v16 = vld [vmem:[#allocation2 + $0x68] sm:$0xff]  ;;  %v9617_v23 = vld [vmem:[#allocation2 + $0x270] sm:$0xff] }
 0x377   : > { %6651 = vmatprep.subr.bf16.mxu1 %v10824_v50 }
 0x378   : > { %3675 = vmatmul.mubr.f32.gmra.mrb[168].mxu0 %v9598_v15 }
 0x379   : > { %6124 = vmatmul.mubr.f32.gmra.mrb[190].mxu1 %v3460_v3  ;;  %3679 = vmatprep.mubr.f32.mxu0 %v8991_v56  ;;  %v9606_v56 = vld [vmem:[#allocation2 + $0x240] sm:$0xff]  ;;  %v4553_v3 = vld [vmem:[#allocation8 + $0x470] sm:$0xff] }
 0x37a   : > { %6653 = vmatpush1.bf16.msra.mxu1 %v6652_v46  ;;  %4024 = vmatprep.mubr.f32.mxu1 %v8939_v39  ;;  %v4545_v39 = vld [vmem:[#allocation8 + $0x430] sm:$0xff] }
 0x37b   : > { %6735 = vmatprep.subr.bf16.mxu1 %v6734_v31  ;;  %v9620_v46 = vld [vmem:[#allocation2 + $0x290] sm:$0xff] }
 0x37c   : > { %3680 = vmatmul.mubr.f32.gmra.mrb[170].mxu0 %v10845_v18  ;;  %v9655_v18 = vld [vmem:[#allocation2 + $0xd8] sm:$0xff] }
 0x37d   : > { %4025 = vmatmul.mubr.f32.vlgmr.msra.gmra.mrb[192].mxu1 %v9345_v7  ;;  %3684 = vmatprep.mubr.f32.mxu0 %v10846_v53  ;;  %v9658_v53 = vld [vmem:[#allocation2 + $0xf8] sm:$0xff] }
 0x37e   : > { %4029 = vmatprep.mubr.f32.mxu1 %v8941_v1  ;;  %6737 = vmatpush3.bf16.msra.mxu1 %v6734_v31  ;;  %v6746_v1 = vpack.c.bf16 %v4546_v54, %v4545_v39  ;;  %v6758_v31 = vpack.c.bf16 %v4552_v19, %v4551_v49  ;;  %v6867_v39 = vld [vmem:[#allocation2 + $0x2d8] sm:$0xff]  ;;  %v9649_v54 = vld [vmem:[#allocation2 + $0xe0] sm:$0xff] }
 0x37f   : > { %6739 = vmatprep.subr.bf16.mxu1 %v6738_v8  ;;  %v4510_v49 = vld [vmem:[#allocation8 + $0x318] sm:$0xff]  ;;  %v3229_v19 = vld [vmem:[#allocation2 + $0x40] sm:$0xff] }
 0x380   : > { %3685 = vmatmul.mubr.f32.gmra.mrb[172].mxu0 %v9606_v56 }
 0x381   : > { %4030 = vmatmul.mubr.f32.gmra.mrb[194].mxu1 %v10821_v37  ;;  %3689 = vmatprep.mubr.f32.mxu0 %v9609_v12 }
 0x382   : > { %4034 = vmatprep.mubr.f32.mxu1 %v6863_v21  ;;  %6741 = vmatpush3.bf16.msra.mxu1 %v6738_v8  ;;  %v6762_v8 = vpack.c.bf16 %v4554_v17, %v4553_v3  ;;  %v9652_v21 = vld [vmem:[#allocation2 + $0x2d0] sm:$0xff]  ;;  %v9681_v3 = vld [vmem:[#allocation2 + $0x158] sm:$0xff]  ;;  %v4512_v17 = vld [vmem:[#allocation8 + $0x328] sm:$0xff] }
 0x383   : > { %6743 = vmatprep.subr.bf16.mxu1 %v6742_v32 }
 0x384   : > { %3690 = vmatmul.mubr.f32.gmra.mrb[174].mxu0 %v10848_v29  ;;  %v9674_v29 = vld [vmem:[#allocation2 + $0x140] sm:$0xff] }
 0x385   : > { %4035 = vmatmul.mubr.f32.gmra.mrb[196].mxu1 %v10847_v5  ;;  %3694 = vmatprep.mubr.f32.mxu0 %v9613_v33  ;;  %v3455_v5 = vld [vmem:[#allocation2 + $0x300] sm:$0xff] }
 0x386   : > { %4039 = vmatprep.mubr.f32.mxu1 %v6864_v63  ;;  %6745 = vmatpush3.bf16.msra.mxu1 %v6742_v32  ;;  %v9644_v32 = vld [vmem:[#allocation2 + $0xc8] sm:$0xff]  ;;  %v3459_v63 = vld [vmem:[#allocation2 + $0x320] sm:$0xff] }
 0x387   : > { %6747 = vmatprep.subr.bf16.mxu1 %v6746_v1 }
 0x388   : > { %3695 = vmatmul.mubr.f32.gmra.mrb[176].mxu0 %v9617_v23 }
 0x389   : > { %4040 = vmatmul.mubr.f32.gmra.mrb[198].mxu1 %v3230_v35  ;;  %3699 = vmatprep.mubr.f32.mxu0 %v9620_v46  ;;  %v9669_v35 = vld [vmem:[#allocation2 + $0x128] sm:$0xff] }
 0x38a   : > { %4044 = vmatprep.mubr.f32.mxu1 %v6865_v16  ;;  %6749 = vmatpush3.bf16.msra.mxu1 %v6746_v1  ;;  %v6868_v1 = vld [vmem:[#allocation2 + $0x2f0] sm:$0xff]  ;;  %v3458_v16 = vld [vmem:[#allocation2 + $0x318] sm:$0xff] }
 0x38b   : > { %6751 = vmatprep.subr.bf16.mxu1 %v6750_v43 }
 0x38d   : > { %4045 = vmatmul.mubr.f32.gmra.mrb[200].mxu1 %v9345_v7  ;;  %v10849_v7 = vld [vmem:[#allocation34_spill] sm:$0xff] }
 0x38e   : > { %4049 = vmatprep.mubr.f32.mxu1 %v6866_v2  ;;  %6753 = vmatpush3.bf16.msra.mxu1 %v6750_v43  ;;  %v9666_v43 = vld [vmem:[#allocation2 + $0x108] sm:$0xff]  ;;  %v9678_v2 = vld [vmem:[#allocation2 + $0x138] sm:$0xff] }
 0x38f   : > { %6755 = vmatprep.subr.bf16.mxu1 %v6754_v47  ;;  %3700 = vmatmul.mubr.f32.gmra.mrb[178].mxu0 %v10849_v7 }
 0x390   : > { %3704 = vmatprep.mubr.f32.mxu0 %v9628_v4 }
 0x391   : > { %4050 = vmatmul.mubr.f32.gmra.mrb[202].mxu1 %v10821_v37  ;;  %v9635_v37 = vld [vmem:[#allocation2 + $0x2a0] sm:$0xff] }
 0x392   : > { %4054 = vmatprep.mubr.f32.mxu1 %v9624_v58  ;;  %6757 = vmatpush3.bf16.msra.mxu1 %v6754_v47  ;;  %v4509_v47 = vld [vmem:[#allocation8 + $0x310] sm:$0xff] }
 0x393   : > { %6759 = vmatprep.subr.bf16.mxu1 %v6758_v31  ;;  %3705 = vmatmul.mubr.f32.gmra.mrb[180].mxu0 %v9635_v37 }
 0x394   : > { %3709 = vmatprep.mubr.f32.mxu0 %v9638_v27 }
 0x395   : > { %4055 = vmatmul.mubr.f32.gmra.mrb[204].mxu1 %v9478_v10  ;;  %v10850_v10 = vld [vmem:[#allocation35_spill] sm:$0xff] }
 0x396   : > { %4059 = vmatprep.mubr.f32.mxu1 %v9632_v38  ;;  %6761 = vmatpush3.bf16.msra.mxu1 %v6758_v31  ;;  %v6690_v31 = vpack.c.bf16 %v4510_v49, %v4509_v47  ;;  %v4519_v47 = vld [vmem:[#allocation8 + $0x360] sm:$0xff]  ;;  %v4520_v49 = vld [vmem:[#allocation8 + $0x368] sm:$0xff] }
 0x397   : > { %6763 = vmatprep.subr.bf16.mxu1 %v6762_v8  ;;  %3710 = vmatmul.mubr.f32.gmra.mrb[182].mxu0 %v10850_v10  ;;  %v4513_v10 = vld [vmem:[#allocation8 + $0x330] sm:$0xff] }
 0x398   : > { %3714 = vmatprep.mubr.f32.mxu0 %v6867_v39  ;;  %v4514_v39 = vld [vmem:[#allocation8 + $0x338] sm:$0xff] }
 0x399   : > { %4060 = vmatmul.mubr.f32.gmra.mrb[206].mxu1 %v9640_v13 }
 0x39a   : > { %4064 = vmatprep.mubr.f32.mxu1 %v9644_v32  ;;  %6765 = vmatpush3.bf16.msra.mxu1 %v6762_v8  ;;  %v9688_v8 = vld [vmem:[#allocation2 + $0x170] sm:$0xff] }
 0x39b   : > { %3715 = vmatmul.mubr.f32.gmra.mrb[184].mxu0 %v9652_v21 }
 0x39c   : > { %3719 = vmatprep.mubr.f32.mxu0 %v6868_v1  ;;  %v9693_v1 = vld [vmem:[#allocation2 + $0xa0] sm:$0xff] }
 0x39d   : > { %4065 = vmatmul.mubr.f32.gmra.mrb[208].mxu1 %v9492_v0  ;;  %v3456_v0 = vld [vmem:[#allocation2 + $0x308] sm:$0xff] }
 0x39e   : > { %4069 = vmatprep.mubr.f32.mxu1 %v9649_v54 }
 0x39f   : > { %3720 = vmatmul.mubr.f32.gmra.mrb[186].mxu0 %v10851_v34  ;;  %v9695_v34 = vld [vmem:[#allocation2 + $0x168] sm:$0xff] }
 0x3a0   : > { %3724 = vmatprep.mubr.f32.mxu0 %v3456_v0  ;;  %v4516_v0 = vld [vmem:[#allocation8 + $0x348] sm:$0xff] }
 0x3a1   : > { %4070 = vmatmul.mubr.f32.gmra.mrb[210].mxu1 %v9655_v18 }
 0x3a2   : > { %4074 = vmatprep.mubr.f32.mxu1 %v9658_v53 }
 0x3a3   : > { %3725 = vmatmul.mubr.f32.gmra.mrb[188].mxu0 %v3455_v5 }
 0x3a4   : > { %3729 = vmatprep.mubr.f32.mxu0 %v3459_v63  ;;  %v9708_v63 = vld [vmem:[#allocation2 + $0x1a0] sm:$0xff] }
 0x3a5   : > { %4075 = vmatmul.mubr.f32.gmra.mrb[212].mxu1 %v9509_v41  ;;  %v6687_v41 = vpack.c.bf16 %v4508_v42, %v4507_v55  ;;  %v4517_v55 = vld [vmem:[#allocation8 + $0x350] sm:$0xff]  ;;  %v4518_v42 = vld [vmem:[#allocation8 + $0x358] sm:$0xff] }
 0x3a6   : > { %4079 = vmatprep.mubr.f32.mxu1 %v9663_v22 }
 0x3a7   : > { %3730 = vmatmul.mubr.f32.gmra.mrb[190].mxu0 %v3458_v16  ;;  %v9713_v16 = vld [vmem:[#allocation2 + $0x100] sm:$0xff] }
 0x3a8   : > { %6158 = vmatprep.mubr.f32.mxu0 %v9450_v20 }
 0x3a9   : > { %4080 = vmatmul.mubr.f32.gmra.mrb[214].mxu1 %v9666_v43 }
 0x3aa   : > { %4084 = vmatprep.mubr.f32.mxu1 %v9669_v35 }
 0x3ab   : > { %6159 = vmatmul.mubr.f32.vlgmr.msra.gmra.mrb[192].mxu0 %v9473_v62 }
 0x3ac   : > { %6161 = vmatprep.mubr.f32.mxu0 %v3229_v19  ;;  %6688 = vmatpush1.bf16.msra.mxu0 %v6687_v41  ;;  %v6702_v41 = vpack.c.bf16 %v4518_v42, %v4517_v55  ;;  %v6705_v19 = vpack.c.bf16 %v4520_v49, %v4519_v47  ;;  %v4526_v55 = vld [vmem:[#allocation8 + $0x398] sm:$0xff]  ;;  %v9753_v42 = vld [vmem:[#allocation2 + $0x1c0] sm:$0xff]  ;;  %v4528_v49 = vld [vmem:[#allocation8 + $0x3a8] sm:$0xff] }
 0x3ad   : > { %4085 = vmatmul.mubr.f32.gmra.mrb[216].mxu1 %v9525_v24  ;;  %6689 = vmatprep.subr.bf16.mxu0 %v10824_v50  ;;  %v4511_v24 = vld [vmem:[#allocation8 + $0x320] sm:$0xff] }
 0x3ae   : > { %4089 = vmatprep.mubr.f32.mxu1 %v9674_v29  ;;  %v6693_v7 = vpack.c.bf16 %v4512_v17, %v4511_v24  ;;  %v4521_v24 = vld [vmem:[#allocation8 + $0x370] sm:$0xff]  ;;  %v4522_v17 = vld [vmem:[#allocation8 + $0x378] sm:$0xff]  ;;  %v4527_v47 = vld [vmem:[#allocation8 + $0x3a0] sm:$0xff] }
 0x3af   : > { %6162 = vmatmul.mubr.f32.gmra.mrb[194].mxu0 %v9471_v6  ;;  %v9699_v6 = vld [vmem:[#allocation2 + $0x188] sm:$0xff] }
 0x3b0   : > { %6164 = vmatprep.mubr.f32.mxu0 %v9450_v20  ;;  %6691 = vmatpush1.bf16.msra.mxu0 %v6690_v31  ;;  %v6696_v20 = vpack.c.bf16 %v4514_v39, %v4513_v10  ;;  %v9728_v31 = vld [vmem:[#allocation2 + $0x1d0] sm:$0xff]  ;;  %v6708_v10 = vpack.c.bf16 %v4522_v17, %v4521_v24  ;;  %v4523_v39 = vld [vmem:[#allocation8 + $0x380] sm:$0xff] }
 0x3b1   : > { %4090 = vmatmul.mubr.f32.gmra.mrb[218].mxu1 %v9678_v2  ;;  %6692 = vmatprep.subr.bf16.mxu0 %v10824_v50  ;;  %v9768_v24 = vld [vmem:[#allocation2 + $0x230] sm:$0xff] }
 0x3b2   : > { %4094 = vmatprep.mubr.f32.mxu1 %v9681_v3  ;;  %v4529_v17 = vld [vmem:[#allocation8 + $0x3b0] sm:$0xff] }
 0x3b3   : > { %6165 = vmatmul.mubr.f32.gmra.mrb[196].mxu0 %v9473_v62  ;;  %v9704_v62 = vld [vmem:[#allocation2 + $0xd0] sm:$0xff] }
 0x3b4   : > { %6167 = vmatprep.mubr.f32.mxu0 %v9693_v1  ;;  %6694 = vmatpush1.bf16.msra.mxu0 %v6693_v7  ;;  %v9733_v7 = vld [vmem:[#allocation2 + $0x160] sm:$0xff] }
 0x3b5   : > { %4095 = vmatmul.mubr.f32.gmra.mrb[220].mxu1 %v9541_v14  ;;  %6695 = vmatprep.subr.bf16.mxu0 %v10824_v50  ;;  %v4515_v14 = vld [vmem:[#allocation8 + $0x340] sm:$0xff] }
 0x3b6   : > { %4099 = vmatprep.mubr.f32.mxu1 %v9688_v8  ;;  %v6699_v5 = vpack.c.bf16 %v4516_v0, %v4515_v14  ;;  %v9748_v0 = vld [vmem:[#allocation2 + $0x200] sm:$0xff] }
 0x3b7   : > { %6168 = vmatmul.mubr.f32.gmra.mrb[198].mxu0 %v9487_v48  ;;  %v9715_v48 = vld [vmem:[#allocation2 + $0x198] sm:$0xff] }
 0x3b8   : > { %6170 = vmatprep.mubr.f32.mxu0 %v9704_v62  ;;  %6697 = vmatpush1.bf16.msra.mxu0 %v6696_v20  ;;  %v4524_v20 = vld [vmem:[#allocation8 + $0x388] sm:$0xff] }
 0x3b9   : > { %4100 = vmatmul.mubr.f32.gmra.mrb[222].mxu1 %v9695_v34  ;;  %6698 = vmatprep.subr.bf16.mxu0 %v10824_v50  ;;  %v6711_v14 = vpack.c.bf16 %v4524_v20, %v4523_v39  ;;  %v9773_v39 = vld [vmem:[#allocation2 + $0x220] sm:$0xff] }
 0x3ba   : > { %4104 = vmatprep.mubr.f32.mxu1 %v9699_v6 }
 0x3bb   : > { %6171 = vmatmul.mubr.f32.gmra.mrb[200].mxu0 %v9496_v11  ;;  %v9724_v11 = vld [vmem:[#allocation2 + $0x130] sm:$0xff] }
 0x3bc   : > { %6173 = vmatprep.mubr.f32.mxu0 %v9713_v16  ;;  %6700 = vmatpush1.bf16.msra.mxu0 %v6699_v5  ;;  %v4525_v5 = vld [vmem:[#allocation8 + $0x390] sm:$0xff] }
 0x3bd   : > { %4105 = vmatmul.mubr.f32.gmra.mrb[224].mxu1 %v9557_v45  ;;  %v9719_v45 = vld [vmem:[#allocation2 + $0x1b8] sm:$0xff]  ;;  %6701 = vmatprep.subr.bf16.mxu0 %v10824_v50 }
 0x3be   : > { %4109 = vmatprep.mubr.f32.mxu1 %v9708_v63 }
 0x3bf   : > { %6174 = vmatmul.mubr.f32.gmra.mrb[202].mxu0 %v9503_v52  ;;  %v9735_v52 = vld [vmem:[#allocation2 + $0x1c8] sm:$0xff] }
 0x3c0   : > { %6176 = vmatprep.mubr.f32.mxu0 %v9724_v11  ;;  %6703 = vmatpush1.bf16.msra.mxu0 %v6702_v41  ;;  %v6714_v41 = vpack.c.bf16 %v4526_v55, %v4525_v5  ;;  %v4532_v5 = vld [vmem:[#allocation8 + $0x3c8] sm:$0xff] }
 0x3c1   : > { %4110 = vmatmul.mubr.f32.gmra.mrb[226].mxu1 %v9715_v48  ;;  %6704 = vmatprep.subr.bf16.mxu0 %v10824_v50 }
 0x3c2   : > { %4114 = vmatprep.mubr.f32.mxu1 %v9719_v45 }
 0x3c3   : > { %6177 = vmatmul.mubr.f32.gmra.mrb[204].mxu0 %v9513_v61  ;;  %v9744_v61 = vld [vmem:[#allocation2 + $0x190] sm:$0xff] }
 0x3c4   : > { %6179 = vmatprep.mubr.f32.mxu0 %v9733_v7  ;;  %6706 = vmatpush1.bf16.msra.mxu0 %v6705_v19  ;;  %v6717_v19 = vpack.c.bf16 %v4528_v49, %v4527_v47  ;;  %v4534_v47 = vld [vmem:[#allocation8 + $0x3d8] sm:$0xff]  ;;  %v9791_v49 = vld [vmem:[#allocation2 + $0x280] sm:$0xff] }
 0x3c5   : > { %4115 = vmatmul.mubr.f32.gmra.mrb[228].mxu1 %v9573_v59  ;;  %v9739_v59 = vld [vmem:[#allocation2 + $0x1e8] sm:$0xff]  ;;  %6707 = vmatprep.subr.bf16.mxu0 %v10824_v50 }
 0x3c6   : > { %4119 = vmatprep.mubr.f32.mxu1 %v9728_v31 }
 0x3c7   : > { %6180 = vmatmul.mubr.f32.gmra.mrb[206].mxu0 %v9520_v36  ;;  %v9755_v36 = vld [vmem:[#allocation2 + $0x1f8] sm:$0xff] }
 0x3c8   : > { %6182 = vmatprep.mubr.f32.mxu0 %v9744_v61  ;;  %6709 = vmatpush1.bf16.msra.mxu0 %v6708_v10  ;;  %v4530_v10 = vld [vmem:[#allocation8 + $0x3b8] sm:$0xff] }
 0x3c9   : > { %4120 = vmatmul.mubr.f32.gmra.mrb[230].mxu1 %v9735_v52  ;;  %6710 = vmatprep.subr.bf16.mxu0 %v10824_v50  ;;  %v6720_v20 = vpack.c.bf16 %v4530_v10, %v4529_v17  ;;  %v4536_v17 = vld [vmem:[#allocation8 + $0x3e8] sm:$0xff]  ;;  %v4537_v10 = vld [vmem:[#allocation8 + $0x3f0] sm:$0xff] }
 0x3ca   : > { %4124 = vmatprep.mubr.f32.mxu1 %v9739_v59 }
 0x3cb   : > { %6183 = vmatmul.mubr.f32.gmra.mrb[208].mxu0 %v9529_v57  ;;  %v9764_v57 = vld [vmem:[#allocation2 + $0x1f0] sm:$0xff] }
 0x3cc   : > { %6185 = vmatprep.mubr.f32.mxu0 %v9753_v42  ;;  %6712 = vmatpush1.bf16.msra.mxu0 %v6711_v14  ;;  %v4531_v14 = vld [vmem:[#allocation8 + $0x3c0] sm:$0xff] }
 0x3cd   : > { %4125 = vmatmul.mubr.f32.gmra.mrb[232].mxu1 %v9588_v51  ;;  %v9759_v51 = vld [vmem:[#allocation2 + $0x218] sm:$0xff]  ;;  %6713 = vmatprep.subr.bf16.mxu0 %v10824_v50  ;;  %v6723_v55 = vpack.c.bf16 %v4532_v5, %v4531_v14  ;;  %v9807_v14 = vld [vmem:[#allocation2 + $0x288] sm:$0xff] }
 0x3ce   : > { %4129 = vmatprep.mubr.f32.mxu1 %v9748_v0  ;;  %v4415_v5 = vld [vmem:[#allocation2 + $0x88] sm:$0xff] }
 0x3cf   : > { %6186 = vmatmul.mubr.f32.gmra.mrb[210].mxu0 %v9536_v25  ;;  %v9775_v25 = vld [vmem:[#allocation2 + $0x228] sm:$0xff] }
 0x3d0   : > { %6188 = vmatprep.mubr.f32.mxu0 %v9764_v57  ;;  %6715 = vmatpush1.bf16.msra.mxu0 %v6714_v41  ;;  %v4533_v41 = vld [vmem:[#allocation8 + $0x3d0] sm:$0xff] }
 0x3d1   : > { %4130 = vmatmul.mubr.f32.gmra.mrb[234].mxu1 %v9755_v36  ;;  %6716 = vmatprep.subr.bf16.mxu0 %v10824_v50 }
 0x3d2   : > { %4134 = vmatprep.mubr.f32.mxu1 %v9759_v51 }
 0x3d3   : > { %6189 = vmatmul.mubr.f32.gmra.mrb[212].mxu0 %v9545_v60  ;;  %v9784_v60 = vld [vmem:[#allocation2 + $0x250] sm:$0xff] }
 0x3d4   : > { %6191 = vmatprep.mubr.f32.mxu0 %v9773_v39  ;;  %6718 = vmatpush1.bf16.msra.mxu0 %v6717_v19  ;;  %v9793_v19 = vld [vmem:[#allocation2 + $0x258] sm:$0xff] }
 0x3d5   : > { %4135 = vmatmul.mubr.f32.gmra.mrb[236].mxu1 %v9598_v15  ;;  %v9779_v15 = vld [vmem:[#allocation2 + $0x248] sm:$0xff]  ;;  %6719 = vmatprep.subr.bf16.mxu0 %v10824_v50 }
 0x3d6   : > { %4139 = vmatprep.mubr.f32.mxu1 %v9768_v24 }
 0x3d7   : > { %6192 = vmatmul.mubr.f32.gmra.mrb[214].mxu0 %v9552_v44  ;;  %v6726_v44 = vpack.c.bf16 %v4534_v47, %v4533_v41  ;;  %v4427_v41 = vld [vmem:[#allocation2 + $0xe8] sm:$0xff]  ;;  %v4433_v47 = vld [vmem:[#allocation2 + $0x118] sm:$0xff] }
 0x3d8   : > { %6194 = vmatprep.mubr.f32.mxu0 %v9784_v60  ;;  %6721 = vmatpush1.bf16.msra.mxu0 %v6720_v20  ;;  %v4538_v20 = vld [vmem:[#allocation8 + $0x3f8] sm:$0xff] }
 0x3d9   : > { %4140 = vmatmul.mubr.f32.gmra.mrb[238].mxu1 %v9775_v25  ;;  %6722 = vmatprep.subr.bf16.mxu0 %v10824_v50 }
 0x3da   : > { %4144 = vmatprep.mubr.f32.mxu1 %v9779_v15 }
 0x3db   : > { %6195 = vmatmul.mubr.f32.gmra.mrb[216].mxu0 %v9561_v9 }
 0x3dc   : > { %6197 = vmatprep.mubr.f32.mxu0 %v9791_v49  ;;  %6724 = vmatpush1.bf16.msra.mxu0 %v6723_v55 }
 0x3dd   : > { %4145 = vmatmul.mubr.f32.gmra.mrb[240].mxu1 %v9606_v56  ;;  %6725 = vmatprep.subr.bf16.mxu0 %v10824_v50  ;;  %v4535_v56 = vld [vmem:[#allocation8 + $0x3e0] sm:$0xff] }
 0x3de   : > { %4149 = vmatprep.mubr.f32.mxu1 %v9609_v12  ;;  %v9800_v12 = vld [vmem:[#allocation2 + $0x2b0] sm:$0xff]  ;;  %v6729_v9 = vpack.c.bf16 %v4536_v17, %v4535_v56  ;;  %v4445_v17 = vld [vmem:[#allocation2 + $0x178] sm:$0xff] }
 0x3df   : > { %6198 = vmatmul.mubr.f32.gmra.mrb[218].mxu0 %v9568_v40  ;;  %v6732_v40 = vpack.c.bf16 %v4538_v20, %v4537_v10  ;;  %v4451_v10 = vld [vmem:[#allocation2 + $0x1a8] sm:$0xff] }
 0x3e0   : > { %6200 = vmatprep.mubr.f32.mxu0 %v9800_v12  ;;  %6727 = vmatpush1.bf16.msra.mxu0 %v6726_v44  ;;  %v4434_v44 = vld [vmem:[#allocation2 + $0x120] sm:$0xff] }
 0x3e1   : > { %4150 = vmatmul.mubr.f32.gmra.mrb[242].mxu1 %v9793_v19  ;;  %6728 = vmatprep.subr.bf16.mxu0 %v10824_v50 }
 0x3e2   : > { %4154 = vmatprep.mubr.f32.mxu1 %v9613_v33  ;;  %v4411_v33 = vld [vmem:[#allocation2 + $0x68] sm:$0xff] }
 0x3e3   : > { %6201 = vmatmul.mubr.f32.gmra.mrb[220].mxu0 %v9577_v28  ;;  %v4410_v28 = vld [vmem:[#allocation2 + $0x60] sm:$0xff] }
 0x3e4   : > { %6203 = vmatprep.mubr.f32.mxu0 %v9466_v26  ;;  %6730 = vmatpush1.bf16.msra.mxu0 %v6729_v9  ;;  %v4414_v26 = vld [vmem:[#allocation2 + $0x80] sm:$0xff] }
 0x3e5   : > { %4155 = vmatmul.mubr.f32.gmra.mrb[244].mxu1 %v9617_v23  ;;  %6731 = vmatprep.subr.bf16.mxu0 %v10824_v50  ;;  %v9816_v23 = vld [vmem:[#allocation2 + $0x2b8] sm:$0xff] }
 0x3e6   : > { %4159 = vmatprep.mubr.f32.mxu1 %v9620_v46  ;;  %v9819_v50 = vld [vmem:[#allocation2 + $0x338] sm:$0xff]  ;;  %v9824_v46 = vld [vmem:[#allocation2 + $0x350] sm:$0xff] }
 0x3e7   : > { %6204 = vmatmul.mubr.f32.gmra.mrb[222].mxu0 %v9584_v30  ;;  %v4413_v30 = vld [vmem:[#allocation2 + $0x78] sm:$0xff] }
 0x3e8   : > { %6733 = vmatpush1.bf16.msra.mxu0 %v6732_v40  ;;  %4619 = vmatprep.mubr.f32.mxu0 %v4411_v33 }
 0x3e9   : > { %4160 = vmatmul.mubr.f32.gmra.mrb[246].mxu1 %v9807_v14 }
 0x3ea   : > { %4164 = vmatprep.mubr.f32.mxu1 %v9628_v4  ;;  %v4416_v4 = vld [vmem:[#allocation2 + $0x90] sm:$0xff] }
 0x3eb   : > { %4620 = vmatmul.mubr.f32.vlgmr.msra.gmra.mrb[224].mxu0 %v4410_v28  ;;  %v4440_v28 = vld [vmem:[#allocation2 + $0x150] sm:$0xff] }
 0x3ec   : > { %4624 = vmatprep.mubr.f32.mxu0 %v4414_v26 }
 0x3ed   : > { %4165 = vmatmul.mubr.f32.gmra.mrb[248].mxu1 %v9635_v37  ;;  %v9828_v37 = vld [vmem:[#allocation2 + $0x348] sm:$0xff] }
 0x3ee   : > { %4169 = vmatprep.mubr.f32.mxu1 %v9638_v27  ;;  %v6872_v27 = vld [vmem:[#allocation2 + $0x10] sm:$0xff] }
 0x3ef   : > { %4625 = vmatmul.mubr.f32.gmra.mrb[226].mxu0 %v4413_v30  ;;  %v4457_v30 = vld [vmem:[#allocation2 + $0x1d8] sm:$0xff] }
 0x3f0   : > { %4629 = vmatprep.mubr.f32.mxu0 %v9624_v58  ;;  %v4422_v58 = vld [vmem:[#allocation2 + $0xc0] sm:$0xff] }
 0x3f1   : > { %4170 = vmatmul.mubr.f32.gmra.mrb[250].mxu1 %v9816_v23 }
 0x3f2   : > { %4174 = vmatprep.mubr.f32.mxu1 %v9819_v50 }
 0x3f3   : > { %4630 = vmatmul.mubr.f32.gmra.mrb[228].mxu0 %v4416_v4 }
 0x3f4   : > { %4634 = vmatprep.mubr.f32.mxu0 %v9632_v38 }
 0x3f5   : > { %4175 = vmatmul.mubr.f32.gmra.mrb[252].mxu1 %v9652_v21  ;;  %v4421_v21 = vld [vmem:[#allocation2 + $0xb8] sm:$0xff] }
 0x3f6   : > { %4179 = vmatprep.mubr.f32.mxu1 %v9824_v46 }
 0x3f7   : > { %4635 = vmatmul.mubr.f32.gmra.mrb[230].mxu0 %v9640_v13 }
 0x3f8   : > { %4639 = vmatprep.mubr.f32.mxu0 %v9644_v32 }
 0x3f9   : > { %4180 = vmatmul.mubr.f32.gmra.mrb[254].mxu1 %v9828_v37  ;;  %v3576_v38 = vpop.f32.mrb[128].mxu0 }
 0x3fa   : > { %6238 = vmatprep.mubr.f32.mxu1 %v6872_v27  ;;  %v3578_v55 = vpop.f32.mrb[129].mxu0 }
 0x3fb   : > { %4640 = vmatmul.mubr.f32.gmra.mrb[232].mxu0 %v4422_v58  ;;  %v4463_v58 = vld [vmem:[#allocation2 + $0x208] sm:$0xff]  ;;  %v4446_v55 = vld [vmem:[#allocation2 + $0x180] sm:$0xff] }
 0x3fc   : > { %4644 = vmatprep.mubr.f32.mxu0 %v9649_v54 }
 0x3fd   : > { %6239 = vmatmul.mubr.f32.vlgmr.msra.gmra.mrb[0].mxu1 %v4415_v5  ;;  %v3581_v13 = vpop.f32.mrb[130].mxu0 }
 0x3fe   : > { %6241 = vmatprep.mubr.f32.mxu1 %v9693_v1  ;;  %v3583_v32 = vpop.f32.mrb[131].mxu0  ;;  %v4428_v1 = vld [vmem:[#allocation2 + $0xf0] sm:$0xff] }
 0x3ff   : > { %4645 = vmatmul.mubr.f32.gmra.mrb[234].mxu0 %v9655_v18  ;;  %v4439_v18 = vld [vmem:[#allocation2 + $0x148] sm:$0xff]  ;;  %v4469_v32 = vld [vmem:[#allocation2 + $0x238] sm:$0xff] }
 0x400   : > { %4649 = vmatprep.mubr.f32.mxu0 %v9658_v53 }
 0x401   : > { %6242 = vmatmul.mubr.f32.gmra.mrb[2].mxu1 %v4421_v21  ;;  %v3586_v54 = vpop.f32.mrb[132].mxu0 }
 0x402   : > { %6244 = vmatprep.mubr.f32.mxu1 %v9704_v62  ;;  %v3588_v62 = vpop.f32.mrb[133].mxu0 }
 0x403   : > { %4650 = vmatmul.mubr.f32.gmra.mrb[236].mxu0 %v4428_v1 }
 0x404   : > { %4654 = vmatprep.mubr.f32.mxu0 %v9663_v22 }
 0x405   : > { %6245 = vmatmul.mubr.f32.gmra.mrb[4].mxu1 %v4427_v41  ;;  %v3591_v53 = vpop.f32.mrb[134].mxu0 }
 0x406   : > { %6247 = vmatprep.mubr.f32.mxu1 %v9713_v16  ;;  %v3593_v16 = vpop.f32.mrb[135].mxu0 }
 0x407   : > { %4655 = vmatmul.mubr.f32.gmra.mrb[238].mxu0 %v9666_v43 }
 0x408   : > { %4659 = vmatprep.mubr.f32.mxu0 %v9669_v35 }
 0x409   : > { %6248 = vmatmul.mubr.f32.gmra.mrb[6].mxu1 %v4433_v47  ;;  %v3596_v43 = vpop.f32.mrb[136].mxu0 }
 0x40a   : > { %6250 = vmatprep.mubr.f32.mxu1 %v9724_v11  ;;  %v3598_v35 = vpop.f32.mrb[137].mxu0 }
 0x40b   : > { %4660 = vmatmul.mubr.f32.gmra.mrb[240].mxu0 %v4434_v44  ;;  %v4481_v44 = vld [vmem:[#allocation2 + $0x298] sm:$0xff]  ;;  %v6873_v35 = vld [vmem:[#allocation2 + $0x340] sm:$0xff] }
 0x40c   : > { %4664 = vmatprep.mubr.f32.mxu0 %v9674_v29 }
 0x40d   : > { %6251 = vmatmul.mubr.f32.gmra.mrb[8].mxu1 %v4439_v18  ;;  %v3601_v33 = vpop.f32.mrb[138].mxu0 }
 0x40e   : > { %6253 = vmatprep.mubr.f32.mxu1 %v9733_v7  ;;  %v3603_v26 = vpop.f32.mrb[139].mxu0 }
 0x40f   : > { %4665 = vmatmul.mubr.f32.gmra.mrb[242].mxu0 %v9678_v2 }
 0x410   : > { %v6080_v56 = vpop.f32.mrb[160].mxu1  ;;  %4669 = vmatprep.mubr.f32.mxu0 %v9681_v3 }
 0x411   : > { %v3801_v22 = vpop.f32.mrb[161].mxu1  ;;  %6254 = vmatmul.mubr.f32.gmra.mrb[10].mxu1 %v4445_v17  ;;  %v9845_v11 = vadd.f32 %v6080_v56, %v3581_v13 }
 0x412   : > { %v9847_v9 = vadd.f32 %v3801_v22, %v3576_v38  ;;  %6256 = vmatprep.mubr.f32.mxu1 %v9744_v61  ;;  %v4487_v22 = vld [vmem:[#allocation2 + $0x2c8] sm:$0xff] }
 0x413   : > { %4670 = vmatmul.mubr.f32.gmra.mrb[244].mxu0 %v4440_v28  ;;  %v3606_v27 = vpop.f32.mrb[140].mxu0  ;;  %v6874_v28 = vld [vmem:[#allocation2 + $0x358] sm:$0xff] }
 0x414   : > { %v6083_v7 = vpop.f32.mrb[162].mxu1  ;;  %4674 = vmatprep.mubr.f32.mxu0 %v9688_v8 }
 0x415   : > { %v3811_v20 = vpop.f32.mrb[163].mxu1  ;;  %6257 = vmatmul.mubr.f32.gmra.mrb[12].mxu1 %v4451_v10  ;;  %v9852_v40 = vadd.f32 %v6083_v7, %v3591_v53 }
 0x416   : > { %6259 = vmatprep.mubr.f32.mxu1 %v9753_v42  ;;  %v9855_v29 = vadd.f32 %v3811_v20, %v3586_v54  ;;  %v3608_v42 = vpop.f32.mrb[141].mxu0  ;;  %v4475_v54 = vld [vmem:[#allocation2 + $0x268] sm:$0xff] }
 0x417   : > { %4675 = vmatmul.mubr.f32.gmra.mrb[246].mxu0 %v9695_v34  ;;  %v3611_v38 = vpop.f32.mrb[142].mxu0 }
 0x418   : > { %v6086_v61 = vpop.f32.mrb[164].mxu1  ;;  %4679 = vmatprep.mubr.f32.mxu0 %v9699_v6 }
 0x419   : > { %v3821_v2 = vpop.f32.mrb[165].mxu1  ;;  %6260 = vmatmul.mubr.f32.gmra.mrb[14].mxu1 %v4457_v30  ;;  %v9858_v4 = vadd.f32 %v6086_v61, %v3601_v33 }
 0x41a   : > { %6262 = vmatprep.mubr.f32.mxu1 %v9764_v57  ;;  %v9861_v3 = vadd.f32 %v3821_v2, %v3596_v43  ;;  %v3613_v57 = vpop.f32.mrb[143].mxu0  ;;  %v4499_v2 = vld [vmem:[#allocation2 + $0x328] sm:$0xff] }
 0x41b   : > { %4680 = vmatmul.mubr.f32.gmra.mrb[248].mxu0 %v4446_v55  ;;  %v3616_v6 = vpop.f32.mrb[144].mxu0 }
 0x41c   : > { %v6089_v5 = vpop.f32.mrb[166].mxu1  ;;  %4684 = vmatprep.mubr.f32.mxu0 %v9708_v63  ;;  %v4452_v63 = vld [vmem:[#allocation2 + $0x1b0] sm:$0xff] }
 0x41d   : > { %v3831_v21 = vpop.f32.mrb[167].mxu1  ;;  %6263 = vmatmul.mubr.f32.gmra.mrb[16].mxu1 %v4463_v58  ;;  %v9868_v41 = vadd.f32 %v6089_v5, %v3611_v38 }
 0x41e   : > { %6265 = vmatprep.mubr.f32.mxu1 %v9773_v39  ;;  %v9866_v8 = vadd.f32 %v3831_v21, %v3606_v27  ;;  %v3618_v39 = vpop.f32.mrb[145].mxu0 }
 0x41f   : > { %4685 = vmatmul.mubr.f32.gmra.mrb[250].mxu0 %v9715_v48  ;;  %v3621_v18 = vpop.f32.mrb[146].mxu0 }
 0x420   : > { %v6092_v13 = vpop.f32.mrb[168].mxu1  ;;  %4689 = vmatprep.mubr.f32.mxu0 %v9719_v45  ;;  %v3623_v16 = vpop.f32.mrb[147].mxu0 }
 0x421   : > { %v3841_v34 = vpop.f32.mrb[169].mxu1  ;;  %6266 = vmatmul.mubr.f32.gmra.mrb[18].mxu1 %v4469_v32  ;;  %v9877_v53 = vadd.f32 %v6092_v13, %v3621_v18 }
 0x422   : > { %6268 = vmatprep.mubr.f32.mxu1 %v9784_v60  ;;  %v9872_v1 = vadd.f32 %v3841_v34, %v3616_v6  ;;  %v4470_v34 = vld [vmem:[#allocation2 + $0x240] sm:$0xff] }
 0x423   : > { %4690 = vmatmul.mubr.f32.gmra.mrb[252].mxu0 %v4452_v63  ;;  %v3626_v48 = vpop.f32.mrb[148].mxu0 }
 0x424   : > { %v6095_v47 = vpop.f32.mrb[170].mxu1  ;;  %4694 = vmatprep.mubr.f32.mxu0 %v9728_v31  ;;  %v3628_v17 = vpop.f32.mrb[149].mxu0  ;;  %v4458_v31 = vld [vmem:[#allocation2 + $0x1e0] sm:$0xff] }
 0x425   : > { %v3851_v62 = vpop.f32.mrb[171].mxu1  ;;  %6269 = vmatmul.mubr.f32.gmra.mrb[20].mxu1 %v4475_v54  ;;  %v4480_v17 = vld [vmem:[#allocation2 + $0x290] sm:$0xff] }
 0x426   : > { %6271 = vmatprep.mubr.f32.mxu1 %v9791_v49  ;;  %v9881_v45 = vadd.f32 %v3851_v62, %v3626_v48 }
 0x427   : > { %4695 = vmatmul.mubr.f32.gmra.mrb[254].mxu0 %v9735_v52  ;;  %v3631_v7 = vpop.f32.mrb[150].mxu0  ;;  %v4496_v52 = vld [vmem:[#allocation2 + $0x310] sm:$0xff] }
 0x428   : > { %v6098_v60 = vpop.f32.mrb[172].mxu1  ;;  %4699 = vmatprep.mubr.f32.mxu0 %v9739_v59  ;;  %v9885_v10 = vadd.f32 %v6095_v47, %v3631_v7  ;;  %v3633_v20 = vpop.f32.mrb[151].mxu0  ;;  %v4483_v7 = vld [vmem:[#allocation2 + $0x2a8] sm:$0xff] }
 0x429   : > { %v3861_v56 = vpop.f32.mrb[173].mxu1  ;;  %6272 = vmatmul.mubr.f32.gmra.mrb[22].mxu1 %v4481_v44  ;;  %v4476_v44 = vld [vmem:[#allocation2 + $0x270] sm:$0xff] }
 0x42a   : > { %6274 = vmatprep.mubr.f32.mxu1 %v9800_v12 }
 0x42b   : > { %4700 = vmatmul.mubr.f32.gmra.mrb[0].mxu0 %v4458_v31  ;;  %v3636_v26 = vpop.f32.mrb[152].mxu0 }
 0x42c   : > { %v6101_v49 = vpop.f32.mrb[174].mxu1  ;;  %4704 = vmatprep.mubr.f32.mxu0 %v9748_v0  ;;  %v9888_v59 = vadd.f32 %v3861_v56, %v3636_v26  ;;  %v3638_v61 = vpop.f32.mrb[153].mxu0  ;;  %v4464_v0 = vld [vmem:[#allocation2 + $0x210] sm:$0xff]  ;;  %v4486_v26 = vld [vmem:[#allocation2 + $0x2c0] sm:$0xff] }
 0x42d   : > { %v3871_v43 = vpop.f32.mrb[175].mxu1  ;;  %6275 = vmatmul.mubr.f32.gmra.mrb[24].mxu1 %v4487_v22 }
 0x42e   : > { %6277 = vmatprep.mubr.f32.mxu1 %v6873_v35 }
 0x42f   : > { %4705 = vmatmul.mubr.f32.gmra.mrb[2].mxu0 %v9755_v36  ;;  %v3641_v42 = vpop.f32.mrb[154].mxu0 }
 0x430   : > { %v6104_v12 = vpop.f32.mrb[176].mxu1  ;;  %4709 = vmatprep.mubr.f32.mxu0 %v9759_v51  ;;  %v9892_v5 = vadd.f32 %v6098_v60, %v3641_v42  ;;  %v3643_v58 = vpop.f32.mrb[155].mxu0 }
 0x431   : > { %v3881_v33 = vpop.f32.mrb[177].mxu1  ;;  %6278 = vmatmul.mubr.f32.gmra.mrb[26].mxu1 %v6874_v28 }
 0x432   : > { %6280 = vmatprep.mubr.f32.mxu1 %v4496_v52 }
 0x433   : > { %4710 = vmatmul.mubr.f32.gmra.mrb[4].mxu0 %v4464_v0  ;;  %v3646_v36 = vpop.f32.mrb[156].mxu0 }
 0x434   : > { %v6107_v30 = vpop.f32.mrb[178].mxu1  ;;  %4714 = vmatprep.mubr.f32.mxu0 %v9768_v24  ;;  %v9897_v55 = vadd.f32 %v3871_v43, %v3646_v36  ;;  %v3648_v57 = vpop.f32.mrb[157].mxu0  ;;  %v4474_v24 = vld [vmem:[#allocation2 + $0x260] sm:$0xff] }
 0x435   : > { %v3891_v27 = vpop.f32.mrb[179].mxu1  ;;  %6281 = vmatmul.mubr.f32.gmra.mrb[28].mxu1 %v4499_v2 }
 0x436   : > { %6283 = vmatprep.mubr.f32.mxu1 %v6873_v35 }
 0x437   : > { %4715 = vmatmul.mubr.f32.gmra.mrb[6].mxu0 %v9775_v25  ;;  %v3651_v32 = vpop.f32.mrb[158].mxu0 }
 0x438   : > { %v9894_v21 = vpop.f32.mrb[180].mxu1  ;;  %4719 = vmatprep.mubr.f32.mxu0 %v9779_v15  ;;  %v9905_v6 = vadd.f32 %v6101_v49, %v3651_v32  ;;  %v3653_v39 = vpop.f32.mrb[159].mxu0  ;;  %v4477_v15 = vld [vmem:[#allocation2 + $0x278] sm:$0xff] }
 0x439   : > { %v3901_v38 = vpop.f32.mrb[181].mxu1  ;;  %6284 = vmatmul.mubr.f32.gmra.mrb[30].mxu1 %v6874_v28 }
 0x43b   : > { %4720 = vmatmul.mubr.f32.gmra.mrb[8].mxu0 %v4470_v34  ;;  %v3656_v62 = vpop.f32.mrb[160].mxu0  ;;  %v6875_v34 = vld [vmem:[#allocation2 + $0x330] sm:$0xff] }
 0x43c   : > { %v9900_v51 = vpop.f32.mrb[182].mxu1  ;;  %4724 = vmatprep.mubr.f32.mxu0 %v4474_v24  ;;  %v9911_v25 = vadd.f32 %v3881_v33, %v3656_v62  ;;  %v3658_v18 = vpop.f32.mrb[161].mxu0  ;;  %v4482_v33 = vld [vmem:[#allocation2 + $0x2a0] sm:$0xff] }
 0x43d   : > { %v9903_v13 = vpop.f32.mrb[183].mxu1  ;;  %v4495_v18 = vld [vmem:[#allocation2 + $0x308] sm:$0xff] }
 0x43f   : > { %4725 = vmatmul.mubr.f32.gmra.mrb[10].mxu0 %v9793_v19  ;;  %v3661_v60 = vpop.f32.mrb[162].mxu0 }
 0x440   : > { %v9907_v47 = vpop.f32.mrb[184].mxu1  ;;  %4729 = vmatprep.mubr.f32.mxu0 %v4477_v15  ;;  %v9918_v56 = vadd.f32 %v6104_v12, %v3661_v60  ;;  %v3663_v48 = vpop.f32.mrb[163].mxu0 }
 0x441   : > { %v9909_v54 = vpop.f32.mrb[185].mxu1  ;;  %v4494_v48 = vld [vmem:[#allocation2 + $0x300] sm:$0xff] }
 0x443   : > { %4730 = vmatmul.mubr.f32.gmra.mrb[12].mxu0 %v4476_v44  ;;  %v3666_v43 = vpop.f32.mrb[164].mxu0 }
 0x444   : > { %v9914_v63 = vpop.f32.mrb[186].mxu1  ;;  %4734 = vmatprep.mubr.f32.mxu0 %v4480_v17  ;;  %v9924_v19 = vadd.f32 %v3891_v27, %v3666_v43  ;;  %v3668_v35 = vpop.f32.mrb[165].mxu0  ;;  %v4498_v43 = vld [vmem:[#allocation2 + $0x320] sm:$0xff] }
 0x445   : > { %v9916_v16 = vpop.f32.mrb[187].mxu1 }
 0x447   : > { %4735 = vmatmul.mubr.f32.gmra.mrb[14].mxu0 %v9807_v14  ;;  %v3671_v12 = vpop.f32.mrb[166].mxu0 }
 0x448   : > { %v9920_v49 = vpop.f32.mrb[188].mxu1  ;;  %4739 = vmatprep.mubr.f32.mxu0 %v4483_v7  ;;  %v9931_v28 = vadd.f32 %v6107_v30, %v3671_v12  ;;  %v3673_v52 = vpop.f32.mrb[167].mxu0 }
 0x449   : > { %v9922_v22 = vpop.f32.mrb[189].mxu1 }
 0x44b   : > { %4740 = vmatmul.mubr.f32.gmra.mrb[16].mxu0 %v4482_v33  ;;  %v3676_v14 = vpop.f32.mrb[168].mxu0  ;;  %v4497_v33 = vld [vmem:[#allocation2 + $0x318] sm:$0xff] }
 0x44c   : > { %v9927_v31 = vpop.f32.mrb[190].mxu1  ;;  %4744 = vmatprep.mubr.f32.mxu0 %v4486_v26  ;;  %v9936_v42 = vadd.f32 %v3901_v38, %v3676_v14  ;;  %v3678_v0 = vpop.f32.mrb[169].mxu0 }
 0x44d   : > { %v9929_v20 = vpop.f32.mrb[191].mxu1 }
 0x44f   : > { %4745 = vmatmul.mubr.f32.gmra.mrb[18].mxu0 %v9816_v23  ;;  %v3681_v57 = vpop.f32.mrb[170].mxu0 }
 0x450   : > { %v4026_v61 = vpop.f32.mrb[192].mxu1  ;;  %4749 = vmatprep.mubr.f32.mxu0 %v9819_v50  ;;  %v9944_v32 = vadd.f32 %v9894_v21, %v3681_v57 }
 0x451   : > { %v9934_v2 = vadd.f32 %v4026_v61, %v9847_v9  ;;  %v4028_v27 = vpop.f32.mrb[193].mxu1  ;;  %v3683_v9 = vpop.f32.mrb[171].mxu0 }
 0x453   : > { %4750 = vmatmul.mubr.f32.gmra.mrb[20].mxu0 %v6875_v34  ;;  %v3686_v24 = vpop.f32.mrb[172].mxu0 }
 0x454   : > { %v4031_v58 = vpop.f32.mrb[194].mxu1  ;;  %4754 = vmatprep.mubr.f32.mxu0 %v9824_v46  ;;  %v9951_v62 = vadd.f32 %v9903_v13, %v3686_v24 }
 0x455   : > { %v9941_v30 = vadd.f32 %v4031_v58, %v9845_v11  ;;  %v4033_v36 = vpop.f32.mrb[195].mxu1  ;;  %v3688_v11 = vpop.f32.mrb[173].mxu0 }
 0x457   : > { %4755 = vmatmul.mubr.f32.gmra.mrb[22].mxu0 %v9828_v37  ;;  %v3691_v44 = vpop.f32.mrb[174].mxu0 }
 0x458   : > { %v4036_v39 = vpop.f32.mrb[196].mxu1  ;;  %4759 = vmatprep.mubr.f32.mxu0 %v4495_v18  ;;  %v3693_v17 = vpop.f32.mrb[175].mxu0 }
 0x459   : > { %v9948_v38 = vadd.f32 %v4036_v39, %v9855_v29  ;;  %v4038_v23 = vpop.f32.mrb[197].mxu1  ;;  %v9958_v29 = vadd.f32 %v9900_v51, %v3691_v44 }
 0x45b   : > { %4760 = vmatmul.mubr.f32.gmra.mrb[24].mxu0 %v4494_v48  ;;  %v3696_v12 = vpop.f32.mrb[176].mxu0 }
 0x45c   : > { %v4041_v21 = vpop.f32.mrb[198].mxu1  ;;  %4764 = vmatprep.mubr.f32.mxu0 %v4498_v43  ;;  %v3698_v52 = vpop.f32.mrb[177].mxu0 }
 0x45d   : > { %v9955_v15 = vadd.f32 %v4041_v21, %v9852_v40  ;;  %v4043_v60 = vpop.f32.mrb[199].mxu1  ;;  %v9964_v40 = vadd.f32 %v9909_v54, %v3696_v12 }
 0x45f   : > { %4765 = vmatmul.mubr.f32.gmra.mrb[26].mxu0 %v4497_v33 }
 0x460   : > { %v4046_v13 = vpop.f32.mrb[200].mxu1  ;;  %4769 = vmatprep.mubr.f32.mxu0 %v9819_v50 }
 0x461   : > { %v9961_v35 = vadd.f32 %v4046_v13, %v9861_v3  ;;  %v4048_v7 = vpop.f32.mrb[201].mxu1 }
 0x462   : > { %v3701_v27 = vpop.f32.mrb[178].mxu0 }
 0x463   : > { %v9969_v14 = vadd.f32 %v9907_v47, %v3701_v27  ;;  %v3703_v3 = vpop.f32.mrb[179].mxu0  ;;  %4770 = vmatmul.mubr.f32.gmra.mrb[28].mxu0 %v6875_v34 }
 0x464   : > { %v4051_v26 = vpop.f32.mrb[202].mxu1  ;;  %4774 = vmatprep.mubr.f32.mxu0 %v9824_v46 }
 0x465   : > { %v4052_v51 = vadd.f32 %v4051_v26, %v9858_v4  ;;  %v4053_v61 = vpop.f32.mrb[203].mxu1 }
 0x466   : > { %v3706_v36 = vpop.f32.mrb[180].mxu0 }
 0x467   : > { %v9976_v57 = vadd.f32 %v9916_v16, %v3706_v36  ;;  %v3708_v50 = vpop.f32.mrb[181].mxu0  ;;  %4775 = vmatmul.mubr.f32.gmra.mrb[30].mxu0 %v9828_v37 }
 0x468   : > { %v4056_v0 = vpop.f32.mrb[204].mxu1 }
 0x469   : > { %v9973_v54 = vadd.f32 %v4056_v0, %v9866_v8  ;;  %v4058_v58 = vpop.f32.mrb[205].mxu1 }
 0x46a   : > { %v3711_v39 = vpop.f32.mrb[182].mxu0 }
 0x46b   : > { %v9981_v34 = vadd.f32 %v9914_v63, %v3711_v39  ;;  %v3713_v46 = vpop.f32.mrb[183].mxu0 }
 0x46c   : > { %v4061_v4 = vpop.f32.mrb[206].mxu1 }
 0x46d   : > { %v4062_v47 = vadd.f32 %v4061_v4, %v9868_v41  ;;  %v4063_v9 = vpop.f32.mrb[207].mxu1 }
 0x46e   : > { %v3716_v11 = vpop.f32.mrb[184].mxu0 }
 0x46f   : > { %v9985_v16 = vadd.f32 %v9922_v22, %v3716_v11  ;;  %v3718_v18 = vpop.f32.mrb[185].mxu0 }
 0x470   : > { %v4066_v23 = vpop.f32.mrb[208].mxu1 }
 0x471   : > { %v4067_v8 = vadd.f32 %v4066_v23, %v9872_v1  ;;  %v4068_v24 = vpop.f32.mrb[209].mxu1 }
 0x472   : > { %v3721_v41 = vpop.f32.mrb[186].mxu0 }
 0x473   : > { %v9989_v44 = vadd.f32 %v9920_v49, %v3721_v41  ;;  %v3723_v63 = vpop.f32.mrb[187].mxu0 }
 0x474   : > { %v4071_v21 = vpop.f32.mrb[210].mxu1 }
 0x475   : > { %v4072_v37 = vadd.f32 %v4071_v21, %v9877_v53  ;;  %v4073_v60 = vpop.f32.mrb[211].mxu1 }
 0x476   : > { %v3726_v1 = vpop.f32.mrb[188].mxu0 }
 0x477   : > { %v9993_v13 = vadd.f32 %v9929_v20, %v3726_v1  ;;  %v3728_v22 = vpop.f32.mrb[189].mxu0 }
 0x478   : > { %v4076_v48 = vpop.f32.mrb[212].mxu1 }
 0x479   : > { %v4077_v17 = vadd.f32 %v4076_v48, %v9881_v45  ;;  %v4078_v43 = vpop.f32.mrb[213].mxu1 }
 0x47a   : > { %v3731_v53 = vpop.f32.mrb[190].mxu0 }
 0x47b   : > { %v9997_v52 = vadd.f32 %v9927_v31, %v3731_v53  ;;  %v3733_v49 = vpop.f32.mrb[191].mxu0 }
 0x47c   : > { %v4081_v7 = vpop.f32.mrb[214].mxu1 }
 0x47d   : > { %v4082_v12 = vadd.f32 %v4081_v7, %v9885_v10  ;;  %v4083_v33 = vpop.f32.mrb[215].mxu1 }
 0x47e   : > { %v6160_v45 = vpop.f32.mrb[192].mxu0 }
 0x47f   : > { %v10001_v3 = vadd.f32 %v6160_v45, %v9941_v30  ;;  %v4251_v20 = vpop.f32.mrb[193].mxu0 }
 0x480   : > { %v4086_v26 = vpop.f32.mrb[216].mxu1  ;;  %v10004_v58 = vadd.f32 %v4251_v20, %v9934_v2 }
 0x481   : > { %v4087_v61 = vadd.f32 %v4086_v26, %v9888_v59  ;;  %v4088_v27 = vpop.f32.mrb[217].mxu1 }
 0x482   : > { %v6163_v50 = vpop.f32.mrb[194].mxu0 }
 0x483   : > { %v10008_v31 = vadd.f32 %v6163_v50, %v9955_v15  ;;  %v4261_v4 = vpop.f32.mrb[195].mxu0 }
 0x484   : > { %v4091_v0 = vpop.f32.mrb[218].mxu1  ;;  %v10011_v59 = vadd.f32 %v4261_v4, %v9948_v38 }
 0x485   : > { %v4092_v10 = vadd.f32 %v4091_v0, %v9892_v5  ;;  %v4093_v36 = vpop.f32.mrb[219].mxu1 }
 0x486   : > { %v6166_v46 = vpop.f32.mrb[196].mxu0 }
 0x487   : > { %v10014_v23 = vadd.f32 %v6166_v46, %v4052_v51  ;;  %v4271_v2 = vpop.f32.mrb[197].mxu0 }
 0x488   : > { %v4096_v9 = vpop.f32.mrb[220].mxu1  ;;  %v10017_v5 = vadd.f32 %v4271_v2, %v9961_v35 }
 0x489   : > { %v4097_v30 = vadd.f32 %v4096_v9, %v9897_v55  ;;  %v4098_v39 = vpop.f32.mrb[221].mxu1 }
 0x48a   : > { %v6169_v18 = vpop.f32.mrb[198].mxu0 }
 0x48b   : > { %v10020_v21 = vadd.f32 %v6169_v18, %v4062_v47  ;;  %v4281_v60 = vpop.f32.mrb[199].mxu0 }
 0x48c   : > { %v4101_v24 = vpop.f32.mrb[222].mxu1  ;;  %v10023_v41 = vadd.f32 %v4281_v60, %v9973_v54 }
 0x48d   : > { %v4102_v11 = vadd.f32 %v4101_v24, %v9905_v6  ;;  %v4103_v15 = vpop.f32.mrb[223].mxu1 }
 0x48e   : > { %v6172_v63 = vpop.f32.mrb[200].mxu0 }
 0x48f   : > { %v10026_v48 = vadd.f32 %v6172_v63, %v4072_v37  ;;  %v4291_v43 = vpop.f32.mrb[201].mxu0 }
 0x490   : > { %v4106_v38 = vpop.f32.mrb[224].mxu1  ;;  %v10028_v1 = vadd.f32 %v4291_v43, %v4067_v8 }
 0x491   : > { %v4107_v55 = vadd.f32 %v4106_v38, %v9911_v25  ;;  %v4108_v51 = vpop.f32.mrb[225].mxu1 }
 0x492   : > { %v6175_v47 = vpop.f32.mrb[202].mxu0 }
 0x493   : > { %v10031_v7 = vadd.f32 %v6175_v47, %v4082_v12  ;;  %v4301_v33 = vpop.f32.mrb[203].mxu0 }
 0x494   : > { %v4111_v35 = vpop.f32.mrb[226].mxu1  ;;  %v10033_v54 = vadd.f32 %v4301_v33, %v4077_v17 }
 0x495   : > { %v4112_v6 = vadd.f32 %v4111_v35, %v9918_v56  ;;  %v4113_v22 = vpop.f32.mrb[227].mxu1 }
 0x496   : > { %v6178_v26 = vpop.f32.mrb[204].mxu0 }
 0x497   : > { %v10036_v37 = vadd.f32 %v6178_v26, %v4092_v10  ;;  %v4311_v27 = vpop.f32.mrb[205].mxu0 }
 0x498   : > { %v4116_v53 = vpop.f32.mrb[228].mxu1  ;;  %v10038_v8 = vadd.f32 %v4311_v27, %v4087_v61 }
 0x499   : > { %v4117_v25 = vadd.f32 %v4116_v53, %v9924_v19  ;;  %v4118_v49 = vpop.f32.mrb[229].mxu1 }
 0x49a   : > { %v6181_v0 = vpop.f32.mrb[206].mxu0 }
 0x49b   : > { %v10041_v12 = vadd.f32 %v6181_v0, %v4102_v11  ;;  %v4321_v36 = vpop.f32.mrb[207].mxu0 }
 0x49c   : > { %v4121_v45 = vpop.f32.mrb[230].mxu1  ;;  %v10043_v17 = vadd.f32 %v4321_v36, %v4097_v30 }
 0x49d   : > { %v4122_v56 = vadd.f32 %v4121_v45, %v9931_v28  ;;  %v4123_v20 = vpop.f32.mrb[231].mxu1 }
 0x49e   : > { %v6184_v9 = vpop.f32.mrb[208].mxu0 }
 0x49f   : > { %v10046_v10 = vadd.f32 %v6184_v9, %v4112_v6  ;;  %v4331_v39 = vpop.f32.mrb[209].mxu0 }
 0x4a0   : > { %v4126_v50 = vpop.f32.mrb[232].mxu1  ;;  %v10048_v61 = vadd.f32 %v4331_v39, %v4107_v55 }
 0x4a1   : > { %v4127_v19 = vadd.f32 %v4126_v50, %v9936_v42  ;;  %v4128_v4 = vpop.f32.mrb[233].mxu1 }
 0x4a2   : > { %v6187_v24 = vpop.f32.mrb[210].mxu0 }
 0x4a3   : > { %v10051_v11 = vadd.f32 %v6187_v24, %v4122_v56  ;;  %v4341_v15 = vpop.f32.mrb[211].mxu0 }
 0x4a4   : > { %v4131_v46 = vpop.f32.mrb[234].mxu1  ;;  %v10053_v30 = vadd.f32 %v4341_v15, %v4117_v25 }
 0x4a5   : > { %v4132_v28 = vadd.f32 %v4131_v46, %v9944_v32  ;;  %v4133_v2 = vpop.f32.mrb[235].mxu1 }
 0x4a6   : > { %v6190_v38 = vpop.f32.mrb[212].mxu0 }
 0x4a7   : > { %v10056_v51 = vadd.f32 %v6190_v38, %v4132_v28  ;;  %v4351_v63 = vpop.f32.mrb[213].mxu0 }
 0x4a8   : > { %v4136_v18 = vpop.f32.mrb[236].mxu1  ;;  %v10058_v55 = vadd.f32 %v4351_v63, %v4127_v19 }
 0x4a9   : > { %v4137_v42 = vadd.f32 %v4136_v18, %v9951_v62  ;;  %v4138_v60 = vpop.f32.mrb[237].mxu1 }
 0x4aa   : > { %v6193_v6 = vpop.f32.mrb[214].mxu0 }
 0x4ab   : > { %v4361_v47 = vpop.f32.mrb[215].mxu0 }
 0x4ac   : > { %v4141_v43 = vpop.f32.mrb[238].mxu1  ;;  %v10063_v53 = vadd.f32 %v4361_v47, %v4137_v42 }
 0x4ad   : > { %v4142_v32 = vadd.f32 %v4141_v43, %v9958_v29  ;;  %v4143_v35 = vpop.f32.mrb[239].mxu1 }
 0x4ae   : > { %v6196_v49 = vpop.f32.mrb[216].mxu0 }
 0x4af   : > { %v10061_v22 = vadd.f32 %v6193_v6, %v4142_v32  ;;  %v4371_v26 = vpop.f32.mrb[217].mxu0 }
 0x4b0   : > { %v4146_v33 = vpop.f32.mrb[240].mxu1 }
 0x4b1   : > { %v4147_v62 = vadd.f32 %v4146_v33, %v9964_v40  ;;  %v4148_v25 = vpop.f32.mrb[241].mxu1 }
 0x4b2   : > { %v6199_v29 = vpop.f32.mrb[218].mxu0 }
 0x4b3   : > { %v10066_v45 = vadd.f32 %v4371_v26, %v4147_v62  ;;  %v4381_v36 = vpop.f32.mrb[219].mxu0 }
 0x4b4   : > { %v4151_v27 = vpop.f32.mrb[242].mxu1 }
 0x4b5   : > { %v4152_v56 = vadd.f32 %v4151_v27, %v9969_v14  ;;  %v4153_v20 = vpop.f32.mrb[243].mxu1 }
 0x4b6   : > { %v6202_v9 = vpop.f32.mrb[220].mxu0 }
 0x4b7   : > { %v10069_v0 = vadd.f32 %v6196_v49, %v4152_v56  ;;  %v4391_v40 = vpop.f32.mrb[221].mxu0 }
 0x4b8   : > { %v4156_v50 = vpop.f32.mrb[244].mxu1 }
 0x4b9   : > { %v4157_v19 = vadd.f32 %v4156_v50, %v9976_v57  ;;  %v4158_v4 = vpop.f32.mrb[245].mxu1 }
 0x4ba   : > { %v6205_v24 = vpop.f32.mrb[222].mxu0 }
 0x4bb   : > { %v10072_v39 = vadd.f32 %v4381_v36, %v4157_v19  ;;  %v4401_v14 = vpop.f32.mrb[223].mxu0 }
 0x4bc   : > { %v4161_v46 = vpop.f32.mrb[246].mxu1 }
 0x4bd   : > { %v4162_v28 = vadd.f32 %v4161_v46, %v9981_v34  ;;  %v4163_v2 = vpop.f32.mrb[247].mxu1 }
 0x4be   : > { %v4621_v38 = vpop.f32.mrb[224].mxu0 }
 0x4bf   : > { %v10075_v15 = vadd.f32 %v6199_v29, %v4162_v28  ;;  %v4623_v57 = vpop.f32.mrb[225].mxu0 }
 0x4c0   : > { %v4166_v18 = vpop.f32.mrb[248].mxu1 }
 0x4c1   : > { %v4167_v42 = vadd.f32 %v4166_v18, %v9985_v16  ;;  %v4168_v60 = vpop.f32.mrb[249].mxu1 }
 0x4c2   : > { %v4626_v6 = vpop.f32.mrb[226].mxu0 }
 0x4c3   : > { %v10078_v63 = vadd.f32 %v4391_v40, %v4167_v42  ;;  %v4628_v34 = vpop.f32.mrb[227].mxu0 }
 0x4c4   : > { %v4171_v43 = vpop.f32.mrb[250].mxu1 }
 0x4c5   : > { %v4172_v32 = vadd.f32 %v4171_v43, %v9989_v44  ;;  %v4173_v35 = vpop.f32.mrb[251].mxu1 }
 0x4c6   : > { %v4631_v49 = vpop.f32.mrb[228].mxu0 }
 0x4c7   : > { %v10081_v47 = vadd.f32 %v6202_v9, %v4172_v32  ;;  %v4633_v16 = vpop.f32.mrb[229].mxu0 }
 0x4c8   : > { %v4176_v33 = vpop.f32.mrb[252].mxu1 }
 0x4c9   : > { %v4177_v62 = vadd.f32 %v4176_v33, %v9993_v13  ;;  %v4178_v25 = vpop.f32.mrb[253].mxu1 }
 0x4ca   : > { %v4636_v29 = vpop.f32.mrb[230].mxu0 }
 0x4cb   : > { %v10084_v26 = vadd.f32 %v4401_v14, %v4177_v62  ;;  %v4638_v44 = vpop.f32.mrb[231].mxu0 }
 0x4cc   : > { %v4181_v27 = vpop.f32.mrb[254].mxu1 }
 0x4cd   : > { %v4182_v56 = vadd.f32 %v4181_v27, %v9997_v52  ;;  %v4183_v20 = vpop.f32.mrb[255].mxu1 }
 0x4ce   : > { %v4641_v40 = vpop.f32.mrb[232].mxu0 }
 0x4cf   : > { %v10087_v36 = vadd.f32 %v6205_v24, %v4182_v56  ;;  %v4643_v46 = vpop.f32.mrb[233].mxu0 }
 0x4d0   : > { %v6240_v50 = vpop.f32.mrb[0].mxu1 }
 0x4d1   : > { %v4846_v19 = vpop.f32.mrb[1].mxu1  ;;  %v4852_v4 = vadd.f32 %v6240_v50, %v4626_v6 }
 0x4d2   : > { %v4847_v9 = vadd.f32 %v4846_v19, %v4621_v38  ;;  %v4646_v42 = vpop.f32.mrb[234].mxu0 }
 0x4d3   : > { %v10090_v13 = vadd.f32 %v4852_v4, %v10001_v3  ;;  %v4648_v60 = vpop.f32.mrb[235].mxu0 }
 0x4d4   : > { %v10093_v28 = vadd.f32 %v4847_v9, %v10004_v58  ;;  %v6243_v2 = vpop.f32.mrb[2].mxu1 }
 0x4d5   : > { %v4856_v14 = vpop.f32.mrb[3].mxu1  ;;  %v4862_v52 = vadd.f32 %v6243_v2, %v4636_v29 }
 0x4d6   : > { %v4857_v18 = vadd.f32 %v4856_v14, %v4631_v49  ;;  %v4651_v35 = vpop.f32.mrb[236].mxu0 }
 0x4d7   : > { %v10096_v24 = vadd.f32 %v4862_v52, %v10008_v31  ;;  %v4653_v6 = vpop.f32.mrb[237].mxu0 }
 0x4d8   : > { %v10099_v57 = vadd.f32 %v4857_v18, %v10011_v59  ;;  %v6246_v38 = vpop.f32.mrb[4].mxu1 }
 0x4d9   : > { %v4866_v43 = vpop.f32.mrb[5].mxu1  ;;  %v4872_v3 = vadd.f32 %v6246_v38, %v4646_v42 }
 0x4da   : > { %v4867_v32 = vadd.f32 %v4866_v43, %v4641_v40  ;;  %v4656_v25 = vpop.f32.mrb[238].mxu0 }
 0x4db   : > { %v10102_v58 = vadd.f32 %v4872_v3, %v10014_v23  ;;  %v4658_v16 = vpop.f32.mrb[239].mxu0 }
 0x4dc   : > { %v6249_v34 = vpop.f32.mrb[6].mxu1  ;;  %v10105_v33 = vadd.f32 %v4867_v32, %v10017_v5 }
 0x4dd   : > { %v4876_v62 = vpop.f32.mrb[7].mxu1  ;;  %v4882_v49 = vadd.f32 %v6249_v34, %v4656_v25  ;;  %v5037_v25 = vadd.f32 %v10090_v13, %v10093_v28 }
 0x4de   : > { %v4877_v31 = vadd.f32 %v4876_v62, %v4651_v35  ;;  %v4661_v23 = vpop.f32.mrb[240].mxu0 }
 0x4df   : > { %v10111_v20 = vadd.f32 %v4882_v49, %v10020_v21  ;;  %v4663_v44 = vpop.f32.mrb[241].mxu0  ;;  %v5076_v49 = vmul.f32 %v10099_v57, %v10099_v57 }
 0x4e0   : > { %v6252_v59 = vpop.f32.mrb[8].mxu1  ;;  %v10108_v27 = vadd.f32 %v4877_v31, %v10023_v41 }
 0x4e1   : > { %v4886_v56 = vpop.f32.mrb[9].mxu1 }
 0x4e2   : > { %v4887_v29 = vadd.f32 %v4886_v56, %v4661_v23  ;;  %v4666_v4 = vpop.f32.mrb[242].mxu0  ;;  %v5038_v23 = vadd.f32 %v5037_v25, %v10099_v57 }
 0x4e3   : > { %v4892_v9 = vadd.f32 %v6252_v59, %v4666_v4  ;;  %v4668_v40 = vpop.f32.mrb[243].mxu0 }
 0x4e4   : > { %v6255_v50 = vpop.f32.mrb[10].mxu1  ;;  %v10114_v5 = vadd.f32 %v4887_v29, %v10028_v1  ;;  %v5077_v29 = vmul.f32 %v10096_v24, %v10096_v24  ;;  %v5078_v40 = vmul.f32 %v10105_v33, %v10105_v33 }
 0x4e5   : > { %v4896_v19 = vpop.f32.mrb[11].mxu1  ;;  %v10117_v41 = vadd.f32 %v4892_v9, %v10026_v48  ;;  %v5075_v48 = vmul.f32 %v10090_v13, %v10090_v13  ;;  %v5039_v9 = vadd.f32 %v5038_v23, %v10096_v24 }
 0x4e6   : > { %v4671_v14 = vpop.f32.mrb[244].mxu0 }
 0x4e7   : > { %v4897_v52 = vadd.f32 %v4896_v19, %v4671_v14  ;;  %v4673_v21 = vpop.f32.mrb[245].mxu0 }
 0x4e8   : > { %v6258_v46 = vpop.f32.mrb[12].mxu1  ;;  %v5040_v21 = vadd.f32 %v5039_v9, %v10105_v33 }
 0x4e9   : > { %v4906_v2 = vpop.f32.mrb[13].mxu1  ;;  %v10120_v60 = vadd.f32 %v4897_v52, %v10033_v54  ;;  %v5074_v54 = vmul.f32 %v10093_v28, %v10093_v28 }
 0x4ea   : > { %v4676_v38 = vpop.f32.mrb[246].mxu0 }
 0x4eb   : > { %v4902_v43 = vadd.f32 %v6255_v50, %v4676_v38  ;;  %v4678_v1 = vpop.f32.mrb[247].mxu0  ;;  %v5106_v56 = vadd.f32 %v5075_v48, %v5074_v54  ;;  %v5041_v48 = vadd.f32 %v5040_v21, %v10102_v58 }
 0x4ec   : > { %v6261_v18 = vpop.f32.mrb[14].mxu1 }
 0x4ed   : > { %v4916_v42 = vpop.f32.mrb[15].mxu1  ;;  %v10125_v35 = vadd.f32 %v4902_v43, %v10031_v7  ;;  %v5107_v4 = vadd.f32 %v5106_v56, %v5076_v49  ;;  %v5042_v49 = vadd.f32 %v5041_v48, %v10108_v27 }
 0x4ee   : > { %v4681_v6 = vpop.f32.mrb[248].mxu0 }
 0x4ef   : > { %v4907_v34 = vadd.f32 %v4906_v2, %v4681_v6  ;;  %v4683_v62 = vpop.f32.mrb[249].mxu0  ;;  %v5108_v52 = vadd.f32 %v5107_v4, %v5077_v29 }
 0x4f0   : > { %v10122_v3 = vpop.f32.mrb[16].mxu1 }
 0x4f1   : > { %v4926_v32 = vpop.f32.mrb[17].mxu1  ;;  %v10140_v7 = vadd.f32 %v4907_v34, %v10038_v8  ;;  %v5109_v6 = vadd.f32 %v5108_v52, %v5078_v40  ;;  %v5080_v34 = vmul.f32 %v10108_v27, %v10108_v27 }
 0x4f2   : > { %v4686_v59 = vpop.f32.mrb[250].mxu0 }
 0x4f3   : > { %v4912_v44 = vadd.f32 %v6258_v46, %v4686_v59  ;;  %v4688_v50 = vpop.f32.mrb[251].mxu0  ;;  %v5079_v46 = vmul.f32 %v10102_v58, %v10102_v58 }
 0x4f4   : > { %v10129_v31 = vpop.f32.mrb[18].mxu1  ;;  %v5082_v50 = vmul.f32 %v10114_v5, %v10114_v5 }
 0x4f5   : > { %v10137_v16 = vpop.f32.mrb[19].mxu1  ;;  %v10153_v8 = vadd.f32 %v4912_v44, %v10036_v37  ;;  %v5110_v25 = vadd.f32 %v5109_v6, %v5079_v46  ;;  %v5043_v44 = vadd.f32 %v5042_v49, %v10111_v20  ;;  %v5084_v6 = vmul.f32 %v10120_v60, %v10120_v60 }
 0x4f6   : > { %v4691_v14 = vpop.f32.mrb[252].mxu0 }
 0x4f7   : > { %v4917_v38 = vadd.f32 %v4916_v42, %v4691_v14  ;;  %v4693_v43 = vpop.f32.mrb[253].mxu0  ;;  %v5081_v42 = vmul.f32 %v10111_v20, %v10111_v20  ;;  %v5111_v29 = vadd.f32 %v5110_v25, %v5080_v34  ;;  %v5044_v14 = vadd.f32 %v5043_v44, %v10114_v5 }
 0x4f8   : > { %v10145_v19 = vpop.f32.mrb[20].mxu1  ;;  %v5086_v44 = vmul.f32 %v10140_v7, %v10140_v7 }
 0x4f9   : > { %v10150_v2 = vpop.f32.mrb[21].mxu1  ;;  %v10166_v37 = vadd.f32 %v4917_v38, %v10043_v17  ;;  %v5112_v40 = vadd.f32 %v5111_v29, %v5081_v42  ;;  %v5045_v43 = vadd.f32 %v5044_v14, %v10117_v41 }
 0x4fa   : > { %v4696_v54 = vpop.f32.mrb[254].mxu0 }
 0x4fb   : > { %v4922_v59 = vadd.f32 %v6261_v18, %v4696_v54  ;;  %v4698_v56 = vpop.f32.mrb[255].mxu0  ;;  %v5083_v18 = vmul.f32 %v10117_v41, %v10117_v41  ;;  %v5113_v38 = vadd.f32 %v5112_v40, %v5082_v50  ;;  %v5046_v25 = vadd.f32 %v5045_v43, %v10120_v60 }
 0x4fc   : > { %v10158_v1 = vpop.f32.mrb[22].mxu1 }
 0x4fd   : > { %v10163_v62 = vpop.f32.mrb[23].mxu1  ;;  %v10179_v17 = vadd.f32 %v4922_v59, %v10041_v12  ;;  %v5114_v54 = vadd.f32 %v5113_v38, %v5083_v18  ;;  %v5047_v29 = vadd.f32 %v5046_v25, %v10125_v35 }
 0x4fe   : > { %v4701_v9 = vpop.f32.mrb[0].mxu0 }
 0x4ff   : > { %v4927_v52 = vadd.f32 %v4926_v32, %v4701_v9  ;;  %v4703_v21 = vpop.f32.mrb[1].mxu0  ;;  %v5085_v32 = vmul.f32 %v10125_v35, %v10125_v35  ;;  %v5115_v56 = vadd.f32 %v5114_v54, %v5084_v6  ;;  %v5048_v14 = vadd.f32 %v5047_v29, %v10140_v7 }
 0x500   : > { %v10171_v23 = vpop.f32.mrb[24].mxu1  ;;  %v5088_v6 = vmul.f32 %v10166_v37, %v10166_v37 }
 0x501   : > { %v10176_v4 = vpop.f32.mrb[25].mxu1  ;;  %v10192_v12 = vadd.f32 %v4927_v52, %v10048_v61  ;;  %v5116_v40 = vadd.f32 %v5115_v56, %v5085_v32  ;;  %v5049_v43 = vadd.f32 %v5048_v14, %v10153_v8 }
 0x502   : > { %v4706_v34 = vpop.f32.mrb[2].mxu0 }
 0x503   : > { %v4932_v49 = vadd.f32 %v10122_v3, %v4706_v34  ;;  %v4708_v42 = vpop.f32.mrb[3].mxu0  ;;  %v5087_v3 = vmul.f32 %v10153_v8, %v10153_v8  ;;  %v5117_v38 = vadd.f32 %v5116_v40, %v5086_v44  ;;  %v5050_v32 = vadd.f32 %v5049_v43, %v10166_v37 }
 0x504   : > { %v10184_v46 = vpop.f32.mrb[26].mxu1  ;;  %v5090_v44 = vmul.f32 %v10192_v12, %v10192_v12 }
 0x505   : > { %v10189_v48 = vpop.f32.mrb[27].mxu1  ;;  %v10206_v50 = vadd.f32 %v4932_v49, %v10046_v10  ;;  %v5118_v25 = vadd.f32 %v5117_v38, %v5087_v3  ;;  %v5051_v29 = vadd.f32 %v5050_v32, %v10179_v17 }
 0x506   : > { %v4711_v9 = vpop.f32.mrb[4].mxu0 }
 0x507   : > { %v4937_v18 = vadd.f32 %v10137_v16, %v4711_v9  ;;  %v4713_v52 = vpop.f32.mrb[5].mxu0  ;;  %v5089_v16 = vmul.f32 %v10179_v17, %v10179_v17  ;;  %v5119_v56 = vadd.f32 %v5118_v25, %v5088_v6  ;;  %v5052_v14 = vadd.f32 %v5051_v29, %v10192_v12 }
 0x508   : > { %v10198_v59 = vpop.f32.mrb[28].mxu1  ;;  %v5091_v3 = vmul.f32 %v10206_v50, %v10206_v50 }
 0x509   : > { %v10203_v61 = vpop.f32.mrb[29].mxu1  ;;  %v10220_v34 = vadd.f32 %v4937_v18, %v10053_v30  ;;  %v5120_v40 = vadd.f32 %v5119_v56, %v5089_v16  ;;  %v5053_v38 = vadd.f32 %v5052_v14, %v10206_v50 }
 0x50a   : > { %v4716_v54 = vpop.f32.mrb[6].mxu0 }
 0x50b   : > { %v4942_v49 = vadd.f32 %v10129_v31, %v4716_v54  ;;  %v4718_v42 = vpop.f32.mrb[7].mxu0  ;;  %v5121_v52 = vadd.f32 %v5120_v40, %v5090_v44  ;;  %v5092_v43 = vmul.f32 %v10220_v34, %v10220_v34  ;;  %v5054_v25 = vadd.f32 %v5053_v38, %v10220_v34 }
 0x50c   : > { %v10212_v21 = vpop.f32.mrb[30].mxu1 }
 0x50d   : > { %v10217_v10 = vpop.f32.mrb[31].mxu1  ;;  %v10230_v9 = vadd.f32 %v4942_v49, %v10051_v11  ;;  %v5122_v54 = vadd.f32 %v5121_v52, %v5091_v3 }
 0x50e   : > { %v4721_v30 = vpop.f32.mrb[8].mxu0 }
 0x50f   : > { %v4947_v18 = vadd.f32 %v10150_v2, %v4721_v30  ;;  %v4723_v31 = vpop.f32.mrb[9].mxu0  ;;  %v5093_v32 = vmul.f32 %v10230_v9, %v10230_v9  ;;  %v5123_v49 = vadd.f32 %v5122_v54, %v5092_v43  ;;  %v5055_v42 = vadd.f32 %v5054_v25, %v10230_v9 }
 0x511   : > { %v10240_v6 = vadd.f32 %v4947_v18, %v10058_v55  ;;  %v5124_v44 = vadd.f32 %v5123_v49, %v5093_v32 }
 0x512   : > { %v4726_v11 = vpop.f32.mrb[10].mxu0 }
 0x513   : > { %v4952_v16 = vadd.f32 %v10145_v19, %v4726_v11  ;;  %v4728_v2 = vpop.f32.mrb[11].mxu0  ;;  %v5094_v56 = vmul.f32 %v10240_v6, %v10240_v6  ;;  %v5056_v30 = vadd.f32 %v5055_v42, %v10240_v6 }
 0x515   : > { %v10250_v29 = vadd.f32 %v4952_v16, %v10056_v51  ;;  %v5125_v3 = vadd.f32 %v5124_v44, %v5094_v56 }
 0x516   : > { %v4731_v55 = vpop.f32.mrb[12].mxu0 }
 0x517   : > { %v5095_v40 = vmul.f32 %v10250_v29, %v10250_v29  ;;  %v4957_v14 = vadd.f32 %v10163_v62, %v4731_v55  ;;  %v4733_v19 = vpop.f32.mrb[13].mxu0  ;;  %v5057_v18 = vadd.f32 %v5056_v30, %v10250_v29 }
 0x519   : > { %v10258_v31 = vadd.f32 %v4957_v14, %v10063_v53  ;;  %v5126_v38 = vadd.f32 %v5125_v3, %v5095_v40 }
 0x51a   : > { %v4736_v52 = vpop.f32.mrb[14].mxu0 }
 0x51b   : > { %v5058_v51 = vadd.f32 %v5057_v18, %v10258_v31  ;;  %v5096_v43 = vmul.f32 %v10258_v31, %v10258_v31  ;;  %v4962_v11 = vadd.f32 %v10158_v1, %v4736_v52  ;;  %v4738_v54 = vpop.f32.mrb[15].mxu0 }
 0x51d   : > { %v5127_v25 = vadd.f32 %v5126_v38, %v5096_v43  ;;  %v10265_v62 = vadd.f32 %v4962_v11, %v10061_v22 }
 0x51e   : > { %v4741_v32 = vpop.f32.mrb[16].mxu0 }
 0x51f   : > { %v5059_v16 = vadd.f32 %v5058_v51, %v10265_v62  ;;  %v5097_v53 = vmul.f32 %v10265_v62, %v10265_v62  ;;  %v4967_v2 = vadd.f32 %v10176_v4, %v4741_v32  ;;  %v4743_v49 = vpop.f32.mrb[17].mxu0 }
 0x521   : > { %v5128_v42 = vadd.f32 %v5127_v25, %v5097_v53  ;;  %v10272_v56 = vadd.f32 %v4967_v2, %v10066_v45 }
 0x522   : > { %v4746_v55 = vpop.f32.mrb[18].mxu0 }
 0x523   : > { %v5060_v1 = vadd.f32 %v5059_v16, %v10272_v56  ;;  %v5098_v22 = vmul.f32 %v10272_v56, %v10272_v56  ;;  %v4972_v44 = vadd.f32 %v10171_v23, %v4746_v55  ;;  %v4748_v30 = vpop.f32.mrb[19].mxu0 }
 0x525   : > { %v5129_v40 = vadd.f32 %v5128_v42, %v5098_v22  ;;  %v10279_v14 = vadd.f32 %v4972_v44, %v10069_v0 }
 0x526   : > { %v4751_v19 = vpop.f32.mrb[20].mxu0 }
 0x527   : > { %v5061_v4 = vadd.f32 %v5060_v1, %v10279_v14  ;;  %v5099_v45 = vmul.f32 %v10279_v14, %v10279_v14  ;;  %v4977_v3 = vadd.f32 %v10189_v48, %v4751_v19  ;;  %v4753_v18 = vpop.f32.mrb[21].mxu0 }
 0x529   : > { %v5130_v52 = vadd.f32 %v5129_v40, %v5099_v45  ;;  %v10286_v38 = vadd.f32 %v4977_v3, %v10072_v39 }
 0x52a   : > { %v4756_v51 = vpop.f32.mrb[22].mxu0 }
 0x52b   : > { %v5062_v23 = vadd.f32 %v5061_v4, %v10286_v38  ;;  %v5100_v0 = vmul.f32 %v10286_v38, %v10286_v38  ;;  %v4982_v43 = vadd.f32 %v10184_v46, %v4756_v51  ;;  %v4758_v11 = vpop.f32.mrb[23].mxu0 }
 0x52d   : > { %v5131_v54 = vadd.f32 %v5130_v52, %v5100_v0  ;;  %v10293_v25 = vadd.f32 %v4982_v43, %v10075_v15 }
 0x52e   : > { %v4761_v32 = vpop.f32.mrb[24].mxu0 }
 0x52f   : > { %v5063_v48 = vadd.f32 %v5062_v23, %v10293_v25  ;;  %v5101_v39 = vmul.f32 %v10293_v25, %v10293_v25  ;;  %v4987_v16 = vadd.f32 %v10203_v61, %v4761_v32  ;;  %v4763_v53 = vpop.f32.mrb[25].mxu0 }
 0x531   : > { %v5132_v2 = vadd.f32 %v5131_v54, %v5101_v39  ;;  %v10300_v49 = vadd.f32 %v4987_v16, %v10078_v63 }
 0x532   : > { %v4766_v42 = vpop.f32.mrb[26].mxu0 }
 0x533   : > { %v5064_v46 = vadd.f32 %v5063_v48, %v10300_v49  ;;  %v5102_v15 = vmul.f32 %v10300_v49, %v10300_v49  ;;  %v4992_v55 = vadd.f32 %v10198_v59, %v4766_v42  ;;  %v4768_v1 = vpop.f32.mrb[27].mxu0 }
 0x535   : > { %v5133_v22 = vadd.f32 %v5132_v2, %v5102_v15  ;;  %v10307_v44 = vadd.f32 %v4992_v55, %v10081_v47 }
 0x536   : > { %v4771_v30 = vpop.f32.mrb[28].mxu0 }
 0x537   : > { %v5065_v61 = vadd.f32 %v5064_v46, %v10307_v44  ;;  %v5103_v63 = vmul.f32 %v10307_v44, %v10307_v44  ;;  %v4997_v40 = vadd.f32 %v10217_v10, %v4771_v30  ;;  %v4773_v19 = vpop.f32.mrb[29].mxu0 }
 0x539   : > { %v5134_v4 = vadd.f32 %v5133_v22, %v5103_v63  ;;  %v10314_v45 = vadd.f32 %v4997_v40, %v10084_v26 }
 0x53a   : > { %v4776_v3 = vpop.f32.mrb[30].mxu0 }
 0x53b   : > { %v5066_v59 = vadd.f32 %v5065_v61, %v10314_v45  ;;  %v5104_v47 = vmul.f32 %v10314_v45, %v10314_v45  ;;  %v5002_v18 = vadd.f32 %v10212_v21, %v4776_v3  ;;  %v4778_v52 = vpop.f32.mrb[31].mxu0 }
 0x53d   : > { %v5135_v51 = vadd.f32 %v5134_v4, %v5104_v47  ;;  %v5036_v23 = vadd.f32 %v5002_v18, %v10087_v36 }
 0x53f   : > { %v5067_v0 = vadd.f32 %v5066_v59, %v5036_v23  ;;  %v5105_v43 = vmul.f32 %v5036_v23, %v5036_v23 }
 0x541   : > { %v5068_v10 = vrot.slane %v5067_v0, 4  ;;  %v5136_v11 = vadd.f32 %v5135_v51, %v5105_v43 }
 0x543   : > { %v5069_v54 = vadd.f32 %v5068_v10, %v5067_v0  ;;  %v5137_v32 = vrot.slane %v5136_v11, 4 }
 0x545   : > { %v5070_v26 = vrot.slane %v5069_v54, 2  ;;  %v5138_v48 = vadd.f32 %v5137_v32, %v5136_v11  ;;  %v5323_v32 = vld [vmem:[%s7270_s13 + $0xf8] sm:$0xff] }
 0x547   : > { %v5071_v39 = vadd.f32 %v5070_v26, %v5069_v54  ;;  %v5139_v16 = vrot.slane %v5138_v48, 2 }
 0x549   : > { %v5072_v53 = vrot.slane %v5071_v39, 1  ;;  %v5140_v2 = vadd.f32 %v5139_v16, %v5138_v48 }
 0x54b   : > { %v5073_v42 = vadd.f32 %v5072_v53, %v5071_v39  ;;  %v5141_v46 = vrot.slane %v5140_v2, 1 }
 0x54d   : > { %v5142_v15 = vadd.f32 %v5141_v46, %v5140_v2  ;;  %v10321_v21 = vmul.f32 0.00390625, %v5073_v42 }
 0x54f   : > { %v5144_v55 = vmul.f32 0.00390625, %v5142_v15  ;;  %v5145_v36 = vmul.f32 %v10321_v21, %v10321_v21  ;;  %v5179_v1 = vsub.f32 %v5036_v23, %v10321_v21  ;;  %v5169_v63 = vsub.f32 %v10250_v29, %v10321_v21  ;;  %v10396_v23 = vld [vmem:[%s10633_s6] ss:$0 sm:$0xff] }
 0x550   : > { %v5170_v40 = vsub.f32 %v10258_v31, %v10321_v21  ;;  %v5171_v19 = vsub.f32 %v10265_v62, %v10321_v21  ;;  %v5172_v4 = vsub.f32 %v10272_v56, %v10321_v21  ;;  %v5173_v3 = vsub.f32 %v10279_v14, %v10321_v21 }
 0x551   : > { %v5146_v22 = vsub.f32 %v5144_v55, %v5145_v36  ;;  %v5174_v59 = vsub.f32 %v10286_v38, %v10321_v21  ;;  %v5175_v47 = vsub.f32 %v10293_v25, %v10321_v21  ;;  %v5176_v29 = vsub.f32 %v10300_v49, %v10321_v21 }
 0x552   : > { %v5177_v31 = vsub.f32 %v10307_v44, %v10321_v21  ;;  %v5178_v62 = vsub.f32 %v10314_v45, %v10321_v21  ;;  %v5148_v56 = vsub.f32 %v10093_v28, %v10321_v21  ;;  %v5149_v14 = vsub.f32 %v10090_v13, %v10321_v21 }
 0x553   : > { %v5147_v30 = vmax.f32 %v5146_v22, 0.0  ;;  %v5150_v38 = vsub.f32 %v10099_v57, %v10321_v21  ;;  %v5151_v25 = vsub.f32 %v10096_v24, %v10321_v21  ;;  %v5152_v49 = vsub.f32 %v10105_v33, %v10321_v21 }
 0x554   : > { %v5153_v44 = vsub.f32 %v10102_v58, %v10321_v21  ;;  %v5154_v45 = vsub.f32 %v10108_v27, %v10321_v21  ;;  %v5155_v28 = vsub.f32 %v10111_v20, %v10321_v21  ;;  %v5156_v13 = vsub.f32 %v10114_v5, %v10321_v21 }
 0x555   : > { %v5180_v61 = vadd.f32 1e-05, %v5147_v30  ;;  %v5157_v57 = vsub.f32 %v10117_v41, %v10321_v21  ;;  %v5158_v24 = vsub.f32 %v10120_v60, %v10321_v21  ;;  %v5159_v33 = vsub.f32 %v10125_v35, %v10321_v21  ;;  %v10383_v60 = vld [vmem:[%s10632_s5] ss:$0 sm:$0xff] }
 0x556   : > { %v5160_v58 = vsub.f32 %v10140_v7, %v10321_v21  ;;  %v5161_v27 = vsub.f32 %v10153_v8, %v10321_v21  ;;  %v5162_v20 = vsub.f32 %v10166_v37, %v10321_v21  ;;  %v5163_v5 = vsub.f32 %v10179_v17, %v10321_v21 }
 0x557   : > { %6840 = vrsqrt.f32 %v5180_v61  ;;  %v5164_v41 = vsub.f32 %v10192_v12, %v10321_v21  ;;  %v5165_v35 = vsub.f32 %v10206_v50, %v10321_v21  ;;  %v5166_v7 = vsub.f32 %v10220_v34, %v10321_v21 }
 0x558   : > { %v5167_v8 = vsub.f32 %v10230_v9, %v10321_v21  ;;  %v5168_v37 = vsub.f32 %v10240_v6, %v10321_v21 }
 0x561   : > { %v6841_v18 = vpop.eup %6840 }
 0x562   : > { %v5213_v17 = vmul.f32 %v6841_v18, %v5179_v1  ;;  %v5182_v12 = vmul.f32 %v6841_v18, %v5148_v56  ;;  %v5183_v52 = vmul.f32 %v6841_v18, %v5149_v14  ;;  %v5184_v51 = vmul.f32 %v6841_v18, %v5150_v38 }
 0x563   : > { %v5185_v50 = vmul.f32 %v6841_v18, %v5151_v25  ;;  %v5186_v0 = vmul.f32 %v6841_v18, %v5152_v49  ;;  %v5187_v43 = vmul.f32 %v6841_v18, %v5153_v44  ;;  %v5188_v34 = vmul.f32 %v6841_v18, %v5154_v45 }
 0x564   : > { %v5252_v10 = vmul.f32 %v10383_v60, %v5213_v17  ;;  %v5189_v11 = vmul.f32 %v6841_v18, %v5155_v28  ;;  %v5190_v9 = vmul.f32 %v6841_v18, %v5156_v13  ;;  %v5191_v54 = vmul.f32 %v6841_v18, %v5157_v57 }
 0x565   : > { %v5192_v6 = vmul.f32 %v6841_v18, %v5158_v24  ;;  %v5193_v26 = vmul.f32 %v6841_v18, %v5159_v33  ;;  %v5194_v48 = vmul.f32 %v6841_v18, %v5160_v58  ;;  %v5195_v39 = vmul.f32 %v6841_v18, %v5161_v27 }
 0x566   : > { %v5291_v16 = vadd.f32 %v10396_v23, %v5252_v10  ;;  %v5196_v53 = vmul.f32 %v6841_v18, %v5162_v20  ;;  %v5197_v2 = vmul.f32 %v6841_v18, %v5163_v5  ;;  %v5198_v42 = vmul.f32 %v6841_v18, %v5164_v41 }
 0x567   : > { %v5199_v46 = vmul.f32 %v6841_v18, %v5165_v35  ;;  %v5200_v15 = vmul.f32 %v6841_v18, %v5166_v7  ;;  %v5201_v21 = vmul.f32 %v6841_v18, %v5167_v8  ;;  %v5202_v55 = vmul.f32 %v6841_v18, %v5168_v37 }
 0x568   : > { %v5355_v36 = vadd.f32 %v5323_v32, %v5291_v16  ;;  %v5203_v1 = vmul.f32 %v6841_v18, %v5169_v63  ;;  %v5204_v22 = vmul.f32 %v6841_v18, %v5170_v40  ;;  %v5205_v30 = vmul.f32 %v6841_v18, %v5171_v19 }
 0x569   : > { %v5206_v61 = vmul.f32 %v6841_v18, %v5172_v4  ;;  %v5207_v56 = vmul.f32 %v6841_v18, %v5173_v3  ;;  %v5208_v14 = vmul.f32 %v6841_v18, %v5174_v59  ;;  %v5209_v38 = vmul.f32 %v6841_v18, %v5175_v47 }
 0x56a   : > { %5387 = vst [vmem:[%s10403_s21 + $0xf8] sm:$0xff] %v5355_v36  ;;  %v5210_v25 = vmul.f32 %v6841_v18, %v5176_v29  ;;  %v5211_v49 = vmul.f32 %v6841_v18, %v5177_v31  ;;  %v5212_v44 = vmul.f32 %v6841_v18, %v5178_v62  ;;  %v5221_v45 = vmul.f32 %v10383_v60, %v5182_v12 }
 0x56b   : > { %v5222_v28 = vmul.f32 %v10383_v60, %v5183_v52  ;;  %v5223_v63 = vmul.f32 %v10383_v60, %v5184_v51  ;;  %v5224_v40 = vmul.f32 %v10383_v60, %v5185_v50  ;;  %v5225_v19 = vmul.f32 %v10383_v60, %v5186_v0 }
 0x56c   : > { %v5226_v4 = vmul.f32 %v10383_v60, %v5187_v43  ;;  %v5227_v3 = vmul.f32 %v10383_v60, %v5188_v34  ;;  %v5228_v59 = vmul.f32 %v10383_v60, %v5189_v11  ;;  %v5229_v47 = vmul.f32 %v10383_v60, %v5190_v9 }
 0x56d   : > { %v5230_v29 = vmul.f32 %v10383_v60, %v5191_v54  ;;  %v5231_v31 = vmul.f32 %v10383_v60, %v5192_v6  ;;  %v5232_v62 = vmul.f32 %v10383_v60, %v5193_v26  ;;  %v5233_v13 = vmul.f32 %v10383_v60, %v5194_v48  ;;  %v5292_v26 = vld [vmem:[%s7270_s13] sm:$0xff]  ;;  %v5293_v48 = vld [vmem:[%s7270_s13 + $0x8] sm:$0xff] }
 0x56e   : > { %v5234_v57 = vmul.f32 %v10383_v60, %v5195_v39  ;;  %v5235_v24 = vmul.f32 %v10383_v60, %v5196_v53  ;;  %v5236_v33 = vmul.f32 %v10383_v60, %v5197_v2  ;;  %v5237_v58 = vmul.f32 %v10383_v60, %v5198_v42  ;;  %v5294_v39 = vld [vmem:[%s7270_s13 + $0x10] sm:$0xff] }
 0x56f   : > { %v5238_v27 = vmul.f32 %v10383_v60, %v5199_v46  ;;  %v5239_v20 = vmul.f32 %v10383_v60, %v5200_v15  ;;  %v5240_v5 = vmul.f32 %v10383_v60, %v5201_v21  ;;  %v5241_v41 = vmul.f32 %v10383_v60, %v5202_v55  ;;  %v5295_v46 = vld [vmem:[%s7270_s13 + $0x18] sm:$0xff]  ;;  %v5296_v15 = vld [vmem:[%s7270_s13 + $0x20] sm:$0xff]  ;;  %v5297_v21 = vld [vmem:[%s7270_s13 + $0x28] sm:$0xff] }
 0x570   : > { %v5242_v18 = vmul.f32 %v10383_v60, %v5203_v1  ;;  %v5243_v35 = vmul.f32 %v10383_v60, %v5204_v22  ;;  %v5244_v7 = vmul.f32 %v10383_v60, %v5205_v30  ;;  %v5245_v8 = vmul.f32 %v10383_v60, %v5206_v61  ;;  %v5298_v55 = vld [vmem:[%s7270_s13 + $0x30] sm:$0xff]  ;;  %v5299_v61 = vld [vmem:[%s7270_s13 + $0x38] sm:$0xff] }
 0x571   : > { %v5246_v37 = vmul.f32 %v10383_v60, %v5207_v56  ;;  %v5247_v17 = vmul.f32 %v10383_v60, %v5208_v14  ;;  %v5248_v12 = vmul.f32 %v10383_v60, %v5209_v38  ;;  %v5249_v52 = vmul.f32 %v10383_v60, %v5210_v25  ;;  %v5300_v56 = vld [vmem:[%s7270_s13 + $0x40] sm:$0xff]  ;;  %v5301_v14 = vld [vmem:[%s7270_s13 + $0x48] sm:$0xff] }
 0x572   : > { %v5250_v51 = vmul.f32 %v10383_v60, %v5211_v49  ;;  %v5251_v50 = vmul.f32 %v10383_v60, %v5212_v44  ;;  %v5260_v0 = vadd.f32 %v10396_v23, %v5221_v45  ;;  %v5261_v43 = vadd.f32 %v10396_v23, %v5222_v28  ;;  %v5302_v45 = vld [vmem:[%s7270_s13 + $0x50] sm:$0xff]  ;;  %v5303_v28 = vld [vmem:[%s7270_s13 + $0x58] sm:$0xff] }
 0x573   : > { %v5262_v34 = vadd.f32 %v10396_v23, %v5223_v63  ;;  %v5263_v10 = vadd.f32 %v10396_v23, %v5224_v40  ;;  %v5264_v11 = vadd.f32 %v10396_v23, %v5225_v19  ;;  %v5265_v9 = vadd.f32 %v10396_v23, %v5226_v4  ;;  %v5304_v63 = vld [vmem:[%s7270_s13 + $0x60] sm:$0xff] }
 0x574   : > { %v5266_v54 = vadd.f32 %v10396_v23, %v5227_v3  ;;  %v5267_v60 = vadd.f32 %v10396_v23, %v5228_v59  ;;  %v5268_v32 = vadd.f32 %v10396_v23, %v5229_v47  ;;  %v5269_v6 = vadd.f32 %v10396_v23, %v5230_v29  ;;  %v5305_v59 = vld [vmem:[%s7270_s13 + $0x68] sm:$0xff]  ;;  %v5306_v47 = vld [vmem:[%s7270_s13 + $0x70] sm:$0xff]  ;;  %v5307_v29 = vld [vmem:[%s7270_s13 + $0x78] sm:$0xff] }
 0x575   : > { %v5270_v16 = vadd.f32 %v10396_v23, %v5231_v31  ;;  %v5271_v53 = vadd.f32 %v10396_v23, %v5232_v62  ;;  %v5272_v2 = vadd.f32 %v10396_v23, %v5233_v13  ;;  %v5273_v42 = vadd.f32 %v10396_v23, %v5234_v57 }
 0x576   : > { %v5274_v36 = vadd.f32 %v10396_v23, %v5235_v24  ;;  %v10460_v1 = vadd.f32 %v10396_v23, %v5236_v33  ;;  %v10463_v22 = vadd.f32 %v10396_v23, %v5237_v58  ;;  %v10466_v30 = vadd.f32 %v10396_v23, %v5238_v27  ;;  %v5308_v24 = vld [vmem:[%s7270_s13 + $0x80] sm:$0xff]  ;;  %v5309_v33 = vld [vmem:[%s7270_s13 + $0x88] sm:$0xff]  ;;  %v5310_v58 = vld [vmem:[%s7270_s13 + $0x90] sm:$0xff] }
 0x577   : > { %v5278_v38 = vadd.f32 %v10396_v23, %v5239_v20  ;;  %v10473_v25 = vadd.f32 %v10396_v23, %v5240_v5  ;;  %v10476_v49 = vadd.f32 %v10396_v23, %v5241_v41  ;;  %v10479_v44 = vadd.f32 %v10396_v23, %v5242_v18  ;;  %v5311_v18 = vld [vmem:[%s7270_s13 + $0x98] sm:$0xff] }
 0x578   : > { %v5282_v40 = vadd.f32 %v10396_v23, %v5243_v35  ;;  %v10486_v19 = vadd.f32 %v10396_v23, %v5244_v7  ;;  %v10489_v4 = vadd.f32 %v10396_v23, %v5245_v8  ;;  %v10492_v3 = vadd.f32 %v10396_v23, %v5246_v37  ;;  %v5312_v35 = vld [vmem:[%s7270_s13 + $0xa0] sm:$0xff]  ;;  %v5313_v7 = vld [vmem:[%s7270_s13 + $0xa8] sm:$0xff] }
 0x579   : > { %v10498_v31 = vadd.f32 %v10396_v23, %v5247_v17  ;;  %v10501_v62 = vadd.f32 %v10396_v23, %v5248_v12  ;;  %v10504_v13 = vadd.f32 %v10396_v23, %v5249_v52  ;;  %v10507_v57 = vadd.f32 %v10396_v23, %v5250_v51  ;;  %v5314_v52 = vld [vmem:[%s7270_s13 + $0xb0] sm:$0xff]  ;;  %v5315_v51 = vld [vmem:[%s7270_s13 + $0xb8] sm:$0xff] }
 0x57a   : > { %v10513_v27 = vadd.f32 %v10396_v23, %v5251_v50  ;;  %v5324_v20 = vadd.f32 %v5292_v26, %v5260_v0  ;;  %v5325_v5 = vadd.f32 %v5293_v48, %v5261_v43  ;;  %v5326_v41 = vadd.f32 %v5294_v39, %v5262_v34  ;;  %v5316_v23 = vld [vmem:[%s7270_s13 + $0xc0] sm:$0xff]  ;;  %v5321_v48 = vld [vmem:[%s7270_s13 + $0xe8] sm:$0xff]  ;;  %v5322_v39 = vld [vmem:[%s7270_s13 + $0xf0] sm:$0xff] }
 0x57b   : > { %v5327_v8 = vadd.f32 %v5295_v46, %v5263_v10  ;;  %v5328_v37 = vadd.f32 %v5296_v15, %v5264_v11  ;;  %v5329_v17 = vadd.f32 %v5297_v21, %v5265_v9  ;;  %v5330_v12 = vadd.f32 %v5298_v55, %v5266_v54  ;;  %v5317_v10 = vld [vmem:[%s7270_s13 + $0xc8] sm:$0xff]  ;;  %v5318_v11 = vld [vmem:[%s7270_s13 + $0xd0] sm:$0xff]  ;;  %v5319_v9 = vld [vmem:[%s7270_s13 + $0xd8] sm:$0xff] }
 0x57c   : > { %v5331_v50 = vadd.f32 %v5299_v61, %v5267_v60  ;;  %v5332_v0 = vadd.f32 %v5300_v56, %v5268_v32  ;;  %v5333_v43 = vadd.f32 %v5301_v14, %v5269_v6  ;;  %v5334_v34 = vadd.f32 %v5302_v45, %v5270_v16  ;;  %5356 = vst [vmem:[%s10403_s21] sm:$0xff] %v5324_v20  ;;  %v5320_v6 = vld [vmem:[%s7270_s13 + $0xe0] sm:$0xff] }
 0x57d   : > { %5357 = vst [vmem:[%s10403_s21 + $0x8] sm:$0xff] %v5325_v5  ;;  %5358 = vst [vmem:[%s10403_s21 + $0x10] sm:$0xff] %v5326_v41  ;;  %v5335_v54 = vadd.f32 %v5303_v28, %v5271_v53  ;;  %v5336_v26 = vadd.f32 %v5304_v63, %v5272_v2  ;;  %v5337_v60 = vadd.f32 %v5305_v59, %v5273_v42 }
 0x57e   : > { %v5338_v32 = vadd.f32 %v5306_v47, %v5274_v36  ;;  %5359 = vst [vmem:[%s10403_s21 + $0x18] sm:$0xff] %v5327_v8  ;;  %5360 = vst [vmem:[%s10403_s21 + $0x20] sm:$0xff] %v5328_v37  ;;  %v5339_v16 = vadd.f32 %v5307_v29, %v10460_v1  ;;  %v5340_v53 = vadd.f32 %v5308_v24, %v10463_v22 }
 0x57f   : > { %5361 = vst [vmem:[%s10403_s21 + $0x28] sm:$0xff] %v5329_v17  ;;  %5362 = vst [vmem:[%s10403_s21 + $0x30] sm:$0xff] %v5330_v12  ;;  %v5341_v2 = vadd.f32 %v5309_v33, %v10466_v30  ;;  %v5342_v42 = vadd.f32 %v5310_v58, %v5278_v38  ;;  %v5343_v46 = vadd.f32 %v5311_v18, %v10473_v25 }
 0x580   : > { %5363 = vst [vmem:[%s10403_s21 + $0x38] sm:$0xff] %v5331_v50  ;;  %5364 = vst [vmem:[%s10403_s21 + $0x40] sm:$0xff] %v5332_v0  ;;  %v5344_v15 = vadd.f32 %v5312_v35, %v10476_v49  ;;  %v5345_v21 = vadd.f32 %v5313_v7, %v10479_v44  ;;  %v5346_v55 = vadd.f32 %v5314_v52, %v5282_v40 }
 0x581   : > { %5365 = vst [vmem:[%s10403_s21 + $0x48] sm:$0xff] %v5333_v43  ;;  %5366 = vst [vmem:[%s10403_s21 + $0x50] sm:$0xff] %v5334_v34  ;;  %v5347_v36 = vadd.f32 %v5315_v51, %v10486_v19  ;;  %v5348_v1 = vadd.f32 %v5316_v23, %v10489_v4  ;;  %v5349_v22 = vadd.f32 %v5317_v10, %v10492_v3 }
 0x582   : > { %5367 = vst [vmem:[%s10403_s21 + $0x58] sm:$0xff] %v5335_v54  ;;  %5368 = vst [vmem:[%s10403_s21 + $0x60] sm:$0xff] %v5336_v26  ;;  %v5350_v30 = vadd.f32 %v5318_v11, %v10498_v31  ;;  %v5351_v61 = vadd.f32 %v5319_v9, %v10501_v62  ;;  %v5352_v56 = vadd.f32 %v5320_v6, %v10504_v13 }
 0x583   : > { %5369 = vst [vmem:[%s10403_s21 + $0x68] sm:$0xff] %v5337_v60  ;;  %5370 = vst [vmem:[%s10403_s21 + $0x70] sm:$0xff] %v5338_v32  ;;  %v5353_v14 = vadd.f32 %v5321_v48, %v10507_v57  ;;  %v5354_v38 = vadd.f32 %v5322_v39, %v10513_v27 }
 0x584   : > { %5371 = vst [vmem:[%s10403_s21 + $0x78] sm:$0xff] %v5339_v16  ;;  %5372 = vst [vmem:[%s10403_s21 + $0x80] sm:$0xff] %v5340_v53 }
 0x585   : > { %5373 = vst [vmem:[%s10403_s21 + $0x88] sm:$0xff] %v5341_v2  ;;  %5374 = vst [vmem:[%s10403_s21 + $0x90] sm:$0xff] %v5342_v42 }
 0x586   : > { %5375 = vst [vmem:[%s10403_s21 + $0x98] sm:$0xff] %v5343_v46  ;;  %5376 = vst [vmem:[%s10403_s21 + $0xa0] sm:$0xff] %v5344_v15 }
 0x587   : > { %5377 = vst [vmem:[%s10403_s21 + $0xa8] sm:$0xff] %v5345_v21  ;;  %5378 = vst [vmem:[%s10403_s21 + $0xb0] sm:$0xff] %v5346_v55 }
 0x588   : > { %5379 = vst [vmem:[%s10403_s21 + $0xb8] sm:$0xff] %v5347_v36  ;;  %5380 = vst [vmem:[%s10403_s21 + $0xc0] sm:$0xff] %v5348_v1 }
 0x589   : > { %5381 = vst [vmem:[%s10403_s21 + $0xc8] sm:$0xff] %v5349_v22  ;;  %5382 = vst [vmem:[%s10403_s21 + $0xd0] sm:$0xff] %v5350_v30 }
 0x58a   : > { %5383 = vst [vmem:[%s10403_s21 + $0xd8] sm:$0xff] %v5351_v61  ;;  %5384 = vst [vmem:[%s10403_s21 + $0xe0] sm:$0xff] %v5352_v56 }
 0x58b   : > { %5385 = vst [vmem:[%s10403_s21 + $0xe8] sm:$0xff] %v5353_v14  ;;  %5386 = vst [vmem:[%s10403_s21 + $0xf0] sm:$0xff] %v5354_v38 }
 0x58c   : > { %6975 = shalt.err (!%p6972_p1)
}
 0x58d   : > { %s6976_s15 = scalar_lea.hbm %s10563_s30, 4096  ;;  %s6980_s21 = scalar_lea.hbm %s10634_s7, 8192 }
 0x58e   : > { %p6977_p13 = scmp.ne.s32.totalorder %s10563_s30, %s6976_s15  ;;  %p6981_p4 = scmp.lt.u32.totalorder %s10563_s30, %s10634_s7 }
 0x58f   : > { %p6982_p5 = scmp.lt.u32.totalorder %s6980_s21, %s6976_s15  ;;  %p6984_p11 = scmp.lt.u32.totalorder %s6976_s15, %s10563_s30 }
 0x590   : > { %p6978_p6 = pnand %p6977_p13, %p10852_p0 }
 0x591   : > { %p6983_p8 = por %p6982_p5, %p6981_p4 }
 0x592   : > { %p6979_p10 = pneg %p6978_p6 }
 0x593   : > { %p6985_p2 = por %p6984_p11, %p6983_p8 }
 0x595   : > { %p6986_p3 = pnand %p6985_p2, %p6979_p10 }
 0x597   : > { %6989 = shalt.err (!%p6986_p3)
}
 0x598   : > { %s7041_s13 = smov 128   ;;  %s7042_s9 = smov 8  }
 0x599   : > { %6776 = dma.vmem_to_hbm [thread:$0]  (%p10852_p0), %s10567_s22, 4096, %s10563_s30, %s5389_s28, %s7041_s13, %s7041_s13, %s7042_s9  }
 0x59a PF: > { %s5417_s29 = sand.u32 1, %s7020_s24   ;;  %p10853_p7 = scmp.ne.s32.totalorder %s10710_s8, 0 }
 0x59b   : > { %p10854_p9 = scmp.ge.s32.totalorder %s7032_s27, 2  ;;  %s5418_s11 = scalar_lea.sflag [#allocation5], %s5417_s29 }
 0x59d   : > { %p6790_p12 = pnand %p10854_p9, %p10853_p7 }
 0x59f   : > { %7015 = dma.done.wait (!%p6790_p12), %s5418_s11, 4096  }
 0x5a0   : > { %7017 = vsyncadd (!%p6790_p12), %s5418_s11, 4294963200  ;;  %p21_p1 = scmp.ge.s32.totalorder %s7199_s12, 4   ;;  %s10855_s24 = smov %s7024_s25 }
 0x5a1   : > { %s10856_s25 = smov %s7028_s26  ;;  %s10857_s26 = smov %s7215_s17 }
 0x5a2   : > { %s10858_s27 = smov %s7199_s12  ;;  %23 = sbr.rel (!%p21_p1) target bundleno = 6 (0x6), region = 109 }
 0x5a9   :  { %5423 = vsyncpa [#allocation4], 1 }
 0x5aa   :  { %5425 = vsyncpa [#allocation4 + $0x1], 1 }
 0x5ab   :  { %5426 = vsyncpa [#allocation7], 1 }
 0x5ac   :  { %5427 = vsyncpa [#allocation5], 1 }
 0x5ad   :  { %5429 = vsyncpa [#allocation5 + $0x1], 1 }

</bundles_post_ra>
